<compile_context>
chip_gen: v7x
topology: tpu7x:2x2x1
jax: 0.10.0
libtpu: 0.0.40
codegen_flags: <defaults>
</compile_context>

<pallas_src>
import numpy as np
import jax
import jax.numpy as jnp
from jax.experimental import pallas as pl
from jax.experimental.pallas import tpu as pltpu

_BN_EPS = 1e-5

VMEM_SPEC = pl.BlockSpec(memory_space=pltpu.MemorySpace.VMEM)
SMEM_SPEC = pl.BlockSpec(memory_space=pltpu.MemorySpace.SMEM)


# ---------------------------------------------------------------------------
# Host-side construction of the Poisson solver / pooling / mask matrices
# ---------------------------------------------------------------------------
def lattice_edges(image_height, image_width):
    mat_is, mat_js = np.meshgrid(range(image_height), range(image_width))
    centers = np.vstack((mat_is.flatten(), mat_js.flatten())).T
    adjacency = np.array(((0, -1), (0, +1), (-1, 0), (+1, 0)))
    neighbors = (centers[:, None, :] + adjacency).reshape(-1, 2)
    i_valid = (
        (neighbors[:, 0] >= 0)
        * (neighbors[:, 0] < image_height)
        * (neighbors[:, 1] >= 0)
        * (neighbors[:, 1] < image_width)
    )
    edges_center = centers.repeat(len(adjacency), axis=0)[i_valid].dot((image_width, 1))
    edges_neighbor = neighbors[i_valid].dot((image_width, 1))
    return edges_center, edges_neighbor


def poisson_inverse(log_resistances):
    """(zmat + 1)^{-1} for a SolvePoisson layer, float64."""
    H, W = log_resistances.shape
    n = H * W
    ec, en = lattice_edges(H, W)
    cond = np.exp(log_resistances).reshape(-1)
    z_off = np.zeros((n, n), dtype=np.float64)
    z_off[ec, en] = cond[ec] + cond[en]          # edges are unique -> plain assignment
    zmat = np.diag(z_off.sum(axis=1)) - z_off
    return np.linalg.inv(zmat + 1.0)


def _pool_matrix(H, W):
    """Flat (H*W, H/2*W/2) 2x2 average-pooling matrix (row-major flattening)."""
    H2, W2 = H // 2, W // 2
    P = np.zeros((H * W, H2 * W2), np.float32)
    for i in range(H):
        for j in range(W):
            P[i * W + j, (i // 2) * W2 + (j // 2)] = 0.25
    return jnp.asarray(P)


def _conv_tap_masks(H, W):
    """(9, H*W) boundary masks for the 3x3 conv taps in flat-lane layout."""
    masks = np.zeros((9, H * W), np.float32)
    t = 0
    for dh in (-1, 0, 1):
        for dw in (-1, 0, 1):
            for i in range(H):
                for j in range(W):
                    if 0 <= i + dh < H and 0 <= j + dw < W:
                        masks[t, i * W + j] = 1.0
            t += 1
    return jnp.asarray(masks)


# ---------------------------------------------------------------------------
# In-kernel helpers (pure jnp on VMEM-resident values)
# ---------------------------------------------------------------------------
def _center_channels(xm, num_ch, hw):
    """Subtract per-channel mean (over batch AND space), channel-major flat layout."""
    b = xm.shape[0]
    inv = 1.0 / float(b * hw)
    parts = []
    for c in range(num_ch):
        seg = xm[:, c * hw:(c + 1) * hw]
        parts.append(seg - jnp.sum(seg) * inv)
    return parts[0] if num_ch == 1 else jnp.concatenate(parts, axis=1)


def _pool_channels(xm, num_ch, hw, pool_mat):
    """2x2 average pool per channel via one matmul per channel."""
    parts = [
        jnp.dot(xm[:, c * hw:(c + 1) * hw], pool_mat,
                preferred_element_type=jnp.float32)
        for c in range(num_ch)
    ]
    return parts[0] if num_ch == 1 else jnp.concatenate(parts, axis=1)


def _poisson_block(xm, w1, b1, w2, b2, cin, cout, hw):
    """Fused PoissonBasicBlock in channel-major flat layout (B, C*HW)."""
    xc = _center_channels(xm, cin, hw)
    y1 = jnp.maximum(
        jnp.dot(xc, w1, preferred_element_type=jnp.float32) + b1, 0.0)
    y1c = _center_channels(y1, cout, hw)
    y2 = jnp.dot(y1c, w2, preferred_element_type=jnp.float32) + b2
    if cout > cin:
        pad = (cout - cin) // 2
        zeros = jnp.zeros((xm.shape[0], pad * hw), jnp.float32)
        shortcut = jnp.concatenate([zeros, xm, zeros], axis=1)
    else:
        shortcut = xm
    return jnp.maximum(y2 + shortcut, 0.0)


def _conv1_bn_relu(x_ref, cw_ref, cb_ref, cmask_ref):
    """3x3 stride-1 conv (3->2) + folded BN + ReLU, lane-dense H*W=1024 layout."""
    H = W = 32
    HW = H * W
    B = x_ref.shape[1]
    masks = cmask_ref[...]                                   # (9, 1024)

    # Masked, shifted input planes (shared across output channels).
    shifted = []
    for ci in range(3):
        xc = x_ref[ci]                                       # (B, 1024)
        taps = []
        for kh in range(3):
            for kw in range(3):
                dh, dw = kh - 1, kw - 1
                off = dh * W + dw
                t = kh * 3 + kw
                if off == 0:
                    taps.append(xc)                          # mask is all-ones
                else:
                    s = pltpu.roll(xc, shift=(-off) % HW, axis=1)
                    taps.append(s * masks[t:t + 1, :])
        shifted.append(taps)

    outs = []
    for o in range(2):
        acc = jnp.zeros((B, HW), jnp.float32)
        for ci in range(3):
            base = (o * 3 + ci) * 9
            for t in range(9):
                acc = acc + cw_ref[base + t] * shifted[ci][t]
        outs.append(jnp.maximum(acc + cb_ref[o], 0.0))
    return outs                                              # [ (B,1024), (B,1024) ]


# ---------------------------------------------------------------------------
# The single fused kernel
# ---------------------------------------------------------------------------
def _poissonnet_kernel(
        x_ref, cw_ref, cb_ref, cmask_ref, p32_ref, p16_ref, p8_ref,
        w1_1, b1_1, w2_1, b2_1,      # group1[0]        2->2 @ 16x16
        w1_2, b1_2, w2_2, b2_2,      # group1_to_group2 2->4 @  8x8
        w1_3, b1_3, w2_3, b2_3,      # group2[0]        4->4 @  8x8
        w1_4, b1_4, w2_4, b2_4,      # group2_to_group3 4->8 @  4x4
        w1_5, b1_5, w2_5, b2_5,      # group3[0]        8->8 @  4x4
        hw_ref, hb_ref,
        o_ref):
    # conv1 + bn1 + relu
    c0, c1 = _conv1_bn_relu(x_ref, cw_ref, cb_ref, cmask_ref)

    # avg_pool2d(2): 32x32 -> 16x16, then merge channels (channel-major flat)
    p32 = p32_ref[...]
    x = jnp.concatenate(
        [jnp.dot(c0, p32, preferred_element_type=jnp.float32),
         jnp.dot(c1, p32, preferred_element_type=jnp.float32)], axis=1)   # (B, 2*256)

    # group1[0]
    x = _poisson_block(x, w1_1[...], b1_1[...], w2_1[...], b2_1[...], 2, 2, 256)

    # avg_pool2d(2): 16x16 -> 8x8
    x = _pool_channels(x, 2, 256, p16_ref[...])                           # (B, 2*64)

    # group1_to_group2, group2[0]
    x = _poisson_block(x, w1_2[...], b1_2[...], w2_2[...], b2_2[...], 2, 4, 64)
    x = _poisson_block(x, w1_3[...], b1_3[...], w2_3[...], b2_3[...], 4, 4, 64)

    # avg_pool2d(2): 8x8 -> 4x4
    x = _pool_channels(x, 4, 64, p8_ref[...])                             # (B, 4*16)

    # group2_to_group3, group3[0]
    x = _poisson_block(x, w1_4[...], b1_4[...], w2_4[...], b2_4[...], 4, 8, 16)
    x = _poisson_block(x, w1_5[...], b1_5[...], w2_5[...], b2_5[...], 8, 8, 16)

    # head: spatial sum folded into the classifier weights -> one matmul
    o_ref[...] = (jnp.dot(x, hw_ref[...], preferred_element_type=jnp.float32)
                  + hb_ref[...])


# ---------------------------------------------------------------------------
# Wrapper
# ---------------------------------------------------------------------------
def poissonnet_forward(x, params):
    """x: (B, 3, 32, 32) float32 NCHW -> logits (B, 10)."""
    B = x.shape[0]
    xin = jnp.transpose(x, (1, 0, 2, 3)).reshape(3, B, 32 * 32)

    args = [xin, params["conv_w"], params["conv_b"], params["conv_masks"],
            params["pool32"], params["pool16"], params["pool8"]]
    for name in ("group1_0", "g1_to_g2", "group2_0", "g2_to_g3", "group3_0"):
        bp = params[name]
        args += [bp["W1"], bp["b1"], bp["W2"], bp["b2"]]
    args += [params["head_w"], params["head_b"]]

    in_specs = [VMEM_SPEC, SMEM_SPEC, SMEM_SPEC] + [VMEM_SPEC] * (len(args) - 3)

    return pl.pallas_call(
        _poissonnet_kernel,
        out_shape=jax.ShapeDtypeStruct((B, 10), jnp.float32),
        in_specs=in_specs,
        out_specs=VMEM_SPEC,
    )(*args)


# ---------------------------------------------------------------------------
# Parameter construction (deterministic, synthetic)
# ---------------------------------------------------------------------------
def _build_block_params(rng, cin, cout, H, W):
    HW = H * W
    bn_scale = 1.0 / np.sqrt(1.0 + _BN_EPS)      # gamma=1, running_var=1 (eval BN)

    def build_solver(ci, co):
        Wm = np.zeros((ci * HW, co * HW), np.float64)
        for o in range(co):                       # same module/RNG order as torch ref
            for c in range(ci):
                log_r = rng.random((H, W))        # ~ torch.rand(H, W, float64)
                a_inv = poisson_inverse(log_r)    # float64 host inverse
                w_oc = 1.0                        # SolvePoissonTensor weight init
                Wm[c * HW:(c + 1) * HW, o * HW:(o + 1) * HW] = bn_scale * w_oc * a_inv.T
        b_row = np.zeros((1, co * HW), np.float32)   # solver bias=0, BN beta=0
        return jnp.asarray(Wm, jnp.float32), jnp.asarray(b_row)

    W1, b1 = build_solver(cin, cout)
    W2, b2 = build_solver(cout, cout)
    return dict(W1=W1, b1=b1, W2=W2, b2=b2)


def init_params(seed=0):
    rng = np.random.default_rng(seed)
    bn_scale = 1.0 / np.sqrt(1.0 + _BN_EPS)
    params = {}

    # conv1: Conv2d(3, 2, 3, padding=1, bias=False) + BN(2) folded (eval mode)
    fan_in = 3 * 3 * 3
    bound = 1.0 / np.sqrt(fan_in)
    conv_w = rng.uniform(-bound, bound, size=(2, 3, 3, 3))
    params["conv_w"] = jnp.asarray((conv_w * bn_scale).reshape(-1), jnp.float32)
    params["conv_b"] = jnp.zeros((2,), jnp.float32)
    params["conv_masks"] = _conv_tap_masks(32, 32)

    # pooling matrices (one per spatial resolution)
    params["pool32"] = _pool_matrix(32, 32)
    params["pool16"] = _pool_matrix(16, 16)
    params["pool8"] = _pool_matrix(8, 8)

    # Poisson blocks (merged solver weights)
    params["group1_0"] = _build_block_params(rng, 2, 2, 16, 16)
    params["g1_to_g2"] = _build_block_params(rng, 2, 4, 8, 8)
    params["group2_0"] = _build_block_params(rng, 4, 4, 8, 8)
    params["g2_to_g3"] = _build_block_params(rng, 4, 8, 4, 4)
    params["group3_0"] = _build_block_params(rng, 8, 8, 4, 4)

    # Linear(8, 10); spatial sum over the 4x4=16 positions folded into weights
    lb = 1.0 / np.sqrt(8)
    lw = rng.uniform(-lb, lb, size=(10, 8))
    lbias = rng.uniform(-lb, lb, size=(10,))
    params["head_w"] = jnp.asarray(np.repeat(lw.T, 16, axis=0), jnp.float32)  # (128, 10)
    params["head_b"] = jnp.asarray(lbias[None, :], jnp.float32)               # (1, 10)
    return params


# ---------------------------------------------------------------------------
if __name__ == "__main__":
    params = init_params(seed=0)
    key = jax.random.PRNGKey(0)
    x = jax.random.normal(key, (2, 3, 32, 32), dtype=jnp.float32)

    fwd = jax.jit(lambda inp: poissonnet_forward(inp, params))
    logits = jax.block_until_ready(fwd(x))

    assert logits.shape == (2, 10), logits.shape
    assert logits.dtype == jnp.float32
    assert bool(jnp.all(jnp.isfinite(logits)))
    print("KERNEL_OK")
</pallas_src>

<mosaic_0001>
module attributes {stable_mosaic.version = 11 : i64} {
  func.func @_poissonnet_kernel(%arg0: memref<3x2x1024xf32, #tpu.memory_space<vmem>>, %arg1: memref<54xf32, #tpu.memory_space<smem>>, %arg2: memref<2xf32, #tpu.memory_space<smem>>, %arg3: memref<9x1024xf32, #tpu.memory_space<vmem>>, %arg4: memref<1024x256xf32, #tpu.memory_space<vmem>>, %arg5: memref<256x64xf32, #tpu.memory_space<vmem>>, %arg6: memref<64x16xf32, #tpu.memory_space<vmem>>, %arg7: memref<512x512xf32, #tpu.memory_space<vmem>>, %arg8: memref<1x512xf32, #tpu.memory_space<vmem>>, %arg9: memref<512x512xf32, #tpu.memory_space<vmem>>, %arg10: memref<1x512xf32, #tpu.memory_space<vmem>>, %arg11: memref<128x256xf32, #tpu.memory_space<vmem>>, %arg12: memref<1x256xf32, #tpu.memory_space<vmem>>, %arg13: memref<256x256xf32, #tpu.memory_space<vmem>>, %arg14: memref<1x256xf32, #tpu.memory_space<vmem>>, %arg15: memref<256x256xf32, #tpu.memory_space<vmem>>, %arg16: memref<1x256xf32, #tpu.memory_space<vmem>>, %arg17: memref<256x256xf32, #tpu.memory_space<vmem>>, %arg18: memref<1x256xf32, #tpu.memory_space<vmem>>, %arg19: memref<64x128xf32, #tpu.memory_space<vmem>>, %arg20: memref<1x128xf32, #tpu.memory_space<vmem>>, %arg21: memref<128x128xf32, #tpu.memory_space<vmem>>, %arg22: memref<1x128xf32, #tpu.memory_space<vmem>>, %arg23: memref<128x128xf32, #tpu.memory_space<vmem>>, %arg24: memref<1x128xf32, #tpu.memory_space<vmem>>, %arg25: memref<128x128xf32, #tpu.memory_space<vmem>>, %arg26: memref<1x128xf32, #tpu.memory_space<vmem>>, %arg27: memref<128x10xf32, #tpu.memory_space<vmem>>, %arg28: memref<1x10xf32, #tpu.memory_space<vmem>>, %arg29: memref<2x10xf32, #tpu.memory_space<vmem>>) attributes {dimension_semantics = [], scalar_prefetch = 0 : i64, scratch_operands = 0 : i64, tpu.core_type = #tpu.core_type<tc>} {
    %c0 = arith.constant 0 : index
    %c0_0 = arith.constant 0 : index
    %0 = vector.load %arg3[%c0, %c0_0] : memref<9x1024xf32, #tpu.memory_space<vmem>>, vector<9x1024xf32>
    %c0_1 = arith.constant 0 : index
    %c0_2 = arith.constant 0 : index
    %c0_3 = arith.constant 0 : index
    %1 = vector.load %arg0[%c0_1, %c0_2, %c0_3] : memref<3x2x1024xf32, #tpu.memory_space<vmem>>, vector<1x2x1024xf32>
    %2 = vector.shape_cast %1 : vector<1x2x1024xf32> to vector<2x1024xf32>
    %c33_i32 = arith.constant 33 : i32
    %3 = tpu.dynamic_rotate %2 by %c33_i32 dim 1 : vector<2x1024xf32>, i32 -> vector<2x1024xf32>
    %4 = vector.extract_strided_slice %0 {offsets = [0, 0], sizes = [1, 1024], strides = [1, 1]} : vector<9x1024xf32> to vector<1x1024xf32>
    %5 = vector.broadcast %4 : vector<1x1024xf32> to vector<2x1024xf32>
    %6 = arith.mulf %3, %5 : vector<2x1024xf32>
    %c32_i32 = arith.constant 32 : i32
    %7 = tpu.dynamic_rotate %2 by %c32_i32 dim 1 : vector<2x1024xf32>, i32 -> vector<2x1024xf32>
    %8 = vector.extract_strided_slice %0 {offsets = [1, 0], sizes = [1, 1024], strides = [1, 1]} : vector<9x1024xf32> to vector<1x1024xf32>
    %9 = vector.broadcast %8 : vector<1x1024xf32> to vector<2x1024xf32>
    %10 = arith.mulf %7, %9 : vector<2x1024xf32>
    %c31_i32 = arith.constant 31 : i32
    %11 = tpu.dynamic_rotate %2 by %c31_i32 dim 1 : vector<2x1024xf32>, i32 -> vector<2x1024xf32>
    %12 = vector.extract_strided_slice %0 {offsets = [2, 0], sizes = [1, 1024], strides = [1, 1]} : vector<9x1024xf32> to vector<1x1024xf32>
    %13 = vector.broadcast %12 : vector<1x1024xf32> to vector<2x1024xf32>
    %14 = arith.mulf %11, %13 : vector<2x1024xf32>
    %c1_i32 = arith.constant 1 : i32
    %15 = tpu.dynamic_rotate %2 by %c1_i32 dim 1 : vector<2x1024xf32>, i32 -> vector<2x1024xf32>
    %16 = vector.extract_strided_slice %0 {offsets = [3, 0], sizes = [1, 1024], strides = [1, 1]} : vector<9x1024xf32> to vector<1x1024xf32>
    %17 = vector.broadcast %16 : vector<1x1024xf32> to vector<2x1024xf32>
    %18 = arith.mulf %15, %17 : vector<2x1024xf32>
    %c1023_i32 = arith.constant 1023 : i32
    %19 = tpu.dynamic_rotate %2 by %c1023_i32 dim 1 : vector<2x1024xf32>, i32 -> vector<2x1024xf32>
    %20 = vector.extract_strided_slice %0 {offsets = [5, 0], sizes = [1, 1024], strides = [1, 1]} : vector<9x1024xf32> to vector<1x1024xf32>
    %21 = vector.broadcast %20 : vector<1x1024xf32> to vector<2x1024xf32>
    %22 = arith.mulf %19, %21 : vector<2x1024xf32>
    %c993_i32 = arith.constant 993 : i32
    %23 = tpu.dynamic_rotate %2 by %c993_i32 dim 1 : vector<2x1024xf32>, i32 -> vector<2x1024xf32>
    %24 = vector.extract_strided_slice %0 {offsets = [6, 0], sizes = [1, 1024], strides = [1, 1]} : vector<9x1024xf32> to vector<1x1024xf32>
    %25 = vector.broadcast %24 : vector<1x1024xf32> to vector<2x1024xf32>
    %26 = arith.mulf %23, %25 : vector<2x1024xf32>
    %c992_i32 = arith.constant 992 : i32
    %27 = tpu.dynamic_rotate %2 by %c992_i32 dim 1 : vector<2x1024xf32>, i32 -> vector<2x1024xf32>
    %28 = vector.extract_strided_slice %0 {offsets = [7, 0], sizes = [1, 1024], strides = [1, 1]} : vector<9x1024xf32> to vector<1x1024xf32>
    %29 = vector.broadcast %28 : vector<1x1024xf32> to vector<2x1024xf32>
    %30 = arith.mulf %27, %29 : vector<2x1024xf32>
    %c991_i32 = arith.constant 991 : i32
    %31 = tpu.dynamic_rotate %2 by %c991_i32 dim 1 : vector<2x1024xf32>, i32 -> vector<2x1024xf32>
    %32 = vector.extract_strided_slice %0 {offsets = [8, 0], sizes = [1, 1024], strides = [1, 1]} : vector<9x1024xf32> to vector<1x1024xf32>
    %33 = vector.broadcast %32 : vector<1x1024xf32> to vector<2x1024xf32>
    %34 = arith.mulf %31, %33 : vector<2x1024xf32>
    %c1 = arith.constant 1 : index
    %c0_4 = arith.constant 0 : index
    %c0_5 = arith.constant 0 : index
    %35 = vector.load %arg0[%c1, %c0_4, %c0_5] : memref<3x2x1024xf32, #tpu.memory_space<vmem>>, vector<1x2x1024xf32>
    %36 = vector.shape_cast %35 : vector<1x2x1024xf32> to vector<2x1024xf32>
    %c33_i32_6 = arith.constant 33 : i32
    %37 = tpu.dynamic_rotate %36 by %c33_i32_6 dim 1 : vector<2x1024xf32>, i32 -> vector<2x1024xf32>
    %38 = vector.extract_strided_slice %0 {offsets = [0, 0], sizes = [1, 1024], strides = [1, 1]} : vector<9x1024xf32> to vector<1x1024xf32>
    %39 = vector.broadcast %38 : vector<1x1024xf32> to vector<2x1024xf32>
    %40 = arith.mulf %37, %39 : vector<2x1024xf32>
    %c32_i32_7 = arith.constant 32 : i32
    %41 = tpu.dynamic_rotate %36 by %c32_i32_7 dim 1 : vector<2x1024xf32>, i32 -> vector<2x1024xf32>
    %42 = vector.extract_strided_slice %0 {offsets = [1, 0], sizes = [1, 1024], strides = [1, 1]} : vector<9x1024xf32> to vector<1x1024xf32>
    %43 = vector.broadcast %42 : vector<1x1024xf32> to vector<2x1024xf32>
    %44 = arith.mulf %41, %43 : vector<2x1024xf32>
    %c31_i32_8 = arith.constant 31 : i32
    %45 = tpu.dynamic_rotate %36 by %c31_i32_8 dim 1 : vector<2x1024xf32>, i32 -> vector<2x1024xf32>
    %46 = vector.extract_strided_slice %0 {offsets = [2, 0], sizes = [1, 1024], strides = [1, 1]} : vector<9x1024xf32> to vector<1x1024xf32>
    %47 = vector.broadcast %46 : vector<1x1024xf32> to vector<2x1024xf32>
    %48 = arith.mulf %45, %47 : vector<2x1024xf32>
    %c1_i32_9 = arith.constant 1 : i32
    %49 = tpu.dynamic_rotate %36 by %c1_i32_9 dim 1 : vector<2x1024xf32>, i32 -> vector<2x1024xf32>
    %50 = vector.extract_strided_slice %0 {offsets = [3, 0], sizes = [1, 1024], strides = [1, 1]} : vector<9x1024xf32> to vector<1x1024xf32>
    %51 = vector.broadcast %50 : vector<1x1024xf32> to vector<2x1024xf32>
    %52 = arith.mulf %49, %51 : vector<2x1024xf32>
    %c1023_i32_10 = arith.constant 1023 : i32
    %53 = tpu.dynamic_rotate %36 by %c1023_i32_10 dim 1 : vector<2x1024xf32>, i32 -> vector<2x1024xf32>
    %54 = vector.extract_strided_slice %0 {offsets = [5, 0], sizes = [1, 1024], strides = [1, 1]} : vector<9x1024xf32> to vector<1x1024xf32>
    %55 = vector.broadcast %54 : vector<1x1024xf32> to vector<2x1024xf32>
    %56 = arith.mulf %53, %55 : vector<2x1024xf32>
    %c993_i32_11 = arith.constant 993 : i32
    %57 = tpu.dynamic_rotate %36 by %c993_i32_11 dim 1 : vector<2x1024xf32>, i32 -> vector<2x1024xf32>
    %58 = vector.extract_strided_slice %0 {offsets = [6, 0], sizes = [1, 1024], strides = [1, 1]} : vector<9x1024xf32> to vector<1x1024xf32>
    %59 = vector.broadcast %58 : vector<1x1024xf32> to vector<2x1024xf32>
    %60 = arith.mulf %57, %59 : vector<2x1024xf32>
    %c992_i32_12 = arith.constant 992 : i32
    %61 = tpu.dynamic_rotate %36 by %c992_i32_12 dim 1 : vector<2x1024xf32>, i32 -> vector<2x1024xf32>
    %62 = vector.extract_strided_slice %0 {offsets = [7, 0], sizes = [1, 1024], strides = [1, 1]} : vector<9x1024xf32> to vector<1x1024xf32>
    %63 = vector.broadcast %62 : vector<1x1024xf32> to vector<2x1024xf32>
    %64 = arith.mulf %61, %63 : vector<2x1024xf32>
    %c991_i32_13 = arith.constant 991 : i32
    %65 = tpu.dynamic_rotate %36 by %c991_i32_13 dim 1 : vector<2x1024xf32>, i32 -> vector<2x1024xf32>
    %66 = vector.extract_strided_slice %0 {offsets = [8, 0], sizes = [1, 1024], strides = [1, 1]} : vector<9x1024xf32> to vector<1x1024xf32>
    %67 = vector.broadcast %66 : vector<1x1024xf32> to vector<2x1024xf32>
    %68 = arith.mulf %65, %67 : vector<2x1024xf32>
    %c2 = arith.constant 2 : index
    %c0_14 = arith.constant 0 : index
    %c0_15 = arith.constant 0 : index
    %69 = vector.load %arg0[%c2, %c0_14, %c0_15] : memref<3x2x1024xf32, #tpu.memory_space<vmem>>, vector<1x2x1024xf32>
    %70 = vector.shape_cast %69 : vector<1x2x1024xf32> to vector<2x1024xf32>
    %c33_i32_16 = arith.constant 33 : i32
    %71 = tpu.dynamic_rotate %70 by %c33_i32_16 dim 1 : vector<2x1024xf32>, i32 -> vector<2x1024xf32>
    %72 = vector.extract_strided_slice %0 {offsets = [0, 0], sizes = [1, 1024], strides = [1, 1]} : vector<9x1024xf32> to vector<1x1024xf32>
    %73 = vector.broadcast %72 : vector<1x1024xf32> to vector<2x1024xf32>
    %74 = arith.mulf %71, %73 : vector<2x1024xf32>
    %c32_i32_17 = arith.constant 32 : i32
    %75 = tpu.dynamic_rotate %70 by %c32_i32_17 dim 1 : vector<2x1024xf32>, i32 -> vector<2x1024xf32>
    %76 = vector.extract_strided_slice %0 {offsets = [1, 0], sizes = [1, 1024], strides = [1, 1]} : vector<9x1024xf32> to vector<1x1024xf32>
    %77 = vector.broadcast %76 : vector<1x1024xf32> to vector<2x1024xf32>
    %78 = arith.mulf %75, %77 : vector<2x1024xf32>
    %c31_i32_18 = arith.constant 31 : i32
    %79 = tpu.dynamic_rotate %70 by %c31_i32_18 dim 1 : vector<2x1024xf32>, i32 -> vector<2x1024xf32>
    %80 = vector.extract_strided_slice %0 {offsets = [2, 0], sizes = [1, 1024], strides = [1, 1]} : vector<9x1024xf32> to vector<1x1024xf32>
    %81 = vector.broadcast %80 : vector<1x1024xf32> to vector<2x1024xf32>
    %82 = arith.mulf %79, %81 : vector<2x1024xf32>
    %c1_i32_19 = arith.constant 1 : i32
    %83 = tpu.dynamic_rotate %70 by %c1_i32_19 dim 1 : vector<2x1024xf32>, i32 -> vector<2x1024xf32>
    %84 = vector.extract_strided_slice %0 {offsets = [3, 0], sizes = [1, 1024], strides = [1, 1]} : vector<9x1024xf32> to vector<1x1024xf32>
    %85 = vector.broadcast %84 : vector<1x1024xf32> to vector<2x1024xf32>
    %86 = arith.mulf %83, %85 : vector<2x1024xf32>
    %c1023_i32_20 = arith.constant 1023 : i32
    %87 = tpu.dynamic_rotate %70 by %c1023_i32_20 dim 1 : vector<2x1024xf32>, i32 -> vector<2x1024xf32>
    %88 = vector.extract_strided_slice %0 {offsets = [5, 0], sizes = [1, 1024], strides = [1, 1]} : vector<9x1024xf32> to vector<1x1024xf32>
    %89 = vector.broadcast %88 : vector<1x1024xf32> to vector<2x1024xf32>
    %90 = arith.mulf %87, %89 : vector<2x1024xf32>
    %c993_i32_21 = arith.constant 993 : i32
    %91 = tpu.dynamic_rotate %70 by %c993_i32_21 dim 1 : vector<2x1024xf32>, i32 -> vector<2x1024xf32>
    %92 = vector.extract_strided_slice %0 {offsets = [6, 0], sizes = [1, 1024], strides = [1, 1]} : vector<9x1024xf32> to vector<1x1024xf32>
    %93 = vector.broadcast %92 : vector<1x1024xf32> to vector<2x1024xf32>
    %94 = arith.mulf %91, %93 : vector<2x1024xf32>
    %c992_i32_22 = arith.constant 992 : i32
    %95 = tpu.dynamic_rotate %70 by %c992_i32_22 dim 1 : vector<2x1024xf32>, i32 -> vector<2x1024xf32>
    %96 = vector.extract_strided_slice %0 {offsets = [7, 0], sizes = [1, 1024], strides = [1, 1]} : vector<9x1024xf32> to vector<1x1024xf32>
    %97 = vector.broadcast %96 : vector<1x1024xf32> to vector<2x1024xf32>
    %98 = arith.mulf %95, %97 : vector<2x1024xf32>
    %c991_i32_23 = arith.constant 991 : i32
    %99 = tpu.dynamic_rotate %70 by %c991_i32_23 dim 1 : vector<2x1024xf32>, i32 -> vector<2x1024xf32>
    %100 = vector.extract_strided_slice %0 {offsets = [8, 0], sizes = [1, 1024], strides = [1, 1]} : vector<9x1024xf32> to vector<1x1024xf32>
    %101 = vector.broadcast %100 : vector<1x1024xf32> to vector<2x1024xf32>
    %102 = arith.mulf %99, %101 : vector<2x1024xf32>
    %cst = arith.constant 0.000000e+00 : f32
    %103 = vector.broadcast %cst : f32 to vector<2x1024xf32>
    %c0_24 = arith.constant 0 : index
    %104 = memref.load %arg1[%c0_24] : memref<54xf32, #tpu.memory_space<smem>>
    %105 = vector.broadcast %104 : f32 to vector<2x1024xf32>
    %106 = arith.mulf %105, %6 : vector<2x1024xf32>
    %107 = arith.addf %103, %106 : vector<2x1024xf32>
    %c1_25 = arith.constant 1 : index
    %108 = memref.load %arg1[%c1_25] : memref<54xf32, #tpu.memory_space<smem>>
    %109 = vector.broadcast %108 : f32 to vector<2x1024xf32>
    %110 = arith.mulf %109, %10 : vector<2x1024xf32>
    %111 = arith.addf %107, %110 : vector<2x1024xf32>
    %c2_26 = arith.constant 2 : index
    %112 = memref.load %arg1[%c2_26] : memref<54xf32, #tpu.memory_space<smem>>
    %113 = vector.broadcast %112 : f32 to vector<2x1024xf32>
    %114 = arith.mulf %113, %14 : vector<2x1024xf32>
    %115 = arith.addf %111, %114 : vector<2x1024xf32>
    %c3 = arith.constant 3 : index
    %116 = memref.load %arg1[%c3] : memref<54xf32, #tpu.memory_space<smem>>
    %117 = vector.broadcast %116 : f32 to vector<2x1024xf32>
    %118 = arith.mulf %117, %18 : vector<2x1024xf32>
    %119 = arith.addf %115, %118 : vector<2x1024xf32>
    %c4 = arith.constant 4 : index
    %120 = memref.load %arg1[%c4] : memref<54xf32, #tpu.memory_space<smem>>
    %121 = vector.broadcast %120 : f32 to vector<2x1024xf32>
    %122 = arith.mulf %121, %2 : vector<2x1024xf32>
    %123 = arith.addf %119, %122 : vector<2x1024xf32>
    %c5 = arith.constant 5 : index
    %124 = memref.load %arg1[%c5] : memref<54xf32, #tpu.memory_space<smem>>
    %125 = vector.broadcast %124 : f32 to vector<2x1024xf32>
    %126 = arith.mulf %125, %22 : vector<2x1024xf32>
    %127 = arith.addf %123, %126 : vector<2x1024xf32>
    %c6 = arith.constant 6 : index
    %128 = memref.load %arg1[%c6] : memref<54xf32, #tpu.memory_space<smem>>
    %129 = vector.broadcast %128 : f32 to vector<2x1024xf32>
    %130 = arith.mulf %129, %26 : vector<2x1024xf32>
    %131 = arith.addf %127, %130 : vector<2x1024xf32>
    %c7 = arith.constant 7 : index
    %132 = memref.load %arg1[%c7] : memref<54xf32, #tpu.memory_space<smem>>
    %133 = vector.broadcast %132 : f32 to vector<2x1024xf32>
    %134 = arith.mulf %133, %30 : vector<2x1024xf32>
    %135 = arith.addf %131, %134 : vector<2x1024xf32>
    %c8 = arith.constant 8 : index
    %136 = memref.load %arg1[%c8] : memref<54xf32, #tpu.memory_space<smem>>
    %137 = vector.broadcast %136 : f32 to vector<2x1024xf32>
    %138 = arith.mulf %137, %34 : vector<2x1024xf32>
    %139 = arith.addf %135, %138 : vector<2x1024xf32>
    %c9 = arith.constant 9 : index
    %140 = memref.load %arg1[%c9] : memref<54xf32, #tpu.memory_space<smem>>
    %141 = vector.broadcast %140 : f32 to vector<2x1024xf32>
    %142 = arith.mulf %141, %40 : vector<2x1024xf32>
    %143 = arith.addf %139, %142 : vector<2x1024xf32>
    %c10 = arith.constant 10 : index
    %144 = memref.load %arg1[%c10] : memref<54xf32, #tpu.memory_space<smem>>
    %145 = vector.broadcast %144 : f32 to vector<2x1024xf32>
    %146 = arith.mulf %145, %44 : vector<2x1024xf32>
    %147 = arith.addf %143, %146 : vector<2x1024xf32>
    %c11 = arith.constant 11 : index
    %148 = memref.load %arg1[%c11] : memref<54xf32, #tpu.memory_space<smem>>
    %149 = vector.broadcast %148 : f32 to vector<2x1024xf32>
    %150 = arith.mulf %149, %48 : vector<2x1024xf32>
    %151 = arith.addf %147, %150 : vector<2x1024xf32>
    %c12 = arith.constant 12 : index
    %152 = memref.load %arg1[%c12] : memref<54xf32, #tpu.memory_space<smem>>
    %153 = vector.broadcast %152 : f32 to vector<2x1024xf32>
    %154 = arith.mulf %153, %52 : vector<2x1024xf32>
    %155 = arith.addf %151, %154 : vector<2x1024xf32>
    %c13 = arith.constant 13 : index
    %156 = memref.load %arg1[%c13] : memref<54xf32, #tpu.memory_space<smem>>
    %157 = vector.broadcast %156 : f32 to vector<2x1024xf32>
    %158 = arith.mulf %157, %36 : vector<2x1024xf32>
    %159 = arith.addf %155, %158 : vector<2x1024xf32>
    %c14 = arith.constant 14 : index
    %160 = memref.load %arg1[%c14] : memref<54xf32, #tpu.memory_space<smem>>
    %161 = vector.broadcast %160 : f32 to vector<2x1024xf32>
    %162 = arith.mulf %161, %56 : vector<2x1024xf32>
    %163 = arith.addf %159, %162 : vector<2x1024xf32>
    %c15 = arith.constant 15 : index
    %164 = memref.load %arg1[%c15] : memref<54xf32, #tpu.memory_space<smem>>
    %165 = vector.broadcast %164 : f32 to vector<2x1024xf32>
    %166 = arith.mulf %165, %60 : vector<2x1024xf32>
    %167 = arith.addf %163, %166 : vector<2x1024xf32>
    %c16 = arith.constant 16 : index
    %168 = memref.load %arg1[%c16] : memref<54xf32, #tpu.memory_space<smem>>
    %169 = vector.broadcast %168 : f32 to vector<2x1024xf32>
    %170 = arith.mulf %169, %64 : vector<2x1024xf32>
    %171 = arith.addf %167, %170 : vector<2x1024xf32>
    %c17 = arith.constant 17 : index
    %172 = memref.load %arg1[%c17] : memref<54xf32, #tpu.memory_space<smem>>
    %173 = vector.broadcast %172 : f32 to vector<2x1024xf32>
    %174 = arith.mulf %173, %68 : vector<2x1024xf32>
    %175 = arith.addf %171, %174 : vector<2x1024xf32>
    %c18 = arith.constant 18 : index
    %176 = memref.load %arg1[%c18] : memref<54xf32, #tpu.memory_space<smem>>
    %177 = vector.broadcast %176 : f32 to vector<2x1024xf32>
    %178 = arith.mulf %177, %74 : vector<2x1024xf32>
    %179 = arith.addf %175, %178 : vector<2x1024xf32>
    %c19 = arith.constant 19 : index
    %180 = memref.load %arg1[%c19] : memref<54xf32, #tpu.memory_space<smem>>
    %181 = vector.broadcast %180 : f32 to vector<2x1024xf32>
    %182 = arith.mulf %181, %78 : vector<2x1024xf32>
    %183 = arith.addf %179, %182 : vector<2x1024xf32>
    %c20 = arith.constant 20 : index
    %184 = memref.load %arg1[%c20] : memref<54xf32, #tpu.memory_space<smem>>
    %185 = vector.broadcast %184 : f32 to vector<2x1024xf32>
    %186 = arith.mulf %185, %82 : vector<2x1024xf32>
    %187 = arith.addf %183, %186 : vector<2x1024xf32>
    %c21 = arith.constant 21 : index
    %188 = memref.load %arg1[%c21] : memref<54xf32, #tpu.memory_space<smem>>
    %189 = vector.broadcast %188 : f32 to vector<2x1024xf32>
    %190 = arith.mulf %189, %86 : vector<2x1024xf32>
    %191 = arith.addf %187, %190 : vector<2x1024xf32>
    %c22 = arith.constant 22 : index
    %192 = memref.load %arg1[%c22] : memref<54xf32, #tpu.memory_space<smem>>
    %193 = vector.broadcast %192 : f32 to vector<2x1024xf32>
    %194 = arith.mulf %193, %70 : vector<2x1024xf32>
    %195 = arith.addf %191, %194 : vector<2x1024xf32>
    %c23 = arith.constant 23 : index
    %196 = memref.load %arg1[%c23] : memref<54xf32, #tpu.memory_space<smem>>
    %197 = vector.broadcast %196 : f32 to vector<2x1024xf32>
    %198 = arith.mulf %197, %90 : vector<2x1024xf32>
    %199 = arith.addf %195, %198 : vector<2x1024xf32>
    %c24 = arith.constant 24 : index
    %200 = memref.load %arg1[%c24] : memref<54xf32, #tpu.memory_space<smem>>
    %201 = vector.broadcast %200 : f32 to vector<2x1024xf32>
    %202 = arith.mulf %201, %94 : vector<2x1024xf32>
    %203 = arith.addf %199, %202 : vector<2x1024xf32>
    %c25 = arith.constant 25 : index
    %204 = memref.load %arg1[%c25] : memref<54xf32, #tpu.memory_space<smem>>
    %205 = vector.broadcast %204 : f32 to vector<2x1024xf32>
    %206 = arith.mulf %205, %98 : vector<2x1024xf32>
    %207 = arith.addf %203, %206 : vector<2x1024xf32>
    %c26 = arith.constant 26 : index
    %208 = memref.load %arg1[%c26] : memref<54xf32, #tpu.memory_space<smem>>
    %209 = vector.broadcast %208 : f32 to vector<2x1024xf32>
    %210 = arith.mulf %209, %102 : vector<2x1024xf32>
    %211 = arith.addf %207, %210 : vector<2x1024xf32>
    %c0_27 = arith.constant 0 : index
    %212 = memref.load %arg2[%c0_27] : memref<2xf32, #tpu.memory_space<smem>>
    %213 = vector.broadcast %212 : f32 to vector<2x1024xf32>
    %214 = arith.addf %211, %213 : vector<2x1024xf32>
    %cst_28 = arith.constant 0.000000e+00 : f32
    %215 = vector.broadcast %cst_28 : f32 to vector<2x1024xf32>
    %216 = arith.maximumf %214, %215 : vector<2x1024xf32>
    %cst_29 = arith.constant 0.000000e+00 : f32
    %217 = vector.broadcast %cst_29 : f32 to vector<2x1024xf32>
    %c27 = arith.constant 27 : index
    %218 = memref.load %arg1[%c27] : memref<54xf32, #tpu.memory_space<smem>>
    %219 = vector.broadcast %218 : f32 to vector<2x1024xf32>
    %220 = arith.mulf %219, %6 : vector<2x1024xf32>
    %221 = arith.addf %217, %220 : vector<2x1024xf32>
    %c28 = arith.constant 28 : index
    %222 = memref.load %arg1[%c28] : memref<54xf32, #tpu.memory_space<smem>>
    %223 = vector.broadcast %222 : f32 to vector<2x1024xf32>
    %224 = arith.mulf %223, %10 : vector<2x1024xf32>
    %225 = arith.addf %221, %224 : vector<2x1024xf32>
    %c29 = arith.constant 29 : index
    %226 = memref.load %arg1[%c29] : memref<54xf32, #tpu.memory_space<smem>>
    %227 = vector.broadcast %226 : f32 to vector<2x1024xf32>
    %228 = arith.mulf %227, %14 : vector<2x1024xf32>
    %229 = arith.addf %225, %228 : vector<2x1024xf32>
    %c30 = arith.constant 30 : index
    %230 = memref.load %arg1[%c30] : memref<54xf32, #tpu.memory_space<smem>>
    %231 = vector.broadcast %230 : f32 to vector<2x1024xf32>
    %232 = arith.mulf %231, %18 : vector<2x1024xf32>
    %233 = arith.addf %229, %232 : vector<2x1024xf32>
    %c31 = arith.constant 31 : index
    %234 = memref.load %arg1[%c31] : memref<54xf32, #tpu.memory_space<smem>>
    %235 = vector.broadcast %234 : f32 to vector<2x1024xf32>
    %236 = arith.mulf %235, %2 : vector<2x1024xf32>
    %237 = arith.addf %233, %236 : vector<2x1024xf32>
    %c32 = arith.constant 32 : index
    %238 = memref.load %arg1[%c32] : memref<54xf32, #tpu.memory_space<smem>>
    %239 = vector.broadcast %238 : f32 to vector<2x1024xf32>
    %240 = arith.mulf %239, %22 : vector<2x1024xf32>
    %241 = arith.addf %237, %240 : vector<2x1024xf32>
    %c33 = arith.constant 33 : index
    %242 = memref.load %arg1[%c33] : memref<54xf32, #tpu.memory_space<smem>>
    %243 = vector.broadcast %242 : f32 to vector<2x1024xf32>
    %244 = arith.mulf %243, %26 : vector<2x1024xf32>
    %245 = arith.addf %241, %244 : vector<2x1024xf32>
    %c34 = arith.constant 34 : index
    %246 = memref.load %arg1[%c34] : memref<54xf32, #tpu.memory_space<smem>>
    %247 = vector.broadcast %246 : f32 to vector<2x1024xf32>
    %248 = arith.mulf %247, %30 : vector<2x1024xf32>
    %249 = arith.addf %245, %248 : vector<2x1024xf32>
    %c35 = arith.constant 35 : index
    %250 = memref.load %arg1[%c35] : memref<54xf32, #tpu.memory_space<smem>>
    %251 = vector.broadcast %250 : f32 to vector<2x1024xf32>
    %252 = arith.mulf %251, %34 : vector<2x1024xf32>
    %253 = arith.addf %249, %252 : vector<2x1024xf32>
    %c36 = arith.constant 36 : index
    %254 = memref.load %arg1[%c36] : memref<54xf32, #tpu.memory_space<smem>>
    %255 = vector.broadcast %254 : f32 to vector<2x1024xf32>
    %256 = arith.mulf %255, %40 : vector<2x1024xf32>
    %257 = arith.addf %253, %256 : vector<2x1024xf32>
    %c37 = arith.constant 37 : index
    %258 = memref.load %arg1[%c37] : memref<54xf32, #tpu.memory_space<smem>>
    %259 = vector.broadcast %258 : f32 to vector<2x1024xf32>
    %260 = arith.mulf %259, %44 : vector<2x1024xf32>
    %261 = arith.addf %257, %260 : vector<2x1024xf32>
    %c38 = arith.constant 38 : index
    %262 = memref.load %arg1[%c38] : memref<54xf32, #tpu.memory_space<smem>>
    %263 = vector.broadcast %262 : f32 to vector<2x1024xf32>
    %264 = arith.mulf %263, %48 : vector<2x1024xf32>
    %265 = arith.addf %261, %264 : vector<2x1024xf32>
    %c39 = arith.constant 39 : index
    %266 = memref.load %arg1[%c39] : memref<54xf32, #tpu.memory_space<smem>>
    %267 = vector.broadcast %266 : f32 to vector<2x1024xf32>
    %268 = arith.mulf %267, %52 : vector<2x1024xf32>
    %269 = arith.addf %265, %268 : vector<2x1024xf32>
    %c40 = arith.constant 40 : index
    %270 = memref.load %arg1[%c40] : memref<54xf32, #tpu.memory_space<smem>>
    %271 = vector.broadcast %270 : f32 to vector<2x1024xf32>
    %272 = arith.mulf %271, %36 : vector<2x1024xf32>
    %273 = arith.addf %269, %272 : vector<2x1024xf32>
    %c41 = arith.constant 41 : index
    %274 = memref.load %arg1[%c41] : memref<54xf32, #tpu.memory_space<smem>>
    %275 = vector.broadcast %274 : f32 to vector<2x1024xf32>
    %276 = arith.mulf %275, %56 : vector<2x1024xf32>
    %277 = arith.addf %273, %276 : vector<2x1024xf32>
    %c42 = arith.constant 42 : index
    %278 = memref.load %arg1[%c42] : memref<54xf32, #tpu.memory_space<smem>>
    %279 = vector.broadcast %278 : f32 to vector<2x1024xf32>
    %280 = arith.mulf %279, %60 : vector<2x1024xf32>
    %281 = arith.addf %277, %280 : vector<2x1024xf32>
    %c43 = arith.constant 43 : index
    %282 = memref.load %arg1[%c43] : memref<54xf32, #tpu.memory_space<smem>>
    %283 = vector.broadcast %282 : f32 to vector<2x1024xf32>
    %284 = arith.mulf %283, %64 : vector<2x1024xf32>
    %285 = arith.addf %281, %284 : vector<2x1024xf32>
    %c44 = arith.constant 44 : index
    %286 = memref.load %arg1[%c44] : memref<54xf32, #tpu.memory_space<smem>>
    %287 = vector.broadcast %286 : f32 to vector<2x1024xf32>
    %288 = arith.mulf %287, %68 : vector<2x1024xf32>
    %289 = arith.addf %285, %288 : vector<2x1024xf32>
    %c45 = arith.constant 45 : index
    %290 = memref.load %arg1[%c45] : memref<54xf32, #tpu.memory_space<smem>>
    %291 = vector.broadcast %290 : f32 to vector<2x1024xf32>
    %292 = arith.mulf %291, %74 : vector<2x1024xf32>
    %293 = arith.addf %289, %292 : vector<2x1024xf32>
    %c46 = arith.constant 46 : index
    %294 = memref.load %arg1[%c46] : memref<54xf32, #tpu.memory_space<smem>>
    %295 = vector.broadcast %294 : f32 to vector<2x1024xf32>
    %296 = arith.mulf %295, %78 : vector<2x1024xf32>
    %297 = arith.addf %293, %296 : vector<2x1024xf32>
    %c47 = arith.constant 47 : index
    %298 = memref.load %arg1[%c47] : memref<54xf32, #tpu.memory_space<smem>>
    %299 = vector.broadcast %298 : f32 to vector<2x1024xf32>
    %300 = arith.mulf %299, %82 : vector<2x1024xf32>
    %301 = arith.addf %297, %300 : vector<2x1024xf32>
    %c48 = arith.constant 48 : index
    %302 = memref.load %arg1[%c48] : memref<54xf32, #tpu.memory_space<smem>>
    %303 = vector.broadcast %302 : f32 to vector<2x1024xf32>
    %304 = arith.mulf %303, %86 : vector<2x1024xf32>
    %305 = arith.addf %301, %304 : vector<2x1024xf32>
    %c49 = arith.constant 49 : index
    %306 = memref.load %arg1[%c49] : memref<54xf32, #tpu.memory_space<smem>>
    %307 = vector.broadcast %306 : f32 to vector<2x1024xf32>
    %308 = arith.mulf %307, %70 : vector<2x1024xf32>
    %309 = arith.addf %305, %308 : vector<2x1024xf32>
    %c50 = arith.constant 50 : index
    %310 = memref.load %arg1[%c50] : memref<54xf32, #tpu.memory_space<smem>>
    %311 = vector.broadcast %310 : f32 to vector<2x1024xf32>
    %312 = arith.mulf %311, %90 : vector<2x1024xf32>
    %313 = arith.addf %309, %312 : vector<2x1024xf32>
    %c51 = arith.constant 51 : index
    %314 = memref.load %arg1[%c51] : memref<54xf32, #tpu.memory_space<smem>>
    %315 = vector.broadcast %314 : f32 to vector<2x1024xf32>
    %316 = arith.mulf %315, %94 : vector<2x1024xf32>
    %317 = arith.addf %313, %316 : vector<2x1024xf32>
    %c52 = arith.constant 52 : index
    %318 = memref.load %arg1[%c52] : memref<54xf32, #tpu.memory_space<smem>>
    %319 = vector.broadcast %318 : f32 to vector<2x1024xf32>
    %320 = arith.mulf %319, %98 : vector<2x1024xf32>
    %321 = arith.addf %317, %320 : vector<2x1024xf32>
    %c53 = arith.constant 53 : index
    %322 = memref.load %arg1[%c53] : memref<54xf32, #tpu.memory_space<smem>>
    %323 = vector.broadcast %322 : f32 to vector<2x1024xf32>
    %324 = arith.mulf %323, %102 : vector<2x1024xf32>
    %325 = arith.addf %321, %324 : vector<2x1024xf32>
    %c1_30 = arith.constant 1 : index
    %326 = memref.load %arg2[%c1_30] : memref<2xf32, #tpu.memory_space<smem>>
    %327 = vector.broadcast %326 : f32 to vector<2x1024xf32>
    %328 = arith.addf %325, %327 : vector<2x1024xf32>
    %cst_31 = arith.constant 0.000000e+00 : f32
    %329 = vector.broadcast %cst_31 : f32 to vector<2x1024xf32>
    %330 = arith.maximumf %328, %329 : vector<2x1024xf32>
    %c0_32 = arith.constant 0 : index
    %c0_33 = arith.constant 0 : index
    %331 = vector.load %arg4[%c0_32, %c0_33] : memref<1024x256xf32, #tpu.memory_space<vmem>>, vector<1024x256xf32>
    %cst_34 = arith.constant dense<0.000000e+00> : vector<2x256xf32>
    %332 = tpu.matmul %216, %331, %cst_34 {dimension_numbers = #tpu.dot_dimension_numbers<[1], [0], [0], [1], [0, 0, 1, 1], [], []>} : vector<2x1024xf32>, vector<1024x256xf32>, vector<2x256xf32> -> vector<2x256xf32>
    %cst_35 = arith.constant dense<0.000000e+00> : vector<2x256xf32>
    %333 = tpu.matmul %330, %331, %cst_35 {dimension_numbers = #tpu.dot_dimension_numbers<[1], [0], [0], [1], [0, 0, 1, 1], [], []>} : vector<2x1024xf32>, vector<1024x256xf32>, vector<2x256xf32> -> vector<2x256xf32>
    %334 = tpu.concatenate %332, %333 in 1 : vector<2x256xf32>, vector<2x256xf32> -> vector<2x512xf32>
    %c0_36 = arith.constant 0 : index
    %c0_37 = arith.constant 0 : index
    %335 = vector.load %arg7[%c0_36, %c0_37] : memref<512x512xf32, #tpu.memory_space<vmem>>, vector<512x512xf32>
    %c0_38 = arith.constant 0 : index
    %c0_39 = arith.constant 0 : index
    %336 = vector.load %arg8[%c0_38, %c0_39] : memref<1x512xf32, #tpu.memory_space<vmem>>, vector<1x512xf32>
    %c0_40 = arith.constant 0 : index
    %c0_41 = arith.constant 0 : index
    %337 = vector.load %arg9[%c0_40, %c0_41] : memref<512x512xf32, #tpu.memory_space<vmem>>, vector<512x512xf32>
    %c0_42 = arith.constant 0 : index
    %c0_43 = arith.constant 0 : index
    %338 = vector.load %arg10[%c0_42, %c0_43] : memref<1x512xf32, #tpu.memory_space<vmem>>, vector<1x512xf32>
    %339 = vector.extract_strided_slice %334 {offsets = [0, 0], sizes = [2, 256], strides = [1, 1]} : vector<2x512xf32> to vector<2x256xf32>
    %340 = vector.shape_cast %339 : vector<2x256xf32> to vector<1x2x256xf32>
    %cst_44 = arith.constant dense<0.000000e+00> : vector<1xf32>
    %341 = vector.multi_reduction <add>, %340, %cst_44 [1, 2] : vector<1x2x256xf32> to vector<1xf32>
    %342 = vector.shape_cast %341 : vector<1xf32> to vector<1x1x1xf32>
    %343 = vector.extract %342[0, 0, 0] : f32 from vector<1x1x1xf32>
    %cst_45 = arith.constant 0.001953125 : f32
    %344 = arith.mulf %343, %cst_45 : f32
    %345 = vector.broadcast %344 : f32 to vector<2x256xf32>
    %346 = arith.subf %339, %345 : vector<2x256xf32>
    %347 = vector.extract_strided_slice %334 {offsets = [0, 256], sizes = [2, 256], strides = [1, 1]} : vector<2x512xf32> to vector<2x256xf32>
    %348 = vector.shape_cast %347 : vector<2x256xf32> to vector<1x2x256xf32>
    %cst_46 = arith.constant dense<0.000000e+00> : vector<1xf32>
    %349 = vector.multi_reduction <add>, %348, %cst_46 [1, 2] : vector<1x2x256xf32> to vector<1xf32>
    %350 = vector.shape_cast %349 : vector<1xf32> to vector<1x1x1xf32>
    %351 = vector.extract %350[0, 0, 0] : f32 from vector<1x1x1xf32>
    %cst_47 = arith.constant 0.001953125 : f32
    %352 = arith.mulf %351, %cst_47 : f32
    %353 = vector.broadcast %352 : f32 to vector<2x256xf32>
    %354 = arith.subf %347, %353 : vector<2x256xf32>
    %355 = tpu.concatenate %346, %354 in 1 : vector<2x256xf32>, vector<2x256xf32> -> vector<2x512xf32>
    %cst_48 = arith.constant dense<0.000000e+00> : vector<2x512xf32>
    %356 = tpu.matmul %355, %335, %cst_48 {dimension_numbers = #tpu.dot_dimension_numbers<[1], [0], [0], [1], [0, 0, 1, 1], [], []>} : vector<2x512xf32>, vector<512x512xf32>, vector<2x512xf32> -> vector<2x512xf32>
    %357 = vector.broadcast %336 : vector<1x512xf32> to vector<2x512xf32>
    %358 = arith.addf %356, %357 : vector<2x512xf32>
    %cst_49 = arith.constant 0.000000e+00 : f32
    %359 = vector.broadcast %cst_49 : f32 to vector<2x512xf32>
    %360 = arith.maximumf %358, %359 : vector<2x512xf32>
    %361 = vector.extract_strided_slice %360 {offsets = [0, 0], sizes = [2, 256], strides = [1, 1]} : vector<2x512xf32> to vector<2x256xf32>
    %362 = vector.shape_cast %361 : vector<2x256xf32> to vector<1x2x256xf32>
    %cst_50 = arith.constant dense<0.000000e+00> : vector<1xf32>
    %363 = vector.multi_reduction <add>, %362, %cst_50 [1, 2] : vector<1x2x256xf32> to vector<1xf32>
    %364 = vector.shape_cast %363 : vector<1xf32> to vector<1x1x1xf32>
    %365 = vector.extract %364[0, 0, 0] : f32 from vector<1x1x1xf32>
    %cst_51 = arith.constant 0.001953125 : f32
    %366 = arith.mulf %365, %cst_51 : f32
    %367 = vector.broadcast %366 : f32 to vector<2x256xf32>
    %368 = arith.subf %361, %367 : vector<2x256xf32>
    %369 = vector.extract_strided_slice %360 {offsets = [0, 256], sizes = [2, 256], strides = [1, 1]} : vector<2x512xf32> to vector<2x256xf32>
    %370 = vector.shape_cast %369 : vector<2x256xf32> to vector<1x2x256xf32>
    %cst_52 = arith.constant dense<0.000000e+00> : vector<1xf32>
    %371 = vector.multi_reduction <add>, %370, %cst_52 [1, 2] : vector<1x2x256xf32> to vector<1xf32>
    %372 = vector.shape_cast %371 : vector<1xf32> to vector<1x1x1xf32>
    %373 = vector.extract %372[0, 0, 0] : f32 from vector<1x1x1xf32>
    %cst_53 = arith.constant 0.001953125 : f32
    %374 = arith.mulf %373, %cst_53 : f32
    %375 = vector.broadcast %374 : f32 to vector<2x256xf32>
    %376 = arith.subf %369, %375 : vector<2x256xf32>
    %377 = tpu.concatenate %368, %376 in 1 : vector<2x256xf32>, vector<2x256xf32> -> vector<2x512xf32>
    %cst_54 = arith.constant dense<0.000000e+00> : vector<2x512xf32>
    %378 = tpu.matmul %377, %337, %cst_54 {dimension_numbers = #tpu.dot_dimension_numbers<[1], [0], [0], [1], [0, 0, 1, 1], [], []>} : vector<2x512xf32>, vector<512x512xf32>, vector<2x512xf32> -> vector<2x512xf32>
    %379 = vector.broadcast %338 : vector<1x512xf32> to vector<2x512xf32>
    %380 = arith.addf %378, %379 : vector<2x512xf32>
    %381 = arith.addf %380, %334 : vector<2x512xf32>
    %cst_55 = arith.constant 0.000000e+00 : f32
    %382 = vector.broadcast %cst_55 : f32 to vector<2x512xf32>
    %383 = arith.maximumf %381, %382 : vector<2x512xf32>
    %c0_56 = arith.constant 0 : index
    %c0_57 = arith.constant 0 : index
    %384 = vector.load %arg5[%c0_56, %c0_57] : memref<256x64xf32, #tpu.memory_space<vmem>>, vector<256x64xf32>
    %385 = vector.extract_strided_slice %383 {offsets = [0, 0], sizes = [2, 256], strides = [1, 1]} : vector<2x512xf32> to vector<2x256xf32>
    %cst_58 = arith.constant dense<0.000000e+00> : vector<2x64xf32>
    %386 = tpu.matmul %385, %384, %cst_58 {dimension_numbers = #tpu.dot_dimension_numbers<[1], [0], [0], [1], [0, 0, 1, 1], [], []>} : vector<2x256xf32>, vector<256x64xf32>, vector<2x64xf32> -> vector<2x64xf32>
    %387 = vector.extract_strided_slice %383 {offsets = [0, 256], sizes = [2, 256], strides = [1, 1]} : vector<2x512xf32> to vector<2x256xf32>
    %cst_59 = arith.constant dense<0.000000e+00> : vector<2x64xf32>
    %388 = tpu.matmul %387, %384, %cst_59 {dimension_numbers = #tpu.dot_dimension_numbers<[1], [0], [0], [1], [0, 0, 1, 1], [], []>} : vector<2x256xf32>, vector<256x64xf32>, vector<2x64xf32> -> vector<2x64xf32>
    %389 = tpu.concatenate %386, %388 in 1 : vector<2x64xf32>, vector<2x64xf32> -> vector<2x128xf32>
    %c0_60 = arith.constant 0 : index
    %c0_61 = arith.constant 0 : index
    %390 = vector.load %arg11[%c0_60, %c0_61] : memref<128x256xf32, #tpu.memory_space<vmem>>, vector<128x256xf32>
    %c0_62 = arith.constant 0 : index
    %c0_63 = arith.constant 0 : index
    %391 = vector.load %arg12[%c0_62, %c0_63] : memref<1x256xf32, #tpu.memory_space<vmem>>, vector<1x256xf32>
    %c0_64 = arith.constant 0 : index
    %c0_65 = arith.constant 0 : index
    %392 = vector.load %arg13[%c0_64, %c0_65] : memref<256x256xf32, #tpu.memory_space<vmem>>, vector<256x256xf32>
    %c0_66 = arith.constant 0 : index
    %c0_67 = arith.constant 0 : index
    %393 = vector.load %arg14[%c0_66, %c0_67] : memref<1x256xf32, #tpu.memory_space<vmem>>, vector<1x256xf32>
    %394 = vector.extract_strided_slice %389 {offsets = [0, 0], sizes = [2, 64], strides = [1, 1]} : vector<2x128xf32> to vector<2x64xf32>
    %395 = vector.shape_cast %394 : vector<2x64xf32> to vector<1x2x64xf32>
    %cst_68 = arith.constant dense<0.000000e+00> : vector<1xf32>
    %396 = vector.multi_reduction <add>, %395, %cst_68 [1, 2] : vector<1x2x64xf32> to vector<1xf32>
    %397 = vector.shape_cast %396 : vector<1xf32> to vector<1x1x1xf32>
    %398 = vector.extract %397[0, 0, 0] : f32 from vector<1x1x1xf32>
    %cst_69 = arith.constant 7.812500e-03 : f32
    %399 = arith.mulf %398, %cst_69 : f32
    %400 = vector.broadcast %399 : f32 to vector<2x64xf32>
    %401 = arith.subf %394, %400 : vector<2x64xf32>
    %402 = vector.extract_strided_slice %389 {offsets = [0, 64], sizes = [2, 64], strides = [1, 1]} : vector<2x128xf32> to vector<2x64xf32>
    %403 = vector.shape_cast %402 : vector<2x64xf32> to vector<1x2x64xf32>
    %cst_70 = arith.constant dense<0.000000e+00> : vector<1xf32>
    %404 = vector.multi_reduction <add>, %403, %cst_70 [1, 2] : vector<1x2x64xf32> to vector<1xf32>
    %405 = vector.shape_cast %404 : vector<1xf32> to vector<1x1x1xf32>
    %406 = vector.extract %405[0, 0, 0] : f32 from vector<1x1x1xf32>
    %cst_71 = arith.constant 7.812500e-03 : f32
    %407 = arith.mulf %406, %cst_71 : f32
    %408 = vector.broadcast %407 : f32 to vector<2x64xf32>
    %409 = arith.subf %402, %408 : vector<2x64xf32>
    %410 = tpu.concatenate %401, %409 in 1 : vector<2x64xf32>, vector<2x64xf32> -> vector<2x128xf32>
    %cst_72 = arith.constant dense<0.000000e+00> : vector<2x256xf32>
    %411 = tpu.matmul %410, %390, %cst_72 {dimension_numbers = #tpu.dot_dimension_numbers<[1], [0], [0], [1], [0, 0, 1, 1], [], []>} : vector<2x128xf32>, vector<128x256xf32>, vector<2x256xf32> -> vector<2x256xf32>
    %412 = vector.broadcast %391 : vector<1x256xf32> to vector<2x256xf32>
    %413 = arith.addf %411, %412 : vector<2x256xf32>
    %cst_73 = arith.constant 0.000000e+00 : f32
    %414 = vector.broadcast %cst_73 : f32 to vector<2x256xf32>
    %415 = arith.maximumf %413, %414 : vector<2x256xf32>
    %416 = vector.extract_strided_slice %415 {offsets = [0, 0], sizes = [2, 64], strides = [1, 1]} : vector<2x256xf32> to vector<2x64xf32>
    %417 = vector.shape_cast %416 : vector<2x64xf32> to vector<1x2x64xf32>
    %cst_74 = arith.constant dense<0.000000e+00> : vector<1xf32>
    %418 = vector.multi_reduction <add>, %417, %cst_74 [1, 2] : vector<1x2x64xf32> to vector<1xf32>
    %419 = vector.shape_cast %418 : vector<1xf32> to vector<1x1x1xf32>
    %420 = vector.extract %419[0, 0, 0] : f32 from vector<1x1x1xf32>
    %cst_75 = arith.constant 7.812500e-03 : f32
    %421 = arith.mulf %420, %cst_75 : f32
    %422 = vector.broadcast %421 : f32 to vector<2x64xf32>
    %423 = arith.subf %416, %422 : vector<2x64xf32>
    %424 = vector.extract_strided_slice %415 {offsets = [0, 64], sizes = [2, 64], strides = [1, 1]} : vector<2x256xf32> to vector<2x64xf32>
    %425 = vector.shape_cast %424 : vector<2x64xf32> to vector<1x2x64xf32>
    %cst_76 = arith.constant dense<0.000000e+00> : vector<1xf32>
    %426 = vector.multi_reduction <add>, %425, %cst_76 [1, 2] : vector<1x2x64xf32> to vector<1xf32>
    %427 = vector.shape_cast %426 : vector<1xf32> to vector<1x1x1xf32>
    %428 = vector.extract %427[0, 0, 0] : f32 from vector<1x1x1xf32>
    %cst_77 = arith.constant 7.812500e-03 : f32
    %429 = arith.mulf %428, %cst_77 : f32
    %430 = vector.broadcast %429 : f32 to vector<2x64xf32>
    %431 = arith.subf %424, %430 : vector<2x64xf32>
    %432 = vector.extract_strided_slice %415 {offsets = [0, 128], sizes = [2, 64], strides = [1, 1]} : vector<2x256xf32> to vector<2x64xf32>
    %433 = vector.shape_cast %432 : vector<2x64xf32> to vector<1x2x64xf32>
    %cst_78 = arith.constant dense<0.000000e+00> : vector<1xf32>
    %434 = vector.multi_reduction <add>, %433, %cst_78 [1, 2] : vector<1x2x64xf32> to vector<1xf32>
    %435 = vector.shape_cast %434 : vector<1xf32> to vector<1x1x1xf32>
    %436 = vector.extract %435[0, 0, 0] : f32 from vector<1x1x1xf32>
    %cst_79 = arith.constant 7.812500e-03 : f32
    %437 = arith.mulf %436, %cst_79 : f32
    %438 = vector.broadcast %437 : f32 to vector<2x64xf32>
    %439 = arith.subf %432, %438 : vector<2x64xf32>
    %440 = vector.extract_strided_slice %415 {offsets = [0, 192], sizes = [2, 64], strides = [1, 1]} : vector<2x256xf32> to vector<2x64xf32>
    %441 = vector.shape_cast %440 : vector<2x64xf32> to vector<1x2x64xf32>
    %cst_80 = arith.constant dense<0.000000e+00> : vector<1xf32>
    %442 = vector.multi_reduction <add>, %441, %cst_80 [1, 2] : vector<1x2x64xf32> to vector<1xf32>
    %443 = vector.shape_cast %442 : vector<1xf32> to vector<1x1x1xf32>
    %444 = vector.extract %443[0, 0, 0] : f32 from vector<1x1x1xf32>
    %cst_81 = arith.constant 7.812500e-03 : f32
    %445 = arith.mulf %444, %cst_81 : f32
    %446 = vector.broadcast %445 : f32 to vector<2x64xf32>
    %447 = arith.subf %440, %446 : vector<2x64xf32>
    %448 = tpu.concatenate %423, %431, %439, %447 in 1 : vector<2x64xf32>, vector<2x64xf32>, vector<2x64xf32>, vector<2x64xf32> -> vector<2x256xf32>
    %cst_82 = arith.constant dense<0.000000e+00> : vector<2x256xf32>
    %449 = tpu.matmul %448, %392, %cst_82 {dimension_numbers = #tpu.dot_dimension_numbers<[1], [0], [0], [1], [0, 0, 1, 1], [], []>} : vector<2x256xf32>, vector<256x256xf32>, vector<2x256xf32> -> vector<2x256xf32>
    %450 = vector.broadcast %393 : vector<1x256xf32> to vector<2x256xf32>
    %451 = arith.addf %449, %450 : vector<2x256xf32>
    %cst_83 = arith.constant 0.000000e+00 : f32
    %452 = vector.broadcast %cst_83 : f32 to vector<2x64xf32>
    %453 = tpu.concatenate %452, %389, %452 in 1 : vector<2x64xf32>, vector<2x128xf32>, vector<2x64xf32> -> vector<2x256xf32>
    %454 = arith.addf %451, %453 : vector<2x256xf32>
    %cst_84 = arith.constant 0.000000e+00 : f32
    %455 = vector.broadcast %cst_84 : f32 to vector<2x256xf32>
    %456 = arith.maximumf %454, %455 : vector<2x256xf32>
    %c0_85 = arith.constant 0 : index
    %c0_86 = arith.constant 0 : index
    %457 = vector.load %arg15[%c0_85, %c0_86] : memref<256x256xf32, #tpu.memory_space<vmem>>, vector<256x256xf32>
    %c0_87 = arith.constant 0 : index
    %c0_88 = arith.constant 0 : index
    %458 = vector.load %arg16[%c0_87, %c0_88] : memref<1x256xf32, #tpu.memory_space<vmem>>, vector<1x256xf32>
    %c0_89 = arith.constant 0 : index
    %c0_90 = arith.constant 0 : index
    %459 = vector.load %arg17[%c0_89, %c0_90] : memref<256x256xf32, #tpu.memory_space<vmem>>, vector<256x256xf32>
    %c0_91 = arith.constant 0 : index
    %c0_92 = arith.constant 0 : index
    %460 = vector.load %arg18[%c0_91, %c0_92] : memref<1x256xf32, #tpu.memory_space<vmem>>, vector<1x256xf32>
    %461 = vector.extract_strided_slice %456 {offsets = [0, 0], sizes = [2, 64], strides = [1, 1]} : vector<2x256xf32> to vector<2x64xf32>
    %462 = vector.shape_cast %461 : vector<2x64xf32> to vector<1x2x64xf32>
    %cst_93 = arith.constant dense<0.000000e+00> : vector<1xf32>
    %463 = vector.multi_reduction <add>, %462, %cst_93 [1, 2] : vector<1x2x64xf32> to vector<1xf32>
    %464 = vector.shape_cast %463 : vector<1xf32> to vector<1x1x1xf32>
    %465 = vector.extract %464[0, 0, 0] : f32 from vector<1x1x1xf32>
    %cst_94 = arith.constant 7.812500e-03 : f32
    %466 = arith.mulf %465, %cst_94 : f32
    %467 = vector.broadcast %466 : f32 to vector<2x64xf32>
    %468 = arith.subf %461, %467 : vector<2x64xf32>
    %469 = vector.extract_strided_slice %456 {offsets = [0, 64], sizes = [2, 64], strides = [1, 1]} : vector<2x256xf32> to vector<2x64xf32>
    %470 = vector.shape_cast %469 : vector<2x64xf32> to vector<1x2x64xf32>
    %cst_95 = arith.constant dense<0.000000e+00> : vector<1xf32>
    %471 = vector.multi_reduction <add>, %470, %cst_95 [1, 2] : vector<1x2x64xf32> to vector<1xf32>
    %472 = vector.shape_cast %471 : vector<1xf32> to vector<1x1x1xf32>
    %473 = vector.extract %472[0, 0, 0] : f32 from vector<1x1x1xf32>
    %cst_96 = arith.constant 7.812500e-03 : f32
    %474 = arith.mulf %473, %cst_96 : f32
    %475 = vector.broadcast %474 : f32 to vector<2x64xf32>
    %476 = arith.subf %469, %475 : vector<2x64xf32>
    %477 = vector.extract_strided_slice %456 {offsets = [0, 128], sizes = [2, 64], strides = [1, 1]} : vector<2x256xf32> to vector<2x64xf32>
    %478 = vector.shape_cast %477 : vector<2x64xf32> to vector<1x2x64xf32>
    %cst_97 = arith.constant dense<0.000000e+00> : vector<1xf32>
    %479 = vector.multi_reduction <add>, %478, %cst_97 [1, 2] : vector<1x2x64xf32> to vector<1xf32>
    %480 = vector.shape_cast %479 : vector<1xf32> to vector<1x1x1xf32>
    %481 = vector.extract %480[0, 0, 0] : f32 from vector<1x1x1xf32>
    %cst_98 = arith.constant 7.812500e-03 : f32
    %482 = arith.mulf %481, %cst_98 : f32
    %483 = vector.broadcast %482 : f32 to vector<2x64xf32>
    %484 = arith.subf %477, %483 : vector<2x64xf32>
    %485 = vector.extract_strided_slice %456 {offsets = [0, 192], sizes = [2, 64], strides = [1, 1]} : vector<2x256xf32> to vector<2x64xf32>
    %486 = vector.shape_cast %485 : vector<2x64xf32> to vector<1x2x64xf32>
    %cst_99 = arith.constant dense<0.000000e+00> : vector<1xf32>
    %487 = vector.multi_reduction <add>, %486, %cst_99 [1, 2] : vector<1x2x64xf32> to vector<1xf32>
    %488 = vector.shape_cast %487 : vector<1xf32> to vector<1x1x1xf32>
    %489 = vector.extract %488[0, 0, 0] : f32 from vector<1x1x1xf32>
    %cst_100 = arith.constant 7.812500e-03 : f32
    %490 = arith.mulf %489, %cst_100 : f32
    %491 = vector.broadcast %490 : f32 to vector<2x64xf32>
    %492 = arith.subf %485, %491 : vector<2x64xf32>
    %493 = tpu.concatenate %468, %476, %484, %492 in 1 : vector<2x64xf32>, vector<2x64xf32>, vector<2x64xf32>, vector<2x64xf32> -> vector<2x256xf32>
    %cst_101 = arith.constant dense<0.000000e+00> : vector<2x256xf32>
    %494 = tpu.matmul %493, %457, %cst_101 {dimension_numbers = #tpu.dot_dimension_numbers<[1], [0], [0], [1], [0, 0, 1, 1], [], []>} : vector<2x256xf32>, vector<256x256xf32>, vector<2x256xf32> -> vector<2x256xf32>
    %495 = vector.broadcast %458 : vector<1x256xf32> to vector<2x256xf32>
    %496 = arith.addf %494, %495 : vector<2x256xf32>
    %cst_102 = arith.constant 0.000000e+00 : f32
    %497 = vector.broadcast %cst_102 : f32 to vector<2x256xf32>
    %498 = arith.maximumf %496, %497 : vector<2x256xf32>
    %499 = vector.extract_strided_slice %498 {offsets = [0, 0], sizes = [2, 64], strides = [1, 1]} : vector<2x256xf32> to vector<2x64xf32>
    %500 = vector.shape_cast %499 : vector<2x64xf32> to vector<1x2x64xf32>
    %cst_103 = arith.constant dense<0.000000e+00> : vector<1xf32>
    %501 = vector.multi_reduction <add>, %500, %cst_103 [1, 2] : vector<1x2x64xf32> to vector<1xf32>
    %502 = vector.shape_cast %501 : vector<1xf32> to vector<1x1x1xf32>
    %503 = vector.extract %502[0, 0, 0] : f32 from vector<1x1x1xf32>
    %cst_104 = arith.constant 7.812500e-03 : f32
    %504 = arith.mulf %503, %cst_104 : f32
    %505 = vector.broadcast %504 : f32 to vector<2x64xf32>
    %506 = arith.subf %499, %505 : vector<2x64xf32>
    %507 = vector.extract_strided_slice %498 {offsets = [0, 64], sizes = [2, 64], strides = [1, 1]} : vector<2x256xf32> to vector<2x64xf32>
    %508 = vector.shape_cast %507 : vector<2x64xf32> to vector<1x2x64xf32>
    %cst_105 = arith.constant dense<0.000000e+00> : vector<1xf32>
    %509 = vector.multi_reduction <add>, %508, %cst_105 [1, 2] : vector<1x2x64xf32> to vector<1xf32>
    %510 = vector.shape_cast %509 : vector<1xf32> to vector<1x1x1xf32>
    %511 = vector.extract %510[0, 0, 0] : f32 from vector<1x1x1xf32>
    %cst_106 = arith.constant 7.812500e-03 : f32
    %512 = arith.mulf %511, %cst_106 : f32
    %513 = vector.broadcast %512 : f32 to vector<2x64xf32>
    %514 = arith.subf %507, %513 : vector<2x64xf32>
    %515 = vector.extract_strided_slice %498 {offsets = [0, 128], sizes = [2, 64], strides = [1, 1]} : vector<2x256xf32> to vector<2x64xf32>
    %516 = vector.shape_cast %515 : vector<2x64xf32> to vector<1x2x64xf32>
    %cst_107 = arith.constant dense<0.000000e+00> : vector<1xf32>
    %517 = vector.multi_reduction <add>, %516, %cst_107 [1, 2] : vector<1x2x64xf32> to vector<1xf32>
    %518 = vector.shape_cast %517 : vector<1xf32> to vector<1x1x1xf32>
    %519 = vector.extract %518[0, 0, 0] : f32 from vector<1x1x1xf32>
    %cst_108 = arith.constant 7.812500e-03 : f32
    %520 = arith.mulf %519, %cst_108 : f32
    %521 = vector.broadcast %520 : f32 to vector<2x64xf32>
    %522 = arith.subf %515, %521 : vector<2x64xf32>
    %523 = vector.extract_strided_slice %498 {offsets = [0, 192], sizes = [2, 64], strides = [1, 1]} : vector<2x256xf32> to vector<2x64xf32>
    %524 = vector.shape_cast %523 : vector<2x64xf32> to vector<1x2x64xf32>
    %cst_109 = arith.constant dense<0.000000e+00> : vector<1xf32>
    %525 = vector.multi_reduction <add>, %524, %cst_109 [1, 2] : vector<1x2x64xf32> to vector<1xf32>
    %526 = vector.shape_cast %525 : vector<1xf32> to vector<1x1x1xf32>
    %527 = vector.extract %526[0, 0, 0] : f32 from vector<1x1x1xf32>
    %cst_110 = arith.constant 7.812500e-03 : f32
    %528 = arith.mulf %527, %cst_110 : f32
    %529 = vector.broadcast %528 : f32 to vector<2x64xf32>
    %530 = arith.subf %523, %529 : vector<2x64xf32>
    %531 = tpu.concatenate %506, %514, %522, %530 in 1 : vector<2x64xf32>, vector<2x64xf32>, vector<2x64xf32>, vector<2x64xf32> -> vector<2x256xf32>
    %cst_111 = arith.constant dense<0.000000e+00> : vector<2x256xf32>
    %532 = tpu.matmul %531, %459, %cst_111 {dimension_numbers = #tpu.dot_dimension_numbers<[1], [0], [0], [1], [0, 0, 1, 1], [], []>} : vector<2x256xf32>, vector<256x256xf32>, vector<2x256xf32> -> vector<2x256xf32>
    %533 = vector.broadcast %460 : vector<1x256xf32> to vector<2x256xf32>
    %534 = arith.addf %532, %533 : vector<2x256xf32>
    %535 = arith.addf %534, %456 : vector<2x256xf32>
    %cst_112 = arith.constant 0.000000e+00 : f32
    %536 = vector.broadcast %cst_112 : f32 to vector<2x256xf32>
    %537 = arith.maximumf %535, %536 : vector<2x256xf32>
    %c0_113 = arith.constant 0 : index
    %c0_114 = arith.constant 0 : index
    %538 = vector.load %arg6[%c0_113, %c0_114] : memref<64x16xf32, #tpu.memory_space<vmem>>, vector<64x16xf32>
    %539 = vector.extract_strided_slice %537 {offsets = [0, 0], sizes = [2, 64], strides = [1, 1]} : vector<2x256xf32> to vector<2x64xf32>
    %cst_115 = arith.constant dense<0.000000e+00> : vector<2x16xf32>
    %540 = tpu.matmul %539, %538, %cst_115 {dimension_numbers = #tpu.dot_dimension_numbers<[1], [0], [0], [1], [0, 0, 1, 1], [], []>} : vector<2x64xf32>, vector<64x16xf32>, vector<2x16xf32> -> vector<2x16xf32>
    %541 = vector.extract_strided_slice %537 {offsets = [0, 64], sizes = [2, 64], strides = [1, 1]} : vector<2x256xf32> to vector<2x64xf32>
    %cst_116 = arith.constant dense<0.000000e+00> : vector<2x16xf32>
    %542 = tpu.matmul %541, %538, %cst_116 {dimension_numbers = #tpu.dot_dimension_numbers<[1], [0], [0], [1], [0, 0, 1, 1], [], []>} : vector<2x64xf32>, vector<64x16xf32>, vector<2x16xf32> -> vector<2x16xf32>
    %543 = vector.extract_strided_slice %537 {offsets = [0, 128], sizes = [2, 64], strides = [1, 1]} : vector<2x256xf32> to vector<2x64xf32>
    %cst_117 = arith.constant dense<0.000000e+00> : vector<2x16xf32>
    %544 = tpu.matmul %543, %538, %cst_117 {dimension_numbers = #tpu.dot_dimension_numbers<[1], [0], [0], [1], [0, 0, 1, 1], [], []>} : vector<2x64xf32>, vector<64x16xf32>, vector<2x16xf32> -> vector<2x16xf32>
    %545 = vector.extract_strided_slice %537 {offsets = [0, 192], sizes = [2, 64], strides = [1, 1]} : vector<2x256xf32> to vector<2x64xf32>
    %cst_118 = arith.constant dense<0.000000e+00> : vector<2x16xf32>
    %546 = tpu.matmul %545, %538, %cst_118 {dimension_numbers = #tpu.dot_dimension_numbers<[1], [0], [0], [1], [0, 0, 1, 1], [], []>} : vector<2x64xf32>, vector<64x16xf32>, vector<2x16xf32> -> vector<2x16xf32>
    %547 = tpu.concatenate %540, %542, %544, %546 in 1 : vector<2x16xf32>, vector<2x16xf32>, vector<2x16xf32>, vector<2x16xf32> -> vector<2x64xf32>
    %c0_119 = arith.constant 0 : index
    %c0_120 = arith.constant 0 : index
    %548 = vector.load %arg19[%c0_119, %c0_120] : memref<64x128xf32, #tpu.memory_space<vmem>>, vector<64x128xf32>
    %c0_121 = arith.constant 0 : index
    %c0_122 = arith.constant 0 : index
    %549 = vector.load %arg20[%c0_121, %c0_122] : memref<1x128xf32, #tpu.memory_space<vmem>>, vector<1x128xf32>
    %c0_123 = arith.constant 0 : index
    %c0_124 = arith.constant 0 : index
    %550 = vector.load %arg21[%c0_123, %c0_124] : memref<128x128xf32, #tpu.memory_space<vmem>>, vector<128x128xf32>
    %c0_125 = arith.constant 0 : index
    %c0_126 = arith.constant 0 : index
    %551 = vector.load %arg22[%c0_125, %c0_126] : memref<1x128xf32, #tpu.memory_space<vmem>>, vector<1x128xf32>
    %552 = vector.extract_strided_slice %547 {offsets = [0, 0], sizes = [2, 16], strides = [1, 1]} : vector<2x64xf32> to vector<2x16xf32>
    %553 = vector.shape_cast %552 : vector<2x16xf32> to vector<1x2x16xf32>
    %cst_127 = arith.constant dense<0.000000e+00> : vector<1xf32>
    %554 = vector.multi_reduction <add>, %553, %cst_127 [1, 2] : vector<1x2x16xf32> to vector<1xf32>
    %555 = vector.shape_cast %554 : vector<1xf32> to vector<1x1x1xf32>
    %556 = vector.extract %555[0, 0, 0] : f32 from vector<1x1x1xf32>
    %cst_128 = arith.constant 3.125000e-02 : f32
    %557 = arith.mulf %556, %cst_128 : f32
    %558 = vector.broadcast %557 : f32 to vector<2x16xf32>
    %559 = arith.subf %552, %558 : vector<2x16xf32>
    %560 = vector.extract_strided_slice %547 {offsets = [0, 16], sizes = [2, 16], strides = [1, 1]} : vector<2x64xf32> to vector<2x16xf32>
    %561 = vector.shape_cast %560 : vector<2x16xf32> to vector<1x2x16xf32>
    %cst_129 = arith.constant dense<0.000000e+00> : vector<1xf32>
    %562 = vector.multi_reduction <add>, %561, %cst_129 [1, 2] : vector<1x2x16xf32> to vector<1xf32>
    %563 = vector.shape_cast %562 : vector<1xf32> to vector<1x1x1xf32>
    %564 = vector.extract %563[0, 0, 0] : f32 from vector<1x1x1xf32>
    %cst_130 = arith.constant 3.125000e-02 : f32
    %565 = arith.mulf %564, %cst_130 : f32
    %566 = vector.broadcast %565 : f32 to vector<2x16xf32>
    %567 = arith.subf %560, %566 : vector<2x16xf32>
    %568 = vector.extract_strided_slice %547 {offsets = [0, 32], sizes = [2, 16], strides = [1, 1]} : vector<2x64xf32> to vector<2x16xf32>
    %569 = vector.shape_cast %568 : vector<2x16xf32> to vector<1x2x16xf32>
    %cst_131 = arith.constant dense<0.000000e+00> : vector<1xf32>
    %570 = vector.multi_reduction <add>, %569, %cst_131 [1, 2] : vector<1x2x16xf32> to vector<1xf32>
    %571 = vector.shape_cast %570 : vector<1xf32> to vector<1x1x1xf32>
    %572 = vector.extract %571[0, 0, 0] : f32 from vector<1x1x1xf32>
    %cst_132 = arith.constant 3.125000e-02 : f32
    %573 = arith.mulf %572, %cst_132 : f32
    %574 = vector.broadcast %573 : f32 to vector<2x16xf32>
    %575 = arith.subf %568, %574 : vector<2x16xf32>
    %576 = vector.extract_strided_slice %547 {offsets = [0, 48], sizes = [2, 16], strides = [1, 1]} : vector<2x64xf32> to vector<2x16xf32>
    %577 = vector.shape_cast %576 : vector<2x16xf32> to vector<1x2x16xf32>
    %cst_133 = arith.constant dense<0.000000e+00> : vector<1xf32>
    %578 = vector.multi_reduction <add>, %577, %cst_133 [1, 2] : vector<1x2x16xf32> to vector<1xf32>
    %579 = vector.shape_cast %578 : vector<1xf32> to vector<1x1x1xf32>
    %580 = vector.extract %579[0, 0, 0] : f32 from vector<1x1x1xf32>
    %cst_134 = arith.constant 3.125000e-02 : f32
    %581 = arith.mulf %580, %cst_134 : f32
    %582 = vector.broadcast %581 : f32 to vector<2x16xf32>
    %583 = arith.subf %576, %582 : vector<2x16xf32>
    %584 = tpu.concatenate %559, %567, %575, %583 in 1 : vector<2x16xf32>, vector<2x16xf32>, vector<2x16xf32>, vector<2x16xf32> -> vector<2x64xf32>
    %cst_135 = arith.constant dense<0.000000e+00> : vector<2x128xf32>
    %585 = tpu.matmul %584, %548, %cst_135 {dimension_numbers = #tpu.dot_dimension_numbers<[1], [0], [0], [1], [0, 0, 1, 1], [], []>} : vector<2x64xf32>, vector<64x128xf32>, vector<2x128xf32> -> vector<2x128xf32>
    %586 = vector.broadcast %549 : vector<1x128xf32> to vector<2x128xf32>
    %587 = arith.addf %585, %586 : vector<2x128xf32>
    %cst_136 = arith.constant 0.000000e+00 : f32
    %588 = vector.broadcast %cst_136 : f32 to vector<2x128xf32>
    %589 = arith.maximumf %587, %588 : vector<2x128xf32>
    %590 = vector.extract_strided_slice %589 {offsets = [0, 0], sizes = [2, 16], strides = [1, 1]} : vector<2x128xf32> to vector<2x16xf32>
    %591 = vector.shape_cast %590 : vector<2x16xf32> to vector<1x2x16xf32>
    %cst_137 = arith.constant dense<0.000000e+00> : vector<1xf32>
    %592 = vector.multi_reduction <add>, %591, %cst_137 [1, 2] : vector<1x2x16xf32> to vector<1xf32>
    %593 = vector.shape_cast %592 : vector<1xf32> to vector<1x1x1xf32>
    %594 = vector.extract %593[0, 0, 0] : f32 from vector<1x1x1xf32>
    %cst_138 = arith.constant 3.125000e-02 : f32
    %595 = arith.mulf %594, %cst_138 : f32
    %596 = vector.broadcast %595 : f32 to vector<2x16xf32>
    %597 = arith.subf %590, %596 : vector<2x16xf32>
    %598 = vector.extract_strided_slice %589 {offsets = [0, 16], sizes = [2, 16], strides = [1, 1]} : vector<2x128xf32> to vector<2x16xf32>
    %599 = vector.shape_cast %598 : vector<2x16xf32> to vector<1x2x16xf32>
    %cst_139 = arith.constant dense<0.000000e+00> : vector<1xf32>
    %600 = vector.multi_reduction <add>, %599, %cst_139 [1, 2] : vector<1x2x16xf32> to vector<1xf32>
    %601 = vector.shape_cast %600 : vector<1xf32> to vector<1x1x1xf32>
    %602 = vector.extract %601[0, 0, 0] : f32 from vector<1x1x1xf32>
    %cst_140 = arith.constant 3.125000e-02 : f32
    %603 = arith.mulf %602, %cst_140 : f32
    %604 = vector.broadcast %603 : f32 to vector<2x16xf32>
    %605 = arith.subf %598, %604 : vector<2x16xf32>
    %606 = vector.extract_strided_slice %589 {offsets = [0, 32], sizes = [2, 16], strides = [1, 1]} : vector<2x128xf32> to vector<2x16xf32>
    %607 = vector.shape_cast %606 : vector<2x16xf32> to vector<1x2x16xf32>
    %cst_141 = arith.constant dense<0.000000e+00> : vector<1xf32>
    %608 = vector.multi_reduction <add>, %607, %cst_141 [1, 2] : vector<1x2x16xf32> to vector<1xf32>
    %609 = vector.shape_cast %608 : vector<1xf32> to vector<1x1x1xf32>
    %610 = vector.extract %609[0, 0, 0] : f32 from vector<1x1x1xf32>
    %cst_142 = arith.constant 3.125000e-02 : f32
    %611 = arith.mulf %610, %cst_142 : f32
    %612 = vector.broadcast %611 : f32 to vector<2x16xf32>
    %613 = arith.subf %606, %612 : vector<2x16xf32>
    %614 = vector.extract_strided_slice %589 {offsets = [0, 48], sizes = [2, 16], strides = [1, 1]} : vector<2x128xf32> to vector<2x16xf32>
    %615 = vector.shape_cast %614 : vector<2x16xf32> to vector<1x2x16xf32>
    %cst_143 = arith.constant dense<0.000000e+00> : vector<1xf32>
    %616 = vector.multi_reduction <add>, %615, %cst_143 [1, 2] : vector<1x2x16xf32> to vector<1xf32>
    %617 = vector.shape_cast %616 : vector<1xf32> to vector<1x1x1xf32>
    %618 = vector.extract %617[0, 0, 0] : f32 from vector<1x1x1xf32>
    %cst_144 = arith.constant 3.125000e-02 : f32
    %619 = arith.mulf %618, %cst_144 : f32
    %620 = vector.broadcast %619 : f32 to vector<2x16xf32>
    %621 = arith.subf %614, %620 : vector<2x16xf32>
    %622 = vector.extract_strided_slice %589 {offsets = [0, 64], sizes = [2, 16], strides = [1, 1]} : vector<2x128xf32> to vector<2x16xf32>
    %623 = vector.shape_cast %622 : vector<2x16xf32> to vector<1x2x16xf32>
    %cst_145 = arith.constant dense<0.000000e+00> : vector<1xf32>
    %624 = vector.multi_reduction <add>, %623, %cst_145 [1, 2] : vector<1x2x16xf32> to vector<1xf32>
    %625 = vector.shape_cast %624 : vector<1xf32> to vector<1x1x1xf32>
    %626 = vector.extract %625[0, 0, 0] : f32 from vector<1x1x1xf32>
    %cst_146 = arith.constant 3.125000e-02 : f32
    %627 = arith.mulf %626, %cst_146 : f32
    %628 = vector.broadcast %627 : f32 to vector<2x16xf32>
    %629 = arith.subf %622, %628 : vector<2x16xf32>
    %630 = vector.extract_strided_slice %589 {offsets = [0, 80], sizes = [2, 16], strides = [1, 1]} : vector<2x128xf32> to vector<2x16xf32>
    %631 = vector.shape_cast %630 : vector<2x16xf32> to vector<1x2x16xf32>
    %cst_147 = arith.constant dense<0.000000e+00> : vector<1xf32>
    %632 = vector.multi_reduction <add>, %631, %cst_147 [1, 2] : vector<1x2x16xf32> to vector<1xf32>
    %633 = vector.shape_cast %632 : vector<1xf32> to vector<1x1x1xf32>
    %634 = vector.extract %633[0, 0, 0] : f32 from vector<1x1x1xf32>
    %cst_148 = arith.constant 3.125000e-02 : f32
    %635 = arith.mulf %634, %cst_148 : f32
    %636 = vector.broadcast %635 : f32 to vector<2x16xf32>
    %637 = arith.subf %630, %636 : vector<2x16xf32>
    %638 = vector.extract_strided_slice %589 {offsets = [0, 96], sizes = [2, 16], strides = [1, 1]} : vector<2x128xf32> to vector<2x16xf32>
    %639 = vector.shape_cast %638 : vector<2x16xf32> to vector<1x2x16xf32>
    %cst_149 = arith.constant dense<0.000000e+00> : vector<1xf32>
    %640 = vector.multi_reduction <add>, %639, %cst_149 [1, 2] : vector<1x2x16xf32> to vector<1xf32>
    %641 = vector.shape_cast %640 : vector<1xf32> to vector<1x1x1xf32>
    %642 = vector.extract %641[0, 0, 0] : f32 from vector<1x1x1xf32>
    %cst_150 = arith.constant 3.125000e-02 : f32
    %643 = arith.mulf %642, %cst_150 : f32
    %644 = vector.broadcast %643 : f32 to vector<2x16xf32>
    %645 = arith.subf %638, %644 : vector<2x16xf32>
    %646 = vector.extract_strided_slice %589 {offsets = [0, 112], sizes = [2, 16], strides = [1, 1]} : vector<2x128xf32> to vector<2x16xf32>
    %647 = vector.shape_cast %646 : vector<2x16xf32> to vector<1x2x16xf32>
    %cst_151 = arith.constant dense<0.000000e+00> : vector<1xf32>
    %648 = vector.multi_reduction <add>, %647, %cst_151 [1, 2] : vector<1x2x16xf32> to vector<1xf32>
    %649 = vector.shape_cast %648 : vector<1xf32> to vector<1x1x1xf32>
    %650 = vector.extract %649[0, 0, 0] : f32 from vector<1x1x1xf32>
    %cst_152 = arith.constant 3.125000e-02 : f32
    %651 = arith.mulf %650, %cst_152 : f32
    %652 = vector.broadcast %651 : f32 to vector<2x16xf32>
    %653 = arith.subf %646, %652 : vector<2x16xf32>
    %654 = tpu.concatenate %597, %605, %613, %621, %629, %637, %645, %653 in 1 : vector<2x16xf32>, vector<2x16xf32>, vector<2x16xf32>, vector<2x16xf32>, vector<2x16xf32>, vector<2x16xf32>, vector<2x16xf32>, vector<2x16xf32> -> vector<2x128xf32>
    %cst_153 = arith.constant dense<0.000000e+00> : vector<2x128xf32>
    %655 = tpu.matmul %654, %550, %cst_153 {dimension_numbers = #tpu.dot_dimension_numbers<[1], [0], [0], [1], [0, 0, 1, 1], [], []>} : vector<2x128xf32>, vector<128x128xf32>, vector<2x128xf32> -> vector<2x128xf32>
    %656 = vector.broadcast %551 : vector<1x128xf32> to vector<2x128xf32>
    %657 = arith.addf %655, %656 : vector<2x128xf32>
    %cst_154 = arith.constant 0.000000e+00 : f32
    %658 = vector.broadcast %cst_154 : f32 to vector<2x32xf32>
    %659 = tpu.concatenate %658, %547, %658 in 1 : vector<2x32xf32>, vector<2x64xf32>, vector<2x32xf32> -> vector<2x128xf32>
    %660 = arith.addf %657, %659 : vector<2x128xf32>
    %cst_155 = arith.constant 0.000000e+00 : f32
    %661 = vector.broadcast %cst_155 : f32 to vector<2x128xf32>
    %662 = arith.maximumf %660, %661 : vector<2x128xf32>
    %c0_156 = arith.constant 0 : index
    %c0_157 = arith.constant 0 : index
    %663 = vector.load %arg23[%c0_156, %c0_157] : memref<128x128xf32, #tpu.memory_space<vmem>>, vector<128x128xf32>
    %c0_158 = arith.constant 0 : index
    %c0_159 = arith.constant 0 : index
    %664 = vector.load %arg24[%c0_158, %c0_159] : memref<1x128xf32, #tpu.memory_space<vmem>>, vector<1x128xf32>
    %c0_160 = arith.constant 0 : index
    %c0_161 = arith.constant 0 : index
    %665 = vector.load %arg25[%c0_160, %c0_161] : memref<128x128xf32, #tpu.memory_space<vmem>>, vector<128x128xf32>
    %c0_162 = arith.constant 0 : index
    %c0_163 = arith.constant 0 : index
    %666 = vector.load %arg26[%c0_162, %c0_163] : memref<1x128xf32, #tpu.memory_space<vmem>>, vector<1x128xf32>
    %667 = vector.extract_strided_slice %662 {offsets = [0, 0], sizes = [2, 16], strides = [1, 1]} : vector<2x128xf32> to vector<2x16xf32>
    %668 = vector.shape_cast %667 : vector<2x16xf32> to vector<1x2x16xf32>
    %cst_164 = arith.constant dense<0.000000e+00> : vector<1xf32>
    %669 = vector.multi_reduction <add>, %668, %cst_164 [1, 2] : vector<1x2x16xf32> to vector<1xf32>
    %670 = vector.shape_cast %669 : vector<1xf32> to vector<1x1x1xf32>
    %671 = vector.extract %670[0, 0, 0] : f32 from vector<1x1x1xf32>
    %cst_165 = arith.constant 3.125000e-02 : f32
    %672 = arith.mulf %671, %cst_165 : f32
    %673 = vector.broadcast %672 : f32 to vector<2x16xf32>
    %674 = arith.subf %667, %673 : vector<2x16xf32>
    %675 = vector.extract_strided_slice %662 {offsets = [0, 16], sizes = [2, 16], strides = [1, 1]} : vector<2x128xf32> to vector<2x16xf32>
    %676 = vector.shape_cast %675 : vector<2x16xf32> to vector<1x2x16xf32>
    %cst_166 = arith.constant dense<0.000000e+00> : vector<1xf32>
    %677 = vector.multi_reduction <add>, %676, %cst_166 [1, 2] : vector<1x2x16xf32> to vector<1xf32>
    %678 = vector.shape_cast %677 : vector<1xf32> to vector<1x1x1xf32>
    %679 = vector.extract %678[0, 0, 0] : f32 from vector<1x1x1xf32>
    %cst_167 = arith.constant 3.125000e-02 : f32
    %680 = arith.mulf %679, %cst_167 : f32
    %681 = vector.broadcast %680 : f32 to vector<2x16xf32>
    %682 = arith.subf %675, %681 : vector<2x16xf32>
    %683 = vector.extract_strided_slice %662 {offsets = [0, 32], sizes = [2, 16], strides = [1, 1]} : vector<2x128xf32> to vector<2x16xf32>
    %684 = vector.shape_cast %683 : vector<2x16xf32> to vector<1x2x16xf32>
    %cst_168 = arith.constant dense<0.000000e+00> : vector<1xf32>
    %685 = vector.multi_reduction <add>, %684, %cst_168 [1, 2] : vector<1x2x16xf32> to vector<1xf32>
    %686 = vector.shape_cast %685 : vector<1xf32> to vector<1x1x1xf32>
    %687 = vector.extract %686[0, 0, 0] : f32 from vector<1x1x1xf32>
    %cst_169 = arith.constant 3.125000e-02 : f32
    %688 = arith.mulf %687, %cst_169 : f32
    %689 = vector.broadcast %688 : f32 to vector<2x16xf32>
    %690 = arith.subf %683, %689 : vector<2x16xf32>
    %691 = vector.extract_strided_slice %662 {offsets = [0, 48], sizes = [2, 16], strides = [1, 1]} : vector<2x128xf32> to vector<2x16xf32>
    %692 = vector.shape_cast %691 : vector<2x16xf32> to vector<1x2x16xf32>
    %cst_170 = arith.constant dense<0.000000e+00> : vector<1xf32>
    %693 = vector.multi_reduction <add>, %692, %cst_170 [1, 2] : vector<1x2x16xf32> to vector<1xf32>
    %694 = vector.shape_cast %693 : vector<1xf32> to vector<1x1x1xf32>
    %695 = vector.extract %694[0, 0, 0] : f32 from vector<1x1x1xf32>
    %cst_171 = arith.constant 3.125000e-02 : f32
    %696 = arith.mulf %695, %cst_171 : f32
    %697 = vector.broadcast %696 : f32 to vector<2x16xf32>
    %698 = arith.subf %691, %697 : vector<2x16xf32>
    %699 = vector.extract_strided_slice %662 {offsets = [0, 64], sizes = [2, 16], strides = [1, 1]} : vector<2x128xf32> to vector<2x16xf32>
    %700 = vector.shape_cast %699 : vector<2x16xf32> to vector<1x2x16xf32>
    %cst_172 = arith.constant dense<0.000000e+00> : vector<1xf32>
    %701 = vector.multi_reduction <add>, %700, %cst_172 [1, 2] : vector<1x2x16xf32> to vector<1xf32>
    %702 = vector.shape_cast %701 : vector<1xf32> to vector<1x1x1xf32>
    %703 = vector.extract %702[0, 0, 0] : f32 from vector<1x1x1xf32>
    %cst_173 = arith.constant 3.125000e-02 : f32
    %704 = arith.mulf %703, %cst_173 : f32
    %705 = vector.broadcast %704 : f32 to vector<2x16xf32>
    %706 = arith.subf %699, %705 : vector<2x16xf32>
    %707 = vector.extract_strided_slice %662 {offsets = [0, 80], sizes = [2, 16], strides = [1, 1]} : vector<2x128xf32> to vector<2x16xf32>
    %708 = vector.shape_cast %707 : vector<2x16xf32> to vector<1x2x16xf32>
    %cst_174 = arith.constant dense<0.000000e+00> : vector<1xf32>
    %709 = vector.multi_reduction <add>, %708, %cst_174 [1, 2] : vector<1x2x16xf32> to vector<1xf32>
    %710 = vector.shape_cast %709 : vector<1xf32> to vector<1x1x1xf32>
    %711 = vector.extract %710[0, 0, 0] : f32 from vector<1x1x1xf32>
    %cst_175 = arith.constant 3.125000e-02 : f32
    %712 = arith.mulf %711, %cst_175 : f32
    %713 = vector.broadcast %712 : f32 to vector<2x16xf32>
    %714 = arith.subf %707, %713 : vector<2x16xf32>
    %715 = vector.extract_strided_slice %662 {offsets = [0, 96], sizes = [2, 16], strides = [1, 1]} : vector<2x128xf32> to vector<2x16xf32>
    %716 = vector.shape_cast %715 : vector<2x16xf32> to vector<1x2x16xf32>
    %cst_176 = arith.constant dense<0.000000e+00> : vector<1xf32>
    %717 = vector.multi_reduction <add>, %716, %cst_176 [1, 2] : vector<1x2x16xf32> to vector<1xf32>
    %718 = vector.shape_cast %717 : vector<1xf32> to vector<1x1x1xf32>
    %719 = vector.extract %718[0, 0, 0] : f32 from vector<1x1x1xf32>
    %cst_177 = arith.constant 3.125000e-02 : f32
    %720 = arith.mulf %719, %cst_177 : f32
    %721 = vector.broadcast %720 : f32 to vector<2x16xf32>
    %722 = arith.subf %715, %721 : vector<2x16xf32>
    %723 = vector.extract_strided_slice %662 {offsets = [0, 112], sizes = [2, 16], strides = [1, 1]} : vector<2x128xf32> to vector<2x16xf32>
    %724 = vector.shape_cast %723 : vector<2x16xf32> to vector<1x2x16xf32>
    %cst_178 = arith.constant dense<0.000000e+00> : vector<1xf32>
    %725 = vector.multi_reduction <add>, %724, %cst_178 [1, 2] : vector<1x2x16xf32> to vector<1xf32>
    %726 = vector.shape_cast %725 : vector<1xf32> to vector<1x1x1xf32>
    %727 = vector.extract %726[0, 0, 0] : f32 from vector<1x1x1xf32>
    %cst_179 = arith.constant 3.125000e-02 : f32
    %728 = arith.mulf %727, %cst_179 : f32
    %729 = vector.broadcast %728 : f32 to vector<2x16xf32>
    %730 = arith.subf %723, %729 : vector<2x16xf32>
    %731 = tpu.concatenate %674, %682, %690, %698, %706, %714, %722, %730 in 1 : vector<2x16xf32>, vector<2x16xf32>, vector<2x16xf32>, vector<2x16xf32>, vector<2x16xf32>, vector<2x16xf32>, vector<2x16xf32>, vector<2x16xf32> -> vector<2x128xf32>
    %cst_180 = arith.constant dense<0.000000e+00> : vector<2x128xf32>
    %732 = tpu.matmul %731, %663, %cst_180 {dimension_numbers = #tpu.dot_dimension_numbers<[1], [0], [0], [1], [0, 0, 1, 1], [], []>} : vector<2x128xf32>, vector<128x128xf32>, vector<2x128xf32> -> vector<2x128xf32>
    %733 = vector.broadcast %664 : vector<1x128xf32> to vector<2x128xf32>
    %734 = arith.addf %732, %733 : vector<2x128xf32>
    %cst_181 = arith.constant 0.000000e+00 : f32
    %735 = vector.broadcast %cst_181 : f32 to vector<2x128xf32>
    %736 = arith.maximumf %734, %735 : vector<2x128xf32>
    %737 = vector.extract_strided_slice %736 {offsets = [0, 0], sizes = [2, 16], strides = [1, 1]} : vector<2x128xf32> to vector<2x16xf32>
    %738 = vector.shape_cast %737 : vector<2x16xf32> to vector<1x2x16xf32>
    %cst_182 = arith.constant dense<0.000000e+00> : vector<1xf32>
    %739 = vector.multi_reduction <add>, %738, %cst_182 [1, 2] : vector<1x2x16xf32> to vector<1xf32>
    %740 = vector.shape_cast %739 : vector<1xf32> to vector<1x1x1xf32>
    %741 = vector.extract %740[0, 0, 0] : f32 from vector<1x1x1xf32>
    %cst_183 = arith.constant 3.125000e-02 : f32
    %742 = arith.mulf %741, %cst_183 : f32
    %743 = vector.broadcast %742 : f32 to vector<2x16xf32>
    %744 = arith.subf %737, %743 : vector<2x16xf32>
    %745 = vector.extract_strided_slice %736 {offsets = [0, 16], sizes = [2, 16], strides = [1, 1]} : vector<2x128xf32> to vector<2x16xf32>
    %746 = vector.shape_cast %745 : vector<2x16xf32> to vector<1x2x16xf32>
    %cst_184 = arith.constant dense<0.000000e+00> : vector<1xf32>
    %747 = vector.multi_reduction <add>, %746, %cst_184 [1, 2] : vector<1x2x16xf32> to vector<1xf32>
    %748 = vector.shape_cast %747 : vector<1xf32> to vector<1x1x1xf32>
    %749 = vector.extract %748[0, 0, 0] : f32 from vector<1x1x1xf32>
    %cst_185 = arith.constant 3.125000e-02 : f32
    %750 = arith.mulf %749, %cst_185 : f32
    %751 = vector.broadcast %750 : f32 to vector<2x16xf32>
    %752 = arith.subf %745, %751 : vector<2x16xf32>
    %753 = vector.extract_strided_slice %736 {offsets = [0, 32], sizes = [2, 16], strides = [1, 1]} : vector<2x128xf32> to vector<2x16xf32>
    %754 = vector.shape_cast %753 : vector<2x16xf32> to vector<1x2x16xf32>
    %cst_186 = arith.constant dense<0.000000e+00> : vector<1xf32>
    %755 = vector.multi_reduction <add>, %754, %cst_186 [1, 2] : vector<1x2x16xf32> to vector<1xf32>
    %756 = vector.shape_cast %755 : vector<1xf32> to vector<1x1x1xf32>
    %757 = vector.extract %756[0, 0, 0] : f32 from vector<1x1x1xf32>
    %cst_187 = arith.constant 3.125000e-02 : f32
    %758 = arith.mulf %757, %cst_187 : f32
    %759 = vector.broadcast %758 : f32 to vector<2x16xf32>
    %760 = arith.subf %753, %759 : vector<2x16xf32>
    %761 = vector.extract_strided_slice %736 {offsets = [0, 48], sizes = [2, 16], strides = [1, 1]} : vector<2x128xf32> to vector<2x16xf32>
    %762 = vector.shape_cast %761 : vector<2x16xf32> to vector<1x2x16xf32>
    %cst_188 = arith.constant dense<0.000000e+00> : vector<1xf32>
    %763 = vector.multi_reduction <add>, %762, %cst_188 [1, 2] : vector<1x2x16xf32> to vector<1xf32>
    %764 = vector.shape_cast %763 : vector<1xf32> to vector<1x1x1xf32>
    %765 = vector.extract %764[0, 0, 0] : f32 from vector<1x1x1xf32>
    %cst_189 = arith.constant 3.125000e-02 : f32
    %766 = arith.mulf %765, %cst_189 : f32
    %767 = vector.broadcast %766 : f32 to vector<2x16xf32>
    %768 = arith.subf %761, %767 : vector<2x16xf32>
    %769 = vector.extract_strided_slice %736 {offsets = [0, 64], sizes = [2, 16], strides = [1, 1]} : vector<2x128xf32> to vector<2x16xf32>
    %770 = vector.shape_cast %769 : vector<2x16xf32> to vector<1x2x16xf32>
    %cst_190 = arith.constant dense<0.000000e+00> : vector<1xf32>
    %771 = vector.multi_reduction <add>, %770, %cst_190 [1, 2] : vector<1x2x16xf32> to vector<1xf32>
    %772 = vector.shape_cast %771 : vector<1xf32> to vector<1x1x1xf32>
    %773 = vector.extract %772[0, 0, 0] : f32 from vector<1x1x1xf32>
    %cst_191 = arith.constant 3.125000e-02 : f32
    %774 = arith.mulf %773, %cst_191 : f32
    %775 = vector.broadcast %774 : f32 to vector<2x16xf32>
    %776 = arith.subf %769, %775 : vector<2x16xf32>
    %777 = vector.extract_strided_slice %736 {offsets = [0, 80], sizes = [2, 16], strides = [1, 1]} : vector<2x128xf32> to vector<2x16xf32>
    %778 = vector.shape_cast %777 : vector<2x16xf32> to vector<1x2x16xf32>
    %cst_192 = arith.constant dense<0.000000e+00> : vector<1xf32>
    %779 = vector.multi_reduction <add>, %778, %cst_192 [1, 2] : vector<1x2x16xf32> to vector<1xf32>
    %780 = vector.shape_cast %779 : vector<1xf32> to vector<1x1x1xf32>
    %781 = vector.extract %780[0, 0, 0] : f32 from vector<1x1x1xf32>
    %cst_193 = arith.constant 3.125000e-02 : f32
    %782 = arith.mulf %781, %cst_193 : f32
    %783 = vector.broadcast %782 : f32 to vector<2x16xf32>
    %784 = arith.subf %777, %783 : vector<2x16xf32>
    %785 = vector.extract_strided_slice %736 {offsets = [0, 96], sizes = [2, 16], strides = [1, 1]} : vector<2x128xf32> to vector<2x16xf32>
    %786 = vector.shape_cast %785 : vector<2x16xf32> to vector<1x2x16xf32>
    %cst_194 = arith.constant dense<0.000000e+00> : vector<1xf32>
    %787 = vector.multi_reduction <add>, %786, %cst_194 [1, 2] : vector<1x2x16xf32> to vector<1xf32>
    %788 = vector.shape_cast %787 : vector<1xf32> to vector<1x1x1xf32>
    %789 = vector.extract %788[0, 0, 0] : f32 from vector<1x1x1xf32>
    %cst_195 = arith.constant 3.125000e-02 : f32
    %790 = arith.mulf %789, %cst_195 : f32
    %791 = vector.broadcast %790 : f32 to vector<2x16xf32>
    %792 = arith.subf %785, %791 : vector<2x16xf32>
    %793 = vector.extract_strided_slice %736 {offsets = [0, 112], sizes = [2, 16], strides = [1, 1]} : vector<2x128xf32> to vector<2x16xf32>
    %794 = vector.shape_cast %793 : vector<2x16xf32> to vector<1x2x16xf32>
    %cst_196 = arith.constant dense<0.000000e+00> : vector<1xf32>
    %795 = vector.multi_reduction <add>, %794, %cst_196 [1, 2] : vector<1x2x16xf32> to vector<1xf32>
    %796 = vector.shape_cast %795 : vector<1xf32> to vector<1x1x1xf32>
    %797 = vector.extract %796[0, 0, 0] : f32 from vector<1x1x1xf32>
    %cst_197 = arith.constant 3.125000e-02 : f32
    %798 = arith.mulf %797, %cst_197 : f32
    %799 = vector.broadcast %798 : f32 to vector<2x16xf32>
    %800 = arith.subf %793, %799 : vector<2x16xf32>
    %801 = tpu.concatenate %744, %752, %760, %768, %776, %784, %792, %800 in 1 : vector<2x16xf32>, vector<2x16xf32>, vector<2x16xf32>, vector<2x16xf32>, vector<2x16xf32>, vector<2x16xf32>, vector<2x16xf32>, vector<2x16xf32> -> vector<2x128xf32>
    %cst_198 = arith.constant dense<0.000000e+00> : vector<2x128xf32>
    %802 = tpu.matmul %801, %665, %cst_198 {dimension_numbers = #tpu.dot_dimension_numbers<[1], [0], [0], [1], [0, 0, 1, 1], [], []>} : vector<2x128xf32>, vector<128x128xf32>, vector<2x128xf32> -> vector<2x128xf32>
    %803 = vector.broadcast %666 : vector<1x128xf32> to vector<2x128xf32>
    %804 = arith.addf %802, %803 : vector<2x128xf32>
    %805 = arith.addf %804, %662 : vector<2x128xf32>
    %cst_199 = arith.constant 0.000000e+00 : f32
    %806 = vector.broadcast %cst_199 : f32 to vector<2x128xf32>
    %807 = arith.maximumf %805, %806 : vector<2x128xf32>
    %c0_200 = arith.constant 0 : index
    %c0_201 = arith.constant 0 : index
    %808 = vector.load %arg27[%c0_200, %c0_201] : memref<128x10xf32, #tpu.memory_space<vmem>>, vector<128x10xf32>
    %cst_202 = arith.constant dense<0.000000e+00> : vector<2x10xf32>
    %809 = tpu.matmul %807, %808, %cst_202 {dimension_numbers = #tpu.dot_dimension_numbers<[1], [0], [0], [1], [0, 0, 1, 1], [], []>} : vector<2x128xf32>, vector<128x10xf32>, vector<2x10xf32> -> vector<2x10xf32>
    %c0_203 = arith.constant 0 : index
    %c0_204 = arith.constant 0 : index
    %810 = vector.load %arg28[%c0_203, %c0_204] : memref<1x10xf32, #tpu.memory_space<vmem>>, vector<1x10xf32>
    %811 = vector.broadcast %810 : vector<1x10xf32> to vector<2x10xf32>
    %812 = arith.addf %809, %811 : vector<2x10xf32>
    %c0_205 = arith.constant 0 : index
    %c0_206 = arith.constant 0 : index
    %813 = vector.load %arg29[%c0_205, %c0_206] : memref<2x10xf32, #tpu.memory_space<vmem>>, vector<2x10xf32>
    tpu.vector_store %arg29[%c0_205, %c0_206], %812 {strides = array<i32>} : memref<2x10xf32, #tpu.memory_space<vmem>>, vector<2x10xf32>,
    return
  }
}

</mosaic_0001>

<bundles_post_ra>
// kernel: _lambda_.1
= control target key start
LH: loop header
LB: loop body
LE: loop exit
PB: predicated region body
PF: predicated region fallthrough
CT: control target
= control target key end

     0   :  { %s9563_s6 = smov 1   ;;  %s9564_s10 = smov 2   ;;  %s13551_s0 = inlined_call_operand.smem [shape: u32[30], index: -1, kind: input, shape index: {}] }
   0x1   :  { %s9637_s5 = sld [smem:[%s13551_s0]]   ;;  %s9565_s14 = smov 3  }
   0x2   :  { %s9642_s9 = sld [smem:[%s13551_s0 + %s9563_s6]]   ;;  %s9566_s18 = smov 4  }
   0x3   :  { %s9647_s13 = sld [smem:[%s13551_s0 + %s9564_s10]]   ;;  %s9567_s22 = smov 5  }
   0x4   :  { %s9652_s17 = sld [smem:[%s13551_s0 + %s9565_s14]]   ;;  %s9568_s26 = smov 6  }
   0x5   :  { %s9657_s21 = sld [smem:[%s13551_s0 + %s9566_s18]]   ;;  %s9569_s30 = smov 7  }
   0x6   :  { %s9662_s25 = sld [smem:[%s13551_s0 + %s9567_s22]]   ;;  %s9570_s4 = smov 8  }
   0x7   :  { %14054 = sst [smem:[#allocation38_spill]] %s9637_s5  ;;  %s9571_s10 = smov 9  }
   0x8   :  { %s9667_s29 = sld [smem:[%s13551_s0 + %s9568_s26]]   ;;  %s9572_s15 = smov 10  }
   0x9   :  { %s9672_s3 = sld [smem:[%s13551_s0 + %s9569_s30]]   ;;  %s9573_s20 = smov 11  }
   0xa   :  { %14055 = sst [smem:[#allocation39_spill]] %s9652_s17  ;;  %s9574_s26 = smov 12  }
   0xb   :  { %s9677_s8 = sld [smem:[%s13551_s0 + %s9570_s4]]   ;;  %s9575_s1 = smov 13  }
   0xc   :  { %14056 = sst [smem:[#allocation40_spill]] %s9662_s25  ;;  %s9576_s7 = smov 14  }
   0xd   :  { %s9682_s14 = sld [smem:[%s13551_s0 + %s9571_s10]]   ;;  %s9578_s22 = smov 16  }
   0xe   :  { %s9687_s19 = sld [smem:[%s13551_s0 + %s9572_s15]]   ;;  %s9577_s15 = smov 15  }
   0xf   :  { %s9692_s24 = sld [smem:[%s13551_s0 + %s9573_s20]]   ;;  %s9579_s28 = smov 17  }
  0x10   :  { %s9697_s30 = sld [smem:[%s13551_s0 + %s9574_s26]]  }
  0x11   :  { %14057 = sst [smem:[#allocation41_spill]] %s9677_s8 }
  0x12   :  { %s9702_s6 = sld [smem:[%s13551_s0 + %s9575_s1]]  }
  0x13   :  { %s9707_s12 = sld [smem:[%s13551_s0 + %s9576_s7]]   ;;  %s9580_s7 = smov 18  }
  0x14   :  { %14058 = sst [smem:[#allocation42_spill]] %s9687_s19 }
  0x15   :  { %s9712_s20 = sld [smem:[%s13551_s0 + %s9577_s15]]   ;;  %s9581_s15 = smov 19  }
  0x16   :  { %14059 = sst [smem:[#allocation43_spill]] %s9697_s30 }
  0x17   :  { %s9717_s27 = sld [smem:[%s13551_s0 + %s9578_s22]]   ;;  %s9582_s22 = smov 20  }
  0x18   :  { %s9722_s4 = sld [smem:[%s13551_s0 + %s9579_s28]]   ;;  %s9583_s28 = smov 21  }
  0x19   :  { %14060 = sst [smem:[#allocation44_spill]] %s9707_s12 }
  0x1a   :  { %s9727_s12 = sld [smem:[%s13551_s0 + %s9580_s7]]   ;;  %s9584_s7 = smov 22  }
  0x1b   :  { %s9732_s30 = sld [smem:[%s13551_s0 + %s9581_s15]]   ;;  %s9585_s15 = smov 23  }
  0x1c   :  { %s9742_s19 = sld [smem:[%s13551_s0 + %s9583_s28]]   ;;  %s9587_s28 = smov 25  }
  0x1d   :  { %14061 = sst [smem:[#allocation45_spill]] %s9717_s27 }
  0x1e   :  { %s9737_s27 = sld [smem:[%s13551_s0 + %s9582_s22]]   ;;  %s9586_s22 = smov 24  }
  0x1f   :  { %s9752_s25 = sld [smem:[%s13551_s0 + %s9585_s15]]   ;;  %s9589_s15 = smov 27  }
  0x20   :  { %14062 = sst [smem:[#allocation46_spill]] %s9727_s12 }
  0x21   :  { %s9747_s12 = sld [smem:[%s13551_s0 + %s9584_s7]]   ;;  %s9588_s7 = smov 26  }
  0x22   :  { %s9762_s8 = sld [smem:[%s13551_s0 + %s9587_s28]]   ;;  %s9591_s28 = smov 29  }
  0x23   :  { %s9772_s17 = sld [smem:[%s13551_s0 + %s9589_s15]]  }
  0x24   :  { %14063 = sst [smem:[#allocation47_spill]] %s9737_s27 }
  0x25   :  { %s9757_s27 = sld [smem:[%s13551_s0 + %s9586_s22]]   ;;  %s9590_s22 = smov 28  }
  0x26   :  { %s9782_s5 = sld [smem:[%s13551_s0 + %s9591_s28]]  }
  0x27   :  { %14064 = sst [smem:[#allocation48_spill]] %s9747_s12 }
  0x28   :  { %s9767_s12 = sld [smem:[%s13551_s0 + %s9588_s7]]  }
  0x2b   :  { %14065 = sst [smem:[#allocation49_spill]] %s9757_s27 }
  0x2c   :  { %s9777_s27 = sld [smem:[%s13551_s0 + %s9590_s22]]  }
  0x2d   :  { %14066 = sst [smem:[#allocation50_spill]] %s9782_s5 }
  0x2e   :  { %64 = vsyncpa [#allocation5], 0 }
  0x2f   :  { %65 = vsyncpa [#allocation7], 0 }
  0x30   :  { %66 = vsyncpa [#allocation3], 0 }
  0x31   :  { %67 = vsyncpa [#allocation10], 0 }
  0x32   :  { %68 = vsyncpa [#allocation13], 0 }
  0x33   :  { %69 = vsyncpa [#allocation16], 0 }
  0x34   :  { %70 = vsyncpa [#allocation19], 0 }
  0x35   :  { %71 = vsyncpa [#allocation22], 0 }
  0x36   :  { %72 = vsyncpa [#allocation25], 0 }
  0x37   :  { %73 = vsyncpa [#allocation4], 0  ;;  %s9592_s7 = smov [#allocation9]   ;;  %s9211_s11 = scalar_lea.hbm %s9667_s29, 1024 }
  0x38   :  { %s117_s10 = sshll.u32 %s9592_s7, 4  ;;  %p9212_p0 = scmp.ne.s32.totalorder %s9667_s29, %s9211_s11  ;;  %s118_s10 = int_to_ptr.vmem [resolvable:$true] %s117_s10 }
  0x39   :  { %p9215_p1 = scmp.lt.u32.totalorder %s9211_s11, %s9667_s29 }
  0x3b   :  { %p9217_p2 = pnand %p9215_p1, %p9212_p0 }
  0x3d   :  { %9220 = shalt.err (!%p9217_p2)
}
  0x3e   :  { %s9221_s0 = scalar_lea.vmem %s118_s10, 1024  ;;  %p9226_p4 = scmp.lt.s32.totalorder %s118_s10, %s118_s10 }
  0x3f   :  { %p9222_p3 = scmp.ne.s32.totalorder %s118_s10, %s9221_s0  ;;  %p9227_p5 = scmp.lt.s32.totalorder %s9221_s0, %s9221_s0 }
  0x41   :  { %p9228_p6 = por %p9227_p5, %p9226_p4 }
  0x43   :  { %p9229_p7 = pnand %p9228_p6, %p9222_p3 }
  0x45   :  { %9232 = shalt.err (!%p9229_p7)
}
  0x46   :  { %s9593_s15 = smov 128   ;;  %s9594_s16 = smov 8  }
  0x47   :  { %123 = dma.hbm_to_vmem [thread:$0]  %s9667_s29, 1024, %s118_s10, [#allocation10], %s9593_s15, %s9593_s15, %s9594_s16  }
  0x48   :  { %s9595_s18 = smov [#allocation12]   ;;  %s9233_s23 = scalar_lea.hbm %s9682_s14, 32768 }
  0x49   :  { %s143_s22 = sshll.u32 %s9595_s18, 4  ;;  %p9234_p8 = scmp.ne.s32.totalorder %s9682_s14, %s9233_s23  ;;  %s144_s22 = int_to_ptr.vmem [resolvable:$true] %s143_s22 }
  0x4a   :  { %p9237_p9 = scmp.lt.u32.totalorder %s9233_s23, %s9682_s14 }
  0x4c   :  { %p9239_p10 = pnand %p9237_p9, %p9234_p8 }
  0x4e   :  { %9242 = shalt.err (!%p9239_p10)
}
  0x4f   :  { %s9243_s26 = scalar_lea.vmem %s144_s22, 32768  ;;  %p9248_p12 = scmp.lt.s32.totalorder %s144_s22, %s144_s22 }
  0x50   :  { %p9244_p11 = scmp.ne.s32.totalorder %s144_s22, %s9243_s26  ;;  %p9249_p13 = scmp.lt.s32.totalorder %s9243_s26, %s9243_s26 }
  0x52   :  { %p9250_p0 = por %p9249_p13, %p9248_p12 }
  0x54   :  { %p9251_p1 = pnand %p9250_p0, %p9244_p11 }
  0x56   :  { %9254 = shalt.err (!%p9251_p1)
}
  0x57   :  { %s9596_s28 = smov 512   ;;  %s13597_s29 = smov 32  }
  0x58   :  { %149 = dma.hbm_to_vmem [thread:$0]  %s9682_s14, 32768, %s144_s22, [#allocation13], %s9596_s28, %s9596_s28, %s13597_s29  }
  0x59   :  { %s9598_s1 = smov [#allocation15]   ;;  %s9599_s7 = smov [#allocation18]  }
  0x5a   :  { %s171_s2 = sshll.u32 %s9598_s1, 4  ;;  %s199_s10 = sshll.u32 %s9599_s7, 4  ;;  %s172_s2 = int_to_ptr.vmem [resolvable:$true] %s171_s2  ;;  %s9798_s10 = int_to_ptr.vmem [resolvable:$true] %s199_s10 }
  0x5b   :  { %s9255_s11 = scalar_lea.hbm %s9702_s6, 8192 }
  0x5c   :  { %p9256_p2 = scmp.ne.s32.totalorder %s9702_s6, %s9255_s11  ;;  %p9259_p3 = scmp.lt.u32.totalorder %s9255_s11, %s9702_s6 }
  0x5e   :  { %p9261_p4 = pnand %p9259_p3, %p9256_p2 }
  0x60   :  { %9264 = shalt.err (!%p9261_p4)
}
  0x61   :  { %s9265_s0 = scalar_lea.vmem %s172_s2, 8192  ;;  %p9270_p6 = scmp.lt.s32.totalorder %s172_s2, %s172_s2 }
  0x62   :  { %p9266_p5 = scmp.ne.s32.totalorder %s172_s2, %s9265_s0  ;;  %p9271_p7 = scmp.lt.s32.totalorder %s9265_s0, %s9265_s0 }
  0x64   :  { %p9272_p8 = por %p9271_p7, %p9270_p6 }
  0x66   :  { %p9273_p9 = pnand %p9272_p8, %p9266_p5 }
  0x68   :  { %9276 = shalt.err (!%p9273_p9)
}
  0x69   :  { %s9600_s14 = smov 256   ;;  %s13555_s18 = smov 16  }
  0x6a   :  { %177 = dma.hbm_to_vmem [thread:$0]  %s9702_s6, 8192, %s172_s2, [#allocation16], %s9600_s14, %s9600_s14, %s13555_s18  }
  0x6b   :  { %s9277_s22 = scalar_lea.hbm %s9722_s4, 8192 }
  0x6c   :  { %p9278_p10 = scmp.ne.s32.totalorder %s9722_s4, %s9277_s22  ;;  %p9281_p11 = scmp.lt.u32.totalorder %s9277_s22, %s9722_s4 }
  0x6e   :  { %p9283_p12 = pnand %p9281_p11, %p9278_p10 }
  0x70   :  { %9286 = shalt.err (!%p9283_p12)
}
  0x71   :  { %s9287_s23 = scalar_lea.vmem %s9798_s10, 8192  ;;  %p9292_p0 = scmp.lt.s32.totalorder %s9798_s10, %s9798_s10 }
  0x72   :  { %p9288_p13 = scmp.ne.s32.totalorder %s9798_s10, %s9287_s23  ;;  %p9293_p1 = scmp.lt.s32.totalorder %s9287_s23, %s9287_s23 }
  0x74   :  { %p9294_p2 = por %p9293_p1, %p9292_p0 }
  0x76   :  { %p9295_p3 = pnand %p9294_p2, %p9288_p13 }
  0x78   :  { %9298 = shalt.err (!%p9295_p3)
}
  0x79   :  { %205 = dma.hbm_to_vmem [thread:$0]  %s9722_s4, 8192, %s9798_s10, [#allocation19], %s9600_s14, %s9600_s14, %s13555_s18  }
  0x7a   :  { %s9602_s6 = smov [#allocation21]   ;;  %s9603_s1 = smov [#allocation24]  }
  0x7b   :  { %s227_s26 = sshll.u32 %s9602_s6, 4  ;;  %s255_s2 = sshll.u32 %s9603_s1, 4  ;;  %s228_s26 = int_to_ptr.vmem [resolvable:$true] %s227_s26  ;;  %s9819_s2 = int_to_ptr.vmem [resolvable:$true] %s255_s2 }
  0x7c   :  { %s9299_s7 = scalar_lea.hbm %s9742_s19, 2048 }
  0x7d   :  { %p9300_p4 = scmp.ne.s32.totalorder %s9742_s19, %s9299_s7  ;;  %p9303_p5 = scmp.lt.u32.totalorder %s9299_s7, %s9742_s19 }
  0x7f   :  { %p9305_p6 = pnand %p9303_p5, %p9300_p4 }
  0x81   :  { %9308 = shalt.err (!%p9305_p6)
}
  0x82   :  { %s9309_s11 = scalar_lea.vmem %s228_s26, 2048  ;;  %p9314_p8 = scmp.lt.s32.totalorder %s228_s26, %s228_s26 }
  0x83   :  { %p9310_p7 = scmp.ne.s32.totalorder %s228_s26, %s9309_s11  ;;  %p9315_p9 = scmp.lt.s32.totalorder %s9309_s11, %s9309_s11 }
  0x85   :  { %p9316_p10 = por %p9315_p9, %p9314_p8 }
  0x87   :  { %p9317_p11 = pnand %p9316_p10, %p9310_p7 }
  0x89   :  { %9320 = shalt.err (!%p9317_p11)
}
  0x8a   :  { %233 = dma.hbm_to_vmem [thread:$0]  %s9742_s19, 2048, %s228_s26, [#allocation22], %s9593_s15, %s9593_s15, %s9594_s16  }
  0x8b   :  { %s9321_s4 = scalar_lea.hbm %s9762_s8, 2048 }
  0x8c   :  { %p9322_p12 = scmp.ne.s32.totalorder %s9762_s8, %s9321_s4  ;;  %p9325_p13 = scmp.lt.u32.totalorder %s9321_s4, %s9762_s8 }
  0x8e   :  { %p9327_p0 = pnand %p9325_p13, %p9322_p12 }
  0x90   :  { %9330 = shalt.err (!%p9327_p0)
}
  0x91   :  { %s9331_s10 = scalar_lea.vmem %s9819_s2, 2048  ;;  %p9336_p2 = scmp.lt.s32.totalorder %s9819_s2, %s9819_s2 }
  0x92   :  { %p9332_p1 = scmp.ne.s32.totalorder %s9819_s2, %s9331_s10  ;;  %p9337_p3 = scmp.lt.s32.totalorder %s9331_s10, %s9331_s10 }
  0x94   :  { %p9338_p4 = por %p9337_p3, %p9336_p2 }
  0x96   :  { %p9339_p5 = pnand %p9338_p4, %p9332_p1 }
  0x98   :  { %9342 = shalt.err (!%p9339_p5)
}
  0x99   :  { %261 = dma.hbm_to_vmem [thread:$0]  %s9762_s8, 2048, %s9819_s2, [#allocation25], %s9593_s15, %s9593_s15, %s9594_s16  }
  0x9a   :  { %s82_s19 = sshll.u32 %s9642_s9, 4  ;;  %s92_s0 = sshll.u32 %s9647_s13, 4  ;;  %s83_s19 = int_to_ptr.vmem [resolvable:$true] %s82_s19  ;;  %s93_s0 = int_to_ptr.vmem [resolvable:$true] %s92_s0 }
  0x9b   :  { %s9343_s22 = scalar_lea.vmem %s83_s19, 16  ;;  %p9348_p7 = scmp.lt.s32.totalorder %s83_s19, %s83_s19 }
  0x9c   :  { %p9344_p6 = scmp.ne.s32.totalorder %s83_s19, %s9343_s22  ;;  %p9349_p8 = scmp.lt.s32.totalorder %s9343_s22, %s9343_s22 }
  0x9e   :  { %p9350_p9 = por %p9349_p8, %p9348_p7 }
  0xa0   :  { %p9351_p10 = pnand %p9350_p9, %p9344_p6 }
  0xa2   :  { %9354 = shalt.err (!%p9351_p10)
}
  0xa3   :  { %s9604_s23 = smov [#allocation2]   ;;  %s9355_s6 = scalar_lea.vmem %s93_s0, 16 }
  0xa4   :  { %85 = dma.vmem_to_smem %s83_s19, 16, %s9604_s23, [#allocation5]  }
  0xa5   :  { %p9356_p11 = scmp.ne.s32.totalorder %s93_s0, %s9355_s6  ;;  %p9360_p12 = scmp.lt.s32.totalorder %s93_s0, %s93_s0 }
  0xa6   :  { %p9361_p13 = scmp.lt.s32.totalorder %s9355_s6, %s9355_s6 }
  0xa8   :  { %p9362_p0 = por %p9361_p13, %p9360_p12 }
  0xaa   :  { %p9363_p1 = pnand %p9362_p0, %p9356_p11 }
  0xac   :  { %9366 = shalt.err (!%p9363_p1)
}
  0xad   :  { %s9605_s9 = smov [#allocation6]   ;;  %s9606_s13 = smov [#allocation8]  }
  0xae   :  { %95 = dma.vmem_to_smem %s93_s0, 16, %s9605_s9, [#allocation7]  }
  0xaf   :  { %s103_s8 = sshll.u32 %s9606_s13, 4  ;;  %s9607_s26 = smov [#allocation11]   ;;  %s104_s8 = int_to_ptr.vmem [resolvable:$true] %s103_s8 }
  0xb0   :  { %s129_s1 = sshll.u32 %s9607_s26, 4  ;;  %s9367_s2 = scalar_lea.hbm %s9657_s21, 32768  ;;  %s9842_s1 = int_to_ptr.vmem [resolvable:$true] %s129_s1 }
  0xb1   :  { %p9368_p2 = scmp.ne.s32.totalorder %s9657_s21, %s9367_s2  ;;  %p9371_p3 = scmp.lt.u32.totalorder %s9367_s2, %s9657_s21 }
  0xb3   :  { %p9373_p4 = pnand %p9371_p3, %p9368_p2 }
  0xb5   :  { %9376 = shalt.err (!%p9373_p4)
}
  0xb6   :  { %s9377_s7 = scalar_lea.vmem %s104_s8, 32768  ;;  %p9382_p6 = scmp.lt.s32.totalorder %s104_s8, %s104_s8 }
  0xb7   :  { %p9378_p5 = scmp.ne.s32.totalorder %s104_s8, %s9377_s7  ;;  %p9383_p7 = scmp.lt.s32.totalorder %s9377_s7, %s9377_s7 }
  0xb9   :  { %p9384_p8 = por %p9383_p7, %p9382_p6 }
  0xbb   :  { %p9385_p9 = pnand %p9384_p8, %p9378_p5 }
  0xbd   :  { %9388 = shalt.err (!%p9385_p9)
}
  0xbe   :  { %109 = dma.hbm_to_vmem [thread:$0]  %s9657_s21, 32768, %s104_s8, [#allocation3], %s9600_s14, %s9600_s14, %s13555_s18  }
  0xbf   :  { %s9389_s11 = scalar_lea.hbm %s9672_s3, 32768 }
  0xc0   :  { %p9390_p10 = scmp.ne.s32.totalorder %s9672_s3, %s9389_s11  ;;  %p9393_p11 = scmp.lt.u32.totalorder %s9389_s11, %s9672_s3 }
  0xc2   :  { %p9395_p12 = pnand %p9393_p11, %p9390_p10 }
  0xc4   :  { %9398 = shalt.err (!%p9395_p12)
}
  0xc5   :  { %s9399_s4 = scalar_lea.vmem %s9842_s1, 32768  ;;  %p9404_p0 = scmp.lt.s32.totalorder %s9842_s1, %s9842_s1 }
  0xc6   :  { %p9400_p13 = scmp.ne.s32.totalorder %s9842_s1, %s9399_s4  ;;  %p9405_p1 = scmp.lt.s32.totalorder %s9399_s4, %s9399_s4 }
  0xc8   :  { %p9406_p2 = por %p9405_p1, %p9404_p0 }
  0xca   :  { %p9407_p3 = pnand %p9406_p2, %p9400_p13 }
  0xcc   :  { %9410 = shalt.err (!%p9407_p3)
}
  0xcd   :  { %135 = dma.hbm_to_vmem [thread:$0]  %s9672_s3, 32768, %s9842_s1, [#allocation10], %s9596_s28, %s9596_s28, %s13597_s29  }
  0xce   :  { %s9608_s21 = smov [#allocation14]   ;;  %s9609_s19 = smov [#allocation17]  }
  0xcf   :  { %s157_s10 = sshll.u32 %s9608_s21, 4  ;;  %s185_s0 = sshll.u32 %s9609_s19, 4  ;;  %s158_s10 = int_to_ptr.vmem [resolvable:$true] %s157_s10  ;;  %s9863_s0 = int_to_ptr.vmem [resolvable:$true] %s185_s0 }
  0xd0   :  { %s9411_s22 = scalar_lea.hbm %s9692_s24, 4096 }
  0xd1   :  { %p9412_p4 = scmp.ne.s32.totalorder %s9692_s24, %s9411_s22  ;;  %p9415_p5 = scmp.lt.u32.totalorder %s9411_s22, %s9692_s24 }
  0xd3   :  { %p9417_p6 = pnand %p9415_p5, %p9412_p4 }
  0xd5   :  { %9420 = shalt.err (!%p9417_p6)
}
  0xd6   :  { %s9421_s23 = scalar_lea.vmem %s158_s10, 4096  ;;  %p9426_p8 = scmp.lt.s32.totalorder %s158_s10, %s158_s10 }
  0xd7   :  { %p9422_p7 = scmp.ne.s32.totalorder %s158_s10, %s9421_s23  ;;  %p9427_p9 = scmp.lt.s32.totalorder %s9421_s23, %s9421_s23 }
  0xd9   :  { %p9428_p10 = por %p9427_p9, %p9426_p8 }
  0xdb   :  { %p9429_p11 = pnand %p9428_p10, %p9422_p7 }
  0xdd   :  { %9432 = shalt.err (!%p9429_p11)
}
  0xde   :  { %163 = dma.hbm_to_vmem [thread:$0]  %s9692_s24, 4096, %s158_s10, [#allocation13], %s9600_s14, %s9600_s14, %s13555_s18  }
  0xdf   :  { %s9433_s3 = scalar_lea.hbm %s9712_s20, 8192 }
  0xe0   :  { %p9434_p12 = scmp.ne.s32.totalorder %s9712_s20, %s9433_s3  ;;  %p9437_p13 = scmp.lt.u32.totalorder %s9433_s3, %s9712_s20 }
  0xe2   :  { %p9439_p0 = pnand %p9437_p13, %p9434_p12 }
  0xe4   :  { %9442 = shalt.err (!%p9439_p0)
}
  0xe5   :  { %s9443_s28 = scalar_lea.vmem %s9863_s0, 8192  ;;  %p9448_p2 = scmp.lt.s32.totalorder %s9863_s0, %s9863_s0 }
  0xe6   :  { %p9444_p1 = scmp.ne.s32.totalorder %s9863_s0, %s9443_s28  ;;  %p9449_p3 = scmp.lt.s32.totalorder %s9443_s28, %s9443_s28 }
  0xe8   :  { %p9450_p4 = por %p9449_p3, %p9448_p2 }
  0xea   :  { %p9451_p5 = pnand %p9450_p4, %p9444_p1 }
  0xec   :  { %9454 = shalt.err (!%p9451_p5)
}
  0xed   :  { %191 = dma.hbm_to_vmem [thread:$0]  %s9712_s20, 8192, %s9863_s0, [#allocation16], %s9600_s14, %s9600_s14, %s13555_s18  }
  0xee   :  { %s9610_s24 = smov [#allocation20]   ;;  %s9611_s9 = smov [#allocation23]  }
  0xef   :  { %s213_s6 = sshll.u32 %s9610_s24, 4  ;;  %s241_s13 = sshll.u32 %s9611_s9, 4  ;;  %s214_s6 = int_to_ptr.vmem [resolvable:$true] %s213_s6  ;;  %s9884_s13 = int_to_ptr.vmem [resolvable:$true] %s241_s13 }
  0xf0   :  { %s9455_s8 = scalar_lea.hbm %s9732_s30, 1024 }
  0xf1   :  { %p9456_p6 = scmp.ne.s32.totalorder %s9732_s30, %s9455_s8  ;;  %p9459_p7 = scmp.lt.u32.totalorder %s9455_s8, %s9732_s30 }
  0xf3   :  { %p9461_p8 = pnand %p9459_p7, %p9456_p6 }
  0xf5   :  { %9464 = shalt.err (!%p9461_p8)
}
  0xf6   :  { %s9465_s26 = scalar_lea.vmem %s214_s6, 1024  ;;  %p9470_p10 = scmp.lt.s32.totalorder %s214_s6, %s214_s6 }
  0xf7   :  { %p9466_p9 = scmp.ne.s32.totalorder %s214_s6, %s9465_s26  ;;  %p9471_p11 = scmp.lt.s32.totalorder %s9465_s26, %s9465_s26 }
  0xf9   :  { %p9472_p12 = por %p9471_p11, %p9470_p10 }
  0xfb   :  { %p9473_p13 = pnand %p9472_p12, %p9466_p9 }
  0xfd   :  { %9476 = shalt.err (!%p9473_p13)
}
  0xfe   :  { %219 = dma.hbm_to_vmem [thread:$0]  %s9732_s30, 1024, %s214_s6, [#allocation19], %s9593_s15, %s9593_s15, %s9594_s16  }
  0xff   :  { %s9477_s20 = scalar_lea.hbm %s9752_s25, 2048 }
 0x100   :  { %p9478_p0 = scmp.ne.s32.totalorder %s9752_s25, %s9477_s20  ;;  %p9481_p1 = scmp.lt.u32.totalorder %s9477_s20, %s9752_s25 }
 0x102   :  { %p9483_p2 = pnand %p9481_p1, %p9478_p0 }
 0x104   :  { %9486 = shalt.err (!%p9483_p2)
}
 0x105   :  { %s9487_s14 = scalar_lea.vmem %s9884_s13, 2048  ;;  %p9492_p4 = scmp.lt.s32.totalorder %s9884_s13, %s9884_s13 }
 0x106   :  { %p9488_p3 = scmp.ne.s32.totalorder %s9884_s13, %s9487_s14  ;;  %p9493_p5 = scmp.lt.s32.totalorder %s9487_s14, %s9487_s14 }
 0x108   :  { %p9494_p6 = por %p9493_p5, %p9492_p4 }
 0x10a   :  { %p9495_p7 = pnand %p9494_p6, %p9488_p3 }
 0x10c   :  { %9498 = shalt.err (!%p9495_p7)
}
 0x10d   :  { %247 = dma.hbm_to_vmem [thread:$0]  %s9752_s25, 2048, %s9884_s13, [#allocation22], %s9593_s15, %s9593_s15, %s9594_s16  }
 0x10e   :  { %s9612_s30 = smov [#allocation26]   ;;  %s9499_s2 = scalar_lea.hbm %s9772_s17, 2048 }
 0x10f   :  { %s269_s1 = sshll.u32 %s9612_s30, 4  ;;  %p9500_p8 = scmp.ne.s32.totalorder %s9772_s17, %s9499_s2  ;;  %s270_s1 = int_to_ptr.vmem [resolvable:$true] %s269_s1 }
 0x110   :  { %p9503_p9 = scmp.lt.u32.totalorder %s9499_s2, %s9772_s17 }
 0x112   :  { %p9505_p10 = pnand %p9503_p9, %p9500_p8 }
 0x114   :  { %9508 = shalt.err (!%p9505_p10)
}
 0x115   :  { %s9509_s7 = scalar_lea.vmem %s270_s1, 2048  ;;  %p9514_p12 = scmp.lt.s32.totalorder %s270_s1, %s270_s1 }
 0x116   :  { %p9510_p11 = scmp.ne.s32.totalorder %s270_s1, %s9509_s7  ;;  %p9515_p13 = scmp.lt.s32.totalorder %s9509_s7, %s9509_s7 }
 0x118   :  { %p9516_p0 = por %p9515_p13, %p9514_p12 }
 0x11a   :  { %p9517_p1 = pnand %p9516_p0, %p9510_p11 }
 0x11c   :  { %9520 = shalt.err (!%p9517_p1)
}
 0x11d   :  { %275 = dma.hbm_to_vmem [thread:$0]  %s9772_s17, 2048, %s270_s1, [#allocation25], %s9593_s15, %s9593_s15, %s9594_s16  }
 0x11e   :  { %9543 = dma.done.wait [#allocation5], 16  }
 0x11f   :  { %9544 = vsyncadd [#allocation5], 4294967280 }
 0x120   :  { %9545 = dma.done.wait [#allocation7], 16  }
 0x121   :  { %9546 = vsyncadd [#allocation7], 4294967280 }
 0x122   :  { %9547 = dma.done.wait [#allocation3], 32768  }
 0x123   :  { %9548 = vsyncadd [#allocation3], 4294934528 }
 0x124   :  { %9549 = dma.done.wait [#allocation10], 33792  }
 0x125   :  { %9550 = vsyncadd [#allocation10], 4294933504 }
 0x126   :  { %9551 = dma.done.wait [#allocation13], 36864  }
 0x127   :  { %9552 = vsyncadd [#allocation13], 4294930432 }
 0x128   :  { %9553 = dma.done.wait [#allocation16], 16384  }
 0x129   :  { %9554 = vsyncadd [#allocation16], 4294950912 }
 0x12a   :  { %9555 = dma.done.wait [#allocation19], 9216  }
 0x12b   :  { %9556 = vsyncadd [#allocation19], 4294958080 }
 0x12c   :  { %9557 = dma.done.wait [#allocation22], 4096  }
 0x12d   :  { %9558 = vsyncadd [#allocation22], 4294963200 }
 0x12e   :  { %9559 = dma.done.wait [#allocation25], 4096  }
 0x12f   :  { %9560 = vsyncadd [#allocation25], 4294963200 }
 0x130   :  { %323 = sfence }
 0x131   :  { %v348_v0 = vlaneseq  ;;  %s14067_s17 = sld [smem:[#allocation38_spill]]  ;;  %v9613_v1 = vmov 1983009808   ;;  %s13567_s25 = smov 33   ;;  %v2751_v24 = vld [vmem:[#allocation8 + $0x8] sm:$0xff]  ;;  %v2753_v25 = vld [vmem:[#allocation8 + $0x18] sm:$0xff] }
 0x132   :  { %v346_v2 = vunpack.c.l.s4 %v9613_v1  ;;  %s13579_s15 = smov 31   ;;  %s13577_s16 = smov 1   ;;  %v7548_v26 = vpack.c.bf16 %v2753_v25, %v2751_v24  ;;  %v2750_v27 = vld [vmem:[#allocation8] sm:$0xff]  ;;  %v2752_v28 = vld [vmem:[#allocation8 + $0x10] sm:$0xff]  ;;  %v2755_v30 = vld [vmem:[#allocation8 + $0x28] sm:$0xff]  ;;  %vm4088_vm8 = vcmask 1041408  }
 0x133   :  { %v9913_v3 = vshrl.u32 %v348_v0, 7  ;;  %s13563_s11 = smov 127   ;;  %s13561_s4 = smov 97   ;;  %v7550_v29 = vpack.c.bf16 %v2752_v28, %v2750_v27  ;;  %v2757_v31 = vld [vmem:[#allocation8 + $0x38] sm:$0xff]  ;;  %v2754_v33 = vld [vmem:[#allocation8 + $0x20] sm:$0xff]  ;;  %v2756_v34 = vld [vmem:[#allocation8 + $0x30] sm:$0xff] }
 0x134   :  { %v347_v5 = vunpack.c.0.s8 %v346_v2  ;;  %s13559_s21 = smov 96   ;;  %s13557_s10 = smov 95   ;;  %7549 = vmatprep.subr.bf16.mxu0 %v7548_v26  ;;  %7805 = vmatprep.subr.bf16.mxu1 %v7548_v26  ;;  %v7552_v32 = vpack.c.bf16 %v2757_v31, %v2755_v30  ;;  %v7554_v35 = vpack.c.bf16 %v2756_v34, %v2754_v33  ;;  %v2759_v36 = vld [vmem:[#allocation8 + $0x48] sm:$0xff]  ;;  %v2761_v37 = vld [vmem:[#allocation8 + $0x58] sm:$0xff]  ;;  %v2758_v39 = vld [vmem:[#allocation8 + $0x40] sm:$0xff]  ;;  %vm4951_vm9 = vcmask 523264  }
 0x135   :  { %7551 = vmatpush1.bf16.msra.mxu0 %v7550_v29  ;;  %7807 = vmatpush1.bf16.msra.mxu1 %v7550_v29  ;;  %v7556_v38 = vpack.c.bf16 %v2761_v37, %v2759_v36  ;;  %v2760_v40 = vld [vmem:[#allocation8 + $0x50] sm:$0xff]  ;;  %v2763_v44 = vld [vmem:[#allocation8 + $0x68] sm:$0xff]  ;;  %v2765_v45 = vld [vmem:[#allocation8 + $0x78] sm:$0xff]  ;;  %s10132_s19 = sld [smem:[#allocation2 + $0x4]]  ;;  %s10134_s0 = sld [smem:[#allocation2 + $0x1f]]  ;;  %vm5051_vm10 = vcmask 517120  }
 0x136   :  { %v9922_v7 = vsub.s32 %v347_v5, %v9913_v3  ;;  %7553 = vmatprep.subr.bf16.mxu0 %v7552_v32  ;;  %7809 = vmatprep.subr.bf16.mxu1 %v7552_v32  ;;  %v7558_v41 = vpack.c.bf16 %v2760_v40, %v2758_v39  ;;  %v7560_v46 = vpack.c.bf16 %v2765_v45, %v2763_v44  ;;  %v2762_v47 = vld [vmem:[#allocation8 + $0x60] sm:$0xff]  ;;  %v2764_v48 = vld [vmem:[#allocation8 + $0x70] sm:$0xff]  ;;  %v2767_v52 = vld [vmem:[#allocation8 + $0x88] sm:$0xff]  ;;  %s10140_s22 = sld [smem:[#allocation2 + $0x1]]  ;;  %s10146_s23 = sld [smem:[#allocation2 + $0x1c]]  ;;  %vm9624_vm11 = vmmov 0  }
 0x137   :  { %v9916_v4 = vld [vmem:[%s14067_s17 + $0x8] sm:$0xff]  ;;  %v9919_v6 = vld [vmem:[%s14067_s17] sm:$0xff]  ;;  %v9968_v15 = vld [vmem:[%s14067_s17 + $0x10] sm:$0xff]  ;;  %v7562_v49 = vpack.c.bf16 %v2764_v48, %v2762_v47  ;;  %s10148_s3 = sld [smem:[#allocation2]]  ;;  %s10150_s28 = sld [smem:[#allocation2 + $0x1b]]  ;;  %vm6055_vm12 = vcmask 130048  }
 0x138   :  { %v361_v8 = vcombine.high %v9916_v4, %v9916_v4  ;;  %v351_v9 = vrot.slane %v9919_v6, %v9922_v7  ;;  %v344_v13 = vcombine.high %v9919_v6, %v9919_v6  ;;  %v9971_v16 = vld [vmem:[%s14067_s17 + $0x18] sm:$0xff]  ;;  %v9977_v17 = vrot.slane %v9968_v15, %v9922_v7  ;;  %v10041_v42 = vld [vmem:[%s14067_s17 + $0x20] sm:$0xff]  ;;  %v10044_v43 = vld [vmem:[%s14067_s17 + $0x28] sm:$0xff]  ;;  %s10152_s24 = sld [smem:[#allocation2 + $0x2]]  ;;  %s14083_s6 = sld [smem:[#allocation39_spill]] }
 0x139   :  { %v930_v18 = vcombine.high %v9971_v16, %v9971_v16  ;;  %v913_v22 = vcombine.high %v9968_v15, %v9968_v15  ;;  %7555 = vmatpush1.bf16.msra.mxu0 %v7554_v35  ;;  %7811 = vmatpush1.bf16.msra.mxu1 %v7554_v35  ;;  %v10052_v50 = vrot.slane %v10041_v42, %v9922_v7  ;;  %v2769_v53 = vld [vmem:[#allocation8 + $0x98] sm:$0xff]  ;;  %v2766_v55 = vld [vmem:[#allocation8 + $0x80] sm:$0xff]  ;;  %v2768_v56 = vld [vmem:[#allocation8 + $0x90] sm:$0xff]  ;;  %s10158_s9 = sld [smem:[#allocation2 + $0xd]]  ;;  %s10160_s13 = sld [smem:[#allocation2 + $0x28]]  ;;  %vm6057_vm13 = vcmask 261120  }
 0x13a   :  { %453 = vrot.lane.b32.xlu1 %v351_v9, %s13597_s29  ;;  %386 = vrot.lane.b32.xlu0 %v351_v9, %s13567_s25  ;;  %v359_v10 = vcombine.high %v351_v9, %v351_v9  ;;  %v9931_v11 = vrot.slane %v361_v8, %v9922_v7  ;;  %v9954_v14 = vrot.slane %v344_v13, %v9922_v7  ;;  %v2771_v60 = vld [vmem:[#allocation8 + $0xa8] sm:$0xff]  ;;  %v2773_v61 = vld [vmem:[#allocation8 + $0xb8] sm:$0xff]  ;;  %v2770_v63 = vld [vmem:[#allocation8 + $0xa0] sm:$0xff]  ;;  %s10168_s8 = sld [smem:[#allocation2 + $0x1d]]  ;;  %s10170_s26 = sld [smem:[#allocation2 + $0x3]]  ;;  %vm6059_vm14 = vcmask 392192  }
 0x13b   :  { %v9986_v19 = vcombine.high %v9977_v17, %v9977_v17  ;;  %v9989_v20 = vrot.slane %v930_v18, %v9922_v7  ;;  %v10022_v23 = vrot.slane %v913_v22, %v9922_v7  ;;  %7557 = vmatprep.subr.bf16.mxu0 %v7556_v38  ;;  %7813 = vmatprep.subr.bf16.mxu1 %v7556_v38  ;;  %v2772_v1 = vld [vmem:[#allocation8 + $0xb0] sm:$0xff]  ;;  %v2775_v8 = vld [vmem:[#allocation8 + $0xc8] sm:$0xff]  ;;  %v2774_v13 = vld [vmem:[#allocation8 + $0xc0] sm:$0xff]  ;;  %s10181_s20 = sld [smem:[#allocation2 + $0x1e]]  ;;  %s10183_s14 = sld [smem:[#allocation2 + $0x5]]  ;;  %vm6087_vm15 = vcmask 123904  }
 0x13c   :  { %14068 = vst [vmem:[#allocation51_spill] sm:$0xff] %v9931_v11  ;;  %v9937_v12 = vcombine.high %v9931_v11, %v9931_v11  ;;  %v1233_v51 = vcombine.high %v10044_v43, %v10044_v43  ;;  %v7564_v54 = vpack.c.bf16 %v2769_v53, %v2767_v52  ;;  %v7566_v57 = vpack.c.bf16 %v2768_v56, %v2766_v55  ;;  %v2781_v22 = vld [vmem:[#allocation8 + $0xf8] sm:$0xff]  ;;  %v2778_v25 = vld [vmem:[#allocation8 + $0xe0] sm:$0xff]  ;;  %v2780_v26 = vld [vmem:[#allocation8 + $0xf0] sm:$0xff]  ;;  %s10188_s30 = sld [smem:[#allocation2 + $0x20]]  ;;  %s10192_s1 = sld [smem:[#allocation2 + $0x6]] }
 0x13d   :  { %14070 = vst [vmem:[#allocation53_spill] sm:$0xff] %v9989_v20  ;;  %v9997_v21 = vcombine.high %v9989_v20, %v9989_v20  ;;  %7559 = vmatpush1.bf16.msra.mxu0 %v7558_v41  ;;  %7815 = vmatpush1.bf16.msra.mxu1 %v7558_v41  ;;  %v10062_v58 = vcombine.high %v10052_v50, %v10052_v50  ;;  %v2783_v28 = vld [vmem:[#allocation8 + $0x108] sm:$0xff]  ;;  %v2785_v29 = vld [vmem:[#allocation8 + $0x118] sm:$0xff]  ;;  %v2782_v31 = vld [vmem:[#allocation8 + $0x100] sm:$0xff]  ;;  %s10210_s2 = sld [smem:[#allocation2 + $0x21]]  ;;  %s10212_s7 = sld [smem:[#allocation2 + $0x7]] }
 0x13e   :  { %455 = vrot.lane.b32.xlu1 %v359_v10, %s13597_s29  ;;  %388 = vrot.lane.b32.xlu0 %v359_v10, %s13567_s25  ;;  %14069 = vst [vmem:[#allocation52_spill] sm:$0xff] %v9937_v12  ;;  %v10065_v59 = vrot.slane %v1233_v51, %v9922_v7  ;;  %v7568_v62 = vpack.c.bf16 %v2773_v61, %v2771_v60  ;;  %v2784_v32 = vld [vmem:[#allocation8 + $0x110] sm:$0xff]  ;;  %v2787_v34 = vld [vmem:[#allocation8 + $0x128] sm:$0xff]  ;;  %v2789_v35 = vld [vmem:[#allocation8 + $0x138] sm:$0xff]  ;;  %s10232_s18 = sld [smem:[#allocation2 + $0x22]]  ;;  %s10408_s5 = sld [smem:[#allocation2 + $0x11]] }
 0x13f   :  { %14071 = vst [vmem:[#allocation54_spill] sm:$0xff] %v9997_v21  ;;  %7561 = vmatprep.subr.bf16.mxu0 %v7560_v46  ;;  %7817 = vmatprep.subr.bf16.mxu1 %v7560_v46  ;;  %v7570_v2 = vpack.c.bf16 %v2772_v1, %v2770_v63  ;;  %v7578_v27 = vpack.c.bf16 %v2780_v26, %v2778_v25  ;;  %v2786_v37 = vld [vmem:[#allocation8 + $0x120] sm:$0xff]  ;;  %v2788_v38 = vld [vmem:[#allocation8 + $0x130] sm:$0xff]  ;;  %v2791_v41 = vld [vmem:[#allocation8 + $0x148] sm:$0xff] }
 0x140   :  { %14072 = vst [vmem:[#allocation55_spill] sm:$0xff] %v10065_v59  ;;  %v10073_v5 = vcombine.high %v10065_v59, %v10065_v59  ;;  %v7580_v30 = vpack.c.bf16 %v2785_v29, %v2783_v28  ;;  %v7582_v33 = vpack.c.bf16 %v2784_v32, %v2782_v31  ;;  %v7584_v36 = vpack.c.bf16 %v2789_v35, %v2787_v34  ;;  %v2793_v44 = vld [vmem:[#allocation8 + $0x158] sm:$0xff]  ;;  %v2790_v48 = vld [vmem:[#allocation8 + $0x140] sm:$0xff]  ;;  %v2795_v53 = vld [vmem:[#allocation8 + $0x168] sm:$0xff] }
 0x141   :  { %7563 = vmatpush1.bf16.msra.mxu0 %v7562_v49  ;;  %7819 = vmatpush1.bf16.msra.mxu1 %v7562_v49  ;;  %v7586_v39 = vpack.c.bf16 %v2788_v38, %v2786_v37  ;;  %v1216_v40 = vcombine.high %v10041_v42, %v10041_v42  ;;  %v7588_v47 = vpack.c.bf16 %v2793_v44, %v2791_v41  ;;  %v2792_v49 = vld [vmem:[#allocation8 + $0x150] sm:$0xff]  ;;  %v2794_v60 = vld [vmem:[#allocation8 + $0x160] sm:$0xff]  ;;  %v2799_v63 = vld [vmem:[#allocation8 + $0x188] sm:$0xff]  ;;  %v14107_v59 = vstv %s10160_s13 }
 0x142   :  { %467 = vrot.lane.b32.xlu1 %v9937_v12, %s13597_s29  ;;  %400 = vrot.lane.b32.xlu0 %v9937_v12, %s13567_s25  ;;  %14073 = vst [vmem:[#allocation56_spill] sm:$0xff] %v10073_v5  ;;  %v7590_v51 = vpack.c.bf16 %v2792_v49, %v2790_v48  ;;  %v2796_v61 = vld [vmem:[#allocation8 + $0x170] sm:$0xff]  ;;  %v2802_v25 = vld [vmem:[#allocation8 + $0x1a0] sm:$0xff]  ;;  %v2807_v29 = vld [vmem:[#allocation8 + $0x1c8] sm:$0xff]  ;;  %v10163_v49 = vsub.s32 1, %v9913_v3  ;;  %v10355_v11 = vstv %s10183_s14  ;;  %s10389_s14 = sld [smem:[#allocation2 + $0x2a]] }
 0x143   :  { %7565 = vmatprep.subr.bf16.mxu0 %v7564_v54  ;;  %7821 = vmatprep.subr.bf16.mxu1 %v7564_v54  ;;  %v10102_v52 = vrot.slane %v1216_v40, %v9922_v7  ;;  %v2797_v54 = vld [vmem:[#allocation8 + $0x178] sm:$0xff]  ;;  %v2804_v26 = vld [vmem:[#allocation8 + $0x1b0] sm:$0xff]  ;;  %v2811_v37 = vld [vmem:[#allocation8 + $0x1e8] sm:$0xff]  ;;  %14109 = vst [vmem:[#allocation89_spill] sm:$0xff] %v10355_v11 }
 0x144   :  { %v7602_v28 = vpack.c.bf16 %v2804_v26, %v2802_v25  ;;  %v2808_v35 = vld [vmem:[#allocation8 + $0x1d0] sm:$0xff]  ;;  %v2813_v38 = vld [vmem:[#allocation8 + $0x1f8] sm:$0xff]  ;;  %v2810_v41 = vld [vmem:[#allocation8 + $0x1e0] sm:$0xff]  ;;  %14084 = vst [vmem:[#allocation66_spill] sm:$0xff] %v10163_v49  ;;  %v10248_v25 = vsub.s32 3, %v9913_v3  ;;  %v10255_v26 = vstv %s10146_s23  ;;  %s10282_s23 = sld [smem:[#allocation2 + $0x25]] }
 0x145   :  { %7567 = vmatpush1.bf16.msra.mxu0 %v7566_v57  ;;  %7823 = vmatpush1.bf16.msra.mxu1 %v7566_v57  ;;  %14074 = vst [vmem:[#allocation57_spill] sm:$0xff] %v10102_v52  ;;  %v7592_v57 = vpack.c.bf16 %v2797_v54, %v2795_v53  ;;  %v2812_v44 = vld [vmem:[#allocation8 + $0x1f0] sm:$0xff]  ;;  %v13566_v53 = vstv %s10132_s19  ;;  %v13565_v54 = vstv %s10134_s0  ;;  %14093 = vst [vmem:[#allocation75_spill] sm:$0xff] %v10255_v26 }
 0x146   :  { %520 = vrot.lane.b32.xlu1 %v359_v10, %s13579_s15  ;;  %518 = vrot.lane.b32.xlu0 %v351_v9, %s13579_s15  ;;  %v7610_v48 = vpack.c.bf16 %v2812_v44, %v2810_v41  ;;  %14092 = vst [vmem:[#allocation74_spill] sm:$0xff] %v10248_v25  ;;  %v10300_v41 = vsub.s32 6, %v9913_v3 }
 0x147   :  { %7569 = vmatprep.subr.bf16.mxu0 %v7568_v62  ;;  %7825 = vmatprep.subr.bf16.mxu1 %v7568_v62  ;;  %v7594_v62 = vpack.c.bf16 %v2796_v61, %v2794_v60  ;;  %v10179_v60 = vld [vmem:[%s14083_s6 + $0x8] sm:$0xff]  ;;  %v10186_v61 = vld [vmem:[%s14083_s6] sm:$0xff] }
 0x148   :  { %14099 = vst [vmem:[#allocation81_spill] sm:$0xff] %v10300_v41  ;;  %v10383_v20 = vrot.slane %v10186_v61, %v10300_v41 }
 0x149   :  { %7571 = vmatpush1.bf16.msra.mxu0 %v7570_v2  ;;  %7827 = vmatpush1.bf16.msra.mxu1 %v7570_v2 }
 0x14a   :  { %583 = vrot.lane.b32.xlu1 %v351_v9, %s13577_s16  ;;  %532 = vrot.lane.b32.xlu0 %v9937_v12, %s13579_s15 }
 0x14e   :  { %597 = vrot.lane.b32.xlu1 %v9937_v12, %s13577_s16  ;;  %585 = vrot.lane.b32.xlu0 %v359_v10, %s13577_s16 }
 0x152   :  { %650 = vrot.lane.b32.xlu0 %v359_v10, %s13563_s11  ;;  %652 = vrot.lane.b32.xlu1 %v9954_v14, %s13563_s11 }
 0x156   :  { %648 = vrot.lane.b32.xlu0 %v351_v9, %s13563_s11  ;;  %715 = vrot.lane.b32.xlu1 %v359_v10, %s13561_s4 }
 0x15a   :  { %717 = vrot.lane.b32.xlu0 %v9954_v14, %s13561_s4  ;;  %713 = vrot.lane.b32.xlu1 %v351_v9, %s13561_s4 }
 0x15e   :  { %780 = vrot.lane.b32.xlu0 %v359_v10, %s13559_s21  ;;  %782 = vrot.lane.b32.xlu1 %v9954_v14, %s13559_s21 }
 0x162   :  { %778 = vrot.lane.b32.xlu0 %v351_v9, %s13559_s21  ;;  %845 = vrot.lane.b32.xlu1 %v359_v10, %s13557_s10 }
 0x166   :  { %847 = vrot.lane.b32.xlu0 %v9954_v14, %s13557_s10  ;;  %843 = vrot.lane.b32.xlu1 %v351_v9, %s13557_s10  ;;  %v2777_v9 = vld [vmem:[#allocation8 + $0xd8] sm:$0xff] }
 0x167   :  { %v7572_v10 = vpack.c.bf16 %v2777_v9, %v2775_v8  ;;  %v2801_v8 = vld [vmem:[#allocation8 + $0x198] sm:$0xff]  ;;  %v2798_v9 = vld [vmem:[#allocation8 + $0x180] sm:$0xff] }
 0x169   :  { %7573 = vmatprep.subr.bf16.mxu0 %v7572_v10  ;;  %7829 = vmatprep.subr.bf16.mxu1 %v7572_v10  ;;  %v2800_v10 = vld [vmem:[#allocation8 + $0x190] sm:$0xff] }
 0x16a   :  { %955 = vrot.lane.b32.xlu0 %v9977_v17, %s13567_s25  ;;  %957 = vrot.lane.b32.xlu1 %v9986_v19, %s13567_s25 }
 0x16e   :  { %969 = vrot.lane.b32.xlu0 %v9997_v21, %s13567_s25  ;;  %987 = vrot.lane.b32.xlu1 %v9977_v17, %s13597_s29 }
 0x172   :  { %989 = vrot.lane.b32.xlu0 %v9986_v19, %s13597_s29  ;;  %1001 = vrot.lane.b32.xlu1 %v9997_v21, %s13597_s29 }
 0x176   :  { %1019 = vrot.lane.b32.xlu0 %v9977_v17, %s13579_s15  ;;  %1021 = vrot.lane.b32.xlu1 %v9986_v19, %s13579_s15 }
 0x17a   :  { %1033 = vrot.lane.b32.xlu0 %v9997_v21, %s13579_s15  ;;  %1051 = vrot.lane.b32.xlu1 %v9977_v17, %s13577_s16 }
 0x17e   :  { %1053 = vrot.lane.b32.xlu0 %v9986_v19, %s13577_s16  ;;  %1065 = vrot.lane.b32.xlu1 %v9997_v21, %s13577_s16  ;;  %v14105_v21 = vstv %s10158_s9 }
 0x17f   :  { %v10341_v12 = vmul.f32 %v9968_v15, %v14105_v21 }
 0x181   :  { %14106 = vst [vmem:[#allocation87_spill] sm:$0xff] %v10341_v12 }
 0x182   :  { %1085 = vrot.lane.b32.xlu0 %v9986_v19, %s13563_s11  ;;  %1087 = vrot.lane.b32.xlu1 %v10022_v23, %s13563_s11 }
 0x186   :  { %1083 = vrot.lane.b32.xlu0 %v9977_v17, %s13563_s11  ;;  %1117 = vrot.lane.b32.xlu1 %v9986_v19, %s13561_s4 }
 0x18a   :  { %1119 = vrot.lane.b32.xlu0 %v10022_v23, %s13561_s4  ;;  %1115 = vrot.lane.b32.xlu1 %v9977_v17, %s13561_s4 }
 0x18e   :  { %1149 = vrot.lane.b32.xlu0 %v9986_v19, %s13559_s21  ;;  %1151 = vrot.lane.b32.xlu1 %v10022_v23, %s13559_s21 }
 0x192   :  { %1147 = vrot.lane.b32.xlu0 %v9977_v17, %s13559_s21  ;;  %1181 = vrot.lane.b32.xlu1 %v9986_v19, %s13557_s10  ;;  %v2779_v19 = vld [vmem:[#allocation8 + $0xe8] sm:$0xff] }
 0x193   :  { %v7576_v24 = vpack.c.bf16 %v2781_v22, %v2779_v19  ;;  %v2805_v19 = vld [vmem:[#allocation8 + $0x1b8] sm:$0xff] }
 0x196   :  { %1183 = vrot.lane.b32.xlu0 %v10022_v23, %s13557_s10  ;;  %1179 = vrot.lane.b32.xlu1 %v9977_v17, %s13557_s10  ;;  %v2776_v17 = vld [vmem:[#allocation8 + $0xd0] sm:$0xff] }
 0x197   :  { %v7574_v18 = vpack.c.bf16 %v2776_v17, %v2774_v13  ;;  %v7596_v13 = vpack.c.bf16 %v2801_v8, %v2799_v63  ;;  %v7598_v17 = vpack.c.bf16 %v2800_v10, %v2798_v9  ;;  %v10202_v63 = vmul.f32 %v13565_v54, %v9919_v6 }
 0x198   :  { %v10208_v8 = vcombine.high %v9954_v14, %v9954_v14  ;;  %v10215_v9 = vand.u32 127, %v348_v0  ;;  %v10226_v10 = vsub.s32 2, %v9913_v3  ;;  %v10237_v0 = vstv %s10140_s22  ;;  %s10268_s22 = sld [smem:[#allocation2 + $0x24]] }
 0x199   :  { %7575 = vmatpush1.bf16.msra.mxu0 %v7574_v18  ;;  %7831 = vmatpush1.bf16.msra.mxu1 %v7574_v18  ;;  %v2803_v18 = vld [vmem:[#allocation8 + $0x1a8] sm:$0xff]  ;;  %14088 = vst [vmem:[#allocation70_spill] sm:$0xff] %v10202_v63  ;;  %14091 = vst [vmem:[#allocation73_spill] sm:$0xff] %v10237_v0  ;;  %v10317_v54 = vrot.slane %v10186_v61, %v10248_v25 }
 0x19a   :  { %1258 = vrot.lane.b32.xlu0 %v10052_v50, %s13567_s25  ;;  %1260 = vrot.lane.b32.xlu1 %v10062_v58, %s13567_s25  ;;  %14089 = vst [vmem:[#allocation71_spill] sm:$0xff] %v10226_v10  ;;  %vm469_vm0 = vcmp.lt.s32.totalorder %v10215_v9, 32  ;;  %vm404_vm1 = vcmp.lt.s32.totalorder %v10215_v9, 33  ;;  %vm534_vm2 = vcmp.lt.s32.totalorder %v10215_v9, 31  ;;  %vm599_vm3 = vcmp.lt.s32.totalorder %v10215_v9, 1 }
 0x19b   :  { %7577 = vmatprep.subr.bf16.mxu0 %v7576_v24  ;;  %7833 = vmatprep.subr.bf16.mxu1 %v7576_v24  ;;  %vm664_vm4 = vcmp.lt.s32.totalorder %v10215_v9, 127  ;;  %vm729_vm5 = vcmp.lt.s32.totalorder %v10215_v9, 97  ;;  %vm794_vm6 = vcmp.lt.s32.totalorder %v10215_v9, 96  ;;  %vm859_vm7 = vcmp.lt.s32.totalorder %v10215_v9, 95 }
 0x19d   :  { %7579 = vmatpush1.bf16.msra.mxu0 %v7578_v27  ;;  %7835 = vmatpush1.bf16.msra.mxu1 %v7578_v27  ;;  %v7600_v27 = vpack.c.bf16 %v2805_v19, %v2803_v18  ;;  %v10241_v18 = vrot.slane %v10186_v61, %v10163_v49 }
 0x19e   :  { %1272 = vrot.lane.b32.xlu0 %v10073_v5, %s13567_s25  ;;  %1290 = vrot.lane.b32.xlu1 %v10052_v50, %s13597_s29 }
 0x19f   :  { %7581 = vmatprep.subr.bf16.mxu0 %v7580_v30  ;;  %7837 = vmatprep.subr.bf16.mxu1 %v7580_v30  ;;  %v2809_v30 = vld [vmem:[#allocation8 + $0x1d8] sm:$0xff] }
 0x1a0   :  { %v7604_v34 = vpack.c.bf16 %v2809_v30, %v2807_v29  ;;  %v10264_v29 = vsub.s32 5, %v9913_v3 }
 0x1a1   :  { %7583 = vmatpush1.bf16.msra.mxu0 %v7582_v33  ;;  %7839 = vmatpush1.bf16.msra.mxu1 %v7582_v33  ;;  %v2806_v33 = vld [vmem:[#allocation8 + $0x1c0] sm:$0xff] }
 0x1a2   :  { %1292 = vrot.lane.b32.xlu0 %v10062_v58, %s13597_s29  ;;  %1304 = vrot.lane.b32.xlu1 %v10073_v5, %s13597_s29  ;;  %14096 = vst [vmem:[#allocation78_spill] sm:$0xff] %v10264_v29  ;;  %v10361_v21 = vrot.slane %v10179_v60, %v10264_v29 }
 0x1a3   :  { %7585 = vmatprep.subr.bf16.mxu0 %v7584_v36  ;;  %7841 = vmatprep.subr.bf16.mxu1 %v7584_v36  ;;  %v7606_v36 = vpack.c.bf16 %v2808_v35, %v2806_v33  ;;  %v10278_v33 = vrot.slane %v10202_v63, %v9922_v7  ;;  %v10324_v35 = vsub.s32 7, %v9913_v3 }
 0x1a5   :  { %7587 = vmatpush1.bf16.msra.mxu0 %v7586_v39  ;;  %7843 = vmatpush1.bf16.msra.mxu1 %v7586_v39  ;;  %14102 = vst [vmem:[#allocation84_spill] sm:$0xff] %v10324_v35 }
 0x1a6   :  { %1322 = vrot.lane.b32.xlu0 %v10052_v50, %s13579_s15  ;;  %1324 = vrot.lane.b32.xlu1 %v10062_v58, %s13579_s15 }
 0x1a7   :  { %7589 = vmatprep.subr.bf16.mxu0 %v7588_v47  ;;  %7845 = vmatprep.subr.bf16.mxu1 %v7588_v47  ;;  %v7608_v47 = vpack.c.bf16 %v2813_v38, %v2811_v37  ;;  %v10293_v37 = vstv %s10168_s8  ;;  %v10297_v38 = vrot.slane %v10179_v60, %v10226_v10  ;;  %s10326_s8 = sld [smem:[#allocation2 + $0x27]] }
 0x1a8   :  { %14098 = vst [vmem:[#allocation80_spill] sm:$0xff] %v10293_v37 }
 0x1a9   :  { %7591 = vmatpush1.bf16.msra.mxu0 %v7590_v51  ;;  %7847 = vmatpush1.bf16.msra.mxu1 %v7590_v51  ;;  %v10166_v51 = vsub.s32 0, %v9913_v3  ;;  %v10346_v3 = vmul.f32 %v9968_v15, %v14107_v59  ;;  %v10371_v15 = vstv %s10188_s30  ;;  %v10375_v59 = vrot.slane %v10186_v61, %v10264_v29  ;;  %s10391_s30 = sld [smem:[#allocation2 + $0x10]] }
 0x1aa   :  { %1336 = vrot.lane.b32.xlu0 %v10073_v5, %s13579_s15  ;;  %1354 = vrot.lane.b32.xlu1 %v10052_v50, %s13577_s16  ;;  %s10350_s15 = sld [smem:[#allocation2 + $0x31]]  ;;  %14110 = vst [vmem:[#allocation90_spill] sm:$0xff] %v10371_v15  ;;  %v10397_v29 = vstv %s10210_s2  ;;  %s10428_s2 = sld [smem:[#allocation2 + $0x2c]] }
 0x1ab   :  { %7593 = vmatprep.subr.bf16.mxu0 %v7592_v57  ;;  %7849 = vmatprep.subr.bf16.mxu1 %v7592_v57  ;;  %14085 = vst [vmem:[#allocation67_spill] sm:$0xff] %v10166_v51  ;;  %v10245_v19 = vrot.slane %v10186_v61, %v10166_v51  ;;  %14108 = vst [vmem:[#allocation88_spill] sm:$0xff] %v10346_v3 }
 0x1ac   :  { %v10093_v45 = vpop.permute.xlu1 %453  ;;  %v10095_v46 = vpop.permute.xlu0 %386  ;;  %14114 = vst [vmem:[#allocation94_spill] sm:$0xff] %v10397_v29  ;;  %v10426_v29 = vrot.slane %v10346_v3, %v9922_v7 }
 0x1ad   :  { %7595 = vmatpush1.bf16.msra.mxu0 %v7594_v62  ;;  %7851 = vmatpush1.bf16.msra.mxu1 %v7594_v62  ;;  %v10197_v62 = vmul.f32 %v13566_v53, %v9919_v6  ;;  %v10219_v6 = vrot.slane %v10179_v60, %v10163_v49  ;;  %v10321_v53 = vrot.slane %v10179_v60, %v10248_v25  ;;  %v10400_v49 = vstv %s10212_s7  ;;  %s10447_s7 = sld [smem:[#allocation2 + $0x2d]] }
 0x1ae   :  { %1356 = vrot.lane.b32.xlu0 %v10062_v58, %s13577_s16  ;;  %1368 = vrot.lane.b32.xlu1 %v10073_v5, %s13577_s16  ;;  %v10334_v5 = vstv %s10181_s20  ;;  %s10348_s16 = sld [smem:[#allocation2 + $0x16]]  ;;  %s10367_s20 = sld [smem:[#allocation2 + $0xf]]  ;;  %v10379_v25 = vrot.slane %v10179_v60, %v10300_v41  ;;  %14115 = vst [vmem:[#allocation95_spill] sm:$0xff] %v10400_v49  ;;  %v10404_v41 = vrot.slane %v10179_v60, %v10324_v35  ;;  %14121 = vst [vmem:[#allocation100_spill] sm:$0xff] %v10426_v29 }
 0x1af   :  { %7597 = vmatprep.subr.bf16.mxu0 %v7596_v13  ;;  %7853 = vmatprep.subr.bf16.mxu1 %v7596_v13  ;;  %14087 = vst [vmem:[#allocation69_spill] sm:$0xff] %v10197_v62  ;;  %v10274_v30 = vrot.slane %v10197_v62, %v9922_v7  ;;  %14104 = vst [vmem:[#allocation86_spill] sm:$0xff] %v10334_v5  ;;  %v10394_v62 = vstv %s10192_s1  ;;  %s14118_s1 = smov 31   ;;  %v10418_v49 = vrot.slane %v10186_v61, %v10324_v35 }
 0x1b0   :  { %v10104_v55 = vpop.permute.xlu1 %455  ;;  %v10106_v56 = vpop.permute.xlu0 %388  ;;  %14113 = vst [vmem:[#allocation93_spill] sm:$0xff] %v10394_v62  ;;  %14116 = vst [vmem:[#allocation96_spill] sm:$0xff] %v10404_v41  ;;  %v10454_v41 = vstv %s10268_s22  ;;  %v10460_v62 = vstv %s10282_s23  ;;  %s10508_s22 = sld [smem:[#allocation2 + $0x2f]]  ;;  %s10510_s23 = sld [smem:[#allocation2 + $0x15]]  ;;  %v10527_v29 = vstv %s10391_s30 }
 0x1b1   :  { %14075 = vst [vmem:[#allocation58_spill] sm:$0xff] %v10104_v55  ;;  %14076 = vst [vmem:[#allocation59_spill] sm:$0xff] %v10106_v56  ;;  %7599 = vmatpush1.bf16.msra.mxu0 %v7598_v17  ;;  %7855 = vmatpush1.bf16.msra.mxu1 %v7598_v17  ;;  %s10667_s30 = sld [smem:[#allocation2 + $0x1a]] }
 0x1b2   :  { %1388 = vrot.lane.b32.xlu0 %v10062_v58, %s13563_s11  ;;  %1390 = vrot.lane.b32.xlu1 %v10102_v52, %s13563_s11  ;;  %14119 = vst [vmem:[#allocation98_spill] sm:$0xff] %v10418_v49  ;;  %14127 = vst [vmem:[#allocation106_spill] sm:$0xff] %v10454_v41  ;;  %v10480_v41 = vstv %s10326_s8  ;;  %s10633_s8 = sld [smem:[#allocation2 + $0x33]] }
 0x1b3   :  { %7601 = vmatprep.subr.bf16.mxu0 %v7600_v27  ;;  %7857 = vmatprep.subr.bf16.mxu1 %v7600_v27  ;;  %v10258_v27 = vstv %s10148_s3  ;;  %s10284_s3 = sld [smem:[#allocation2 + $0xb]]  ;;  %14129 = vst [vmem:[#allocation108_spill] sm:$0xff] %v10460_v62  ;;  %14133 = vst [vmem:[#allocation112_spill] sm:$0xff] %v10480_v41  ;;  %v476_v41 = vsel %vm469_vm0, %v10093_v45, %v10104_v55 }
 0x1b4   :  { %v10112_v1 = vpop.permute.xlu1 %467  ;;  %v10114_v2 = vpop.permute.xlu0 %400  ;;  %14094 = vst [vmem:[#allocation76_spill] sm:$0xff] %v10258_v27  ;;  %14142 = vst [vmem:[#allocation120_spill] sm:$0xff] %v10527_v29  ;;  %v10555_v29 = vstv %s10428_s2  ;;  %s10669_s2 = sld [smem:[#allocation2 + $0x35]] }
 0x1b5   :  { %14077 = vst [vmem:[#allocation60_spill] sm:$0xff] %v10112_v1  ;;  %14078 = vst [vmem:[#allocation61_spill] sm:$0xff] %v10114_v2  ;;  %7603 = vmatpush1.bf16.msra.mxu0 %v7602_v28  ;;  %7859 = vmatpush1.bf16.msra.mxu1 %v7602_v28  ;;  %v10261_v28 = vstv %s10150_s28  ;;  %s10306_s28 = sld [smem:[#allocation2 + $0x26]] }
 0x1b6   :  { %1386 = vrot.lane.b32.xlu0 %v10052_v50, %s13563_s11  ;;  %1420 = vrot.lane.b32.xlu1 %v10062_v58, %s13561_s4  ;;  %14095 = vst [vmem:[#allocation77_spill] sm:$0xff] %v10261_v28  ;;  %s10270_s11 = sld [smem:[#allocation2 + $0xa]]  ;;  %14151 = vst [vmem:[#allocation126_spill] sm:$0xff] %v10555_v29 }
 0x1b7   :  { %7605 = vmatprep.subr.bf16.mxu0 %v7604_v34  ;;  %7861 = vmatprep.subr.bf16.mxu1 %v7604_v34  ;;  %v10331_v34 = vstv %s10170_s26  ;;  %s10365_s26 = sld [smem:[#allocation2 + $0x29]] }
 0x1b8   :  { %v10120_v22 = vpop.permute.xlu1 %520  ;;  %v10122_v24 = vpop.permute.xlu0 %518  ;;  %14103 = vst [vmem:[#allocation85_spill] sm:$0xff] %v10331_v34 }
 0x1b9   :  { %14079 = vst [vmem:[#allocation62_spill] sm:$0xff] %v10120_v22  ;;  %7607 = vmatpush1.bf16.msra.mxu0 %v7606_v36  ;;  %7863 = vmatpush1.bf16.msra.mxu1 %v7606_v36  ;;  %v10290_v36 = vstv %s10152_s24  ;;  %s10308_s24 = sld [smem:[#allocation2 + $0xc]] }
 0x1ba   :  { %1422 = vrot.lane.b32.xlu0 %v10102_v52, %s13561_s4  ;;  %1418 = vrot.lane.b32.xlu1 %v10052_v50, %s13561_s4  ;;  %s10252_s4 = sld [smem:[#allocation2 + $0x9]]  ;;  %14097 = vst [vmem:[#allocation79_spill] sm:$0xff] %v10290_v36 }
 0x1bb   :  { %7609 = vmatprep.subr.bf16.mxu0 %v7608_v47  ;;  %7865 = vmatprep.subr.bf16.mxu1 %v7608_v47 }
 0x1bc   :  { %v10128_v31 = vpop.permute.xlu1 %583  ;;  %v10130_v32 = vpop.permute.xlu0 %532 }
 0x1bd   :  { %14080 = vst [vmem:[#allocation63_spill] sm:$0xff] %v10130_v32  ;;  %7611 = vmatpush1.bf16.msra.mxu0 %v7610_v48  ;;  %7867 = vmatpush1.bf16.msra.mxu1 %v7610_v48  ;;  %v10313_v48 = vrot.slane %v10186_v61, %v10226_v10  ;;  %v10502_v62 = vstv %s10365_s26  ;;  %s10651_s26 = sld [smem:[#allocation2 + $0x19]] }
 0x1be   :  { %1452 = vrot.lane.b32.xlu0 %v10062_v58, %s13559_s21  ;;  %1454 = vrot.lane.b32.xlu1 %v10102_v52, %s13559_s21  ;;  %14136 = vst [vmem:[#allocation114_spill] sm:$0xff] %v10502_v62  ;;  %v10521_v62 = vstv %s10367_s20  ;;  %s10653_s20 = sld [smem:[#allocation2 + $0x34]] }
 0x1bf   :  { %14140 = vst [vmem:[#allocation118_spill] sm:$0xff] %v10521_v62 }
 0x1c0   :  { %v10142_v39 = vpop.permute.xlu1 %597  ;;  %v10144_v40 = vpop.permute.xlu0 %585  ;;  %v10445_v3 = vstv %s10252_s4  ;;  %s10466_s4 = sld [smem:[#allocation2 + $0x13]] }
 0x1c1   :  { %14081 = vst [vmem:[#allocation64_spill] sm:$0xff] %v10142_v39  ;;  %14082 = vst [vmem:[#allocation65_spill] sm:$0xff] %v10144_v40 }
 0x1c2   :  { %1450 = vrot.lane.b32.xlu0 %v10052_v50, %s13559_s21  ;;  %1484 = vrot.lane.b32.xlu1 %v10062_v58, %s13557_s10  ;;  %s10250_s21 = sld [smem:[#allocation2 + $0x23]]  ;;  %14124 = vst [vmem:[#allocation103_spill] sm:$0xff] %v10445_v3  ;;  %v10471_v3 = vstv %s10284_s3  ;;  %s14149_s3 = smov 127  }
 0x1c3   :  { %14130 = vst [vmem:[#allocation109_spill] sm:$0xff] %v10471_v3 }
 0x1c4   :  { %v10172_v58 = vpop.permute.xlu0 %650  ;;  %v10176_v57 = vpop.permute.xlu1 %652 }
 0x1c5   :  { %14086 = vst [vmem:[#allocation68_spill] sm:$0xff] %v10176_v57 }
 0x1c6   :  { %1486 = vrot.lane.b32.xlu0 %v10102_v52, %s13557_s10  ;;  %1482 = vrot.lane.b32.xlu1 %v10052_v50, %s13557_s10  ;;  %v10223_v50 = vrot.slane %v10179_v60, %v10166_v51  ;;  %s10234_s10 = sld [smem:[#allocation2 + $0x8]]  ;;  %v10422_v60 = vrot.slane %v10341_v12, %v9922_v7  ;;  %v10442_v12 = vrot.slane %v9916_v4, %v9922_v7 }
 0x1c7   :  { %v10464_v4 = vcombine.high %v10022_v23, %v10022_v23 }
 0x1c8   :  { %v10228_v13 = vpop.permute.xlu0 %648  ;;  %v10230_v17 = vpop.permute.xlu1 %715  ;;  %14120 = vst [vmem:[#allocation99_spill] sm:$0xff] %v10422_v60  ;;  %v10438_v35 = vstv %s10250_s21  ;;  %s10468_s21 = sld [smem:[#allocation2 + $0x2e]]  ;;  %v10536_v60 = vcombine.high %v10102_v52, %v10102_v52 }
 0x1c9   :  { %14090 = vst [vmem:[#allocation72_spill] sm:$0xff] %v10228_v13  ;;  %14123 = vst [vmem:[#allocation102_spill] sm:$0xff] %v10438_v35  ;;  %v10474_v35 = vstv %s10306_s28  ;;  %s10613_s28 = sld [smem:[#allocation2 + $0x18]] }
 0x1ca   :  { %390 = vrot.lane.b32.xlu0 %v9954_v14, %s13567_s25  ;;  %392 = vrot.lane.b32.xlu1 %v10208_v8, %s13567_s25  ;;  %s10328_s25 = sld [smem:[#allocation2 + $0xe]]  ;;  %14131 = vst [vmem:[#allocation110_spill] sm:$0xff] %v10474_v35  ;;  %v411_v35 = vsel %vm404_vm1, %v10095_v46, %v10106_v56  ;;  %14144 = vst [vmem:[#allocation122_spill] sm:$0xff] %v10536_v60 }
 0x1cc   :  { %v10302_v44 = vpop.permute.xlu0 %717  ;;  %v10304_v47 = vpop.permute.xlu1 %713  ;;  %v10435_v61 = vstv %s10234_s10  ;;  %s10488_s10 = sld [smem:[#allocation2 + $0x14]] }
 0x1cd   :  { %14100 = vst [vmem:[#allocation82_spill] sm:$0xff] %v10302_v44  ;;  %14101 = vst [vmem:[#allocation83_spill] sm:$0xff] %v10304_v47 }
 0x1ce   :  { %457 = vrot.lane.b32.xlu0 %v9954_v14, %s13597_s29  ;;  %459 = vrot.lane.b32.xlu1 %v10208_v8, %s13597_s29  ;;  %s10406_s29 = sld [smem:[#allocation2 + $0x2b]]  ;;  %14122 = vst [vmem:[#allocation101_spill] sm:$0xff] %v10435_v61  ;;  %v10457_v61 = vstv %s10270_s11  ;;  %s14134_s11 = smov 1  }
 0x1cf   :  { %14128 = vst [vmem:[#allocation107_spill] sm:$0xff] %v10457_v61  ;;  %v10506_v61 = vrot.slane %v9971_v16, %v9922_v7  ;;  %v10524_v16 = vstv %s10389_s14  ;;  %s14166_s14 = smov 96  }
 0x1d0   :  { %v10385_v10 = vpop.permute.xlu0 %780  ;;  %v10387_v63 = vpop.permute.xlu1 %782  ;;  %14141 = vst [vmem:[#allocation119_spill] sm:$0xff] %v10524_v16  ;;  %v511_v16 = vmul.f32 %v10219_v6, %v476_v41  ;;  %v412_v41 = vsel %vm404_vm1, %v10114_v2, %v10095_v46  ;;  %v10588_v46 = vstv %s10466_s4  ;;  %v10591_v2 = vstv %s10468_s21  ;;  %s10710_s4 = sld [smem:[#allocation6 + $0x1]]  ;;  %s14176_s21 = smov 33  }
 0x1d1   :  { %14111 = vst [vmem:[#allocation91_spill] sm:$0xff] %v10385_v10  ;;  %14112 = vst [vmem:[#allocation92_spill] sm:$0xff] %v10387_v63  ;;  %v10412_v10 = vstv %s10232_s18  ;;  %s10430_s18 = sld [smem:[#allocation2 + $0x12]] }
 0x1d2   :  { %14117 = vst [vmem:[#allocation97_spill] sm:$0xff] %v10412_v10  ;;  %522 = vrot.lane.b32.xlu0 %v9954_v14, %s14118_s1  ;;  %524 = vrot.lane.b32.xlu1 %v10208_v8, %s14118_s1  ;;  %14137 = vst [vmem:[#allocation115_spill] sm:$0xff] %v10506_v61  ;;  %v1535_v29 = vmul.f32 %v10237_v0, %v511_v16 }
 0x1d3   :  { %14155 = vst [vmem:[#allocation130_spill] sm:$0xff] %v10588_v46  ;;  %14156 = vst [vmem:[#allocation131_spill] sm:$0xff] %v10591_v2 }
 0x1d4   :  { %v10449_v10 = vpop.permute.xlu0 %778  ;;  %v10451_v49 = vpop.permute.xlu1 %845 }
 0x1d5   :  { %14125 = vst [vmem:[#allocation104_spill] sm:$0xff] %v10449_v10  ;;  %14126 = vst [vmem:[#allocation105_spill] sm:$0xff] %v10451_v49  ;;  %v10477_v49 = vstv %s10308_s24  ;;  %s14160_s24 = smov 97  }
 0x1d6   :  { %14132 = vst [vmem:[#allocation111_spill] sm:$0xff] %v10477_v49  ;;  %587 = vrot.lane.b32.xlu0 %v9954_v14, %s14134_s11  ;;  %589 = vrot.lane.b32.xlu1 %v10208_v8, %s14134_s11  ;;  %v10499_v14 = vstv %s10328_s25  ;;  %s10529_s25 = sld [smem:[#allocation2 + $0x30]]  ;;  %v14145_v49 = vstv %s10348_s16 }
 0x1d7   :  { %14135 = vst [vmem:[#allocation113_spill] sm:$0xff] %v10499_v14  ;;  %v10532_v14 = vstv %s10406_s29  ;;  %v10541_v56 = vmul.f32 %v10041_v42, %v14145_v49  ;;  %v10558_v62 = vstv %s10430_s18  ;;  %s10560_s29 = sld [smem:[#allocation2 + $0x17]]  ;;  %v446_v49 = vmul.f32 %v10223_v50, %v411_v35  ;;  %s10678_s18 = sld [smem:[#allocation6]] }
 0x1d8   :  { %v10516_v3 = vpop.permute.xlu0 %847  ;;  %v10518_v55 = vpop.permute.xlu1 %843  ;;  %14143 = vst [vmem:[#allocation121_spill] sm:$0xff] %v10532_v14  ;;  %v10552_v14 = vstv %s10408_s5  ;;  %14152 = vst [vmem:[#allocation127_spill] sm:$0xff] %v10558_v62  ;;  %s10578_s5 = sld [smem:[#allocation2 + $0x32]]  ;;  %v542_v62 = vsel %vm534_vm2, %v10130_v32, %v10122_v24 }
 0x1d9   :  { %14138 = vst [vmem:[#allocation116_spill] sm:$0xff] %v10516_v3  ;;  %14139 = vst [vmem:[#allocation117_spill] sm:$0xff] %v10518_v55  ;;  %v14147_v3 = vstv %s10350_s15  ;;  %v10607_v46 = vrot.slane %v10541_v56, %v9922_v7 }
 0x1da   :  { %14146 = vst [vmem:[#allocation123_spill] sm:$0xff] %v10541_v56  ;;  %v10546_v55 = vmul.f32 %v10041_v42, %v14147_v3  ;;  %654 = vrot.lane.b32.xlu0 %v10208_v8, %s14149_s3  ;;  %14150 = vst [vmem:[#allocation125_spill] sm:$0xff] %v10552_v14  ;;  %v477_v42 = vsel %vm469_vm0, %v10112_v1, %v10093_v45  ;;  %v541_v3 = vsel %vm534_vm2, %v10122_v24, %v10120_v22 }
 0x1db   :  { %656 = vrot.lane.b32.xlu1 %v10442_v12, %s14149_s3  ;;  %v10585_v1 = vstv %s10447_s7  ;;  %v10595_v22 = vrot.slane %v10044_v43, %v9922_v7  ;;  %14158 = vst [vmem:[#allocation133_spill] sm:$0xff] %v10607_v46  ;;  %v510_v43 = vmul.f32 %v10241_v18, %v477_v42  ;;  %v445_v24 = vmul.f32 %v10245_v19, %v412_v41  ;;  %s14172_s7 = smov 95  }
 0x1dc   :  { %14148 = vst [vmem:[#allocation124_spill] sm:$0xff] %v10546_v55  ;;  %v10580_v35 = vpop.permute.xlu0 %955  ;;  %v10582_v45 = vpop.permute.xlu1 %957  ;;  %14154 = vst [vmem:[#allocation129_spill] sm:$0xff] %v10585_v1  ;;  %v606_v1 = vsel %vm599_vm3, %v10128_v31, %v10144_v40  ;;  %v10611_v2 = vrot.slane %v10546_v55, %v9922_v7  ;;  %v576_v32 = vmul.f32 %v10297_v38, %v541_v3  ;;  %v10621_v40 = vstv %s10488_s10  ;;  %s14186_s10 = smov 32  }
 0x1dd   :  { %14153 = vst [vmem:[#allocation128_spill] sm:$0xff] %v10582_v45  ;;  %14157 = vst [vmem:[#allocation132_spill] sm:$0xff] %v10595_v22  ;;  %v1517_v14 = vmul.f32 %v10258_v27, %v446_v49  ;;  %v10628_v55 = vstv %s10508_s22  ;;  %v10631_v42 = vstv %s10510_s23  ;;  %v575_v41 = vmul.f32 %v10313_v48, %v542_v62  ;;  %s14833_s22 = sld [smem:[#allocation42_spill]]  ;;  %s9621_s23 = smov 64  }
 0x1de   :  { %14159 = vst [vmem:[#allocation134_spill] sm:$0xff] %v10611_v2  ;;  %719 = vrot.lane.b32.xlu0 %v10208_v8, %s14160_s24  ;;  %14161 = vst [vmem:[#allocation135_spill] sm:$0xff] %v10621_v40  ;;  %v607_v3 = vsel %vm599_vm3, %v10142_v39, %v10128_v31  ;;  %v641_v40 = vmul.f32 %v10321_v53, %v606_v1  ;;  %v10646_v52 = vstv %s10529_s25  ;;  %s14834_s25 = sld [smem:[#allocation43_spill]] }
 0x1df   :  { %721 = vrot.lane.b32.xlu1 %v10442_v12, %s14160_s24  ;;  %14162 = vst [vmem:[#allocation136_spill] sm:$0xff] %v10628_v55  ;;  %14163 = vst [vmem:[#allocation137_spill] sm:$0xff] %v10631_v42  ;;  %v2153_v42 = vmul.f32 %v10255_v26, %v511_v16  ;;  %v2135_v55 = vmul.f32 %v10261_v28, %v446_v49  ;;  %v1534_v62 = vmul.f32 %v10237_v0, %v510_v43 }
 0x1e0   :  { %v10641_v56 = vpop.permute.xlu0 %969  ;;  %v10643_v60 = vpop.permute.xlu1 %987  ;;  %14165 = vst [vmem:[#allocation139_spill] sm:$0xff] %v10646_v52  ;;  %v1516_v39 = vmul.f32 %v10258_v27, %v445_v24  ;;  %v1553_v16 = vmul.f32 %v10290_v36, %v576_v32  ;;  %v10665_v49 = vstv %s10560_s29  ;;  %v1543_v52 = vadd.f32 %v1535_v29, %v1517_v14 }
 0x1e1   :  { %14164 = vst [vmem:[#allocation138_spill] sm:$0xff] %v10641_v56  ;;  %14167 = vst [vmem:[#allocation140_spill] sm:$0xff] %v10665_v49  ;;  %v2171_v1 = vmul.f32 %v10293_v37, %v576_v32  ;;  %v640_v31 = vmul.f32 %v10317_v54, %v607_v3  ;;  %v10676_v0 = vstv %s10578_s5  ;;  %v2152_v27 = vmul.f32 %v10255_v26, %v510_v43 }
 0x1e2   :  { %784 = vrot.lane.b32.xlu0 %v10208_v8, %s14166_s14  ;;  %14168 = vst [vmem:[#allocation141_spill] sm:$0xff] %v10676_v0  ;;  %v2134_v2 = vmul.f32 %v10261_v28, %v445_v24  ;;  %v1552_v49 = vmul.f32 %v10290_v36, %v575_v41  ;;  %v1571_v29 = vmul.f32 %v10331_v34, %v641_v40  ;;  %v10695_v43 = vstv %s10613_s28  ;;  %v2815_v24 = vld [vmem:[#allocation8 + $0x208] sm:$0xff]  ;;  %v2817_v36 = vld [vmem:[#allocation8 + $0x218] sm:$0xff] }
 0x1e3   :  { %786 = vrot.lane.b32.xlu1 %v10442_v12, %s14166_s14  ;;  %v2161_v3 = vadd.f32 %v2153_v42, %v2135_v55  ;;  %v2189_v46 = vmul.f32 %v10334_v5, %v641_v40  ;;  %v10692_v0 = vcombine.high %v10442_v12, %v10442_v12  ;;  %14171 = vst [vmem:[#allocation144_spill] sm:$0xff] %v10695_v43  ;;  %v14210_v43 = vld [vmem:[#allocation105_spill] sm:$0xff] }
 0x1e4   :  { %v10684_v14 = vpop.permute.xlu0 %989  ;;  %v10686_v32 = vpop.permute.xlu1 %1001  ;;  %v1542_v26 = vadd.f32 %v1534_v62, %v1516_v39  ;;  %v1561_v28 = vadd.f32 %v1553_v16, %v1543_v52  ;;  %v2170_v22 = vmul.f32 %v10293_v37, %v575_v41  ;;  %v670_v55 = vsel %vm664_vm4, %v10172_v58, %v10176_v57 }
 0x1e5   :  { %14169 = vst [vmem:[#allocation142_spill] sm:$0xff] %v10684_v14  ;;  %14170 = vst [vmem:[#allocation143_spill] sm:$0xff] %v10686_v32  ;;  %v2179_v40 = vadd.f32 %v2171_v1, %v2161_v3  ;;  %v1570_v42 = vmul.f32 %v10331_v34, %v640_v31  ;;  %v10708_v52 = vstv %s10633_s8  ;;  %v7612_v39 = vpack.c.bf16 %v2817_v36, %v2815_v24  ;;  %v10718_v3 = vld [vmem:[%s14083_s6 + $0x10] sm:$0xff]  ;;  %v10721_v34 = vld [vmem:[%s14083_s6 + $0x18] sm:$0xff] }
 0x1e6   :  { %849 = vrot.lane.b32.xlu0 %v10208_v8, %s14172_s7  ;;  %14173 = vst [vmem:[#allocation145_spill] sm:$0xff] %v10708_v52  ;;  %v2160_v41 = vadd.f32 %v2152_v27, %v2134_v2  ;;  %v1560_v62 = vadd.f32 %v1552_v49, %v1542_v26  ;;  %v2188_v16 = vmul.f32 %v10334_v5, %v640_v31  ;;  %v10729_v26 = vstv %s10651_s26 }
 0x1e7   :  { %851 = vrot.lane.b32.xlu1 %v10442_v12, %s14172_s7  ;;  %v1579_v57 = vadd.f32 %v1571_v29, %v1561_v28  ;;  %v2197_v37 = vadd.f32 %v2189_v46, %v2179_v40  ;;  %v706_v36 = vmul.f32 %v10361_v21, %v670_v55  ;;  %v671_v2 = vsel %vm664_vm4, %v10228_v13, %v10172_v58 }
 0x1e8   :  { %v10713_v8 = vpop.permute.xlu0 %1019  ;;  %v10715_v1 = vpop.permute.xlu1 %1021  ;;  %14175 = vst [vmem:[#allocation147_spill] sm:$0xff] %v10729_v26  ;;  %7613 = vmatprep.subr.bf16.mxu0 %v7612_v39  ;;  %7869 = vmatprep.subr.bf16.mxu1 %v7612_v39  ;;  %v2178_v27 = vadd.f32 %v2170_v22, %v2160_v41  ;;  %v10735_v28 = vstv %s10653_s20  ;;  %v10738_v46 = vstv %s10667_s30  ;;  %v10741_v31 = vstv %s10669_s2  ;;  %s14835_s2 = sld [smem:[#allocation44_spill]] }
 0x1e9   :  { %14174 = vst [vmem:[#allocation146_spill] sm:$0xff] %v10715_v1  ;;  %14177 = vst [vmem:[#allocation148_spill] sm:$0xff] %v10735_v28  ;;  %v1578_v49 = vadd.f32 %v1570_v42, %v1560_v62  ;;  %v10747_v58 = vrot.slane %v10718_v3, %v10166_v51  ;;  %v10751_v22 = vrot.slane %v10721_v34, %v10166_v51  ;;  %v10754_v29 = vstv %s10678_s18 }
 0x1ea   :  { %959 = vrot.lane.b32.xlu0 %v10022_v23, %s14176_s21  ;;  %14178 = vst [vmem:[#allocation149_spill] sm:$0xff] %v10738_v46  ;;  %14179 = vst [vmem:[#allocation150_spill] sm:$0xff] %v10741_v31  ;;  %v2196_v24 = vadd.f32 %v2188_v16, %v2178_v27  ;;  %v14183_v55 = vcombine.high %v10274_v30, %v10274_v30  ;;  %v705_v42 = vmul.f32 %v10375_v59, %v671_v2 }
 0x1eb   :  { %961 = vrot.lane.b32.xlu1 %v10464_v4, %s14176_s21  ;;  %14180 = vst [vmem:[#allocation151_spill] sm:$0xff] %v10747_v58  ;;  %14181 = vst [vmem:[#allocation152_spill] sm:$0xff] %v10751_v22  ;;  %v735_v39 = vsel %vm729_vm5, %v10230_v17, %v10302_v44  ;;  %v1645_v13 = vmul.f32 %v10355_v11, %v706_v36  ;;  %v14185_v16 = vcombine.high %v10278_v33, %v10278_v33 }
 0x1ec   :  { %14182 = vst [vmem:[#allocation153_spill] sm:$0xff] %v10754_v29  ;;  %v1635_v40 = vadd.f32 %v14183_v55, %v1579_v57  ;;  %v10764_v41 = vpop.permute.xlu0 %1033  ;;  %v10766_v62 = vpop.permute.xlu1 %1051  ;;  %v2263_v57 = vmul.f32 %v10371_v15, %v706_v36  ;;  %v736_v2 = vsel %vm729_vm5, %v10304_v47, %v10230_v17  ;;  %v14187_v55 = vld [vmem:[#allocation66_spill] sm:$0xff]  ;;  %v14190_v29 = vld [vmem:[#allocation69_spill] sm:$0xff]  ;;  %v771_v22 = vmul.f32 %v10379_v25, %v735_v39  ;;  %v14192_v17 = vld [vmem:[#allocation71_spill] sm:$0xff] }
 0x1ed   :  { %14184 = vst [vmem:[#allocation154_spill] sm:$0xff] %v10764_v41  ;;  %v2253_v27 = vadd.f32 %v14185_v16, %v2197_v37  ;;  %v10781_v44 = vrot.slane %v10718_v3, %v14187_v55  ;;  %v10785_v5 = vrot.slane %v10721_v34, %v14187_v55  ;;  %v1592_v37 = vcombine.high %v14190_v29, %v14190_v29  ;;  %v14191_v36 = vld [vmem:[#allocation70_spill] sm:$0xff]  ;;  %v14196_v39 = vld [vmem:[#allocation91_spill] sm:$0xff] }
 0x1ee   :  { %991 = vrot.lane.b32.xlu0 %v10022_v23, %s14186_s10  ;;  %v2210_v16 = vcombine.high %v14191_v36, %v14191_v36  ;;  %v10796_v47 = vrot.slane %v10718_v3, %v14192_v17  ;;  %v1644_v29 = vmul.f32 %v10355_v11, %v705_v42  ;;  %v2262_v58 = vmul.f32 %v10371_v15, %v705_v42  ;;  %v14199_v42 = vld [vmem:[#allocation74_spill] sm:$0xff] }
 0x1ef   :  { %14188 = vst [vmem:[#allocation155_spill] sm:$0xff] %v10781_v44  ;;  %14189 = vst [vmem:[#allocation156_spill] sm:$0xff] %v10785_v5  ;;  %993 = vrot.lane.b32.xlu1 %v10464_v4, %s14186_s10  ;;  %v10800_v44 = vrot.slane %v10721_v34, %v14192_v17  ;;  %v10803_v5 = vstv %s10710_s4  ;;  %v770_v36 = vmul.f32 %v10383_v20, %v736_v2 }
 0x1f0   :  { %14193 = vst [vmem:[#allocation69_spill] sm:$0xff] %v10796_v47  ;;  %14195 = vst [vmem:[#allocation157_spill] sm:$0xff] %v10803_v5  ;;  %v800_v31 = vsel %vm794_vm6, %v14196_v39, %v10387_v63  ;;  %v10812_v46 = vpop.permute.xlu0 %1053  ;;  %v10814_v47 = vpop.permute.xlu1 %1065  ;;  %v1653_v28 = vadd.f32 %v1645_v13, %v1635_v40  ;;  %v2271_v26 = vadd.f32 %v2263_v57, %v2253_v27 }
 0x1f1   :  { %14194 = vst [vmem:[#allocation70_spill] sm:$0xff] %v10800_v44  ;;  %14197 = vst [vmem:[#allocation91_spill] sm:$0xff] %v10812_v46  ;;  %v1634_v44 = vadd.f32 %v10274_v30, %v1578_v49  ;;  %v2252_v5 = vadd.f32 %v10278_v33, %v2196_v24  ;;  %v10822_v2 = vrot.slane %v10718_v3, %v14199_v42  ;;  %v14204_v30 = vld [vmem:[#allocation93_spill] sm:$0xff]  ;;  %v14205_v49 = vld [vmem:[#allocation96_spill] sm:$0xff] }
 0x1f2   :  { %14198 = vst [vmem:[#allocation158_spill] sm:$0xff] %v10814_v47  ;;  %1023 = vrot.lane.b32.xlu0 %v10022_v23, %s14118_s1  ;;  %v10826_v63 = vrot.slane %v10721_v34, %v14199_v42  ;;  %v10829_v15 = vrot.slane %v1592_v37, %v9922_v7  ;;  %v10832_v13 = vrot.slane %v2210_v16, %v9922_v7  ;;  %v14207_v16 = vld [vmem:[#allocation94_spill] sm:$0xff] }
 0x1f3   :  { %14200 = vst [vmem:[#allocation159_spill] sm:$0xff] %v10822_v2  ;;  %v1663_v33 = vmul.f32 %v14204_v30, %v771_v22  ;;  %v836_v24 = vmul.f32 %v14205_v49, %v800_v31  ;;  %v801_v40 = vsel %vm794_vm6, %v10449_v10, %v14196_v39  ;;  %1025 = vrot.lane.b32.xlu1 %v10464_v4, %s14118_s1  ;;  %v10854_v39 = vld [vmem:[%s14083_s6 + $0x48] ss:$0 sm:$0xff]  ;;  %v14209_v10 = vld [vmem:[#allocation116_spill] sm:$0xff] }
 0x1f4   :  { %14201 = vst [vmem:[#allocation160_spill] sm:$0xff] %v10826_v63  ;;  %14202 = vst [vmem:[#allocation161_spill] sm:$0xff] %v10829_v15  ;;  %v10844_v27 = vcombine.high %v10506_v61, %v10506_v61  ;;  %v1652_v57 = vadd.f32 %v1644_v29, %v1634_v44  ;;  %v2270_v37 = vadd.f32 %v2262_v58, %v2252_v5  ;;  %v10848_v31 = vpop.permute.xlu0 %1085  ;;  %v10850_v2 = vpop.permute.xlu1 %1087  ;;  %v14214_v58 = vld [vmem:[#allocation98_spill] sm:$0xff]  ;;  %v2819_v15 = vld [vmem:[#allocation8 + $0x228] sm:$0xff] }
 0x1f5   :  { %14203 = vst [vmem:[#allocation162_spill] sm:$0xff] %v10832_v13  ;;  %v2281_v11 = vmul.f32 %v14207_v16, %v771_v22  ;;  %v1662_v63 = vmul.f32 %v14204_v30, %v770_v36  ;;  %14208 = vst [vmem:[#allocation163_spill] sm:$0xff] %v10850_v2  ;;  %v2280_v52 = vmul.f32 %v14207_v16, %v770_v36  ;;  %v10870_v29 = vld [vmem:[%s14083_s6 + $0x40] ss:$0 sm:$0xff]  ;;  %v14215_v36 = vld [vmem:[#allocation117_spill] sm:$0xff] }
 0x1f6   :  { %14206 = vst [vmem:[#allocation96_spill] sm:$0xff] %v10844_v27  ;;  %v865_v42 = vsel %vm859_vm7, %v14210_v43, %v14209_v10  ;;  %v14211_v27 = vld [vmem:[#allocation78_spill] sm:$0xff]  ;;  %v835_v22 = vmul.f32 %v14214_v58, %v801_v40  ;;  %v866_v16 = vsel %vm859_vm7, %v14215_v36, %v14210_v43  ;;  %1055 = vrot.lane.b32.xlu0 %v10022_v23, %s14134_s11  ;;  %v14217_v40 = vld [vmem:[#allocation97_spill] sm:$0xff] }
 0x1f7   :  { %v10862_v5 = vrot.slane %v10718_v3, %v14211_v27  ;;  %v10866_v44 = vrot.slane %v10721_v34, %v14211_v27  ;;  %v2299_v17 = vmul.f32 %v14217_v40, %v836_v24  ;;  %v977_v55 = vsel %vm404_vm1, %v10580_v35, %v10582_v45  ;;  %1057 = vrot.lane.b32.xlu1 %v10464_v4, %s14134_s11  ;;  %v14219_v45 = vld [vmem:[#allocation81_spill] sm:$0xff] }
 0x1f8   :  { %v2289_v23 = vadd.f32 %v2281_v11, %v2271_v26  ;;  %v1670_v43 = vadd.f32 %v1662_v63, %v1652_v57  ;;  %v901_v10 = vmul.f32 %v10854_v39, %v865_v42  ;;  %v2288_v30 = vadd.f32 %v2280_v52, %v2270_v37 }
 0x1f9   :  { %14212 = vst [vmem:[#allocation105_spill] sm:$0xff] %v10862_v5  ;;  %14213 = vst [vmem:[#allocation164_spill] sm:$0xff] %v10866_v44  ;;  %v1671_v5 = vadd.f32 %v1663_v33, %v1653_v28  ;;  %v14216_v44 = vld [vmem:[#allocation95_spill] sm:$0xff]  ;;  %v978_v28 = vsel %vm404_vm1, %v10641_v56, %v10580_v35  ;;  %v10895_v33 = vpop.permute.xlu0 %1083  ;;  %v900_v36 = vmul.f32 %v10870_v29, %v866_v16  ;;  %v14223_v56 = vld [vmem:[#allocation102_spill] sm:$0xff] }
 0x1fa   :  { %v1681_v27 = vmul.f32 %v14216_v44, %v836_v24  ;;  %14218 = vst [vmem:[#allocation98_spill] sm:$0xff] %v10895_v33  ;;  %v10897_v24 = vpop.permute.xlu1 %1117  ;;  %v10902_v13 = vrot.slane %v10718_v3, %v14219_v45  ;;  %v10906_v11 = vrot.slane %v10721_v34, %v14219_v45  ;;  %v1680_v63 = vmul.f32 %v14216_v44, %v835_v22 }
 0x1fb   :  { %v2298_v26 = vmul.f32 %v14217_v40, %v835_v22  ;;  %v980_v35 = vmul.f32 %v977_v55, %v10223_v50  ;;  %v1009_v52 = vsel %vm469_vm0, %v10643_v60, %v10684_v14  ;;  %1089 = vrot.lane.b32.xlu0 %v10464_v4, %s14149_s3  ;;  %v2307_v57 = vadd.f32 %v2299_v17, %v2289_v23  ;;  %v14222_v55 = vld [vmem:[#allocation101_spill] sm:$0xff] }
 0x1fc   :  { %14220 = vst [vmem:[#allocation165_spill] sm:$0xff] %v10902_v13  ;;  %14221 = vst [vmem:[#allocation166_spill] sm:$0xff] %v10906_v11  ;;  %v1689_v42 = vadd.f32 %v1681_v27, %v1671_v5  ;;  %v979_v37 = vmul.f32 %v978_v28, %v10245_v19  ;;  %v1010_v16 = vsel %vm469_vm0, %v10686_v32, %v10643_v60  ;;  %1091 = vrot.lane.b32.xlu1 %v10506_v61, %s14149_s3  ;;  %v14226_v27 = vld [vmem:[#allocation84_spill] sm:$0xff]  ;;  %v14229_v13 = vld [vmem:[#allocation103_spill] sm:$0xff] }
 0x1fd   :  { %v1699_v22 = vmul.f32 %v14222_v55, %v901_v10  ;;  %v2317_v40 = vmul.f32 %v14223_v56, %v901_v10  ;;  %v10926_v14 = vpop.permute.xlu0 %1119  ;;  %v10932_v17 = vrot.slane %v10718_v3, %v14226_v27  ;;  %v10936_v5 = vrot.slane %v10721_v34, %v14226_v27  ;;  %v14230_v34 = vld [vmem:[#allocation106_spill] sm:$0xff]  ;;  %v14240_v27 = vld [vmem:[#allocation111_spill] sm:$0xff] }
 0x1fe   :  { %14224 = vst [vmem:[#allocation167_spill] sm:$0xff] %v10926_v14  ;;  %v10928_v44 = vpop.permute.xlu1 %1115  ;;  %v1698_v60 = vmul.f32 %v14222_v55, %v900_v36  ;;  %v2316_v23 = vmul.f32 %v14223_v56, %v900_v36  ;;  %v1012_v28 = vmul.f32 %v1009_v52, %v10219_v6  ;;  %v1041_v10 = vsel %vm534_vm2, %v10713_v8, %v10715_v1 }
 0x1ff   :  { %14225 = vst [vmem:[#allocation168_spill] sm:$0xff] %v10928_v44  ;;  %14227 = vst [vmem:[#allocation169_spill] sm:$0xff] %v10932_v17  ;;  %v1688_v32 = vadd.f32 %v1680_v63, %v1670_v43  ;;  %v2306_v11 = vadd.f32 %v2298_v26, %v2288_v30  ;;  %v1717_v3 = vmul.f32 %v14229_v13, %v980_v35  ;;  %1121 = vrot.lane.b32.xlu0 %v10464_v4, %s14160_s24 }
 0x200   :  { %14228 = vst [vmem:[#allocation170_spill] sm:$0xff] %v10936_v5  ;;  %v1011_v17 = vmul.f32 %v1010_v16, %v10241_v18  ;;  %v2335_v55 = vmul.f32 %v14230_v34, %v980_v35  ;;  %v1716_v36 = vmul.f32 %v14229_v13, %v979_v37  ;;  %v1042_v52 = vsel %vm534_vm2, %v10764_v41, %v10713_v8  ;;  %v14232_v41 = vld [vmem:[#allocation107_spill] sm:$0xff] }
 0x201   :  { %v1073_v30 = vsel %vm599_vm3, %v10766_v62, %v10812_v46  ;;  %1123 = vrot.lane.b32.xlu1 %v10506_v61, %s14160_s24  ;;  %v1707_v43 = vadd.f32 %v1699_v22, %v1689_v42  ;;  %v2325_v63 = vadd.f32 %v2317_v40, %v2307_v57  ;;  %v2334_v26 = vmul.f32 %v14230_v34, %v979_v37  ;;  %v10963_v16 = vpop.permute.xlu0 %1149  ;;  %v2814_v5 = vld [vmem:[#allocation8 + $0x200] sm:$0xff]  ;;  %v2816_v42 = vld [vmem:[#allocation8 + $0x210] sm:$0xff] }
 0x202   :  { %v1044_v35 = vmul.f32 %v1041_v10, %v10297_v38  ;;  %v10965_v1 = vpop.permute.xlu1 %1151  ;;  %v1706_v13 = vadd.f32 %v1698_v60, %v1688_v32  ;;  %v2324_v8 = vadd.f32 %v2316_v23, %v2306_v11  ;;  %v1735_v56 = vmul.f32 %v14232_v41, %v1012_v28  ;;  %v14233_v40 = vld [vmem:[#allocation108_spill] sm:$0xff] }
 0x203   :  { %14231 = vst [vmem:[#allocation171_spill] sm:$0xff] %v10965_v1  ;;  %v1074_v46 = vsel %vm599_vm3, %v10814_v47, %v10766_v62  ;;  %v2353_v57 = vmul.f32 %v14233_v40, %v1012_v28  ;;  %v1734_v37 = vmul.f32 %v14232_v41, %v1011_v17  ;;  %v1043_v22 = vmul.f32 %v1042_v52, %v10313_v48  ;;  %v14234_v47 = vld [vmem:[#allocation109_spill] sm:$0xff] }
 0x204   :  { %v1076_v10 = vmul.f32 %v1073_v30, %v10321_v53  ;;  %1153 = vrot.lane.b32.xlu0 %v10464_v4, %s14166_s14  ;;  %v1725_v32 = vadd.f32 %v1717_v3, %v1707_v43  ;;  %v2343_v11 = vadd.f32 %v2335_v55, %v2325_v63  ;;  %v1724_v60 = vadd.f32 %v1716_v36, %v1706_v13  ;;  %v2821_v3 = vld [vmem:[#allocation8 + $0x238] sm:$0xff]  ;;  %v14239_v63 = vld [vmem:[#allocation88_spill] sm:$0xff] }
 0x205   :  { %v2352_v23 = vmul.f32 %v14233_v40, %v1011_v17  ;;  %1155 = vrot.lane.b32.xlu1 %v10506_v61, %s14166_s14  ;;  %v2342_v62 = vadd.f32 %v2334_v26, %v2324_v8  ;;  %v1753_v28 = vmul.f32 %v14234_v47, %v1044_v35  ;;  %v1075_v41 = vmul.f32 %v1074_v46, %v10317_v54  ;;  %v10983_v34 = vpop.permute.xlu0 %1147  ;;  %v14237_v13 = vld [vmem:[#allocation110_spill] sm:$0xff]  ;;  %v14238_v17 = vld [vmem:[#allocation87_spill] sm:$0xff] }
 0x206   :  { %14235 = vst [vmem:[#allocation172_spill] sm:$0xff] %v10983_v34  ;;  %v10985_v52 = vpop.permute.xlu1 %1181  ;;  %v10987_v30 = vpack.c.bf16 %v2816_v42, %v2814_v5  ;;  %v1743_v55 = vadd.f32 %v1735_v56, %v1725_v32  ;;  %v2371_v36 = vmul.f32 %v14237_v13, %v1044_v35  ;;  %v1792_v43 = vcombine.high %v14238_v17, %v14238_v17  ;;  %v14242_v32 = vld [vmem:[#allocation112_spill] sm:$0xff] }
 0x207   :  { %v2410_v26 = vcombine.high %v14239_v63, %v14239_v63  ;;  %v2361_v8 = vadd.f32 %v2353_v57, %v2343_v11  ;;  %v1742_v40 = vadd.f32 %v1734_v37, %v1724_v60  ;;  %v1752_v46 = vmul.f32 %v14234_v47, %v1043_v22  ;;  %v2818_v57 = vld [vmem:[#allocation8 + $0x220] sm:$0xff]  ;;  %v2820_v17 = vld [vmem:[#allocation8 + $0x230] sm:$0xff]  ;;  %v2823_v63 = vld [vmem:[#allocation8 + $0x248] sm:$0xff] }
 0x208   :  { %14236 = vst [vmem:[#allocation173_spill] sm:$0xff] %v10987_v30  ;;  %v1771_v45 = vmul.f32 %v14240_v27, %v1076_v10  ;;  %1185 = vrot.lane.b32.xlu0 %v10464_v4, %s14172_s7  ;;  %v2360_v5 = vadd.f32 %v2352_v23, %v2342_v62  ;;  %v2370_v56 = vmul.f32 %v14237_v13, %v1043_v22  ;;  %v14245_v22 = vld [vmem:[#allocation132_spill] sm:$0xff] }
 0x209   :  { %v1104_v35 = vsel %vm664_vm4, %v10848_v31, %v10850_v2  ;;  %1187 = vrot.lane.b32.xlu1 %v10506_v61, %s14172_s7  ;;  %v11005_v42 = vpack.c.bf16 %v2821_v3, %v2819_v15  ;;  %v1761_v37 = vadd.f32 %v1753_v28, %v1743_v55  ;;  %v2389_v11 = vmul.f32 %v14242_v32, %v1076_v10  ;;  %v11009_v4 = vpop.permute.xlu0 %1183  ;;  %v2825_v2 = vld [vmem:[#allocation8 + $0x258] sm:$0xff]  ;;  %v2822_v3 = vld [vmem:[#allocation8 + $0x240] sm:$0xff]  ;;  %v2824_v55 = vld [vmem:[#allocation8 + $0x250] sm:$0xff] }
 0x20a   :  { %v1770_v60 = vmul.f32 %v14240_v27, %v1075_v41  ;;  %14243 = vst [vmem:[#allocation88_spill] sm:$0xff] %v11009_v4  ;;  %v11011_v23 = vpop.permute.xlu1 %1179  ;;  %v11015_v62 = vcombine.high %v14245_v22, %v14245_v22  ;;  %v2379_v13 = vadd.f32 %v2371_v36, %v2361_v8  ;;  %v2388_v15 = vmul.f32 %v14242_v32, %v1075_v41  ;;  %v14249_v36 = vld [vmem:[#allocation57_spill] sm:$0xff]  ;;  %v2827_v8 = vld [vmem:[#allocation8 + $0x268] sm:$0xff] }
 0x20b   :  { %14241 = vst [vmem:[#allocation87_spill] sm:$0xff] %v11005_v42  ;;  %14244 = vst [vmem:[#allocation174_spill] sm:$0xff] %v11011_v23  ;;  %v11019_v28 = vrot.slane %v1792_v43, %v9922_v7  ;;  %v11022_v10 = vrot.slane %v2410_v26, %v9922_v7  ;;  %v1760_v27 = vadd.f32 %v1752_v46, %v1742_v40  ;;  %v14250_v26 = vld [vmem:[#allocation122_spill] sm:$0xff] }
 0x20c   :  { %14246 = vst [vmem:[#allocation132_spill] sm:$0xff] %v11015_v62  ;;  %v1779_v47 = vadd.f32 %v1771_v45, %v1761_v37  ;;  %v1108_v61 = vmul.f32 %v1104_v35, %v10361_v21  ;;  %v1105_v62 = vsel %vm664_vm4, %v10895_v33, %v10848_v31  ;;  %1262 = vrot.lane.b32.xlu0 %v14249_v36, %s14176_s21  ;;  %v2829_v46 = vld [vmem:[#allocation8 + $0x278] sm:$0xff]  ;;  %v2826_v35 = vld [vmem:[#allocation8 + $0x260] sm:$0xff] }
 0x20d   :  { %14247 = vst [vmem:[#allocation175_spill] sm:$0xff] %v11019_v28  ;;  %14248 = vst [vmem:[#allocation176_spill] sm:$0xff] %v11022_v10  ;;  %v2378_v41 = vadd.f32 %v2370_v56, %v2360_v5  ;;  %v1136_v43 = vsel %vm729_vm5, %v10897_v24, %v10926_v14  ;;  %1264 = vrot.lane.b32.xlu1 %v14250_v26, %s14176_s21  ;;  %v11037_v45 = vpack.c.bf16 %v2820_v17, %v2818_v57  ;;  %v11045_v56 = vpop.permute.xlu0 %1258  ;;  %v2828_v57 = vld [vmem:[#allocation8 + $0x270] sm:$0xff]  ;;  %v2831_v17 = vld [vmem:[#allocation8 + $0x288] sm:$0xff] }
 0x20e   :  { %v11039_v40 = vpack.c.bf16 %v2825_v2, %v2823_v63  ;;  %v2397_v31 = vadd.f32 %v2389_v11, %v2379_v13  ;;  %v1778_v37 = vadd.f32 %v1770_v60, %v1760_v27  ;;  %v1137_v5 = vsel %vm729_vm5, %v10928_v44, %v10897_v24  ;;  %v11047_v33 = vpop.permute.xlu1 %1260  ;;  %v2833_v2 = vld [vmem:[#allocation8 + $0x298] sm:$0xff]  ;;  %v2830_v11 = vld [vmem:[#allocation8 + $0x280] sm:$0xff]  ;;  %v2832_v24 = vld [vmem:[#allocation8 + $0x290] sm:$0xff] }
 0x20f   :  { %14251 = vst [vmem:[#allocation57_spill] sm:$0xff] %v11037_v45  ;;  %14253 = vst [vmem:[#allocation177_spill] sm:$0xff] %v11047_v33  ;;  %v11049_v14 = vpack.c.bf16 %v2824_v55, %v2822_v3  ;;  %v2396_v63 = vadd.f32 %v2388_v15, %v2378_v41  ;;  %v1107_v32 = vmul.f32 %v1105_v62, %v10375_v59  ;;  %v14255_v60 = vld [vmem:[#allocation99_spill] sm:$0xff]  ;;  %v14257_v3 = vld [vmem:[#allocation113_spill] sm:$0xff] }
 0x210   :  { %14252 = vst [vmem:[#allocation122_spill] sm:$0xff] %v11039_v40  ;;  %v14256_v44 = vcombine.high %v14255_v60, %v14255_v60  ;;  %v1845_v55 = vmul.f32 %v14257_v3, %v1108_v61  ;;  %v1168_v62 = vsel %vm794_vm6, %v10963_v16, %v10965_v1  ;;  %1294 = vrot.lane.b32.xlu0 %v14249_v36, %s14186_s10  ;;  %v2837_v13 = vld [vmem:[#allocation8 + $0x2b8] sm:$0xff]  ;;  %v14261_v27 = vld [vmem:[#allocation100_spill] sm:$0xff] }
 0x211   :  { %14254 = vst [vmem:[#allocation178_spill] sm:$0xff] %v11049_v14  ;;  %v1140_v14 = vmul.f32 %v1136_v43, %v10379_v25  ;;  %v1139_v15 = vmul.f32 %v1137_v5, %v10383_v20  ;;  %1296 = vrot.lane.b32.xlu1 %v14250_v26, %s14186_s10  ;;  %v11070_v41 = vpack.c.bf16 %v2829_v46, %v2827_v8  ;;  %v2835_v43 = vld [vmem:[#allocation8 + $0x2a8] sm:$0xff]  ;;  %v14263_v28 = vld [vmem:[#allocation114_spill] sm:$0xff]  ;;  %v11081_v5 = vpop.permute.xlu0 %1272 }
 0x212   :  { %v1835_v40 = vadd.f32 %v14256_v44, %v1779_v47  ;;  %v11072_v47 = vpack.c.bf16 %v2828_v57, %v2826_v35  ;;  %v11074_v44 = vpack.c.bf16 %v2833_v2, %v2831_v17  ;;  %v14262_v10 = vcombine.high %v14261_v27, %v14261_v27  ;;  %14264 = vst [vmem:[#allocation100_spill] sm:$0xff] %v11081_v5  ;;  %v11083_v30 = vpop.permute.xlu1 %1290  ;;  %v14266_v2 = vld [vmem:[#allocation118_spill] sm:$0xff] }
 0x213   :  { %14258 = vst [vmem:[#allocation99_spill] sm:$0xff] %v11070_v41  ;;  %v2463_v45 = vmul.f32 %v14263_v28, %v1108_v61  ;;  %v1834_v42 = vadd.f32 %v14255_v60, %v1778_v37  ;;  %v11085_v8 = vpack.c.bf16 %v2832_v24, %v2830_v11  ;;  %v1844_v46 = vmul.f32 %v14257_v3, %v1107_v32  ;;  %v2834_v61 = vld [vmem:[#allocation8 + $0x2a0] sm:$0xff]  ;;  %v2841_v24 = vld [vmem:[#allocation8 + $0x2d8] sm:$0xff] }
 0x214   :  { %14259 = vst [vmem:[#allocation179_spill] sm:$0xff] %v11072_v47  ;;  %14260 = vst [vmem:[#allocation180_spill] sm:$0xff] %v11074_v44  ;;  %v2453_v1 = vadd.f32 %v14262_v10, %v2397_v31  ;;  %v2462_v35 = vmul.f32 %v14263_v28, %v1107_v32  ;;  %v1172_v57 = vmul.f32 %v1168_v62, %v14205_v49  ;;  %v2836_v31 = vld [vmem:[#allocation8 + $0x2b0] sm:$0xff]  ;;  %1326 = vrot.lane.b32.xlu0 %v14249_v36, %s14118_s1  ;;  %v2839_v32 = vld [vmem:[#allocation8 + $0x2c8] sm:$0xff] }
 0x215   :  { %14265 = vst [vmem:[#allocation181_spill] sm:$0xff] %v11085_v8  ;;  %v1169_v10 = vsel %vm794_vm6, %v10983_v34, %v10963_v16  ;;  %v1853_v37 = vadd.f32 %v1845_v55, %v1835_v40  ;;  %v2452_v17 = vadd.f32 %v14261_v27, %v2396_v63  ;;  %v1863_v60 = vmul.f32 %v14266_v2, %v1140_v14  ;;  %v14268_v62 = vld [vmem:[#allocation119_spill] sm:$0xff]  ;;  %v2840_v27 = vld [vmem:[#allocation8 + $0x2d0] sm:$0xff] }
 0x216   :  { %v11098_v11 = vpack.c.bf16 %v2837_v13, %v2835_v43  ;;  %v2481_v28 = vmul.f32 %v14268_v62, %v1140_v14  ;;  %v1862_v3 = vmul.f32 %v14266_v2, %v1139_v15  ;;  %v2480_v16 = vmul.f32 %v14268_v62, %v1139_v15  ;;  %1328 = vrot.lane.b32.xlu1 %v14250_v26, %s14118_s1  ;;  %v2838_v63 = vld [vmem:[#allocation8 + $0x2c0] sm:$0xff]  ;;  %v11114_v43 = vpop.permute.xlu0 %1292  ;;  %v11116_v15 = vpop.permute.xlu1 %1304  ;;  %v14271_v2 = vld [vmem:[#allocation120_spill] sm:$0xff]  ;;  %v14272_v47 = vld [vmem:[#allocation121_spill] sm:$0xff] }
 0x217   :  { %v1200_v40 = vsel %vm859_vm7, %v10985_v52, %v11009_v4  ;;  %v2471_v13 = vadd.f32 %v2463_v45, %v2453_v1  ;;  %v1171_v55 = vmul.f32 %v1169_v10, %v14214_v58  ;;  %v1201_v14 = vsel %vm859_vm7, %v11011_v23, %v10985_v52  ;;  %14269 = vst [vmem:[#allocation183_spill] sm:$0xff] %v11114_v43  ;;  %v2843_v1 = vld [vmem:[#allocation8 + $0x2e8] sm:$0xff]  ;;  %v2845_v45 = vld [vmem:[#allocation8 + $0x2f8] sm:$0xff]  ;;  %v2842_v10 = vld [vmem:[#allocation8 + $0x2e0] sm:$0xff] }
 0x218   :  { %14267 = vst [vmem:[#allocation182_spill] sm:$0xff] %v11098_v11  ;;  %14270 = vst [vmem:[#allocation184_spill] sm:$0xff] %v11116_v15  ;;  %v11118_v34 = vpack.c.bf16 %v2836_v31, %v2834_v61  ;;  %v1852_v4 = vadd.f32 %v1844_v46, %v1834_v42  ;;  %v2470_v62 = vadd.f32 %v2462_v35, %v2452_v17  ;;  %1358 = vrot.lane.b32.xlu0 %v14249_v36, %s14134_s11  ;;  %v2844_v61 = vld [vmem:[#allocation8 + $0x2f0] sm:$0xff]  ;;  %v2847_v42 = vld [vmem:[#allocation8 + $0x308] sm:$0xff] }
 0x219   :  { %v1881_v11 = vmul.f32 %v14271_v2, %v1172_v57  ;;  %v11121_v8 = vpack.c.bf16 %v2841_v24, %v2839_v32  ;;  %v1871_v44 = vadd.f32 %v1863_v60, %v1853_v37  ;;  %v2499_v41 = vmul.f32 %v14272_v47, %v1172_v57  ;;  %v2849_v46 = vld [vmem:[#allocation8 + $0x318] sm:$0xff]  ;;  %v2846_v37 = vld [vmem:[#allocation8 + $0x300] sm:$0xff]  ;;  %v2848_v57 = vld [vmem:[#allocation8 + $0x310] sm:$0xff] }
 0x21a   :  { %v1204_v52 = vmul.f32 %v10854_v39, %v1200_v40  ;;  %v11127_v23 = vpack.c.bf16 %v2840_v27, %v2838_v63  ;;  %v2489_v35 = vadd.f32 %v2481_v28, %v2471_v13  ;;  %v1870_v31 = vadd.f32 %v1862_v3, %v1852_v4  ;;  %1360 = vrot.lane.b32.xlu1 %v14250_v26, %s14134_s11  ;;  %v1323_v40 = vpop.permute.xlu0 %1322  ;;  %v11138_v28 = vpop.permute.xlu1 %1324  ;;  %v2851_v63 = vld [vmem:[#allocation8 + $0x328] sm:$0xff] }
 0x21b   :  { %v2488_v17 = vadd.f32 %v2480_v16, %v2470_v62  ;;  %v1203_v32 = vmul.f32 %v10870_v29, %v1201_v14  ;;  %v1880_v60 = vmul.f32 %v14271_v2, %v1171_v55  ;;  %v2498_v24 = vmul.f32 %v14272_v47, %v1171_v55  ;;  %14273 = vst [vmem:[#allocation185_spill] sm:$0xff] %v11138_v28  ;;  %v14274_v27 = vld [vmem:[#allocation123_spill] sm:$0xff]  ;;  %v14275_v14 = vld [vmem:[#allocation125_spill] sm:$0xff] }
 0x21c   :  { %v1280_v36 = vsel %vm404_vm1, %v11045_v56, %v11047_v33  ;;  %v11140_v4 = vpack.c.bf16 %v2845_v45, %v2843_v1  ;;  %v1889_v3 = vadd.f32 %v1881_v11, %v1871_v44  ;;  %v11142_v62 = vpack.c.bf16 %v2844_v61, %v2842_v10  ;;  %1392 = vrot.lane.b32.xlu0 %v14250_v26, %s14149_s3  ;;  %v2853_v2 = vld [vmem:[#allocation8 + $0x338] sm:$0xff]  ;;  %v2850_v1 = vld [vmem:[#allocation8 + $0x320] sm:$0xff]  ;;  %v2852_v45 = vld [vmem:[#allocation8 + $0x330] sm:$0xff] }
 0x21d   :  { %v11144_v16 = vpack.c.bf16 %v2849_v46, %v2847_v42  ;;  %v1992_v13 = vcombine.high %v14274_v27, %v14274_v27  ;;  %v2507_v55 = vadd.f32 %v2499_v41, %v2489_v35  ;;  %v1899_v47 = vmul.f32 %v14275_v14, %v1204_v52  ;;  %v14276_v44 = vld [vmem:[#allocation124_spill] sm:$0xff]  ;;  %v14277_v10 = vld [vmem:[#allocation126_spill] sm:$0xff] }
 0x21e   :  { %v11151_v33 = vpack.c.bf16 %v2848_v57, %v2846_v37  ;;  %v2610_v11 = vcombine.high %v14276_v44, %v14276_v44  ;;  %v2517_v61 = vmul.f32 %v14277_v10, %v1204_v52  ;;  %v1898_v42 = vmul.f32 %v14275_v14, %v1203_v32  ;;  %1394 = vrot.lane.b32.xlu1 %v14245_v22, %s14149_s3  ;;  %v11169_v27 = vpop.permute.xlu0 %1336  ;;  %v14292_v14 = vld [vmem:[#allocation136_spill] sm:$0xff] }
 0x21f   :  { %v1283_v46 = vmul.f32 %v1280_v36, %v10223_v50  ;;  %v1281_v41 = vsel %vm404_vm1, %v11081_v5, %v11045_v56  ;;  %v1888_v35 = vadd.f32 %v1880_v60, %v1870_v31  ;;  %v2506_v37 = vadd.f32 %v2498_v24, %v2488_v17  ;;  %14278 = vst [vmem:[#allocation123_spill] sm:$0xff] %v11169_v27  ;;  %v1355_v50 = vpop.permute.xlu1 %1354  ;;  %v2855_v36 = vld [vmem:[#allocation8 + $0x348] sm:$0xff]  ;;  %v2854_v60 = vld [vmem:[#allocation8 + $0x340] sm:$0xff]  ;;  %v2856_v24 = vld [vmem:[#allocation8 + $0x350] sm:$0xff] }
 0x220   :  { %v2516_v57 = vmul.f32 %v14277_v10, %v1203_v32  ;;  %v1312_v52 = vsel %vm469_vm0, %v11083_v30, %v11114_v43  ;;  %v1313_v56 = vsel %vm469_vm0, %v11116_v15, %v11083_v30  ;;  %v11175_v44 = vpack.c.bf16 %v2853_v2, %v2851_v63  ;;  %v2857_v32 = vld [vmem:[#allocation8 + $0x358] sm:$0xff]  ;;  %1424 = vrot.lane.b32.xlu0 %v14250_v26, %s14160_s24 }
 0x221   :  { %v11177_v31 = vpack.c.bf16 %v2852_v45, %v2850_v1  ;;  %v11180_v17 = vrot.slane %v1992_v13, %v9922_v7  ;;  %v1907_v5 = vadd.f32 %v1899_v47, %v1889_v3  ;;  %v1282_v43 = vmul.f32 %v1281_v41, %v10245_v19  ;;  %v14281_v13 = vld [vmem:[#allocation127_spill] sm:$0xff] }
 0x222   :  { %v1344_v10 = vsel %vm534_vm2, %v1323_v40, %v11138_v28  ;;  %v11189_v30 = vrot.slane %v2610_v11, %v9922_v7  ;;  %v2525_v2 = vadd.f32 %v2517_v61, %v2507_v55  ;;  %v1906_v63 = vadd.f32 %v1898_v42, %v1888_v35  ;;  %1426 = vrot.lane.b32.xlu1 %v14245_v22, %s14160_s24  ;;  %v11196_v3 = vpop.permute.xlu0 %1356  ;;  %v2859_v55 = vld [vmem:[#allocation8 + $0x368] sm:$0xff]  ;;  %v2861_v61 = vld [vmem:[#allocation8 + $0x378] sm:$0xff] }
 0x223   :  { %14279 = vst [vmem:[#allocation124_spill] sm:$0xff] %v11180_v17  ;;  %v1917_v1 = vmul.f32 %v14281_v13, %v1283_v46  ;;  %v1315_v45 = vmul.f32 %v1312_v52, %v10219_v6  ;;  %v2524_v19 = vadd.f32 %v2516_v57, %v2506_v37  ;;  %v1314_v47 = vmul.f32 %v1313_v56, %v10241_v18  ;;  %v11198_v41 = vpop.permute.xlu1 %1368  ;;  %v14286_v42 = vld [vmem:[#allocation129_spill] sm:$0xff]  ;;  %v2863_v18 = vld [vmem:[#allocation8 + $0x388] sm:$0xff] }
 0x224   :  { %14280 = vst [vmem:[#allocation186_spill] sm:$0xff] %v11189_v30  ;;  %14282 = vst [vmem:[#allocation187_spill] sm:$0xff] %v11196_v3  ;;  %v11200_v15 = vpack.c.bf16 %v2857_v32, %v2855_v36  ;;  %v11202_v11 = vpack.c.bf16 %v2856_v24, %v2854_v60  ;;  %v2535_v35 = vmul.f32 %v14286_v42, %v1283_v46  ;;  %1456 = vrot.lane.b32.xlu0 %v14250_v26, %s14166_s14  ;;  %v2860_v46 = vld [vmem:[#allocation8 + $0x370] sm:$0xff]  ;;  %v14287_v32 = vld [vmem:[#allocation130_spill] sm:$0xff] }
 0x225   :  { %14283 = vst [vmem:[#allocation188_spill] sm:$0xff] %v11198_v41  ;;  %v1347_v6 = vmul.f32 %v1344_v10, %v10297_v38  ;;  %v1376_v37 = vsel %vm599_vm3, %v1355_v50, %v11196_v3  ;;  %v1916_v57 = vmul.f32 %v14281_v13, %v1282_v43  ;;  %v2534_v52 = vmul.f32 %v14286_v42, %v1282_v43  ;;  %v2858_v10 = vld [vmem:[#allocation8 + $0x360] sm:$0xff] }
 0x226   :  { %14284 = vst [vmem:[#allocation189_spill] sm:$0xff] %v11200_v15  ;;  %14285 = vst [vmem:[#allocation190_spill] sm:$0xff] %v11202_v11  ;;  %v1345_v36 = vsel %vm534_vm2, %v11169_v27, %v1323_v40  ;;  %v1925_v56 = vadd.f32 %v1917_v1, %v1907_v5  ;;  %v1935_v60 = vmul.f32 %v14287_v32, %v1315_v45  ;;  %1458 = vrot.lane.b32.xlu1 %v14245_v22, %s14166_s14  ;;  %v2865_v40 = vld [vmem:[#allocation8 + $0x398] sm:$0xff]  ;;  %v14289_v27 = vld [vmem:[#allocation131_spill] sm:$0xff]  ;;  %v1389_v1 = vpop.permute.xlu0 %1388 }
 0x227   :  { %v1379_v24 = vmul.f32 %v1376_v37, %v10321_v53  ;;  %v11224_v43 = vpack.c.bf16 %v2861_v61, %v2859_v55  ;;  %v2553_v17 = vmul.f32 %v14289_v27, %v1315_v45  ;;  %v1934_v3 = vmul.f32 %v14287_v32, %v1314_v47  ;;  %v11232_v30 = vpop.permute.xlu1 %1390  ;;  %v2862_v53 = vld [vmem:[#allocation8 + $0x380] sm:$0xff]  ;;  %v2864_v37 = vld [vmem:[#allocation8 + $0x390] sm:$0xff] }
 0x228   :  { %v2552_v38 = vmul.f32 %v14289_v27, %v1314_v47  ;;  %v1377_v5 = vsel %vm599_vm3, %v11198_v41, %v1355_v50  ;;  %14290 = vst [vmem:[#allocation192_spill] sm:$0xff] %v11232_v30  ;;  %v2543_v28 = vadd.f32 %v2535_v35, %v2525_v2  ;;  %v14291_v55 = vld [vmem:[#allocation135_spill] sm:$0xff]  ;;  %v1346_v42 = vmul.f32 %v1345_v36, %v10313_v48  ;;  %v2869_v27 = vld [vmem:[#allocation8 + $0x3b8] sm:$0xff] }
 0x229   :  { %14288 = vst [vmem:[#allocation191_spill] sm:$0xff] %v11224_v43  ;;  %v1953_v61 = vmul.f32 %v14291_v55, %v1347_v6  ;;  %v11236_v13 = vpack.c.bf16 %v2860_v46, %v2858_v10  ;;  %v1924_v45 = vadd.f32 %v1916_v57, %v1906_v63  ;;  %v2542_v32 = vadd.f32 %v2534_v52, %v2524_v19  ;;  %v2867_v41 = vld [vmem:[#allocation8 + $0x3a8] sm:$0xff]  ;;  %v2866_v43 = vld [vmem:[#allocation8 + $0x3a0] sm:$0xff]  ;;  %v14293_v2 = vld [vmem:[#allocation137_spill] sm:$0xff] }
 0x22a   :  { %v2571_v47 = vmul.f32 %v14292_v14, %v1347_v6  ;;  %1488 = vrot.lane.b32.xlu0 %v14250_v26, %s14172_s7  ;;  %v11241_v50 = vpack.c.bf16 %v2865_v40, %v2863_v18  ;;  %v1943_v11 = vadd.f32 %v1935_v60, %v1925_v56  ;;  %v1971_v35 = vmul.f32 %v14293_v2, %v1379_v24  ;;  %v2868_v63 = vld [vmem:[#allocation8 + $0x3b0] sm:$0xff]  ;;  %v2871_v19 = vld [vmem:[#allocation8 + $0x3c8] sm:$0xff]  ;;  %v2873_v26 = vld [vmem:[#allocation8 + $0x3d8] sm:$0xff]  ;;  %v11250_v10 = vpop.permute.xlu0 %1386 }
 0x22b   :  { %v1378_v15 = vmul.f32 %v1377_v5, %v10317_v54  ;;  %1490 = vrot.lane.b32.xlu1 %v14245_v22, %s14172_s7  ;;  %v11247_v48 = vpack.c.bf16 %v2864_v37, %v2862_v53  ;;  %v2561_v6 = vadd.f32 %v2553_v17, %v2543_v28  ;;  %v1942_v18 = vadd.f32 %v1934_v3, %v1924_v45  ;;  %v14294_v52 = vld [vmem:[#allocation139_spill] sm:$0xff]  ;;  %v1421_v40 = vpop.permute.xlu1 %1420 }
 0x22c   :  { %v2560_v57 = vadd.f32 %v2552_v38, %v2542_v32  ;;  %v2589_v36 = vmul.f32 %v14294_v52, %v1379_v24  ;;  %14295 = vst [vmem:[#allocation193_spill] sm:$0xff] %v11250_v10  ;;  %v1961_v46 = vadd.f32 %v1953_v61, %v1943_v11  ;;  %v1952_v54 = vmul.f32 %v14291_v55, %v1346_v42  ;;  %v11258_v5 = vld [vmem:[%s14083_s6 + $0x20] sm:$0xff]  ;;  %v11261_v53 = vld [vmem:[%s14083_s6 + $0x28] sm:$0xff]  ;;  %v2872_v38 = vld [vmem:[#allocation8 + $0x3d0] sm:$0xff] }
 0x22d   :  { %v2570_v56 = vmul.f32 %v14292_v14, %v1346_v42  ;;  %v1407_v60 = vsel %vm664_vm4, %v1389_v1, %v11232_v30  ;;  %v2579_v28 = vadd.f32 %v2571_v47, %v2561_v6  ;;  %v11265_v17 = vpack.c.bf16 %v2869_v27, %v2867_v41  ;;  %v2870_v42 = vld [vmem:[#allocation8 + $0x3c0] sm:$0xff]  ;;  %v2875_v27 = vld [vmem:[#allocation8 + $0x3e8] sm:$0xff]  ;;  %v2877_v41 = vld [vmem:[#allocation8 + $0x3f8] sm:$0xff] }
 0x22e   :  { %394 = vrot.lane.b32.xlu0 %v10442_v12, %s14176_s21  ;;  %v11267_v3 = vpack.c.bf16 %v2868_v63, %v2866_v43  ;;  %v11269_v11 = vpack.c.bf16 %v2873_v26, %v2871_v19  ;;  %v1979_v32 = vadd.f32 %v1971_v35, %v1961_v46  ;;  %v1970_v24 = vmul.f32 %v14293_v2, %v1378_v15  ;;  %v11279_v47 = vpop.permute.xlu0 %1422  ;;  %v14300_v6 = vld [vmem:[#allocation66_spill] sm:$0xff] }
 0x22f   :  { %v2588_v37 = vmul.f32 %v14294_v52, %v1378_v15  ;;  %v1408_v61 = vsel %vm664_vm4, %v11250_v10, %v1389_v1  ;;  %396 = vrot.lane.b32.xlu1 %v10692_v0, %s14176_s21  ;;  %v2597_v43 = vadd.f32 %v2589_v36, %v2579_v28  ;;  %v1411_v45 = vmul.f32 %v1407_v60, %v10361_v21  ;;  %v11289_v19 = vpop.permute.xlu1 %1418  ;;  %v14306_v10 = vld [vmem:[#allocation140_spill] sm:$0xff]  ;;  %v2886_v52 = vld [vmem:[#allocation8 + $0x440] sm:$0xff] }
 0x230   :  { %14296 = vst [vmem:[#allocation194_spill] sm:$0xff] %v11279_v47  ;;  %v11283_v35 = vrot.slane %v11258_v5, %v10166_v51  ;;  %v11287_v15 = vrot.slane %v11261_v53, %v10166_v51  ;;  %v1960_v63 = vadd.f32 %v1952_v54, %v1942_v18  ;;  %v2578_v1 = vadd.f32 %v2570_v56, %v2560_v57  ;;  %v2874_v54 = vld [vmem:[#allocation8 + $0x3e0] sm:$0xff]  ;;  %v2876_v56 = vld [vmem:[#allocation8 + $0x3f0] sm:$0xff] }
 0x231   :  { %14299 = vst [vmem:[#allocation197_spill] sm:$0xff] %v11289_v19  ;;  %v11291_v26 = vpack.c.bf16 %v2872_v38, %v2870_v42  ;;  %v11295_v36 = vrot.slane %v11258_v5, %v14300_v6  ;;  %v1410_v21 = vmul.f32 %v1408_v61, %v10375_v59  ;;  %v1439_v46 = vsel %vm729_vm5, %v1421_v40, %v11279_v47  ;;  %v14304_v42 = vld [vmem:[#allocation133_spill] sm:$0xff]  ;;  %v14407_v2 = vld [vmem:[#allocation170_spill] sm:$0xff] }
 0x232   :  { %14297 = vst [vmem:[#allocation195_spill] sm:$0xff] %v11283_v35  ;;  %14298 = vst [vmem:[#allocation196_spill] sm:$0xff] %v11287_v15  ;;  %461 = vrot.lane.b32.xlu0 %v10442_v12, %s14186_s10  ;;  %v11305_v18 = vrot.slane %v11261_v53, %v14300_v6  ;;  %v11307_v57 = vpack.c.bf16 %v2877_v41, %v2875_v27  ;;  %v1978_v60 = vadd.f32 %v1970_v24, %v1960_v63  ;;  %v14307_v27 = vld [vmem:[#allocation141_spill] sm:$0xff]  ;;  %v14308_v15 = vld [vmem:[#allocation134_spill] sm:$0xff] }
 0x233   :  { %14301 = vst [vmem:[#allocation198_spill] sm:$0xff] %v11295_v36  ;;  %v2596_v59 = vadd.f32 %v2588_v37, %v2578_v1  ;;  %v1440_v28 = vsel %vm729_vm5, %v11289_v19, %v1421_v40  ;;  %463 = vrot.lane.b32.xlu1 %v10692_v0, %s14186_s10  ;;  %v14305_v38 = vcombine.high %v14304_v42, %v14304_v42  ;;  %v1453_v36 = vpop.permute.xlu0 %1452  ;;  %v9208_v63 = vld [vmem:[%s14067_s17 + $0x8] sm:$0xff]  ;;  %v14310_v1 = vstv %s10132_s19  ;;  %v11328_v19 = vpop.permute.xlu1 %1454 }
 0x234   :  { %14302 = vst [vmem:[#allocation199_spill] sm:$0xff] %v11305_v18  ;;  %14303 = vst [vmem:[#allocation200_spill] sm:$0xff] %v11307_v57  ;;  %v2045_v18 = vmul.f32 %v14306_v10, %v1411_v45  ;;  %v2663_v41 = vmul.f32 %v14307_v27, %v1411_v45  ;;  %v14309_v24 = vcombine.high %v14308_v15, %v14308_v15  ;;  %v14316_v45 = vstv %s10134_s0  ;;  %v14421_v57 = vld [vmem:[#allocation128_spill] sm:$0xff]  ;;  %s14827_s0 = sld [smem:[#allocation41_spill]] }
 0x235   :  { %v2035_v61 = vadd.f32 %v14305_v38, %v1979_v32  ;;  %v11325_v35 = vmul.f32 %v9208_v63, %v14310_v1  ;;  %v1443_v40 = vmul.f32 %v1439_v46, %v10379_v25  ;;  %14312 = vst [vmem:[#allocation134_spill] sm:$0xff] %v11328_v19  ;;  %v11330_v6 = vpack.c.bf16 %v2876_v56, %v2874_v54  ;;  %v14314_v32 = vld [vmem:[#allocation71_spill] sm:$0xff] }
 0x236   :  { %v2653_v37 = vadd.f32 %v14309_v24, %v2597_v43  ;;  %v11334_v38 = vrot.slane %v11258_v5, %v14314_v32  ;;  %v11338_v51 = vmul.f32 %v9208_v63, %v14316_v45  ;;  %v2044_v47 = vmul.f32 %v14306_v10, %v1410_v21  ;;  %526 = vrot.lane.b32.xlu0 %v10442_v12, %s14118_s1  ;;  %v14320_v45 = vld [vmem:[#allocation74_spill] sm:$0xff] }
 0x237   :  { %14311 = vst [vmem:[#allocation133_spill] sm:$0xff] %v11325_v35  ;;  %14313 = vst [vmem:[#allocation201_spill] sm:$0xff] %v11330_v6  ;;  %v1442_v43 = vmul.f32 %v1440_v28, %v10383_v20  ;;  %v1471_v24 = vsel %vm794_vm6, %v1453_v36, %v11328_v19  ;;  %v11349_v25 = vrot.slane %v11261_v53, %v14314_v32  ;;  %528 = vrot.lane.b32.xlu1 %v10692_v0, %s14118_s1  ;;  %v11357_v20 = vpop.permute.xlu0 %1450  ;;  %v14387_v10 = vld [vmem:[#allocation178_spill] sm:$0xff] }
 0x238   :  { %14315 = vst [vmem:[#allocation202_spill] sm:$0xff] %v11334_v38  ;;  %14317 = vst [vmem:[#allocation203_spill] sm:$0xff] %v11338_v51  ;;  %v2034_v46 = vadd.f32 %v14304_v42, %v1978_v60  ;;  %v2652_v54 = vadd.f32 %v14308_v15, %v2596_v59  ;;  %v2662_v56 = vmul.f32 %v14307_v27, %v1410_v21  ;;  %v14323_v15 = vld [vmem:[#allocation144_spill] sm:$0xff]  ;;  %v1485_v21 = vpop.permute.xlu1 %1484  ;;  %v14386_v27 = vld [vmem:[#allocation90_spill] sm:$0xff] }
 0x239   :  { %14318 = vst [vmem:[#allocation204_spill] sm:$0xff] %v11349_v25  ;;  %v1475_v63 = vmul.f32 %v1471_v24, %v14205_v49  ;;  %14319 = vst [vmem:[#allocation205_spill] sm:$0xff] %v11357_v20  ;;  %v2053_v28 = vadd.f32 %v2045_v18, %v2035_v61  ;;  %v2671_v1 = vadd.f32 %v2663_v41, %v2653_v37  ;;  %v14326_v41 = vld [vmem:[#allocation145_spill] sm:$0xff] }
 0x23a   :  { %v11361_v38 = vrot.slane %v11258_v5, %v14320_v45  ;;  %v11365_v60 = vrot.slane %v11325_v35, %v9922_v7  ;;  %v2063_v59 = vmul.f32 %v14323_v15, %v1443_v40  ;;  %v1472_v49 = vsel %vm794_vm6, %v11357_v20, %v1453_v36  ;;  %591 = vrot.lane.b32.xlu0 %v10442_v12, %s14134_s11 }
 0x23b   :  { %v11373_v42 = vrot.slane %v11261_v53, %v14320_v45  ;;  %v11377_v18 = vrot.slane %v11338_v51, %v9922_v7  ;;  %v2052_v61 = vadd.f32 %v2044_v47, %v2034_v46  ;;  %v2681_v37 = vmul.f32 %v14326_v41, %v1443_v40  ;;  %593 = vrot.lane.b32.xlu1 %v10692_v0, %s14134_s11  ;;  %v14328_v51 = vld [vmem:[#allocation78_spill] sm:$0xff]  ;;  %v11393_v46 = vpop.permute.xlu0 %1486 }
 0x23c   :  { %14321 = vst [vmem:[#allocation206_spill] sm:$0xff] %v11361_v38  ;;  %14322 = vst [vmem:[#allocation207_spill] sm:$0xff] %v11365_v60  ;;  %v2062_v24 = vmul.f32 %v14323_v15, %v1442_v43  ;;  %v1474_v35 = vmul.f32 %v1472_v49, %v14214_v58  ;;  %v2670_v36 = vadd.f32 %v2662_v56, %v2652_v54  ;;  %v14331_v58 = vld [vmem:[#allocation148_spill] sm:$0xff]  ;;  %v14375_v15 = vld [vmem:[#allocation57_spill] sm:$0xff] }
 0x23d   :  { %14324 = vst [vmem:[#allocation208_spill] sm:$0xff] %v11373_v42  ;;  %14325 = vst [vmem:[#allocation209_spill] sm:$0xff] %v11377_v18  ;;  %v2680_v20 = vmul.f32 %v14326_v41, %v1442_v43  ;;  %v14327_v42 = vld [vmem:[#allocation147_spill] sm:$0xff]  ;;  %v11390_v47 = vrot.slane %v11258_v5, %v14328_v51  ;;  %v2699_v49 = vmul.f32 %v14331_v58, %v1475_v63  ;;  %v14371_v41 = vld [vmem:[#allocation96_spill] sm:$0xff] }
 0x23e   :  { %v2081_v38 = vmul.f32 %v14327_v42, %v1475_v63  ;;  %v2080_v40 = vmul.f32 %v14327_v42, %v1474_v35  ;;  %14330 = vst [vmem:[#allocation211_spill] sm:$0xff] %v11393_v46  ;;  %v11400_v43 = vrot.slane %v11261_v53, %v14328_v51  ;;  %v2698_v54 = vmul.f32 %v14331_v58, %v1474_v35 }
 0x23f   :  { %14329 = vst [vmem:[#allocation210_spill] sm:$0xff] %v11390_v47  ;;  %v1503_v56 = vsel %vm859_vm7, %v1485_v21, %v11393_v46  ;;  %v11406_v47 = vpop.permute.xlu1 %1482  ;;  %v2071_v25 = vadd.f32 %v2063_v59, %v2053_v28  ;;  %v2070_v63 = vadd.f32 %v2062_v24, %v2052_v61  ;;  %658 = vrot.lane.b32.xlu0 %v10692_v0, %s14149_s3  ;;  %v14335_v59 = vld [vmem:[#allocation81_spill] sm:$0xff]  ;;  %v14370_v46 = vld [vmem:[#allocation160_spill] sm:$0xff] }
 0x240   :  { %14332 = vst [vmem:[#allocation212_spill] sm:$0xff] %v11400_v43  ;;  %14333 = vst [vmem:[#allocation213_spill] sm:$0xff] %v11406_v47  ;;  %v1507_v32 = vmul.f32 %v10854_v39, %v1503_v56  ;;  %v1504_v12 = vsel %vm859_vm7, %v11406_v47, %v1485_v21  ;;  %v2689_v35 = vadd.f32 %v2681_v37, %v2671_v1  ;;  %v14334_v43 = vld [vmem:[#allocation51_spill] sm:$0xff]  ;;  %v391_v39 = vpop.permute.xlu0 %390  ;;  %v14337_v24 = vld [vmem:[#allocation149_spill] sm:$0xff] }
 0x241   :  { %v2688_v51 = vadd.f32 %v2680_v20, %v2670_v36  ;;  %v1506_v60 = vmul.f32 %v10870_v29, %v1504_v12  ;;  %660 = vrot.lane.b32.xlu1 %v14334_v43, %s14149_s3  ;;  %v2089_v28 = vadd.f32 %v2081_v38, %v2071_v25  ;;  %v11421_v61 = vrot.slane %v11258_v5, %v14335_v59  ;;  %v14338_v21 = vld [vmem:[#allocation150_spill] sm:$0xff]  ;;  %v14339_v29 = vld [vmem:[#allocation59_spill] sm:$0xff] }
 0x242   :  { %v2099_v56 = vmul.f32 %v14337_v24, %v1507_v32  ;;  %v2707_v45 = vadd.f32 %v2699_v49, %v2689_v35  ;;  %v2717_v47 = vmul.f32 %v14338_v21, %v1507_v32  ;;  %v2088_v18 = vadd.f32 %v2080_v40, %v2070_v63  ;;  %v14341_v36 = vld [vmem:[#allocation151_spill] sm:$0xff]  ;;  %v14342_v63 = vld [vmem:[#allocation152_spill] sm:$0xff] }
 0x243   :  { %14336 = vst [vmem:[#allocation214_spill] sm:$0xff] %v11421_v61  ;;  %v2098_v1 = vmul.f32 %v14337_v24, %v1506_v60  ;;  %v2716_v20 = vmul.f32 %v14338_v21, %v1506_v60  ;;  %v410_v37 = vsel %vm404_vm1, %v14339_v29, %v391_v39  ;;  %v11430_v38 = vpop.permute.xlu1 %392  ;;  %v2706_v25 = vadd.f32 %v2698_v54, %v2688_v51  ;;  %v14346_v21 = vld [vmem:[#allocation84_spill] sm:$0xff] }
 0x244   :  { %14340 = vst [vmem:[#allocation59_spill] sm:$0xff] %v11430_v38  ;;  %v447_v12 = vmul.f32 %v14341_v36, %v410_v37  ;;  %v409_v49 = vsel %vm404_vm1, %v391_v39, %v11430_v38  ;;  %723 = vrot.lane.b32.xlu0 %v10692_v0, %s14160_s24  ;;  %v2107_v32 = vadd.f32 %v2099_v56, %v2089_v28  ;;  %v458_v54 = vpop.permute.xlu0 %457  ;;  %v14344_v37 = vld [vmem:[#allocation153_spill] sm:$0xff] }
 0x245   :  { %v2725_v40 = vadd.f32 %v2717_v47, %v2707_v45  ;;  %v448_v60 = vmul.f32 %v14342_v63, %v409_v49  ;;  %725 = vrot.lane.b32.xlu1 %v14334_v43, %s14160_s24  ;;  %v2106_v35 = vadd.f32 %v2098_v1, %v2088_v18  ;;  %v2724_v29 = vadd.f32 %v2716_v20, %v2706_v25  ;;  %v14345_v39 = vld [vmem:[#allocation157_spill] sm:$0xff]  ;;  %v14349_v47 = vld [vmem:[#allocation76_spill] sm:$0xff]  ;;  %v14351_v20 = vld [vmem:[#allocation58_spill] sm:$0xff] }
 0x246   :  { %v11443_v51 = vrot.slane %v11261_v53, %v14335_v59  ;;  %v2117_v61 = vadd.f32 %v14344_v37, %v2107_v32  ;;  %v11449_v28 = vrot.slane %v11258_v5, %v14346_v21  ;;  %v11453_v45 = vrot.slane %v11261_v53, %v14346_v21  ;;  %v14350_v56 = vld [vmem:[#allocation77_spill] sm:$0xff] }
 0x247   :  { %v2735_v38 = vadd.f32 %v14345_v39, %v2725_v40  ;;  %v1518_v18 = vmul.f32 %v14349_v47, %v447_v12  ;;  %v2136_v1 = vmul.f32 %v14350_v56, %v447_v12  ;;  %v475_v25 = vsel %vm469_vm0, %v14351_v20, %v458_v54  ;;  %v11460_v49 = vpop.permute.xlu1 %459  ;;  %v14353_v40 = vld [vmem:[#allocation155_spill] sm:$0xff] }
 0x248   :  { %14343 = vst [vmem:[#allocation151_spill] sm:$0xff] %v11443_v51  ;;  %14347 = vst [vmem:[#allocation152_spill] sm:$0xff] %v11449_v28  ;;  %v2116_v32 = vadd.f32 %v14344_v37, %v2106_v35  ;;  %v512_v59 = vmul.f32 %v14353_v40, %v475_v25  ;;  %v474_v5 = vsel %vm469_vm0, %v458_v54, %v11460_v49  ;;  %788 = vrot.lane.b32.xlu0 %v10692_v0, %s14166_s14  ;;  %v14355_v51 = vld [vmem:[#allocation73_spill] sm:$0xff]  ;;  %v14356_v54 = vld [vmem:[#allocation75_spill] sm:$0xff]  ;;  %v523_v24 = vpop.permute.xlu0 %522 }
 0x249   :  { %14348 = vst [vmem:[#allocation215_spill] sm:$0xff] %v11453_v45  ;;  %14352 = vst [vmem:[#allocation58_spill] sm:$0xff] %v11460_v49  ;;  %v2125_v53 = vmax.f32 %v2117_v61, 0.0  ;;  %v2743_v21 = vmax.f32 %v2735_v38, 0.0  ;;  %v1519_v12 = vmul.f32 %v14349_v47, %v448_v60  ;;  %v14354_v45 = vld [vmem:[#allocation156_spill] sm:$0xff]  ;;  %790 = vrot.lane.b32.xlu1 %v14334_v43, %s14166_s14  ;;  %v2734_v35 = vadd.f32 %v14345_v39, %v2724_v29  ;;  %v2881_v39 = vld [vmem:[#allocation8 + $0x418] sm:$0xff] }
 0x24a   :  { %v513_v28 = vmul.f32 %v14354_v45, %v474_v5  ;;  %v2124_v20 = vmax.f32 %v2116_v32, 0.0  ;;  %v2137_v25 = vmul.f32 %v14350_v56, %v448_v60  ;;  %v1536_v37 = vmul.f32 %v14355_v51, %v512_v59  ;;  %v14357_v5 = vld [vmem:[#allocation62_spill] sm:$0xff]  ;;  %v2879_v60 = vld [vmem:[#allocation8 + $0x408] sm:$0xff] }
 0x24b   :  { %v2154_v49 = vmul.f32 %v14356_v54, %v512_v59  ;;  %3070 = vmatprep.mubr.f32.mxu0 %v2125_v53  ;;  %3354 = vmatprep.mubr.f32.mxu1 %v2743_v21  ;;  %v540_v47 = vsel %vm534_vm2, %v14357_v5, %v523_v24  ;;  %v11482_v32 = vpop.permute.xlu1 %524  ;;  %v2742_v29 = vmax.f32 %v2734_v35, 0.0  ;;  %v14359_v59 = vld [vmem:[#allocation69_spill] sm:$0xff]  ;;  %v14360_v5 = vld [vmem:[#allocation70_spill] sm:$0xff] }
 0x24c   :  { %v1537_v61 = vmul.f32 %v14355_v51, %v513_v28  ;;  %v2155_v38 = vmul.f32 %v14356_v54, %v513_v28  ;;  %14358 = vst [vmem:[#allocation155_spill] sm:$0xff] %v11482_v32  ;;  %3071 = vmatmul.mubr.f32.vlgmr.msra.gmra.mrb[0].mxu0 %v2124_v20  ;;  %v1544_v56 = vadd.f32 %v1536_v37, %v1518_v18  ;;  %v14361_v20 = vld [vmem:[#allocation79_spill] sm:$0xff]  ;;  %v14362_v18 = vld [vmem:[#allocation80_spill] sm:$0xff] }
 0x24d   :  { %v2162_v58 = vadd.f32 %v2154_v49, %v2136_v1  ;;  %v577_v42 = vmul.f32 %v14359_v59, %v540_v47  ;;  %v539_v21 = vsel %vm534_vm2, %v523_v24, %v11482_v32  ;;  %853 = vrot.lane.b32.xlu0 %v10692_v0, %s14172_s7  ;;  %3355 = vmatmul.mubr.f32.vlgmr.msra.gmra.mrb[0].mxu1 %v2742_v29  ;;  %v588_v47 = vpop.permute.xlu0 %587  ;;  %v14363_v49 = vld [vmem:[#allocation173_spill] sm:$0xff]  ;;  %v2878_v0 = vld [vmem:[#allocation8 + $0x400] sm:$0xff] }
 0x24e   :  { %v1545_v28 = vadd.f32 %v1537_v61, %v1519_v12  ;;  %v2163_v53 = vadd.f32 %v2155_v38, %v2137_v25  ;;  %v578_v54 = vmul.f32 %v14360_v5, %v539_v21  ;;  %855 = vrot.lane.b32.xlu1 %v14334_v43, %s14172_s7  ;;  %7615 = vmatpush1.bf16.msra.mxu0 %v14363_v49  ;;  %v2880_v12 = vld [vmem:[#allocation8 + $0x410] sm:$0xff]  ;;  %v2883_v21 = vld [vmem:[#allocation8 + $0x428] sm:$0xff] }
 0x24f   :  { %v1554_v37 = vmul.f32 %v14361_v20, %v577_v42  ;;  %v2172_v1 = vmul.f32 %v14362_v18, %v577_v42  ;;  %7871 = vmatpush1.bf16.msra.mxu1 %v14363_v49  ;;  %v11497_v24 = vpack.c.bf16 %v2881_v39, %v2879_v60  ;;  %v14365_v61 = vld [vmem:[#allocation65_spill] sm:$0xff]  ;;  %v11504_v29 = vpop.permute.xlu1 %589  ;;  %v14367_v42 = vld [vmem:[#allocation87_spill] sm:$0xff]  ;;  %v11611_v43 = vld [vmem:[%s14083_s6 + $0x50] ss:$0 sm:$0xff] }
 0x250   :  { %v1555_v35 = vmul.f32 %v14361_v20, %v578_v54  ;;  %v2173_v25 = vmul.f32 %v14362_v18, %v578_v54  ;;  %v605_v38 = vsel %vm599_vm3, %v14365_v61, %v588_v47  ;;  %14366 = vst [vmem:[#allocation62_spill] sm:$0xff] %v11504_v29  ;;  %7617 = vmatprep.subr.bf16.mxu0 %v14367_v42  ;;  %v2885_v49 = vld [vmem:[#allocation8 + $0x438] sm:$0xff]  ;;  %v14368_v32 = vld [vmem:[#allocation159_spill] sm:$0xff] }
 0x251   :  { %14364 = vst [vmem:[#allocation156_spill] sm:$0xff] %v11497_v24  ;;  %7873 = vmatprep.subr.bf16.mxu1 %v14367_v42  ;;  %v1562_v39 = vadd.f32 %v1554_v37, %v1544_v56  ;;  %v2180_v60 = vadd.f32 %v2172_v1, %v2162_v58  ;;  %v642_v51 = vmul.f32 %v14368_v32, %v605_v38  ;;  %v14369_v18 = vld [vmem:[#allocation115_spill] sm:$0xff]  ;;  %v14373_v56 = vld [vmem:[#allocation85_spill] sm:$0xff]  ;;  %v14374_v37 = vld [vmem:[#allocation86_spill] sm:$0xff]  ;;  %v655_v38 = vpop.permute.xlu0 %654 }
 0x252   :  { %v604_v54 = vsel %vm599_vm3, %v588_v47, %v11504_v29  ;;  %963 = vrot.lane.b32.xlu0 %v14369_v18, %s14176_s21  ;;  %v1563_v61 = vadd.f32 %v1555_v35, %v1545_v28  ;;  %v2181_v20 = vadd.f32 %v2173_v25, %v2163_v53  ;;  %965 = vrot.lane.b32.xlu1 %v14371_v41, %s14176_s21  ;;  %v2882_v28 = vld [vmem:[#allocation8 + $0x420] sm:$0xff]  ;;  %v2884_v53 = vld [vmem:[#allocation8 + $0x430] sm:$0xff] }
 0x253   :  { %v643_v19 = vmul.f32 %v14370_v46, %v604_v54  ;;  %v11517_v42 = vpack.c.bf16 %v2880_v12, %v2878_v0  ;;  %v1572_v58 = vmul.f32 %v14373_v56, %v642_v51  ;;  %v2190_v1 = vmul.f32 %v14374_v37, %v642_v51  ;;  %7619 = vmatpush1.bf16.msra.mxu0 %v14375_v15  ;;  %v14377_v54 = vld [vmem:[#allocation68_spill] sm:$0xff]  ;;  %v11530_v12 = vpop.permute.xlu1 %656  ;;  %v14379_v51 = vld [vmem:[#allocation122_spill] sm:$0xff] }
 0x254   :  { %7875 = vmatpush1.bf16.msra.mxu1 %v14375_v15  ;;  %v11523_v47 = vpack.c.bf16 %v2885_v49, %v2883_v21  ;;  %v669_v0 = vsel %vm664_vm4, %v14377_v54, %v655_v38  ;;  %14378 = vst [vmem:[#allocation173_spill] sm:$0xff] %v11530_v12  ;;  %7621 = vmatprep.subr.bf16.mxu0 %v14379_v51  ;;  %v14380_v21 = vld [vmem:[#allocation105_spill] sm:$0xff]  ;;  %v14381_v54 = vld [vmem:[#allocation164_spill] sm:$0xff] }
 0x255   :  { %14372 = vst [vmem:[#allocation69_spill] sm:$0xff] %v11517_v42  ;;  %v1573_v35 = vmul.f32 %v14373_v56, %v643_v19  ;;  %v2191_v25 = vmul.f32 %v14374_v37, %v643_v19  ;;  %7877 = vmatprep.subr.bf16.mxu1 %v14379_v51  ;;  %v1580_v42 = vadd.f32 %v1572_v58, %v1562_v39  ;;  %v14383_v39 = vld [vmem:[#allocation161_spill] sm:$0xff] }
 0x256   :  { %14376 = vst [vmem:[#allocation70_spill] sm:$0xff] %v11523_v47  ;;  %v2198_v15 = vadd.f32 %v2190_v1, %v2180_v60  ;;  %v707_v49 = vmul.f32 %v14380_v21, %v669_v0  ;;  %v668_v56 = vsel %vm664_vm4, %v655_v38, %v11530_v12  ;;  %995 = vrot.lane.b32.xlu0 %v14369_v18, %s14186_s10  ;;  %v14384_v58 = vld [vmem:[#allocation89_spill] sm:$0xff]  ;;  %v14385_v0 = vld [vmem:[#allocation162_spill] sm:$0xff]  ;;  %v720_v12 = vpop.permute.xlu0 %719 }
 0x257   :  { %v1581_v19 = vadd.f32 %v1573_v35, %v1563_v61  ;;  %v2199_v37 = vadd.f32 %v2191_v25, %v2181_v20  ;;  %v708_v47 = vmul.f32 %v14381_v54, %v668_v56  ;;  %997 = vrot.lane.b32.xlu1 %v14371_v41, %s14186_s10  ;;  %v11543_v29 = vpack.c.bf16 %v2884_v53, %v2882_v28  ;;  %v11558_v35 = vpop.permute.xlu1 %721  ;;  %v2887_v25 = vld [vmem:[#allocation8 + $0x448] sm:$0xff] }
 0x258   :  { %v1636_v60 = vadd.f32 %v14383_v39, %v1580_v42  ;;  %v1646_v1 = vmul.f32 %v14384_v58, %v707_v49  ;;  %v2254_v51 = vadd.f32 %v14385_v0, %v2198_v15  ;;  %v2264_v38 = vmul.f32 %v14386_v27, %v707_v49  ;;  %7623 = vmatpush1.bf16.msra.mxu0 %v14387_v10  ;;  %v2889_v15 = vld [vmem:[#allocation8 + $0x458] sm:$0xff] }
 0x259   :  { %14382 = vst [vmem:[#allocation65_spill] sm:$0xff] %v11543_v29  ;;  %v14388_v20 = vcombine.high %v14383_v39, %v14383_v39  ;;  %v1647_v56 = vmul.f32 %v14384_v58, %v708_v47  ;;  %v14389_v28 = vcombine.high %v14385_v0, %v14385_v0  ;;  %v2265_v42 = vmul.f32 %v14386_v27, %v708_v47  ;;  %v14392_v0 = vld [vmem:[#allocation165_spill] sm:$0xff]  ;;  %v14393_v27 = vld [vmem:[#allocation166_spill] sm:$0xff] }
 0x25a   :  { %14390 = vst [vmem:[#allocation87_spill] sm:$0xff] %v11558_v35  ;;  %7879 = vmatpush1.bf16.msra.mxu1 %v14387_v10  ;;  %v1654_v49 = vadd.f32 %v1646_v1, %v1636_v60  ;;  %v2272_v39 = vadd.f32 %v2264_v38, %v2254_v51  ;;  %1027 = vrot.lane.b32.xlu0 %v14369_v18, %s14118_s1  ;;  %v785_v60 = vpop.permute.xlu0 %784  ;;  %v14394_v1 = vld [vmem:[#allocation99_spill] sm:$0xff]  ;;  %v9209_v51 = vld [vmem:[%s14067_s17 + $0x18] sm:$0xff]  ;;  %v14395_v38 = vstv %s10158_s9 }
 0x25b   :  { %v1637_v61 = vadd.f32 %v14388_v20, %v1581_v19  ;;  %v2255_v53 = vadd.f32 %v14389_v28, %v2199_v37  ;;  %v14391_v19 = vld [vmem:[#allocation82_spill] sm:$0xff]  ;;  %v733_v37 = vsel %vm729_vm5, %v720_v12, %v11558_v35  ;;  %1029 = vrot.lane.b32.xlu1 %v14371_v41, %s14118_s1  ;;  %7625 = vmatprep.subr.bf16.mxu0 %v14394_v1  ;;  %v11590_v30 = vpop.permute.xlu1 %786 }
 0x25c   :  { %v734_v20 = vsel %vm729_vm5, %v14391_v19, %v720_v12  ;;  %v773_v58 = vmul.f32 %v14393_v27, %v733_v37  ;;  %7881 = vmatprep.subr.bf16.mxu1 %v14394_v1  ;;  %v11578_v12 = vmul.f32 %v9209_v51, %v14395_v38  ;;  %v14397_v19 = vstv %s10160_s13  ;;  %14402 = vst [vmem:[#allocation96_spill] sm:$0xff] %v11590_v30  ;;  %v14403_v1 = vld [vmem:[#allocation179_spill] sm:$0xff]  ;;  %v14404_v38 = vld [vmem:[#allocation92_spill] sm:$0xff] }
 0x25d   :  { %v1655_v47 = vadd.f32 %v1647_v56, %v1637_v61  ;;  %v2273_v10 = vadd.f32 %v2265_v42, %v2255_v53  ;;  %v772_v28 = vmul.f32 %v14392_v0, %v734_v20  ;;  %v11582_v35 = vmul.f32 %v9209_v51, %v14397_v19  ;;  %v14400_v56 = vld [vmem:[#allocation93_spill] sm:$0xff]  ;;  %v14401_v42 = vld [vmem:[#allocation94_spill] sm:$0xff]  ;;  %7627 = vmatpush1.bf16.msra.mxu0 %v14403_v1 }
 0x25e   :  { %14396 = vst [vmem:[#allocation159_spill] sm:$0xff] %v11578_v12  ;;  %v11584_v61 = vpack.c.bf16 %v2889_v15, %v2887_v25  ;;  %v1665_v37 = vmul.f32 %v14400_v56, %v773_v58  ;;  %v2283_v29 = vmul.f32 %v14401_v42, %v773_v58  ;;  %v799_v51 = vsel %vm794_vm6, %v14404_v38, %v785_v60  ;;  %v2888_v15 = vld [vmem:[#allocation8 + $0x450] sm:$0xff]  ;;  %v2893_v19 = vld [vmem:[#allocation8 + $0x478] sm:$0xff] }
 0x25f   :  { %14398 = vst [vmem:[#allocation115_spill] sm:$0xff] %v11582_v35  ;;  %v1664_v53 = vmul.f32 %v14400_v56, %v772_v28  ;;  %v2282_v20 = vmul.f32 %v14401_v42, %v772_v28  ;;  %v798_v25 = vsel %vm794_vm6, %v785_v60, %v11590_v30  ;;  %1059 = vrot.lane.b32.xlu0 %v14369_v18, %s14134_s11  ;;  %v2891_v28 = vld [vmem:[#allocation8 + $0x468] sm:$0xff]  ;;  %v14406_v60 = vld [vmem:[#allocation169_spill] sm:$0xff] }
 0x260   :  { %14399 = vst [vmem:[#allocation160_spill] sm:$0xff] %v11584_v61  ;;  %7883 = vmatpush1.bf16.msra.mxu1 %v14403_v1  ;;  %v11604_v58 = vrot.slane %v11578_v12, %v9922_v7  ;;  %v1673_v38 = vadd.f32 %v1665_v37, %v1655_v47  ;;  %v2291_v61 = vadd.f32 %v2283_v29, %v2273_v10  ;;  %v850_v1 = vpop.permute.xlu0 %849  ;;  %v14408_v12 = vld [vmem:[#allocation180_spill] sm:$0xff]  ;;  %v11622_v47 = vpop.permute.xlu1 %851  ;;  %v14412_v10 = vld [vmem:[#allocation181_spill] sm:$0xff] }
 0x261   :  { %v1672_v42 = vadd.f32 %v1664_v53, %v1654_v49  ;;  %v2290_v56 = vadd.f32 %v2282_v20, %v2272_v39  ;;  %1061 = vrot.lane.b32.xlu1 %v14371_v41, %s14134_s11  ;;  %v837_v30 = vmul.f32 %v14406_v60, %v799_v51  ;;  %v838_v18 = vmul.f32 %v14407_v2, %v798_v25  ;;  %v14410_v29 = vld [vmem:[#allocation116_spill] sm:$0xff]  ;;  %v14416_v25 = vld [vmem:[#allocation97_spill] sm:$0xff] }
 0x262   :  { %14405 = vst [vmem:[#allocation57_spill] sm:$0xff] %v11604_v58  ;;  %7629 = vmatprep.subr.bf16.mxu0 %v14408_v12  ;;  %7885 = vmatprep.subr.bf16.mxu1 %v14408_v12  ;;  %v11617_v49 = vrot.slane %v11582_v35, %v9922_v7  ;;  %v864_v39 = vsel %vm859_vm7, %v14410_v29, %v850_v1  ;;  %14411 = vst [vmem:[#allocation122_spill] sm:$0xff] %v11622_v47  ;;  %v14415_v12 = vld [vmem:[#allocation95_spill] sm:$0xff]  ;;  %v11636_v29 = vld [vmem:[%s14083_s6 + $0x58] ss:$0 sm:$0xff] }
 0x263   :  { %7631 = vmatpush1.bf16.msra.mxu0 %v14412_v10  ;;  %v11627_v20 = vpack.c.bf16 %v2888_v15, %v2886_v52  ;;  %v11629_v37 = vpack.c.bf16 %v2893_v19, %v2891_v28  ;;  %v1682_v51 = vmul.f32 %v14415_v12, %v837_v30  ;;  %v2300_v35 = vmul.f32 %v14416_v25, %v837_v30  ;;  %v14417_v15 = vld [vmem:[#allocation53_spill] sm:$0xff]  ;;  %v2890_v28 = vld [vmem:[#allocation8 + $0x460] sm:$0xff] }
 0x264   :  { %14409 = vst [vmem:[#allocation68_spill] sm:$0xff] %v11617_v49  ;;  %v1683_v24 = vmul.f32 %v14415_v12, %v838_v18  ;;  %v2301_v6 = vmul.f32 %v14416_v25, %v838_v18  ;;  %1093 = vrot.lane.b32.xlu0 %v14371_v41, %s14149_s3  ;;  %v902_v14 = vmul.f32 %v11611_v43, %v864_v39  ;;  %v2892_v19 = vld [vmem:[#allocation8 + $0x470] sm:$0xff]  ;;  %v960_v12 = vpop.permute.xlu0 %959  ;;  %v14418_v39 = vld [vmem:[#allocation182_spill] sm:$0xff]  ;;  %v11656_v30 = vpop.permute.xlu1 %961 }
 0x265   :  { %14413 = vst [vmem:[#allocation105_spill] sm:$0xff] %v11627_v20  ;;  %14414 = vst [vmem:[#allocation164_spill] sm:$0xff] %v11629_v37  ;;  %v863_v52 = vsel %vm859_vm7, %v850_v1, %v11622_v47  ;;  %1095 = vrot.lane.b32.xlu1 %v14417_v15, %s14149_s3  ;;  %7887 = vmatpush1.bf16.msra.mxu1 %v14412_v10  ;;  %v1690_v18 = vadd.f32 %v1682_v51, %v1672_v42  ;;  %v14419_v37 = vld [vmem:[#allocation101_spill] sm:$0xff]  ;;  %v14420_v1 = vld [vmem:[#allocation102_spill] sm:$0xff] }
 0x266   :  { %v2308_v53 = vadd.f32 %v2300_v35, %v2290_v56  ;;  %v1691_v58 = vadd.f32 %v1683_v24, %v1673_v38  ;;  %v2309_v25 = vadd.f32 %v2301_v6, %v2291_v61  ;;  %7633 = vmatprep.subr.bf16.mxu0 %v14418_v39  ;;  %v1700_v20 = vmul.f32 %v14419_v37, %v902_v14  ;;  %v2895_v35 = vld [vmem:[#allocation8 + $0x488] sm:$0xff]  ;;  %v2897_v61 = vld [vmem:[#allocation8 + $0x498] sm:$0xff] }
 0x267   :  { %v2318_v47 = vmul.f32 %v14420_v1, %v902_v14  ;;  %v903_v55 = vmul.f32 %v11636_v29, %v863_v52  ;;  %v976_v10 = vsel %vm404_vm1, %v14421_v57, %v960_v12  ;;  %14422 = vst [vmem:[#allocation161_spill] sm:$0xff] %v11656_v30  ;;  %7889 = vmatprep.subr.bf16.mxu1 %v14418_v39  ;;  %v14423_v51 = vld [vmem:[#allocation103_spill] sm:$0xff]  ;;  %v14424_v52 = vld [vmem:[#allocation106_spill] sm:$0xff] }
 0x268   :  { %v981_v24 = vmul.f32 %v976_v10, %v14341_v36  ;;  %v975_v6 = vsel %vm404_vm1, %v960_v12, %v11656_v30  ;;  %1125 = vrot.lane.b32.xlu0 %v14371_v41, %s14160_s24  ;;  %7635 = vmatpush1.bf16.msra.mxu0 %v11118_v34  ;;  %v11666_v14 = vpack.c.bf16 %v2892_v19, %v2890_v28  ;;  %v992_v49 = vpop.permute.xlu0 %991  ;;  %v14425_v19 = vld [vmem:[#allocation142_spill] sm:$0xff] }
 0x269   :  { %v1708_v57 = vadd.f32 %v1700_v20, %v1690_v18  ;;  %v2326_v56 = vadd.f32 %v2318_v47, %v2308_v53  ;;  %v1701_v42 = vmul.f32 %v14419_v37, %v903_v55  ;;  %v2319_v38 = vmul.f32 %v14420_v1, %v903_v55  ;;  %1127 = vrot.lane.b32.xlu1 %v14417_v15, %s14160_s24  ;;  %v2894_v20 = vld [vmem:[#allocation8 + $0x480] sm:$0xff]  ;;  %v2896_v47 = vld [vmem:[#allocation8 + $0x490] sm:$0xff]  ;;  %v11680_v18 = vpop.permute.xlu1 %993 }
 0x26a   :  { %v1718_v12 = vmul.f32 %v14423_v51, %v981_v24  ;;  %v2336_v39 = vmul.f32 %v14424_v52, %v981_v24  ;;  %v982_v10 = vmul.f32 %v975_v6, %v14342_v63  ;;  %7891 = vmatpush1.bf16.msra.mxu1 %v11118_v34  ;;  %7637 = vmatprep.subr.bf16.mxu0 %v11121_v8 }
 0x26b   :  { %v1709_v53 = vadd.f32 %v1701_v42, %v1691_v58  ;;  %v2327_v28 = vadd.f32 %v2319_v38, %v2309_v25  ;;  %v1008_v55 = vsel %vm469_vm0, %v14425_v19, %v992_v49  ;;  %14426 = vst [vmem:[#allocation162_spill] sm:$0xff] %v11680_v18  ;;  %7893 = vmatprep.subr.bf16.mxu1 %v11121_v8  ;;  %v2899_v58 = vld [vmem:[#allocation8 + $0x4a8] sm:$0xff]  ;;  %v2901_v25 = vld [vmem:[#allocation8 + $0x4b8] sm:$0xff] }
 0x26c   :  { %v11683_v24 = vpack.c.bf16 %v2897_v61, %v2895_v35  ;;  %v1726_v6 = vadd.f32 %v1718_v12, %v1708_v57  ;;  %v2344_v30 = vadd.f32 %v2336_v39, %v2326_v56  ;;  %v1719_v34 = vmul.f32 %v14423_v51, %v982_v10  ;;  %1157 = vrot.lane.b32.xlu0 %v14371_v41, %s14166_s14  ;;  %v1024_v56 = vpop.permute.xlu0 %1023  ;;  %v14427_v12 = vld [vmem:[#allocation107_spill] sm:$0xff]  ;;  %v14429_v19 = vld [vmem:[#allocation146_spill] sm:$0xff] }
 0x26d   :  { %v2337_v1 = vmul.f32 %v14424_v52, %v982_v10  ;;  %v1013_v42 = vmul.f32 %v1008_v55, %v14353_v40  ;;  %v1007_v38 = vsel %vm469_vm0, %v992_v49, %v11680_v18  ;;  %1159 = vrot.lane.b32.xlu1 %v14417_v15, %s14166_s14  ;;  %7639 = vmatpush1.bf16.msra.mxu0 %v11127_v23  ;;  %v14428_v10 = vld [vmem:[#allocation108_spill] sm:$0xff]  ;;  %v11706_v18 = vpop.permute.xlu1 %1025  ;;  %v14449_v52 = vld [vmem:[#allocation167_spill] sm:$0xff] }
 0x26e   :  { %v11696_v8 = vpack.c.bf16 %v2896_v47, %v2894_v20  ;;  %v1727_v35 = vadd.f32 %v1719_v34, %v1709_v53  ;;  %v1014_v57 = vmul.f32 %v1007_v38, %v14354_v45  ;;  %7895 = vmatpush1.bf16.msra.mxu1 %v11127_v23  ;;  %7641 = vmatprep.subr.bf16.mxu0 %v11140_v4 }
 0x26f   :  { %v2345_v61 = vadd.f32 %v2337_v1, %v2327_v28  ;;  %v1736_v39 = vmul.f32 %v14427_v12, %v1013_v42  ;;  %v2354_v49 = vmul.f32 %v14428_v10, %v1013_v42  ;;  %v1040_v55 = vsel %vm534_vm2, %v14429_v19, %v1024_v56  ;;  %14430 = vst [vmem:[#allocation178_spill] sm:$0xff] %v11706_v18 }
 0x270   :  { %7897 = vmatprep.subr.bf16.mxu1 %v11140_v4  ;;  %v11709_v1 = vpack.c.bf16 %v2901_v25, %v2899_v58  ;;  %v1737_v20 = vmul.f32 %v14427_v12, %v1014_v57  ;;  %v2355_v23 = vmul.f32 %v14428_v10, %v1014_v57  ;;  %v1045_v47 = vmul.f32 %v1040_v55, %v14359_v59  ;;  %v14431_v25 = vld [vmem:[#allocation109_spill] sm:$0xff]  ;;  %v14432_v57 = vld [vmem:[#allocation110_spill] sm:$0xff]  ;;  %v1056_v55 = vpop.permute.xlu0 %1055 }
 0x271   :  { %v1039_v53 = vsel %vm534_vm2, %v1024_v56, %v11706_v18  ;;  %1189 = vrot.lane.b32.xlu0 %v14371_v41, %s14172_s7  ;;  %v1744_v28 = vadd.f32 %v1736_v39, %v1726_v6  ;;  %v2362_v34 = vadd.f32 %v2354_v49, %v2344_v30  ;;  %1191 = vrot.lane.b32.xlu1 %v14417_v15, %s14172_s7  ;;  %v14433_v6 = vld [vmem:[#allocation91_spill] sm:$0xff]  ;;  %v11731_v39 = vpop.permute.xlu1 %1057  ;;  %v2908_v10 = vld [vmem:[#allocation8 + $0x4f0] sm:$0xff] }
 0x272   :  { %v1046_v42 = vmul.f32 %v1039_v53, %v14360_v5  ;;  %7643 = vmatpush1.bf16.msra.mxu0 %v11142_v62  ;;  %v1745_v4 = vadd.f32 %v1737_v20, %v1727_v35  ;;  %v2363_v58 = vadd.f32 %v2355_v23, %v2345_v61  ;;  %v1754_v38 = vmul.f32 %v14431_v25, %v1045_v47  ;;  %v2898_v35 = vld [vmem:[#allocation8 + $0x4a0] sm:$0xff]  ;;  %v2900_v61 = vld [vmem:[#allocation8 + $0x4b0] sm:$0xff]  ;;  %v2905_v53 = vld [vmem:[#allocation8 + $0x4d8] sm:$0xff] }
 0x273   :  { %v2372_v19 = vmul.f32 %v14432_v57, %v1045_v47  ;;  %7899 = vmatpush1.bf16.msra.mxu1 %v11142_v62  ;;  %v1072_v56 = vsel %vm599_vm3, %v14433_v6, %v1056_v55  ;;  %14434 = vst [vmem:[#allocation82_spill] sm:$0xff] %v11731_v39  ;;  %7645 = vmatprep.subr.bf16.mxu0 %v11144_v16  ;;  %v2903_v47 = vld [vmem:[#allocation8 + $0x4c8] sm:$0xff]  ;;  %v2906_v18 = vld [vmem:[#allocation8 + $0x4e0] sm:$0xff] }
 0x274   :  { %v1755_v41 = vmul.f32 %v14431_v25, %v1046_v42  ;;  %v2373_v30 = vmul.f32 %v14432_v57, %v1046_v42  ;;  %7901 = vmatprep.subr.bf16.mxu1 %v11144_v16  ;;  %v1762_v49 = vadd.f32 %v1754_v38, %v1744_v28  ;;  %v1077_v62 = vmul.f32 %v1072_v56, %v14368_v32  ;;  %v14435_v16 = vld [vmem:[#allocation132_spill] sm:$0xff]  ;;  %v14436_v28 = vld [vmem:[#allocation111_spill] sm:$0xff]  ;;  %v1090_v56 = vpop.permute.xlu0 %1089 }
 0x275   :  { %v2380_v20 = vadd.f32 %v2372_v19, %v2362_v34  ;;  %v1071_v23 = vsel %vm599_vm3, %v1056_v55, %v11731_v39  ;;  %1266 = vrot.lane.b32.xlu0 %v14245_v22, %s14176_s21  ;;  %1268 = vrot.lane.b32.xlu1 %v14435_v16, %s14176_s21  ;;  %v14437_v38 = vld [vmem:[#allocation112_spill] sm:$0xff]  ;;  %v11749_v55 = vpack.c.bf16 %v2900_v61, %v2898_v35 }
 0x276   :  { %v1763_v42 = vadd.f32 %v1755_v41, %v1745_v4  ;;  %v2381_v6 = vadd.f32 %v2373_v30, %v2363_v58  ;;  %v1078_v57 = vmul.f32 %v1071_v23, %v14370_v46  ;;  %7647 = vmatpush1.bf16.msra.mxu0 %v11151_v33  ;;  %v1772_v34 = vmul.f32 %v14436_v28, %v1077_v62  ;;  %v14438_v41 = vld [vmem:[#allocation163_spill] sm:$0xff]  ;;  %v11756_v23 = vpop.permute.xlu1 %1091 }
 0x277   :  { %v2390_v19 = vmul.f32 %v14437_v38, %v1077_v62  ;;  %7903 = vmatpush1.bf16.msra.mxu1 %v11151_v33  ;;  %7649 = vmatprep.subr.bf16.mxu0 %v11175_v44  ;;  %v1103_v30 = vsel %vm664_vm4, %v14438_v41, %v1090_v56  ;;  %14439 = vst [vmem:[#allocation165_spill] sm:$0xff] %v11756_v23 }
 0x278   :  { %v1773_v4 = vmul.f32 %v14436_v28, %v1078_v57  ;;  %v2391_v58 = vmul.f32 %v14437_v38, %v1078_v57  ;;  %7905 = vmatprep.subr.bf16.mxu1 %v11175_v44  ;;  %v11759_v62 = vpack.c.bf16 %v2905_v53, %v2903_v47  ;;  %v1780_v39 = vadd.f32 %v1772_v34, %v1762_v49  ;;  %v14441_v44 = vld [vmem:[#allocation175_spill] sm:$0xff]  ;;  %v14443_v53 = vld [vmem:[#allocation176_spill] sm:$0xff] }
 0x279   :  { %v2398_v33 = vadd.f32 %v2390_v19, %v2380_v20  ;;  %v1109_v25 = vmul.f32 %v1103_v30, %v14380_v21  ;;  %v1102_v35 = vsel %vm664_vm4, %v1090_v56, %v11756_v23  ;;  %1298 = vrot.lane.b32.xlu0 %v14245_v22, %s14186_s10  ;;  %1300 = vrot.lane.b32.xlu1 %v14435_v16, %s14186_s10  ;;  %v14442_v20 = vld [vmem:[#allocation113_spill] sm:$0xff]  ;;  %v14444_v19 = vld [vmem:[#allocation114_spill] sm:$0xff]  ;;  %v1122_v30 = vpop.permute.xlu0 %1121 }
 0x27a   :  { %14440 = vst [vmem:[#allocation166_spill] sm:$0xff] %v11759_v62  ;;  %v1781_v57 = vadd.f32 %v1773_v4, %v1763_v42  ;;  %v2399_v61 = vadd.f32 %v2391_v58, %v2381_v6  ;;  %v1110_v41 = vmul.f32 %v1102_v35, %v14381_v54  ;;  %7651 = vmatpush1.bf16.msra.mxu0 %v11177_v31  ;;  %v2902_v42 = vld [vmem:[#allocation8 + $0x4c0] sm:$0xff]  ;;  %v2904_v6 = vld [vmem:[#allocation8 + $0x4d0] sm:$0xff]  ;;  %v2907_v4 = vld [vmem:[#allocation8 + $0x4e8] sm:$0xff]  ;;  %v11784_v28 = vpop.permute.xlu1 %1123 }
 0x27b   :  { %v1836_v49 = vadd.f32 %v14441_v44, %v1780_v39  ;;  %v1846_v47 = vmul.f32 %v14442_v20, %v1109_v25  ;;  %v2454_v34 = vadd.f32 %v14443_v53, %v2398_v33  ;;  %v2464_v56 = vmul.f32 %v14444_v19, %v1109_v25  ;;  %7907 = vmatpush1.bf16.msra.mxu1 %v11177_v31  ;;  %v14448_v25 = vld [vmem:[#allocation189_spill] sm:$0xff] }
 0x27c   :  { %v14445_v58 = vcombine.high %v14441_v44, %v14441_v44  ;;  %v1847_v23 = vmul.f32 %v14442_v20, %v1110_v41  ;;  %v14446_v39 = vcombine.high %v14443_v53, %v14443_v53  ;;  %v2465_v33 = vmul.f32 %v14444_v19, %v1110_v41  ;;  %14447 = vst [vmem:[#allocation99_spill] sm:$0xff] %v11784_v28  ;;  %v2909_v31 = vld [vmem:[#allocation8 + $0x4f8] sm:$0xff]  ;;  %v2912_v19 = vld [vmem:[#allocation8 + $0x510] sm:$0xff] }
 0x27d   :  { %7653 = vmatprep.subr.bf16.mxu0 %v14448_v25  ;;  %v1854_v12 = vadd.f32 %v1846_v47, %v1836_v49  ;;  %v2472_v62 = vadd.f32 %v2464_v56, %v2454_v34  ;;  %v1134_v44 = vsel %vm729_vm5, %v1122_v30, %v11784_v28  ;;  %1330 = vrot.lane.b32.xlu0 %v14245_v22, %s14118_s1  ;;  %v2911_v49 = vld [vmem:[#allocation8 + $0x508] sm:$0xff]  ;;  %v2913_v47 = vld [vmem:[#allocation8 + $0x518] sm:$0xff]  ;;  %v1154_v34 = vpop.permute.xlu0 %1153 }
 0x27e   :  { %v1837_v35 = vadd.f32 %v14445_v58, %v1781_v57  ;;  %v2455_v38 = vadd.f32 %v14446_v39, %v2399_v61  ;;  %v1135_v57 = vsel %vm729_vm5, %v14449_v52, %v1122_v30  ;;  %v1142_v58 = vmul.f32 %v1134_v44, %v14393_v27  ;;  %1332 = vrot.lane.b32.xlu1 %v14435_v16, %s14118_s1  ;;  %v14450_v52 = vld [vmem:[#allocation190_spill] sm:$0xff]  ;;  %v14453_v39 = vld [vmem:[#allocation119_spill] sm:$0xff]  ;;  %v11811_v28 = vpop.permute.xlu1 %1155 }
 0x27f   :  { %v1141_v53 = vmul.f32 %v1135_v57, %v14392_v0  ;;  %7909 = vmatprep.subr.bf16.mxu1 %v14448_v25  ;;  %7655 = vmatpush1.bf16.msra.mxu0 %v14450_v52  ;;  %v11801_v56 = vpack.c.bf16 %v2904_v6, %v2902_v42  ;;  %v11803_v30 = vpack.c.bf16 %v2909_v31, %v2907_v4  ;;  %v2910_v25 = vld [vmem:[#allocation8 + $0x500] sm:$0xff]  ;;  %v2915_v42 = vld [vmem:[#allocation8 + $0x528] sm:$0xff] }
 0x280   :  { %v1855_v61 = vadd.f32 %v1847_v23, %v1837_v35  ;;  %v2473_v41 = vadd.f32 %v2465_v33, %v2455_v38  ;;  %v11805_v23 = vpack.c.bf16 %v2908_v10, %v2906_v18  ;;  %v14452_v38 = vld [vmem:[#allocation118_spill] sm:$0xff]  ;;  %v2483_v44 = vmul.f32 %v14453_v39, %v1142_v58  ;;  %14454 = vst [vmem:[#allocation92_spill] sm:$0xff] %v11811_v28  ;;  %v14455_v6 = vld [vmem:[#allocation171_spill] sm:$0xff] }
 0x281   :  { %v1864_v35 = vmul.f32 %v14452_v38, %v1141_v53  ;;  %v2482_v33 = vmul.f32 %v14453_v39, %v1141_v53  ;;  %v1865_v57 = vmul.f32 %v14452_v38, %v1142_v58  ;;  %7911 = vmatpush1.bf16.msra.mxu1 %v14450_v52  ;;  %v1167_v18 = vsel %vm794_vm6, %v14455_v6, %v1154_v34  ;;  %v14456_v4 = vld [vmem:[#allocation191_spill] sm:$0xff]  ;;  %v2917_v53 = vld [vmem:[#allocation8 + $0x538] sm:$0xff]  ;;  %v2916_v52 = vld [vmem:[#allocation8 + $0x530] sm:$0xff] }
 0x282   :  { %14451 = vst [vmem:[#allocation179_spill] sm:$0xff] %v11805_v23  ;;  %v1166_v10 = vsel %vm794_vm6, %v1154_v34, %v11811_v28  ;;  %1362 = vrot.lane.b32.xlu0 %v14245_v22, %s14134_s11  ;;  %7657 = vmatprep.subr.bf16.mxu0 %v14456_v4  ;;  %v11823_v31 = vpack.c.bf16 %v2913_v47, %v2911_v49  ;;  %v2914_v58 = vld [vmem:[#allocation8 + $0x520] sm:$0xff]  ;;  %v1186_v28 = vpop.permute.xlu0 %1185  ;;  %v14457_v49 = vld [vmem:[#allocation88_spill] sm:$0xff] }
 0x283   :  { %v1872_v39 = vadd.f32 %v1864_v35, %v1854_v12  ;;  %v2490_v38 = vadd.f32 %v2482_v33, %v2472_v62  ;;  %v1873_v20 = vadd.f32 %v1865_v57, %v1855_v61  ;;  %v2491_v23 = vadd.f32 %v2483_v44, %v2473_v41  ;;  %1364 = vrot.lane.b32.xlu1 %v14435_v16, %s14134_s11  ;;  %v11836_v62 = vpop.permute.xlu1 %1187  ;;  %v14460_v47 = vld [vmem:[#allocation120_spill] sm:$0xff] }
 0x284   :  { %v1173_v6 = vmul.f32 %v1167_v18, %v14406_v60  ;;  %v1174_v34 = vmul.f32 %v1166_v10, %v14407_v2  ;;  %7913 = vmatprep.subr.bf16.mxu1 %v14456_v4  ;;  %7659 = vmatpush1.bf16.msra.mxu0 %v11236_v13  ;;  %v11831_v22 = vpack.c.bf16 %v2912_v19, %v2910_v25  ;;  %v14461_v19 = vld [vmem:[#allocation121_spill] sm:$0xff]  ;;  %v9210_v18 = vld [vmem:[%s14067_s17 + $0x28] sm:$0xff]  ;;  %v14463_v10 = vstv %s10348_s16 }
 0x285   :  { %v1199_v12 = vsel %vm859_vm7, %v14457_v49, %v1186_v28  ;;  %14458 = vst [vmem:[#allocation169_spill] sm:$0xff] %v11836_v62  ;;  %7915 = vmatpush1.bf16.msra.mxu1 %v11236_v13  ;;  %7661 = vmatprep.subr.bf16.mxu0 %v11241_v50  ;;  %v11840_v61 = vpack.c.bf16 %v2917_v53, %v2915_v42  ;;  %v14462_v42 = vld [vmem:[#allocation55_spill] sm:$0xff]  ;;  %v14465_v49 = vld [vmem:[#allocation125_spill] sm:$0xff] }
 0x286   :  { %v11842_v41 = vpack.c.bf16 %v2916_v52, %v2914_v58  ;;  %v1882_v35 = vmul.f32 %v14460_v47, %v1173_v6  ;;  %v2500_v33 = vmul.f32 %v14461_v19, %v1173_v6  ;;  %v1883_v57 = vmul.f32 %v14460_v47, %v1174_v34  ;;  %1396 = vrot.lane.b32.xlu0 %v14435_v16, %s14149_s3 }
 0x287   :  { %v2501_v44 = vmul.f32 %v14461_v19, %v1174_v34  ;;  %v1205_v25 = vmul.f32 %v11611_v43, %v1199_v12  ;;  %v1198_v13 = vsel %vm859_vm7, %v1186_v28, %v11836_v62  ;;  %1398 = vrot.lane.b32.xlu1 %v14462_v42, %s14149_s3  ;;  %7917 = vmatprep.subr.bf16.mxu1 %v11241_v50  ;;  %v1263_v34 = vpop.permute.xlu0 %1262  ;;  %v14466_v19 = vld [vmem:[#allocation126_spill] sm:$0xff]  ;;  %v14467_v62 = vld [vmem:[#allocation177_spill] sm:$0xff] }
 0x288   :  { %14459 = vst [vmem:[#allocation170_spill] sm:$0xff] %v11842_v41  ;;  %v11860_v4 = vmul.f32 %v9210_v18, %v14463_v10  ;;  %v1890_v53 = vadd.f32 %v1882_v35, %v1872_v39  ;;  %v2508_v58 = vadd.f32 %v2500_v33, %v2490_v38  ;;  %v1891_v52 = vadd.f32 %v1883_v57, %v1873_v20  ;;  %v11869_v41 = vpop.permute.xlu1 %1264  ;;  %v14470_v57 = vld [vmem:[#allocation129_spill] sm:$0xff] }
 0x289   :  { %v2509_v6 = vadd.f32 %v2501_v44, %v2491_v23  ;;  %7663 = vmatpush1.bf16.msra.mxu0 %v11247_v48  ;;  %v1900_v12 = vmul.f32 %v14465_v49, %v1205_v25  ;;  %v2518_v28 = vmul.f32 %v14466_v19, %v1205_v25  ;;  %v1206_v47 = vmul.f32 %v11636_v29, %v1198_v13 }
 0x28a   :  { %14464 = vst [vmem:[#allocation180_spill] sm:$0xff] %v11860_v4  ;;  %v1279_v50 = vsel %vm404_vm1, %v14467_v62, %v1263_v34  ;;  %7919 = vmatpush1.bf16.msra.mxu1 %v11247_v48  ;;  %v1278_v23 = vsel %vm404_vm1, %v1263_v34, %v11869_v41  ;;  %1428 = vrot.lane.b32.xlu0 %v14435_v16, %s14160_s24 }
 0x28b   :  { %v1284_v20 = vmul.f32 %v1279_v50, %v14341_v36  ;;  %7665 = vmatprep.subr.bf16.mxu0 %v11265_v17  ;;  %v11881_v38 = vrot.slane %v11860_v4, %v9922_v7  ;;  %v1908_v39 = vadd.f32 %v1900_v12, %v1890_v53  ;;  %v2526_v62 = vadd.f32 %v2518_v28, %v2508_v58  ;;  %v14469_v36 = vld [vmem:[#allocation127_spill] sm:$0xff]  ;;  %v1295_v13 = vpop.permute.xlu0 %1294 }
 0x28c   :  { %v1901_v35 = vmul.f32 %v14465_v49, %v1206_v47  ;;  %v2519_v48 = vmul.f32 %v14466_v19, %v1206_v47  ;;  %1430 = vrot.lane.b32.xlu1 %v14462_v42, %s14160_s24  ;;  %v1285_v25 = vmul.f32 %v1278_v23, %v14342_v63  ;;  %7921 = vmatprep.subr.bf16.mxu1 %v11265_v17  ;;  %v14471_v58 = vld [vmem:[#allocation183_spill] sm:$0xff]  ;;  %v11895_v34 = vpop.permute.xlu1 %1296 }
 0x28d   :  { %14468 = vst [vmem:[#allocation116_spill] sm:$0xff] %v11881_v38  ;;  %v1918_v33 = vmul.f32 %v14469_v36, %v1284_v20  ;;  %v2536_v44 = vmul.f32 %v14470_v57, %v1284_v20  ;;  %7667 = vmatpush1.bf16.msra.mxu0 %v11267_v3  ;;  %v1311_v47 = vsel %vm469_vm0, %v14471_v58, %v1295_v13  ;;  %14472 = vst [vmem:[#allocation181_spill] sm:$0xff] %v11895_v34 }
 0x28e   :  { %v1909_v10 = vadd.f32 %v1901_v35, %v1891_v52  ;;  %v2527_v53 = vadd.f32 %v2519_v48, %v2509_v6  ;;  %7923 = vmatpush1.bf16.msra.mxu1 %v11267_v3  ;;  %7669 = vmatprep.subr.bf16.mxu0 %v11269_v11  ;;  %v1919_v28 = vmul.f32 %v14469_v36, %v1285_v25  ;;  %v14473_v3 = vstv %s10350_s15  ;;  %v14475_v35 = vld [vmem:[#allocation130_spill] sm:$0xff] }
 0x28f   :  { %v1926_v12 = vadd.f32 %v1918_v33, %v1908_v39  ;;  %v2544_v63 = vadd.f32 %v2536_v44, %v2526_v62  ;;  %v2537_v17 = vmul.f32 %v14470_v57, %v1285_v25  ;;  %1460 = vrot.lane.b32.xlu0 %v14435_v16, %s14166_s14  ;;  %v1316_v52 = vmul.f32 %v1311_v47, %v14353_v40  ;;  %v1327_v62 = vpop.permute.xlu0 %1326  ;;  %v14476_v33 = vld [vmem:[#allocation131_spill] sm:$0xff]  ;;  %v14477_v25 = vld [vmem:[#allocation185_spill] sm:$0xff] }
 0x290   :  { %v1310_v6 = vsel %vm469_vm0, %v1295_v13, %v11895_v34  ;;  %1462 = vrot.lane.b32.xlu1 %v14462_v42, %s14166_s14  ;;  %7925 = vmatprep.subr.bf16.mxu1 %v11269_v11  ;;  %v11912_v50 = vmul.f32 %v9210_v18, %v14473_v3  ;;  %v1927_v20 = vadd.f32 %v1919_v28, %v1909_v10  ;;  %v11923_v18 = vpop.permute.xlu1 %1328  ;;  %v14479_v13 = vld [vmem:[#allocation200_spill] sm:$0xff] }
 0x291   :  { %v2545_v23 = vadd.f32 %v2537_v17, %v2527_v53  ;;  %v1317_v39 = vmul.f32 %v1310_v6, %v14354_v45  ;;  %7671 = vmatpush1.bf16.msra.mxu0 %v11291_v26  ;;  %v1936_v48 = vmul.f32 %v14475_v35, %v1316_v52  ;;  %v2554_v44 = vmul.f32 %v14476_v33, %v1316_v52  ;;  %v14480_v6 = vld [vmem:[#allocation135_spill] sm:$0xff]  ;;  %v14481_v3 = vld [vmem:[#allocation136_spill] sm:$0xff] }
 0x292   :  { %14474 = vst [vmem:[#allocation53_spill] sm:$0xff] %v11912_v50  ;;  %v1343_v11 = vsel %vm534_vm2, %v14477_v25, %v1327_v62  ;;  %14478 = vst [vmem:[#allocation182_spill] sm:$0xff] %v11923_v18  ;;  %7927 = vmatpush1.bf16.msra.mxu1 %v11291_v26  ;;  %7673 = vmatprep.subr.bf16.mxu0 %v14479_v13  ;;  %v1342_v58 = vsel %vm534_vm2, %v1327_v62, %v11923_v18  ;;  %v14482_v62 = vld [vmem:[#allocation201_spill] sm:$0xff] }
 0x293   :  { %v1937_v45 = vmul.f32 %v14475_v35, %v1317_v39  ;;  %v2555_v10 = vmul.f32 %v14476_v33, %v1317_v39  ;;  %v1348_v53 = vmul.f32 %v1343_v11, %v14359_v59  ;;  %1492 = vrot.lane.b32.xlu0 %v14435_v16, %s14172_s7  ;;  %v1944_v47 = vadd.f32 %v1936_v48, %v1926_v12  ;;  %v1359_v25 = vpop.permute.xlu0 %1358  ;;  %v14540_v33 = vld [vmem:[#allocation155_spill] sm:$0xff] }
 0x294   :  { %v2562_v28 = vadd.f32 %v2554_v44, %v2544_v63  ;;  %v1349_v17 = vmul.f32 %v1342_v58, %v14360_v5  ;;  %1494 = vrot.lane.b32.xlu1 %v14462_v42, %s14172_s7  ;;  %7929 = vmatprep.subr.bf16.mxu1 %v14479_v13  ;;  %v14483_v63 = vld [vmem:[#allocation187_spill] sm:$0xff]  ;;  %v11947_v48 = vpop.permute.xlu1 %1360  ;;  %v2921_v44 = vld [vmem:[#allocation8 + $0x558] sm:$0xff] }
 0x295   :  { %v1945_v26 = vadd.f32 %v1937_v45, %v1927_v20  ;;  %v2563_v52 = vadd.f32 %v2555_v10, %v2545_v23  ;;  %v1954_v59 = vmul.f32 %v14480_v6, %v1348_v53  ;;  %v2572_v39 = vmul.f32 %v14481_v3, %v1348_v53  ;;  %7675 = vmatpush1.bf16.msra.mxu0 %v14482_v62  ;;  %v14485_v20 = vld [vmem:[#allocation156_spill] sm:$0xff]  ;;  %v14486_v53 = vld [vmem:[#allocation51_spill] sm:$0xff] }
 0x296   :  { %v1955_v16 = vmul.f32 %v14480_v6, %v1349_v17  ;;  %v2573_v12 = vmul.f32 %v14481_v3, %v1349_v17  ;;  %v1375_v5 = vsel %vm599_vm3, %v14483_v63, %v1359_v25  ;;  %14484 = vst [vmem:[#allocation128_spill] sm:$0xff] %v11947_v48  ;;  %7931 = vmatpush1.bf16.msra.mxu1 %v14482_v62  ;;  %v2919_v23 = vld [vmem:[#allocation8 + $0x548] sm:$0xff]  ;;  %v2918_v58 = vld [vmem:[#allocation8 + $0x540] sm:$0xff]  ;;  %v2920_v17 = vld [vmem:[#allocation8 + $0x550] sm:$0xff] }
 0x297   :  { %7677 = vmatprep.subr.bf16.mxu0 %v14485_v20  ;;  %v1962_v11 = vadd.f32 %v1954_v59, %v1944_v47  ;;  %v2580_v13 = vadd.f32 %v2572_v39, %v2562_v28  ;;  %v1380_v45 = vmul.f32 %v1375_v5, %v14368_v32  ;;  %v1374_v10 = vsel %vm599_vm3, %v1359_v25, %v11947_v48  ;;  %v14487_v47 = vld [vmem:[#allocation137_spill] sm:$0xff]  ;;  %v14488_v28 = vld [vmem:[#allocation139_spill] sm:$0xff]  ;;  %v1393_v39 = vpop.permute.xlu0 %1392  ;;  %v14499_v3 = vld [vmem:[#allocation194_spill] sm:$0xff] }
 0x298   :  { %398 = vrot.lane.b32.xlu0 %v14486_v53, %s14176_s21  ;;  %v1963_v63 = vadd.f32 %v1955_v16, %v1945_v26  ;;  %v2581_v40 = vadd.f32 %v2573_v12, %v2563_v52  ;;  %v1381_v62 = vmul.f32 %v1374_v10, %v14370_v46  ;;  %465 = vrot.lane.b32.xlu1 %v14486_v53, %s14186_s10  ;;  %v14490_v52 = vld [vmem:[#allocation192_spill] sm:$0xff]  ;;  %v11974_v12 = vpop.permute.xlu1 %1394  ;;  %v14506_v6 = vld [vmem:[#allocation67_spill] sm:$0xff] }
 0x299   :  { %7933 = vmatprep.subr.bf16.mxu1 %v14485_v20  ;;  %v1972_v32 = vmul.f32 %v14487_v47, %v1380_v45  ;;  %v2590_v59 = vmul.f32 %v14488_v28, %v1380_v45  ;;  %v11965_v25 = vrot.slane %v11912_v50, %v9922_v7  ;;  %v11967_v5 = vpack.c.bf16 %v2921_v44, %v2919_v23 }
 0x29a   :  { %v1973_v26 = vmul.f32 %v14487_v47, %v1381_v62  ;;  %v2591_v46 = vmul.f32 %v14488_v28, %v1381_v62  ;;  %v1406_v16 = vsel %vm664_vm4, %v14490_v52, %v1393_v39  ;;  %14491 = vst [vmem:[#allocation142_spill] sm:$0xff] %v11974_v12  ;;  %v11976_v20 = vpack.c.bf16 %v2920_v17, %v2918_v58  ;;  %v2925_v58 = vld [vmem:[#allocation8 + $0x578] sm:$0xff]  ;;  %v2928_v47 = vld [vmem:[#allocation8 + $0x590] sm:$0xff] }
 0x29b   :  { %14489 = vst [vmem:[#allocation103_spill] sm:$0xff] %v11965_v25  ;;  %v1980_v45 = vadd.f32 %v1972_v32, %v1962_v11  ;;  %v2598_v10 = vadd.f32 %v2590_v59, %v2580_v13  ;;  %v1412_v38 = vmul.f32 %v1406_v16, %v14380_v21  ;;  %v1405_v23 = vsel %vm664_vm4, %v1393_v39, %v11974_v12  ;;  %v2923_v13 = vld [vmem:[#allocation8 + $0x568] sm:$0xff]  ;;  %v14494_v39 = vld [vmem:[#allocation186_spill] sm:$0xff]  ;;  %v14495_v16 = vld [vmem:[#allocation141_spill] sm:$0xff] }
 0x29c   :  { %530 = vrot.lane.b32.xlu0 %v14486_v53, %s14118_s1  ;;  %v1981_v44 = vadd.f32 %v1973_v26, %v1963_v63  ;;  %v2599_v62 = vadd.f32 %v2591_v46, %v2581_v40  ;;  %v1413_v50 = vmul.f32 %v1405_v23, %v14381_v54  ;;  %595 = vrot.lane.b32.xlu1 %v14486_v53, %s14134_s11  ;;  %v14492_v21 = vld [vmem:[#allocation124_spill] sm:$0xff]  ;;  %v1425_v63 = vpop.permute.xlu0 %1424  ;;  %v2922_v40 = vld [vmem:[#allocation8 + $0x560] sm:$0xff]  ;;  %v12001_v28 = vpop.permute.xlu1 %1426 }
 0x29d   :  { %v2036_v17 = vadd.f32 %v14492_v21, %v1980_v45  ;;  %v14493_v32 = vld [vmem:[#allocation140_spill] sm:$0xff]  ;;  %v2654_v52 = vadd.f32 %v14494_v39, %v2598_v10  ;;  %v2664_v12 = vmul.f32 %v14495_v16, %v1412_v38  ;;  %v14496_v53 = vcombine.high %v14492_v21, %v14492_v21  ;;  %14498 = vst [vmem:[#allocation146_spill] sm:$0xff] %v12001_v28  ;;  %v2929_v10 = vld [vmem:[#allocation8 + $0x598] sm:$0xff] }
 0x29e   :  { %v2046_v59 = vmul.f32 %v14493_v32, %v1412_v38  ;;  %v2924_v26 = vld [vmem:[#allocation8 + $0x570] sm:$0xff]  ;;  %v2927_v54 = vld [vmem:[#allocation8 + $0x588] sm:$0xff]  ;;  %v2047_v23 = vmul.f32 %v14493_v32, %v1413_v50  ;;  %v14497_v11 = vcombine.high %v14494_v39, %v14494_v39  ;;  %v2665_v25 = vmul.f32 %v14495_v16, %v1413_v50  ;;  %v2926_v38 = vld [vmem:[#allocation8 + $0x580] sm:$0xff] }
 0x29f   :  { %v2037_v46 = vadd.f32 %v14496_v53, %v1981_v44  ;;  %v2672_v48 = vadd.f32 %v2664_v12, %v2654_v52  ;;  %v1438_v21 = vsel %vm729_vm5, %v14499_v3, %v1425_v63  ;;  %v1437_v44 = vsel %vm729_vm5, %v1425_v63, %v12001_v28  ;;  %v14500_v39 = vld [vmem:[#allocation52_spill] sm:$0xff]  ;;  %v2933_v3 = vld [vmem:[#allocation8 + $0x5b8] sm:$0xff]  ;;  %v2930_v12 = vld [vmem:[#allocation8 + $0x5a0] sm:$0xff] }
 0x2a0   :  { %v2655_v45 = vadd.f32 %v14497_v11, %v2599_v62  ;;  %v2054_v4 = vadd.f32 %v2046_v59, %v2036_v17  ;;  %662 = vrot.lane.b32.xlu0 %v14500_v39, %s14149_s3  ;;  %v2931_v62 = vld [vmem:[#allocation8 + $0x5a8] sm:$0xff]  ;;  %v1444_v53 = vmul.f32 %v1438_v21, %v14392_v0  ;;  %v1445_v17 = vmul.f32 %v1437_v44, %v14393_v27  ;;  %v2932_v59 = vld [vmem:[#allocation8 + $0x5b0] sm:$0xff]  ;;  %v1457_v52 = vpop.permute.xlu0 %1456  ;;  %v12027_v44 = vpop.permute.xlu1 %1458 }
 0x2a1   :  { %v2055_v50 = vadd.f32 %v2047_v23, %v2037_v46  ;;  %727 = vrot.lane.b32.xlu1 %v14500_v39, %s14160_s24  ;;  %v12015_v63 = vpack.c.bf16 %v2925_v58, %v2923_v13  ;;  %v12017_v28 = vpack.c.bf16 %v2924_v26, %v2922_v40  ;;  %v12019_v16 = vpack.c.bf16 %v2929_v10, %v2927_v54  ;;  %v14501_v0 = vld [vmem:[#allocation144_spill] sm:$0xff]  ;;  %v14502_v23 = vld [vmem:[#allocation145_spill] sm:$0xff]  ;;  %v14504_v58 = vld [vmem:[#allocation134_spill] sm:$0xff] }
 0x2a2   :  { %v2673_v11 = vadd.f32 %v2665_v25, %v2655_v45  ;;  %v12021_v25 = vpack.c.bf16 %v2928_v47, %v2926_v38  ;;  %v2064_v46 = vmul.f32 %v14501_v0, %v1444_v53  ;;  %v2682_v27 = vmul.f32 %v14502_v23, %v1444_v53  ;;  %14503 = vst [vmem:[#allocation91_spill] sm:$0xff] %v12027_v44  ;;  %v12030_v32 = vld [vmem:[%s14083_s6 + $0x30] sm:$0xff]  ;;  %v12033_v13 = vld [vmem:[%s14083_s6 + $0x38] sm:$0xff]  ;;  %v2935_v10 = vld [vmem:[#allocation8 + $0x5c8] sm:$0xff] }
 0x2a3   :  { %v2065_v45 = vmul.f32 %v14501_v0, %v1445_v17  ;;  %v2683_v21 = vmul.f32 %v14502_v23, %v1445_v17  ;;  %v1470_v40 = vsel %vm794_vm6, %v14504_v58, %v1457_v52  ;;  %v1469_v47 = vsel %vm794_vm6, %v1457_v52, %v12027_v44  ;;  %v2937_v38 = vld [vmem:[#allocation8 + $0x5d8] sm:$0xff] }
 0x2a4   :  { %792 = vrot.lane.b32.xlu0 %v14500_v39, %s14166_s14  ;;  %v12043_v26 = vpack.c.bf16 %v2933_v3, %v2931_v62  ;;  %v12045_v54 = vpack.c.bf16 %v2932_v59, %v2930_v12  ;;  %v2072_v53 = vadd.f32 %v2064_v46, %v2054_v4  ;;  %v2690_v17 = vadd.f32 %v2682_v27, %v2672_v48  ;;  %v1489_v44 = vpop.permute.xlu0 %1488  ;;  %v2934_v4 = vld [vmem:[#allocation8 + $0x5c0] sm:$0xff]  ;;  %v2936_v48 = vld [vmem:[#allocation8 + $0x5d0] sm:$0xff] }
 0x2a5   :  { %v2073_v23 = vadd.f32 %v2065_v45, %v2055_v50  ;;  %v2691_v0 = vadd.f32 %v2683_v21, %v2673_v11  ;;  %857 = vrot.lane.b32.xlu1 %v14500_v39, %s14172_s7  ;;  %v1476_v58 = vmul.f32 %v1470_v40, %v14406_v60  ;;  %v1477_v52 = vmul.f32 %v1469_v47, %v14407_v2  ;;  %v14509_v50 = vld [vmem:[#allocation211_spill] sm:$0xff]  ;;  %v12062_v39 = vpop.permute.xlu1 %1490  ;;  %v14511_v60 = vld [vmem:[#allocation66_spill] sm:$0xff]  ;;  %v14516_v45 = vld [vmem:[#allocation148_spill] sm:$0xff] }
 0x2a6   :  { %14505 = vst [vmem:[#allocation132_spill] sm:$0xff] %v12045_v54  ;;  %v12053_v62 = vrot.slane %v12030_v32, %v14506_v6  ;;  %v12057_v3 = vrot.slane %v12033_v13, %v14506_v6  ;;  %v1502_v11 = vsel %vm859_vm7, %v14509_v50, %v1489_v44  ;;  %14510 = vst [vmem:[#allocation176_spill] sm:$0xff] %v12062_v39  ;;  %v14515_v46 = vld [vmem:[#allocation147_spill] sm:$0xff] }
 0x2a7   :  { %v12066_v2 = vrot.slane %v12030_v32, %v14511_v60  ;;  %v12070_v12 = vrot.slane %v12033_v13, %v14511_v60  ;;  %v12072_v59 = vpack.c.bf16 %v2937_v38, %v2935_v10  ;;  %v2082_v27 = vmul.f32 %v14515_v46, %v1476_v58  ;;  %v14518_v38 = vld [vmem:[#allocation71_spill] sm:$0xff] }
 0x2a8   :  { %14507 = vst [vmem:[#allocation163_spill] sm:$0xff] %v12053_v62  ;;  %14508 = vst [vmem:[#allocation175_spill] sm:$0xff] %v12057_v3  ;;  %v2700_v21 = vmul.f32 %v14516_v45, %v1476_v58  ;;  %v2083_v40 = vmul.f32 %v14515_v46, %v1477_v52  ;;  %v2701_v47 = vmul.f32 %v14516_v45, %v1477_v52  ;;  %967 = vrot.lane.b32.xlu0 %v14417_v15, %s14176_s21  ;;  %v14521_v62 = vld [vmem:[#allocation150_spill] sm:$0xff] }
 0x2a9   :  { %14512 = vst [vmem:[#allocation189_spill] sm:$0xff] %v12066_v2  ;;  %14513 = vst [vmem:[#allocation167_spill] sm:$0xff] %v12070_v12  ;;  %v1508_v50 = vmul.f32 %v11611_v43, %v1502_v11  ;;  %v1501_v60 = vsel %vm859_vm7, %v1489_v44, %v12062_v39  ;;  %999 = vrot.lane.b32.xlu1 %v14417_v15, %s14186_s10  ;;  %v12086_v10 = vpack.c.bf16 %v2936_v48, %v2934_v4  ;;  %v395_v2 = vpop.permute.xlu0 %394  ;;  %v14520_v43 = vld [vmem:[#allocation149_spill] sm:$0xff]  ;;  %v14522_v44 = vld [vmem:[#allocation59_spill] sm:$0xff]  ;;  %v12098_v4 = vpop.permute.xlu1 %396 }
 0x2aa   :  { %14514 = vst [vmem:[#allocation190_spill] sm:$0xff] %v12072_v59  ;;  %v12090_v58 = vrot.slane %v12030_v32, %v14518_v38  ;;  %v2090_v6 = vadd.f32 %v2082_v27, %v2072_v53  ;;  %v2708_v52 = vadd.f32 %v2700_v21, %v2690_v17  ;;  %v1509_v12 = vmul.f32 %v11636_v29, %v1501_v60  ;;  %v14524_v17 = vld [vmem:[#allocation195_spill] sm:$0xff]  ;;  %v14525_v21 = vld [vmem:[#allocation196_spill] sm:$0xff] }
 0x2ab   :  { %14517 = vst [vmem:[#allocation171_spill] sm:$0xff] %v12086_v10  ;;  %v2091_v3 = vadd.f32 %v2083_v40, %v2073_v23  ;;  %v2100_v11 = vmul.f32 %v14520_v43, %v1508_v50  ;;  %v2718_v45 = vmul.f32 %v14521_v62, %v1508_v50  ;;  %v408_v46 = vsel %vm404_vm1, %v14522_v44, %v395_v2  ;;  %v14542_v10 = vld [vmem:[#allocation202_spill] sm:$0xff]  ;;  %v14545_v59 = vld [vmem:[#allocation80_spill] sm:$0xff] }
 0x2ac   :  { %14519 = vst [vmem:[#allocation191_spill] sm:$0xff] %v12090_v58  ;;  %14523 = vst [vmem:[#allocation88_spill] sm:$0xff] %v12098_v4  ;;  %v2709_v48 = vadd.f32 %v2701_v47, %v2691_v0  ;;  %v2101_v39 = vmul.f32 %v14520_v43, %v1509_v12  ;;  %v2719_v53 = vmul.f32 %v14521_v62, %v1509_v12  ;;  %1031 = vrot.lane.b32.xlu0 %v14417_v15, %s14118_s1  ;;  %v14527_v12 = vld [vmem:[#allocation76_spill] sm:$0xff]  ;;  %v14528_v47 = vld [vmem:[#allocation77_spill] sm:$0xff] }
 0x2ad   :  { %v449_v27 = vmul.f32 %v14524_v17, %v408_v46  ;;  %v407_v29 = vsel %vm404_vm1, %v395_v2, %v12098_v4  ;;  %v2108_v23 = vadd.f32 %v2100_v11, %v2090_v6  ;;  %v2726_v60 = vadd.f32 %v2718_v45, %v2708_v52  ;;  %1063 = vrot.lane.b32.xlu1 %v14417_v15, %s14134_s11  ;;  %v462_v44 = vpop.permute.xlu0 %461  ;;  %v14529_v45 = vld [vmem:[#allocation58_spill] sm:$0xff]  ;;  %v12122_v15 = vpop.permute.xlu1 %463  ;;  %v14531_v11 = vld [vmem:[#allocation153_spill] sm:$0xff]  ;;  %v14539_v62 = vld [vmem:[#allocation75_spill] sm:$0xff] }
 0x2ae   :  { %v450_v40 = vmul.f32 %v14525_v21, %v407_v29  ;;  %v12113_v0 = vrot.slane %v12033_v13, %v14518_v38  ;;  %v2109_v2 = vadd.f32 %v2101_v39, %v2091_v3  ;;  %v2727_v58 = vadd.f32 %v2719_v53, %v2709_v48  ;;  %14530 = vst [vmem:[#allocation177_spill] sm:$0xff] %v12122_v15  ;;  %v14532_v38 = vld [vmem:[#allocation198_spill] sm:$0xff]  ;;  %v14534_v48 = vld [vmem:[#allocation157_spill] sm:$0xff] }
 0x2af   :  { %v1520_v46 = vmul.f32 %v14527_v12, %v449_v27  ;;  %v2138_v50 = vmul.f32 %v14528_v47, %v449_v27  ;;  %v473_v52 = vsel %vm469_vm0, %v14529_v45, %v462_v44  ;;  %v2118_v29 = vadd.f32 %v14531_v11, %v2108_v23  ;;  %v14533_v3 = vld [vmem:[#allocation54_spill] sm:$0xff] }
 0x2b0   :  { %14526 = vst [vmem:[#allocation55_spill] sm:$0xff] %v12113_v0  ;;  %v1521_v4 = vmul.f32 %v14527_v12, %v450_v40  ;;  %v2139_v6 = vmul.f32 %v14528_v47, %v450_v40  ;;  %v514_v0 = vmul.f32 %v14532_v38, %v473_v52  ;;  %v472_v27 = vsel %vm469_vm0, %v462_v44, %v12122_v15  ;;  %v14535_v40 = vld [vmem:[#allocation199_spill] sm:$0xff]  ;;  %v14536_v52 = vld [vmem:[#allocation74_spill] sm:$0xff]  ;;  %v14538_v44 = vld [vmem:[#allocation73_spill] sm:$0xff] }
 0x2b1   :  { %1097 = vrot.lane.b32.xlu0 %v14533_v3, %s14149_s3  ;;  %v2119_v39 = vadd.f32 %v14531_v11, %v2109_v2  ;;  %v2737_v53 = vadd.f32 %v14534_v48, %v2727_v58  ;;  %v515_v47 = vmul.f32 %v14535_v40, %v472_v27  ;;  %1129 = vrot.lane.b32.xlu1 %v14533_v3, %s14160_s24  ;;  %v2126_v45 = vmax.f32 %v2118_v29, 0.0  ;;  %v527_v18 = vpop.permute.xlu0 %526 }
 0x2b2   :  { %v2736_v23 = vadd.f32 %v14534_v48, %v2726_v60  ;;  %v12139_v12 = vrot.slane %v12030_v32, %v14536_v52  ;;  %v1538_v15 = vmul.f32 %v14538_v44, %v514_v0  ;;  %v2156_v43 = vmul.f32 %v14539_v62, %v514_v0  ;;  %v12148_v60 = vpop.permute.xlu1 %528 }
 0x2b3   :  { %v2127_v2 = vmax.f32 %v2119_v39, 0.0  ;;  %v2745_v11 = vmax.f32 %v2737_v53, 0.0  ;;  %v1539_v58 = vmul.f32 %v14538_v44, %v515_v47  ;;  %v2157_v27 = vmul.f32 %v14539_v62, %v515_v47  ;;  %14541 = vst [vmem:[#allocation185_spill] sm:$0xff] %v12148_v60  ;;  %v14543_v44 = vld [vmem:[#allocation204_spill] sm:$0xff]  ;;  %v14544_v62 = vld [vmem:[#allocation79_spill] sm:$0xff] }
 0x2b4   :  { %14537 = vst [vmem:[#allocation183_spill] sm:$0xff] %v12139_v12  ;;  %v538_v29 = vsel %vm534_vm2, %v14540_v33, %v527_v18  ;;  %v2744_v48 = vmax.f32 %v2736_v23, 0.0  ;;  %v1546_v35 = vadd.f32 %v1538_v15, %v1520_v46  ;;  %v2164_v12 = vadd.f32 %v2156_v43, %v2138_v50  ;;  %v2940_v23 = vld [vmem:[#allocation8 + $0x5f0] sm:$0xff] }
 0x2b5   :  { %v579_v34 = vmul.f32 %v14542_v10, %v538_v29  ;;  %v537_v0 = vsel %vm534_vm2, %v527_v18, %v12148_v60  ;;  %3141 = vmatprep.mubr.f32.mxu0 %v2127_v2  ;;  %v1547_v39 = vadd.f32 %v1539_v58, %v1521_v4  ;;  %v2165_v53 = vadd.f32 %v2157_v27, %v2139_v6  ;;  %v592_v43 = vpop.permute.xlu0 %591  ;;  %v2939_v18 = vld [vmem:[#allocation8 + $0x5e8] sm:$0xff]  ;;  %v14547_v6 = vld [vmem:[#allocation62_spill] sm:$0xff] }
 0x2b6   :  { %v580_v47 = vmul.f32 %v14543_v44, %v537_v0  ;;  %3425 = vmatprep.mubr.f32.mxu1 %v2745_v11  ;;  %3142 = vmatmul.mubr.f32.vlgmr.msra.gmra.mrb[0].mxu0 %v2126_v45  ;;  %v12161_v46 = vrot.slane %v12033_v13, %v14536_v52  ;;  %v12170_v15 = vpop.permute.xlu1 %593  ;;  %v14549_v11 = vld [vmem:[#allocation69_spill] sm:$0xff]  ;;  %v2938_v45 = vld [vmem:[#allocation8 + $0x5e0] sm:$0xff] }
 0x2b7   :  { %v1556_v33 = vmul.f32 %v14544_v62, %v579_v34  ;;  %v2174_v57 = vmul.f32 %v14545_v59, %v579_v34  ;;  %3426 = vmatmul.mubr.f32.vlgmr.msra.gmra.mrb[0].mxu1 %v2744_v48  ;;  %1161 = vrot.lane.b32.xlu0 %v14533_v3, %s14166_s14  ;;  %v603_v34 = vsel %vm599_vm3, %v14547_v6, %v592_v43  ;;  %v2941_v48 = vld [vmem:[#allocation8 + $0x5f8] sm:$0xff]  ;;  %v14551_v6 = vld [vmem:[#allocation208_spill] sm:$0xff] }
 0x2b8   :  { %14546 = vst [vmem:[#allocation200_spill] sm:$0xff] %v12161_v46  ;;  %v1557_v4 = vmul.f32 %v14544_v62, %v580_v47  ;;  %v2175_v50 = vmul.f32 %v14545_v59, %v580_v47  ;;  %1193 = vrot.lane.b32.xlu1 %v14533_v3, %s14172_s7  ;;  %14548 = vst [vmem:[#allocation201_spill] sm:$0xff] %v12170_v15  ;;  %7679 = vmatpush1.bf16.msra.mxu0 %v14549_v11  ;;  %v14550_v27 = vld [vmem:[#allocation206_spill] sm:$0xff]  ;;  %v14553_v59 = vld [vmem:[#allocation85_spill] sm:$0xff] }
 0x2b9   :  { %v1564_v2 = vadd.f32 %v1556_v33, %v1546_v35  ;;  %v2182_v58 = vadd.f32 %v2174_v57, %v2164_v12  ;;  %v644_v29 = vmul.f32 %v14550_v27, %v603_v34  ;;  %v602_v0 = vsel %vm599_vm3, %v592_v43, %v12170_v15  ;;  %7935 = vmatpush1.bf16.msra.mxu1 %v14549_v11  ;;  %v14552_v46 = vld [vmem:[#allocation70_spill] sm:$0xff]  ;;  %v659_v12 = vpop.permute.xlu0 %658  ;;  %v14559_v34 = vld [vmem:[#allocation65_spill] sm:$0xff] }
 0x2ba   :  { %v1565_v3 = vadd.f32 %v1557_v4, %v1547_v39  ;;  %v2183_v47 = vadd.f32 %v2175_v50, %v2165_v53  ;;  %v645_v52 = vmul.f32 %v14551_v6, %v602_v0  ;;  %7681 = vmatprep.subr.bf16.mxu0 %v14552_v46  ;;  %7937 = vmatprep.subr.bf16.mxu1 %v14552_v46  ;;  %v14554_v35 = vld [vmem:[#allocation86_spill] sm:$0xff]  ;;  %v14557_v46 = vld [vmem:[#allocation173_spill] sm:$0xff]  ;;  %v12196_v50 = vpop.permute.xlu1 %660  ;;  %v14561_v0 = vld [vmem:[#allocation212_spill] sm:$0xff] }
 0x2bb   :  { %v1574_v62 = vmul.f32 %v14553_v59, %v644_v29  ;;  %v2192_v57 = vmul.f32 %v14554_v35, %v644_v29  ;;  %1270 = vrot.lane.b32.xlu0 %v14462_v42, %s14176_s21  ;;  %v12185_v33 = vpack.c.bf16 %v2941_v48, %v2939_v18  ;;  %v12187_v43 = vpack.c.bf16 %v2940_v23, %v2938_v45  ;;  %v14560_v48 = vld [vmem:[#allocation210_spill] sm:$0xff] }
 0x2bc   :  { %v1575_v39 = vmul.f32 %v14553_v59, %v645_v52  ;;  %v2193_v53 = vmul.f32 %v14554_v35, %v645_v52  ;;  %1302 = vrot.lane.b32.xlu1 %v14462_v42, %s14186_s10  ;;  %v667_v4 = vsel %vm664_vm4, %v14557_v46, %v659_v12  ;;  %14558 = vst [vmem:[#allocation51_spill] sm:$0xff] %v12196_v50  ;;  %v14562_v59 = vld [vmem:[#allocation160_spill] sm:$0xff]  ;;  %v14563_v46 = vld [vmem:[#allocation207_spill] sm:$0xff] }
 0x2bd   :  { %14555 = vst [vmem:[#allocation187_spill] sm:$0xff] %v12185_v33  ;;  %14556 = vst [vmem:[#allocation156_spill] sm:$0xff] %v12187_v43  ;;  %7683 = vmatpush1.bf16.msra.mxu0 %v14559_v34  ;;  %v1582_v11 = vadd.f32 %v1574_v62, %v1564_v2  ;;  %v2200_v18 = vadd.f32 %v2192_v57, %v2182_v58  ;;  %v709_v45 = vmul.f32 %v14560_v48, %v667_v4  ;;  %v14564_v62 = vld [vmem:[#allocation89_spill] sm:$0xff]  ;;  %v14566_v4 = vld [vmem:[#allocation90_spill] sm:$0xff] }
 0x2be   :  { %v666_v23 = vsel %vm664_vm4, %v659_v12, %v12196_v50  ;;  %7939 = vmatpush1.bf16.msra.mxu1 %v14559_v34  ;;  %v1583_v52 = vadd.f32 %v1575_v39, %v1565_v3  ;;  %v2201_v29 = vadd.f32 %v2193_v53, %v2183_v47  ;;  %7685 = vmatprep.subr.bf16.mxu0 %v14562_v59  ;;  %v14565_v58 = vld [vmem:[#allocation209_spill] sm:$0xff]  ;;  %v724_v12 = vpop.permute.xlu0 %723  ;;  %v14583_v50 = vld [vmem:[#allocation96_spill] sm:$0xff] }
 0x2bf   :  { %v710_v35 = vmul.f32 %v14561_v0, %v666_v23  ;;  %7941 = vmatprep.subr.bf16.mxu1 %v14562_v59  ;;  %v1638_v15 = vadd.f32 %v14563_v46, %v1582_v11  ;;  %v1648_v2 = vmul.f32 %v14564_v62, %v709_v45  ;;  %v2256_v57 = vadd.f32 %v14565_v58, %v2200_v18  ;;  %v12223_v11 = vpop.permute.xlu1 %725  ;;  %v14570_v23 = vld [vmem:[#allocation87_spill] sm:$0xff]  ;;  %v14585_v33 = vld [vmem:[#allocation152_spill] sm:$0xff] }
 0x2c0   :  { %v2266_v60 = vmul.f32 %v14566_v4, %v709_v45  ;;  %1334 = vrot.lane.b32.xlu0 %v14462_v42, %s14118_s1  ;;  %v14567_v3 = vcombine.high %v14563_v46, %v14563_v46  ;;  %v14568_v59 = vcombine.high %v14565_v58, %v14565_v58  ;;  %1366 = vrot.lane.b32.xlu1 %v14462_v42, %s14134_s11  ;;  %s14832_s11 = sld [smem:[#allocation40_spill]] }
 0x2c1   :  { %v1649_v39 = vmul.f32 %v14564_v62, %v710_v35  ;;  %v2267_v34 = vmul.f32 %v14566_v4, %v710_v35  ;;  %14569 = vst [vmem:[#allocation192_spill] sm:$0xff] %v12223_v11  ;;  %v1656_v18 = vadd.f32 %v1648_v2, %v1638_v15  ;;  %v732_v46 = vsel %vm729_vm5, %v14570_v23, %v724_v12  ;;  %v14572_v35 = vld [vmem:[#allocation214_spill] sm:$0xff]  ;;  %v14573_v4 = vld [vmem:[#allocation151_spill] sm:$0xff]  ;;  %v14575_v2 = vld [vmem:[#allocation164_spill] sm:$0xff] }
 0x2c2   :  { %v1639_v47 = vadd.f32 %v14567_v3, %v1583_v52  ;;  %v2257_v53 = vadd.f32 %v14568_v59, %v2201_v29  ;;  %v2274_v45 = vadd.f32 %v2266_v60, %v2256_v57  ;;  %v731_v52 = vsel %vm729_vm5, %v724_v12, %v12223_v11  ;;  %v14571_v3 = vld [vmem:[#allocation105_spill] sm:$0xff]  ;;  %v14574_v60 = vld [vmem:[#allocation56_spill] sm:$0xff]  ;;  %v789_v15 = vpop.permute.xlu0 %788  ;;  %v14577_v12 = vld [vmem:[#allocation203_spill] sm:$0xff] }
 0x2c3   :  { %7687 = vmatpush1.bf16.msra.mxu0 %v14571_v3  ;;  %v774_v59 = vmul.f32 %v14572_v35, %v732_v46  ;;  %v775_v42 = vmul.f32 %v14573_v4, %v731_v52  ;;  %7943 = vmatpush1.bf16.msra.mxu1 %v14571_v3  ;;  %v14576_v57 = vld [vmem:[#allocation133_spill] sm:$0xff]  ;;  %v2227_v62 = vcombine.high %v14577_v12, %v14577_v12  ;;  %v14581_v46 = vld [vmem:[#allocation94_spill] sm:$0xff] }
 0x2c4   :  { %v1657_v29 = vadd.f32 %v1649_v39, %v1639_v47  ;;  %v2275_v58 = vadd.f32 %v2267_v34, %v2257_v53  ;;  %1400 = vrot.lane.b32.xlu0 %v14574_v60, %s14149_s3  ;;  %7689 = vmatprep.subr.bf16.mxu0 %v14575_v2  ;;  %v1609_v23 = vcombine.high %v14576_v57, %v14576_v57  ;;  %v14578_v47 = vld [vmem:[#allocation78_spill] sm:$0xff]  ;;  %v14580_v53 = vld [vmem:[#allocation93_spill] sm:$0xff]  ;;  %v12252_v57 = vpop.permute.xlu1 %790 }
 0x2c5   :  { %v12244_v39 = vrot.slane %v12030_v32, %v14578_v47  ;;  %v1666_v34 = vmul.f32 %v14580_v53, %v774_v59  ;;  %v2284_v52 = vmul.f32 %v14581_v46, %v774_v59  ;;  %v1667_v3 = vmul.f32 %v14580_v53, %v775_v42  ;;  %1432 = vrot.lane.b32.xlu1 %v14574_v60, %s14160_s24 }
 0x2c6   :  { %v2285_v11 = vmul.f32 %v14581_v46, %v775_v42  ;;  %14582 = vst [vmem:[#allocation186_spill] sm:$0xff] %v12252_v57  ;;  %v797_v12 = vsel %vm794_vm6, %v14583_v50, %v789_v15  ;;  %7945 = vmatprep.subr.bf16.mxu1 %v14575_v2  ;;  %v12263_v59 = vrot.slane %v1609_v23, %v9922_v7  ;;  %v14586_v50 = vld [vmem:[#allocation215_spill] sm:$0xff]  ;;  %v12271_v2 = vld [vmem:[%s14083_s6 + $0x60] ss:$0 sm:$0xff] }
 0x2c7   :  { %14579 = vst [vmem:[#allocation124_spill] sm:$0xff] %v12244_v39  ;;  %v796_v39 = vsel %vm794_vm6, %v789_v15, %v12252_v57  ;;  %7691 = vmatpush1.bf16.msra.mxu0 %v11666_v14  ;;  %v1674_v42 = vadd.f32 %v1666_v34, %v1656_v18  ;;  %v2292_v46 = vadd.f32 %v2284_v52, %v2274_v45  ;;  %v854_v15 = vpop.permute.xlu0 %853  ;;  %v14589_v23 = vld [vmem:[#allocation95_spill] sm:$0xff]  ;;  %v14590_v34 = vld [vmem:[#allocation97_spill] sm:$0xff] }
 0x2c8   :  { %14584 = vst [vmem:[#allocation194_spill] sm:$0xff] %v12263_v59  ;;  %v1675_v53 = vadd.f32 %v1667_v3, %v1657_v29  ;;  %v2293_v43 = vadd.f32 %v2285_v11, %v2275_v58  ;;  %7947 = vmatpush1.bf16.msra.mxu1 %v11666_v14  ;;  %v839_v36 = vmul.f32 %v14585_v33, %v797_v12  ;;  %v14587_v14 = vld [vmem:[#allocation122_spill] sm:$0xff]  ;;  %v12281_v45 = vpop.permute.xlu1 %855  ;;  %v12296_v12 = vld [vmem:[%s14083_s6 + $0x68] ss:$0 sm:$0xff] }
 0x2c9   :  { %v840_v54 = vmul.f32 %v14586_v50, %v796_v39  ;;  %1464 = vrot.lane.b32.xlu0 %v14574_v60, %s14166_s14  ;;  %7693 = vmatprep.subr.bf16.mxu0 %v11683_v24  ;;  %v862_v11 = vsel %vm859_vm7, %v14587_v14, %v854_v15  ;;  %14588 = vst [vmem:[#allocation52_spill] sm:$0xff] %v12281_v45 }
 0x2ca   :  { %1496 = vrot.lane.b32.xlu1 %v14574_v60, %s14172_s7  ;;  %7949 = vmatprep.subr.bf16.mxu1 %v11683_v24  ;;  %v12285_v29 = vrot.slane %v2227_v62, %v9922_v7  ;;  %v12289_v58 = vrot.slane %v12033_v13, %v14578_v47  ;;  %v1684_v39 = vmul.f32 %v14589_v23, %v839_v36 }
 0x2cb   :  { %v2302_v52 = vmul.f32 %v14590_v34, %v839_v36  ;;  %v1685_v60 = vmul.f32 %v14589_v23, %v840_v54  ;;  %v2303_v3 = vmul.f32 %v14590_v34, %v840_v54  ;;  %7695 = vmatpush1.bf16.msra.mxu0 %v11696_v8  ;;  %v904_v24 = vmul.f32 %v12271_v2, %v862_v11  ;;  %v964_v34 = vpop.permute.xlu0 %963  ;;  %v14591_v23 = vld [vmem:[#allocation102_spill] sm:$0xff] }
 0x2cc   :  { %v861_v62 = vsel %vm859_vm7, %v854_v15, %v12281_v45  ;;  %7951 = vmatpush1.bf16.msra.mxu1 %v11696_v8  ;;  %7697 = vmatprep.subr.bf16.mxu0 %v11709_v1  ;;  %v1692_v47 = vadd.f32 %v1684_v39, %v1674_v42  ;;  %v14592_v45 = vld [vmem:[#allocation161_spill] sm:$0xff]  ;;  %v12314_v59 = vpop.permute.xlu1 %965  ;;  %v2943_v39 = vld [vmem:[#allocation8 + $0x608] sm:$0xff] }
 0x2cd   :  { %v2310_v14 = vadd.f32 %v2302_v52, %v2292_v46  ;;  %v1693_v54 = vadd.f32 %v1685_v60, %v1675_v53  ;;  %v2311_v18 = vadd.f32 %v2303_v3, %v2293_v43  ;;  %7953 = vmatprep.subr.bf16.mxu1 %v11709_v1  ;;  %v1702_v11 = vmul.f32 %v14419_v37, %v904_v24  ;;  %v14594_v1 = vld [vmem:[#allocation81_spill] sm:$0xff] }
 0x2ce   :  { %v2320_v57 = vmul.f32 %v14591_v23, %v904_v24  ;;  %v905_v15 = vmul.f32 %v12296_v12, %v861_v62  ;;  %v974_v8 = vsel %vm404_vm1, %v14592_v45, %v964_v34  ;;  %14593 = vst [vmem:[#allocation134_spill] sm:$0xff] %v12314_v59  ;;  %v973_v43 = vsel %vm404_vm1, %v964_v34, %v12314_v59  ;;  %v2945_v45 = vld [vmem:[#allocation8 + $0x618] sm:$0xff] }
 0x2cf   :  { %v983_v42 = vmul.f32 %v974_v8, %v14524_v17  ;;  %7699 = vmatpush1.bf16.msra.mxu0 %v11749_v55  ;;  %v12323_v53 = vrot.slane %v12030_v32, %v14594_v1  ;;  %v12327_v46 = vrot.slane %v12033_v13, %v14594_v1  ;;  %v1710_v52 = vadd.f32 %v1702_v11, %v1692_v47  ;;  %v14597_v62 = vld [vmem:[#allocation106_spill] sm:$0xff]  ;;  %v996_v59 = vpop.permute.xlu0 %995  ;;  %v2944_v47 = vld [vmem:[#allocation8 + $0x610] sm:$0xff] }
 0x2d0   :  { %v2328_v60 = vadd.f32 %v2320_v57, %v2310_v14  ;;  %v1703_v3 = vmul.f32 %v14419_v37, %v905_v15  ;;  %v2321_v24 = vmul.f32 %v14591_v23, %v905_v15  ;;  %7955 = vmatpush1.bf16.msra.mxu1 %v11749_v55  ;;  %v984_v36 = vmul.f32 %v973_v43, %v14525_v21  ;;  %v2942_v1 = vld [vmem:[#allocation8 + $0x600] sm:$0xff]  ;;  %v12340_v55 = vpop.permute.xlu1 %997 }
 0x2d1   :  { %14595 = vst [vmem:[#allocation211_spill] sm:$0xff] %v12323_v53  ;;  %14596 = vst [vmem:[#allocation59_spill] sm:$0xff] %v12327_v46  ;;  %v1720_v34 = vmul.f32 %v14423_v51, %v983_v42  ;;  %v2338_v8 = vmul.f32 %v14597_v62, %v983_v42  ;;  %v14598_v53 = vld [vmem:[#allocation166_spill] sm:$0xff]  ;;  %v12342_v23 = vpack.c.bf16 %v2945_v45, %v2943_v39 }
 0x2d2   :  { %7701 = vmatprep.subr.bf16.mxu0 %v14598_v53  ;;  %7957 = vmatprep.subr.bf16.mxu1 %v14598_v53  ;;  %v1711_v57 = vadd.f32 %v1703_v3, %v1693_v54  ;;  %v2329_v14 = vadd.f32 %v2321_v24, %v2311_v18  ;;  %v14599_v11 = vld [vmem:[#allocation162_spill] sm:$0xff]  ;;  %v1721_v43 = vmul.f32 %v14423_v51, %v984_v36  ;;  %v14601_v24 = vld [vmem:[#allocation107_spill] sm:$0xff] }
 0x2d3   :  { %v1006_v15 = vsel %vm469_vm0, %v14599_v11, %v996_v59  ;;  %v1728_v42 = vadd.f32 %v1720_v34, %v1710_v52  ;;  %v2346_v37 = vadd.f32 %v2338_v8, %v2328_v60  ;;  %v2339_v46 = vmul.f32 %v14597_v62, %v984_v36  ;;  %7703 = vmatpush1.bf16.msra.mxu0 %v11801_v56  ;;  %v1028_v60 = vpop.permute.xlu0 %1027  ;;  %v14600_v36 = vld [vmem:[#allocation84_spill] sm:$0xff]  ;;  %v14605_v11 = vld [vmem:[#allocation179_spill] sm:$0xff] }
 0x2d4   :  { %v1015_v53 = vmul.f32 %v1006_v15, %v14532_v38  ;;  %v1005_v18 = vsel %vm469_vm0, %v996_v59, %v12340_v55  ;;  %7959 = vmatpush1.bf16.msra.mxu1 %v11801_v56  ;;  %7705 = vmatprep.subr.bf16.mxu0 %v11803_v30  ;;  %v12353_v54 = vpack.c.bf16 %v2944_v47, %v2942_v1  ;;  %v14602_v59 = vld [vmem:[#allocation108_spill] sm:$0xff]  ;;  %v14603_v56 = vld [vmem:[#allocation178_spill] sm:$0xff]  ;;  %v12366_v47 = vpop.permute.xlu1 %1029 }
 0x2d5   :  { %v1729_v39 = vadd.f32 %v1721_v43, %v1711_v57  ;;  %v2347_v45 = vadd.f32 %v2339_v46, %v2329_v14  ;;  %v1016_v52 = vmul.f32 %v1005_v18, %v14535_v40  ;;  %7961 = vmatprep.subr.bf16.mxu1 %v11803_v30  ;;  %v12359_v3 = vrot.slane %v12030_v32, %v14600_v36  ;;  %v2947_v15 = vld [vmem:[#allocation8 + $0x628] sm:$0xff]  ;;  %v2949_v43 = vld [vmem:[#allocation8 + $0x638] sm:$0xff] }
 0x2d6   :  { %v1738_v34 = vmul.f32 %v14601_v24, %v1015_v53  ;;  %v2356_v8 = vmul.f32 %v14602_v59, %v1015_v53  ;;  %v1038_v1 = vsel %vm534_vm2, %v14603_v56, %v1028_v60  ;;  %14604 = vst [vmem:[#allocation195_spill] sm:$0xff] %v12366_v47  ;;  %v12370_v46 = vrot.slane %v12033_v13, %v14600_v36  ;;  %v14606_v36 = vld [vmem:[#allocation109_spill] sm:$0xff] }
 0x2d7   :  { %v1739_v30 = vmul.f32 %v14601_v24, %v1016_v52  ;;  %v2357_v57 = vmul.f32 %v14602_v59, %v1016_v52  ;;  %v1047_v32 = vmul.f32 %v1038_v1, %v14542_v10  ;;  %v1037_v14 = vsel %vm534_vm2, %v1028_v60, %v12366_v47  ;;  %7707 = vmatpush1.bf16.msra.mxu0 %v14605_v11  ;;  %v14607_v59 = vld [vmem:[#allocation110_spill] sm:$0xff]  ;;  %v1060_v62 = vpop.permute.xlu0 %1059 }
 0x2d8   :  { %v1746_v53 = vadd.f32 %v1738_v34, %v1728_v42  ;;  %v2364_v18 = vadd.f32 %v2356_v8, %v2346_v37  ;;  %v1048_v56 = vmul.f32 %v1037_v14, %v14543_v44  ;;  %7963 = vmatpush1.bf16.msra.mxu1 %v14605_v11  ;;  %7709 = vmatprep.subr.bf16.mxu0 %v11823_v31  ;;  %v2946_v60 = vld [vmem:[#allocation8 + $0x620] sm:$0xff]  ;;  %v12390_v8 = vpop.permute.xlu1 %1061 }
 0x2d9   :  { %v1747_v13 = vadd.f32 %v1739_v30, %v1729_v39  ;;  %v2365_v52 = vadd.f32 %v2357_v57, %v2347_v45  ;;  %v1756_v1 = vmul.f32 %v14606_v36, %v1047_v32  ;;  %v2374_v24 = vmul.f32 %v14607_v59, %v1047_v32  ;;  %7965 = vmatprep.subr.bf16.mxu1 %v11823_v31  ;;  %v14608_v42 = vld [vmem:[#allocation82_spill] sm:$0xff]  ;;  %v2948_v45 = vld [vmem:[#allocation8 + $0x630] sm:$0xff]  ;;  %v2951_v30 = vld [vmem:[#allocation8 + $0x648] sm:$0xff] }
 0x2da   :  { %v1757_v47 = vmul.f32 %v14606_v36, %v1048_v56  ;;  %v2375_v37 = vmul.f32 %v14607_v59, %v1048_v56  ;;  %v1070_v34 = vsel %vm599_vm3, %v14608_v42, %v1060_v62  ;;  %14609 = vst [vmem:[#allocation196_spill] sm:$0xff] %v12390_v8  ;;  %v12392_v39 = vpack.c.bf16 %v2949_v43, %v2947_v15  ;;  %v2953_v57 = vld [vmem:[#allocation8 + $0x658] sm:$0xff]  ;;  %v2950_v56 = vld [vmem:[#allocation8 + $0x640] sm:$0xff]  ;;  %v2952_v59 = vld [vmem:[#allocation8 + $0x650] sm:$0xff] }
 0x2db   :  { %v1764_v32 = vadd.f32 %v1756_v1, %v1746_v53  ;;  %v2382_v14 = vadd.f32 %v2374_v24, %v2364_v18  ;;  %v1079_v31 = vmul.f32 %v1070_v34, %v14550_v27  ;;  %v1069_v11 = vsel %vm599_vm3, %v1060_v62, %v12390_v8  ;;  %7711 = vmatpush1.bf16.msra.mxu0 %v11831_v22  ;;  %v14610_v43 = vld [vmem:[#allocation111_spill] sm:$0xff]  ;;  %v14611_v53 = vld [vmem:[#allocation112_spill] sm:$0xff]  ;;  %v1094_v1 = vpop.permute.xlu0 %1093 }
 0x2dc   :  { %v1765_v42 = vadd.f32 %v1757_v47, %v1747_v13  ;;  %v2383_v36 = vadd.f32 %v2375_v37, %v2365_v52  ;;  %v1080_v15 = vmul.f32 %v1069_v11, %v14551_v6  ;;  %7967 = vmatpush1.bf16.msra.mxu1 %v11831_v22  ;;  %7713 = vmatprep.subr.bf16.mxu0 %v11840_v61  ;;  %v14612_v52 = vld [vmem:[#allocation165_spill] sm:$0xff]  ;;  %v12414_v37 = vpop.permute.xlu1 %1095 }
 0x2dd   :  { %v1774_v24 = vmul.f32 %v14610_v43, %v1079_v31  ;;  %v2392_v18 = vmul.f32 %v14611_v53, %v1079_v31  ;;  %7969 = vmatprep.subr.bf16.mxu1 %v11840_v61  ;;  %v12405_v62 = vpack.c.bf16 %v2948_v45, %v2946_v60  ;;  %v12407_v34 = vpack.c.bf16 %v2953_v57, %v2951_v30  ;;  %v14615_v45 = vld [vmem:[#allocation170_spill] sm:$0xff] }
 0x2de   :  { %v1775_v47 = vmul.f32 %v14610_v43, %v1080_v15  ;;  %v2393_v13 = vmul.f32 %v14611_v53, %v1080_v15  ;;  %v1101_v22 = vsel %vm664_vm4, %v14612_v52, %v1094_v1  ;;  %14613 = vst [vmem:[#allocation58_spill] sm:$0xff] %v12414_v37  ;;  %v12416_v11 = vpack.c.bf16 %v2952_v59, %v2950_v56  ;;  %v14616_v59 = vld [vmem:[#allocation57_spill] sm:$0xff]  ;;  %v14619_v52 = vld [vmem:[#allocation114_spill] sm:$0xff] }
 0x2df   :  { %v1782_v31 = vadd.f32 %v1774_v24, %v1764_v32  ;;  %v2400_v8 = vadd.f32 %v2392_v18, %v2382_v14  ;;  %v1111_v61 = vmul.f32 %v1101_v22, %v14560_v48  ;;  %v1100_v60 = vsel %vm664_vm4, %v1094_v1, %v12414_v37  ;;  %7715 = vmatpush1.bf16.msra.mxu0 %v14615_v45  ;;  %v14617_v32 = vld [vmem:[#allocation113_spill] sm:$0xff]  ;;  %v14618_v24 = vld [vmem:[#allocation68_spill] sm:$0xff]  ;;  %v1126_v53 = vpop.permute.xlu0 %1125 }
 0x2e0   :  { %14614 = vst [vmem:[#allocation198_spill] sm:$0xff] %v12416_v11  ;;  %v1783_v30 = vadd.f32 %v1775_v47, %v1765_v42  ;;  %v2401_v57 = vadd.f32 %v2393_v13, %v2383_v36  ;;  %v1112_v15 = vmul.f32 %v1100_v60, %v14561_v0  ;;  %7971 = vmatpush1.bf16.msra.mxu1 %v14615_v45  ;;  %v2955_v1 = vld [vmem:[#allocation8 + $0x668] sm:$0xff]  ;;  %v12439_v45 = vpop.permute.xlu1 %1127  ;;  %v2956_v43 = vld [vmem:[#allocation8 + $0x670] sm:$0xff] }
 0x2e1   :  { %7717 = vmatprep.subr.bf16.mxu0 %v11967_v5  ;;  %v1838_v56 = vadd.f32 %v14616_v59, %v1782_v31  ;;  %v1848_v14 = vmul.f32 %v14617_v32, %v1111_v61  ;;  %v2456_v18 = vadd.f32 %v14618_v24, %v2400_v8  ;;  %v2466_v22 = vmul.f32 %v14619_v52, %v1111_v61  ;;  %v2957_v8 = vld [vmem:[#allocation8 + $0x678] sm:$0xff]  ;;  %v2954_v61 = vld [vmem:[#allocation8 + $0x660] sm:$0xff] }
 0x2e2   :  { %7973 = vmatprep.subr.bf16.mxu1 %v11967_v5  ;;  %v14620_v36 = vcombine.high %v14616_v59, %v14616_v59  ;;  %v1849_v47 = vmul.f32 %v14617_v32, %v1112_v15  ;;  %v14621_v13 = vcombine.high %v14618_v24, %v14618_v24  ;;  %v2467_v60 = vmul.f32 %v14619_v52, %v1112_v15  ;;  %v14622_v11 = vld [vmem:[#allocation99_spill] sm:$0xff] }
 0x2e3   :  { %v1856_v37 = vadd.f32 %v1848_v14, %v1838_v56  ;;  %v2474_v5 = vadd.f32 %v2466_v22, %v2456_v18  ;;  %v1133_v59 = vsel %vm729_vm5, %v14622_v11, %v1126_v53  ;;  %7719 = vmatpush1.bf16.msra.mxu0 %v11976_v20  ;;  %v1158_v56 = vpop.permute.xlu0 %1157  ;;  %v12453_v11 = vpack.c.bf16 %v2957_v8, %v2955_v1  ;;  %v14624_v22 = vld [vmem:[#allocation118_spill] sm:$0xff]  ;;  %v14628_v8 = vld [vmem:[#allocation115_spill] sm:$0xff] }
 0x2e4   :  { %v1839_v42 = vadd.f32 %v14620_v36, %v1783_v30  ;;  %v2457_v31 = vadd.f32 %v14621_v13, %v2401_v57  ;;  %v1132_v30 = vsel %vm729_vm5, %v1126_v53, %v12439_v45  ;;  %v1143_v15 = vmul.f32 %v1133_v59, %v14572_v35  ;;  %7975 = vmatpush1.bf16.msra.mxu1 %v11976_v20  ;;  %v14623_v53 = vld [vmem:[#allocation159_spill] sm:$0xff] }
 0x2e5   :  { %v1144_v36 = vmul.f32 %v1132_v30, %v14573_v4  ;;  %7721 = vmatprep.subr.bf16.mxu0 %v12015_v63  ;;  %7977 = vmatprep.subr.bf16.mxu1 %v12015_v63  ;;  %v12455_v14 = vpack.c.bf16 %v2956_v43, %v2954_v61  ;;  %v1809_v18 = vcombine.high %v14623_v53, %v14623_v53  ;;  %v2959_v59 = vld [vmem:[#allocation8 + $0x688] sm:$0xff]  ;;  %v2960_v53 = vld [vmem:[#allocation8 + $0x690] sm:$0xff] }
 0x2e6   :  { %v1857_v57 = vadd.f32 %v1849_v47, %v1839_v42  ;;  %v2475_v24 = vadd.f32 %v2467_v60, %v2457_v31  ;;  %v1866_v42 = vmul.f32 %v14624_v22, %v1143_v15  ;;  %v14625_v47 = vld [vmem:[#allocation119_spill] sm:$0xff]  ;;  %v12463_v60 = vpop.permute.xlu1 %1159  ;;  %v14627_v30 = vld [vmem:[#allocation92_spill] sm:$0xff]  ;;  %v2427_v61 = vcombine.high %v14628_v8, %v14628_v8  ;;  %v14629_v8 = vld [vmem:[#allocation169_spill] sm:$0xff] }
 0x2e7   :  { %v2484_v13 = vmul.f32 %v14625_v47, %v1143_v15  ;;  %v1867_v31 = vmul.f32 %v14624_v22, %v1144_v36  ;;  %v2485_v20 = vmul.f32 %v14625_v47, %v1144_v36  ;;  %14626 = vst [vmem:[#allocation54_spill] sm:$0xff] %v12463_v60  ;;  %v1165_v63 = vsel %vm794_vm6, %v14627_v30, %v1158_v56  ;;  %v2961_v15 = vld [vmem:[#allocation8 + $0x698] sm:$0xff]  ;;  %v2958_v36 = vld [vmem:[#allocation8 + $0x680] sm:$0xff] }
 0x2e8   :  { %v1164_v43 = vsel %vm794_vm6, %v1158_v56, %v12463_v60  ;;  %7723 = vmatpush1.bf16.msra.mxu0 %v12017_v28  ;;  %v12473_v1 = vrot.slane %v1809_v18, %v9922_v7  ;;  %v1874_v47 = vadd.f32 %v1866_v42, %v1856_v37  ;;  %7979 = vmatpush1.bf16.msra.mxu1 %v12017_v28  ;;  %v1190_v60 = vpop.permute.xlu0 %1189  ;;  %v14631_v42 = vld [vmem:[#allocation120_spill] sm:$0xff] }
 0x2e9   :  { %v2492_v22 = vadd.f32 %v2484_v13, %v2474_v5  ;;  %v1875_v52 = vadd.f32 %v1867_v31, %v1857_v57  ;;  %v2493_v32 = vadd.f32 %v2485_v20, %v2475_v24  ;;  %v1175_v30 = vmul.f32 %v1165_v63, %v14585_v33  ;;  %7725 = vmatprep.subr.bf16.mxu0 %v12019_v16  ;;  %v14632_v31 = vld [vmem:[#allocation121_spill] sm:$0xff] }
 0x2ea   :  { %v1176_v56 = vmul.f32 %v1164_v43, %v14586_v50  ;;  %7981 = vmatprep.subr.bf16.mxu1 %v12019_v16  ;;  %v1197_v37 = vsel %vm859_vm7, %v14629_v8, %v1190_v60  ;;  %v12487_v5 = vpop.permute.xlu1 %1191  ;;  %v12490_v28 = vrot.slane %v2427_v61, %v9922_v7  ;;  %v12492_v57 = vpack.c.bf16 %v2961_v15, %v2959_v59  ;;  %v2963_v43 = vld [vmem:[#allocation8 + $0x6a8] sm:$0xff]  ;;  %v2965_v15 = vld [vmem:[#allocation8 + $0x6b8] sm:$0xff] }
 0x2eb   :  { %14630 = vst [vmem:[#allocation199_spill] sm:$0xff] %v12487_v5  ;;  %v12494_v24 = vpack.c.bf16 %v2960_v53, %v2958_v36  ;;  %v1884_v13 = vmul.f32 %v14631_v42, %v1175_v30  ;;  %v2502_v16 = vmul.f32 %v14632_v31, %v1175_v30  ;;  %v1207_v8 = vmul.f32 %v12271_v2, %v1197_v37  ;;  %v2962_v36 = vld [vmem:[#allocation8 + $0x6a0] sm:$0xff]  ;;  %v2964_v53 = vld [vmem:[#allocation8 + $0x6b0] sm:$0xff] }
 0x2ec   :  { %v1885_v20 = vmul.f32 %v14631_v42, %v1176_v56  ;;  %v2503_v63 = vmul.f32 %v14632_v31, %v1176_v56  ;;  %7727 = vmatpush1.bf16.msra.mxu0 %v12021_v25  ;;  %v1196_v59 = vsel %vm859_vm7, %v1190_v60, %v12487_v5  ;;  %7983 = vmatpush1.bf16.msra.mxu1 %v12021_v25  ;;  %v1267_v42 = vpop.permute.xlu0 %1266 }
 0x2ed   :  { %7729 = vmatprep.subr.bf16.mxu0 %v12043_v26  ;;  %v1892_v30 = vadd.f32 %v1884_v13, %v1874_v47  ;;  %v2510_v56 = vadd.f32 %v2502_v16, %v2492_v22  ;;  %7985 = vmatprep.subr.bf16.mxu1 %v12043_v26  ;;  %v1902_v37 = vmul.f32 %v14465_v49, %v1207_v8  ;;  %v2967_v13 = vld [vmem:[#allocation8 + $0x6c8] sm:$0xff]  ;;  %v2969_v16 = vld [vmem:[#allocation8 + $0x6d8] sm:$0xff] }
 0x2ee   :  { %v1893_v18 = vadd.f32 %v1885_v20, %v1875_v52  ;;  %v2511_v31 = vadd.f32 %v2503_v63, %v2493_v32  ;;  %v2520_v60 = vmul.f32 %v14466_v19, %v1207_v8  ;;  %v1208_v25 = vmul.f32 %v12296_v12, %v1196_v59  ;;  %v12516_v5 = vpop.permute.xlu1 %1268  ;;  %v14634_v52 = vld [vmem:[#allocation132_spill] sm:$0xff] }
 0x2ef   :  { %v1277_v61 = vsel %vm404_vm1, %v11869_v41, %v1267_v42  ;;  %14633 = vst [vmem:[#allocation155_spill] sm:$0xff] %v12516_v5  ;;  %v1276_v32 = vsel %vm404_vm1, %v1267_v42, %v12516_v5  ;;  %v12523_v26 = vpack.c.bf16 %v2965_v15, %v2963_v43  ;;  %v12525_v22 = vpack.c.bf16 %v2964_v53, %v2962_v36  ;;  %v14638_v15 = vld [vmem:[#allocation190_spill] sm:$0xff]  ;;  %v2968_v53 = vld [vmem:[#allocation8 + $0x6d0] sm:$0xff] }
 0x2f0   :  { %v1286_v47 = vmul.f32 %v1277_v61, %v14524_v17  ;;  %7731 = vmatpush1.bf16.msra.mxu0 %v14634_v52  ;;  %v1910_v20 = vadd.f32 %v1902_v37, %v1892_v30  ;;  %v2528_v63 = vadd.f32 %v2520_v60, %v2510_v56  ;;  %v1903_v41 = vmul.f32 %v14465_v49, %v1208_v25  ;;  %v14636_v17 = vld [vmem:[#allocation127_spill] sm:$0xff]  ;;  %v14637_v61 = vld [vmem:[#allocation129_spill] sm:$0xff]  ;;  %v1299_v43 = vpop.permute.xlu0 %1298 }
 0x2f1   :  { %14635 = vst [vmem:[#allocation202_spill] sm:$0xff] %v12525_v22  ;;  %v2521_v8 = vmul.f32 %v14466_v19, %v1208_v25  ;;  %7987 = vmatpush1.bf16.msra.mxu1 %v14634_v52  ;;  %v1287_v5 = vmul.f32 %v1276_v32, %v14525_v21  ;;  %7733 = vmatprep.subr.bf16.mxu0 %v14638_v15  ;;  %v2966_v36 = vld [vmem:[#allocation8 + $0x6c0] sm:$0xff]  ;;  %v14639_v37 = vld [vmem:[#allocation181_spill] sm:$0xff] }
 0x2f2   :  { %v1920_v59 = vmul.f32 %v14636_v17, %v1286_v47  ;;  %v2538_v42 = vmul.f32 %v14637_v61, %v1286_v47  ;;  %7989 = vmatprep.subr.bf16.mxu1 %v14638_v15  ;;  %v1911_v30 = vadd.f32 %v1903_v41, %v1893_v18  ;;  %v1309_v60 = vsel %vm469_vm0, %v14639_v37, %v1299_v43  ;;  %v12538_v25 = vpop.permute.xlu1 %1300  ;;  %v2971_v47 = vld [vmem:[#allocation8 + $0x6e8] sm:$0xff]  ;;  %v2973_v19 = vld [vmem:[#allocation8 + $0x6f8] sm:$0xff]  ;;  %v2970_v18 = vld [vmem:[#allocation8 + $0x6e0] sm:$0xff] }
 0x2f3   :  { %v2529_v56 = vadd.f32 %v2521_v8, %v2511_v31  ;;  %14640 = vst [vmem:[#allocation204_spill] sm:$0xff] %v12538_v25  ;;  %v12540_v52 = vpack.c.bf16 %v2969_v16, %v2967_v13  ;;  %v1921_v49 = vmul.f32 %v14636_v17, %v1287_v5  ;;  %v2539_v15 = vmul.f32 %v14637_v61, %v1287_v5  ;;  %v14641_v22 = vld [vmem:[#allocation171_spill] sm:$0xff]  ;;  %v2972_v31 = vld [vmem:[#allocation8 + $0x6f0] sm:$0xff] }
 0x2f4   :  { %v1928_v21 = vadd.f32 %v1920_v59, %v1910_v20  ;;  %v2546_v32 = vadd.f32 %v2538_v42, %v2528_v63  ;;  %7735 = vmatpush1.bf16.msra.mxu0 %v14641_v22  ;;  %v1318_v41 = vmul.f32 %v1309_v60, %v14532_v38  ;;  %v1308_v8 = vsel %vm469_vm0, %v1299_v43, %v12538_v25  ;;  %v14642_v13 = vld [vmem:[#allocation187_spill] sm:$0xff]  ;;  %v1331_v59 = vpop.permute.xlu0 %1330  ;;  %v14645_v38 = vld [vmem:[#allocation130_spill] sm:$0xff] }
 0x2f5   :  { %7991 = vmatpush1.bf16.msra.mxu1 %v14641_v22  ;;  %7737 = vmatprep.subr.bf16.mxu0 %v14642_v13  ;;  %v12551_v16 = vpack.c.bf16 %v2968_v53, %v2966_v36  ;;  %v1929_v20 = vadd.f32 %v1921_v49, %v1911_v30  ;;  %v2547_v63 = vadd.f32 %v2539_v15, %v2529_v56  ;;  %v14646_v60 = vld [vmem:[#allocation131_spill] sm:$0xff]  ;;  %v14647_v43 = vld [vmem:[#allocation182_spill] sm:$0xff]  ;;  %v14650_v30 = vld [vmem:[#allocation156_spill] sm:$0xff] }
 0x2f6   :  { %v1319_v5 = vmul.f32 %v1308_v8, %v14535_v40  ;;  %7993 = vmatprep.subr.bf16.mxu1 %v14642_v13  ;;  %v12555_v42 = vpack.c.bf16 %v2973_v19, %v2971_v47  ;;  %v1938_v37 = vmul.f32 %v14645_v38, %v1318_v41  ;;  %v2556_v61 = vmul.f32 %v14646_v60, %v1318_v41  ;;  %v12562_v17 = vpop.permute.xlu1 %1332  ;;  %v14651_v41 = vld [vmem:[#allocation135_spill] sm:$0xff]  ;;  %v14652_v13 = vld [vmem:[#allocation136_spill] sm:$0xff] }
 0x2f7   :  { %14643 = vst [vmem:[#allocation62_spill] sm:$0xff] %v12551_v16  ;;  %v1341_v22 = vsel %vm534_vm2, %v14647_v43, %v1331_v59  ;;  %14648 = vst [vmem:[#allocation206_spill] sm:$0xff] %v12562_v17  ;;  %v12564_v36 = vpack.c.bf16 %v2972_v31, %v2970_v18  ;;  %v1340_v19 = vsel %vm534_vm2, %v1331_v59, %v12562_v17  ;;  %v2977_v43 = vld [vmem:[#allocation8 + $0x718] sm:$0xff] }
 0x2f8   :  { %14644 = vst [vmem:[#allocation69_spill] sm:$0xff] %v12555_v42  ;;  %v1939_v49 = vmul.f32 %v14645_v38, %v1319_v5  ;;  %v2557_v40 = vmul.f32 %v14646_v60, %v1319_v5  ;;  %v1350_v53 = vmul.f32 %v1341_v22, %v14542_v10  ;;  %7739 = vmatpush1.bf16.msra.mxu0 %v14650_v30  ;;  %v1363_v5 = vpop.permute.xlu0 %1362 }
 0x2f9   :  { %14649 = vst [vmem:[#allocation208_spill] sm:$0xff] %v12564_v36  ;;  %v1946_v56 = vadd.f32 %v1938_v37, %v1928_v21  ;;  %v2564_v47 = vadd.f32 %v2556_v61, %v2546_v32  ;;  %v1351_v15 = vmul.f32 %v1340_v19, %v14543_v44  ;;  %7995 = vmatpush1.bf16.msra.mxu1 %v14650_v30  ;;  %v14653_v61 = vld [vmem:[#allocation128_spill] sm:$0xff] }
 0x2fa   :  { %7741 = vmatprep.subr.bf16.mxu0 %v12342_v23  ;;  %v1947_v18 = vadd.f32 %v1939_v49, %v1929_v20  ;;  %v2565_v31 = vadd.f32 %v2557_v40, %v2547_v63  ;;  %v1956_v8 = vmul.f32 %v14651_v41, %v1350_v53  ;;  %v2574_v10 = vmul.f32 %v14652_v13, %v1350_v53  ;;  %v12584_v32 = vpop.permute.xlu1 %1364  ;;  %v14655_v37 = vld [vmem:[#allocation180_spill] sm:$0xff] }
 0x2fb   :  { %7997 = vmatprep.subr.bf16.mxu1 %v12342_v23  ;;  %v1957_v59 = vmul.f32 %v14651_v41, %v1351_v15  ;;  %v2575_v21 = vmul.f32 %v14652_v13, %v1351_v15  ;;  %v1373_v44 = vsel %vm599_vm3, %v14653_v61, %v1363_v5  ;;  %14654 = vst [vmem:[#allocation70_spill] sm:$0xff] %v12584_v32  ;;  %v2975_v63 = vld [vmem:[#allocation8 + $0x708] sm:$0xff]  ;;  %v14657_v61 = vld [vmem:[#allocation137_spill] sm:$0xff] }
 0x2fc   :  { %v2009_v20 = vcombine.high %v14655_v37, %v14655_v37  ;;  %v1964_v22 = vadd.f32 %v1956_v8, %v1946_v56  ;;  %v2582_v49 = vadd.f32 %v2574_v10, %v2564_v47  ;;  %v1382_v40 = vmul.f32 %v1373_v44, %v14550_v27  ;;  %v14658_v37 = vld [vmem:[#allocation139_spill] sm:$0xff]  ;;  %v1397_v60 = vpop.permute.xlu0 %1396  ;;  %v14659_v56 = vld [vmem:[#allocation53_spill] sm:$0xff] }
 0x2fd   :  { %v1372_v23 = vsel %vm599_vm3, %v1363_v5, %v12584_v32  ;;  %v1965_v53 = vadd.f32 %v1957_v59, %v1947_v18  ;;  %v2583_v19 = vadd.f32 %v2575_v21, %v2565_v31  ;;  %v2627_v47 = vcombine.high %v14659_v56, %v14659_v56  ;;  %v14661_v31 = vld [vmem:[#allocation142_spill] sm:$0xff]  ;;  %v14666_v5 = vld [vmem:[#allocation103_spill] sm:$0xff] }
 0x2fe   :  { %v1383_v30 = vmul.f32 %v1372_v23, %v14551_v6  ;;  %v12594_v15 = vrot.slane %v2009_v20, %v9922_v7  ;;  %v1974_v13 = vmul.f32 %v14657_v61, %v1382_v40  ;;  %v2592_v41 = vmul.f32 %v14658_v37, %v1382_v40  ;;  %v12607_v10 = vpop.permute.xlu1 %1398 }
 0x2ff   :  { %v12600_v27 = vpack.c.bf16 %v2977_v43, %v2975_v63  ;;  %v1404_v6 = vsel %vm664_vm4, %v14661_v31, %v1397_v60  ;;  %14662 = vst [vmem:[#allocation210_spill] sm:$0xff] %v12607_v10  ;;  %v1403_v20 = vsel %vm664_vm4, %v1397_v60, %v12607_v10  ;;  %v12617_v23 = vrot.slane %v2627_v47, %v9922_v7  ;;  %v14665_v31 = vld [vmem:[#allocation140_spill] sm:$0xff] }
 0x300   :  { %14656 = vst [vmem:[#allocation173_spill] sm:$0xff] %v12594_v15  ;;  %v1975_v8 = vmul.f32 %v14657_v61, %v1383_v30  ;;  %v2593_v18 = vmul.f32 %v14658_v37, %v1383_v30  ;;  %v1982_v59 = vadd.f32 %v1974_v13, %v1964_v22  ;;  %v2600_v21 = vadd.f32 %v2592_v41, %v2582_v49  ;;  %v14664_v30 = vld [vmem:[#allocation116_spill] sm:$0xff]  ;;  %v14667_v41 = vld [vmem:[#allocation141_spill] sm:$0xff]  ;;  %v2974_v49 = vld [vmem:[#allocation8 + $0x700] sm:$0xff] }
 0x301   :  { %14660 = vst [vmem:[#allocation65_spill] sm:$0xff] %v12600_v27  ;;  %v1414_v44 = vmul.f32 %v1404_v6, %v14560_v48  ;;  %v1415_v40 = vmul.f32 %v1403_v20, %v14561_v0  ;;  %14663 = vst [vmem:[#allocation212_spill] sm:$0xff] %v12617_v23  ;;  %v1429_v48 = vpop.permute.xlu0 %1428  ;;  %v2976_v6 = vld [vmem:[#allocation8 + $0x710] sm:$0xff]  ;;  %v2979_v15 = vld [vmem:[#allocation8 + $0x728] sm:$0xff]  ;;  %v14668_v60 = vcombine.high %v14664_v30, %v14664_v30 }
 0x302   :  { %v1983_v63 = vadd.f32 %v1975_v8, %v1965_v53  ;;  %v2601_v43 = vadd.f32 %v2593_v18, %v2583_v19  ;;  %v2038_v56 = vadd.f32 %v14664_v30, %v1982_v59  ;;  %v2656_v13 = vadd.f32 %v14666_v5, %v2600_v21  ;;  %v12631_v8 = vpop.permute.xlu1 %1430  ;;  %v2981_v18 = vld [vmem:[#allocation8 + $0x738] sm:$0xff]  ;;  %v2978_v59 = vld [vmem:[#allocation8 + $0x720] sm:$0xff]  ;;  %v2980_v21 = vld [vmem:[#allocation8 + $0x730] sm:$0xff] }
 0x303   :  { %v2048_v37 = vmul.f32 %v14665_v31, %v1414_v44  ;;  %v2666_v22 = vmul.f32 %v14667_v41, %v1414_v44  ;;  %v2049_v0 = vmul.f32 %v14665_v31, %v1415_v40  ;;  %v14669_v7 = vcombine.high %v14666_v5, %v14666_v5  ;;  %14670 = vst [vmem:[#allocation160_spill] sm:$0xff] %v12631_v8  ;;  %v14671_v61 = vld [vmem:[#allocation146_spill] sm:$0xff]  ;;  %v2984_v10 = vld [vmem:[#allocation8 + $0x750] sm:$0xff]  ;;  %v2995_v23 = vld [vmem:[#allocation8 + $0x7a8] sm:$0xff] }
 0x304   :  { %v2039_v53 = vadd.f32 %v14668_v60, %v1983_v63  ;;  %v2667_v47 = vmul.f32 %v14667_v41, %v1415_v40  ;;  %v1436_v30 = vsel %vm729_vm5, %v14671_v61, %v1429_v48  ;;  %v1435_v63 = vsel %vm729_vm5, %v1429_v48, %v12631_v8  ;;  %v2983_v60 = vld [vmem:[#allocation8 + $0x748] sm:$0xff]  ;;  %v2985_v5 = vld [vmem:[#allocation8 + $0x758] sm:$0xff]  ;;  %v2982_v31 = vld [vmem:[#allocation8 + $0x740] sm:$0xff] }
 0x305   :  { %v2657_v19 = vadd.f32 %v14669_v7, %v2601_v43  ;;  %v2056_v44 = vadd.f32 %v2048_v37, %v2038_v56  ;;  %v2674_v20 = vadd.f32 %v2666_v22, %v2656_v13  ;;  %v1446_v40 = vmul.f32 %v1436_v30, %v14572_v35  ;;  %v2987_v37 = vld [vmem:[#allocation8 + $0x768] sm:$0xff]  ;;  %v1461_v56 = vpop.permute.xlu0 %1460  ;;  %v2989_v8 = vld [vmem:[#allocation8 + $0x778] sm:$0xff] }
 0x306   :  { %v2057_v43 = vadd.f32 %v2049_v0, %v2039_v53  ;;  %v1447_v41 = vmul.f32 %v1435_v63, %v14573_v4  ;;  %v12643_v61 = vpack.c.bf16 %v2976_v6, %v2974_v49  ;;  %v12645_v22 = vpack.c.bf16 %v2981_v18, %v2979_v15  ;;  %v2986_v53 = vld [vmem:[#allocation8 + $0x760] sm:$0xff]  ;;  %v2988_v0 = vld [vmem:[#allocation8 + $0x770] sm:$0xff]  ;;  %v12653_v32 = vpop.permute.xlu1 %1462  ;;  %v2991_v13 = vld [vmem:[#allocation8 + $0x788] sm:$0xff] }
 0x307   :  { %v2675_v7 = vadd.f32 %v2667_v47, %v2657_v19  ;;  %v12647_v48 = vpack.c.bf16 %v2980_v21, %v2978_v59  ;;  %v14675_v19 = vld [vmem:[#allocation144_spill] sm:$0xff]  ;;  %v14676_v47 = vld [vmem:[#allocation145_spill] sm:$0xff]  ;;  %14677 = vst [vmem:[#allocation105_spill] sm:$0xff] %v12653_v32  ;;  %v2990_v6 = vld [vmem:[#allocation8 + $0x780] sm:$0xff]  ;;  %v1467_v59 = vsel %vm794_vm6, %v1461_v56, %v12653_v32  ;;  %v12661_v21 = vpack.c.bf16 %v2985_v5, %v2983_v60 }
 0x308   :  { %14672 = vst [vmem:[#allocation207_spill] sm:$0xff] %v12643_v61  ;;  %14673 = vst [vmem:[#allocation209_spill] sm:$0xff] %v12645_v22  ;;  %v2066_v35 = vmul.f32 %v14675_v19, %v1446_v40  ;;  %v2684_v4 = vmul.f32 %v14676_v47, %v1446_v40  ;;  %v2067_v30 = vmul.f32 %v14675_v19, %v1447_v41  ;;  %v2993_v49 = vld [vmem:[#allocation8 + $0x798] sm:$0xff]  ;;  %v14678_v15 = vld [vmem:[#allocation91_spill] sm:$0xff] }
 0x309   :  { %14674 = vst [vmem:[#allocation87_spill] sm:$0xff] %v12647_v48  ;;  %v2685_v63 = vmul.f32 %v14676_v47, %v1447_v41  ;;  %v1468_v18 = vsel %vm794_vm6, %v14678_v15, %v1461_v56  ;;  %14679 = vst [vmem:[#allocation214_spill] sm:$0xff] %v12661_v21  ;;  %v12663_v40 = vpack.c.bf16 %v2984_v10, %v2982_v31  ;;  %v2992_v19 = vld [vmem:[#allocation8 + $0x790] sm:$0xff]  ;;  %v2997_v41 = vld [vmem:[#allocation8 + $0x7b8] sm:$0xff]  ;;  %v1493_v27 = vpop.permute.xlu0 %1492 }
 0x30a   :  { %v2074_v47 = vadd.f32 %v2066_v35, %v2056_v44  ;;  %v2692_v48 = vadd.f32 %v2684_v4, %v2674_v20  ;;  %v2075_v22 = vadd.f32 %v2067_v30, %v2057_v43  ;;  %v2994_v61 = vld [vmem:[#allocation8 + $0x7a0] sm:$0xff]  ;;  %v1478_v17 = vmul.f32 %v1468_v18, %v14585_v33  ;;  %v2996_v10 = vld [vmem:[#allocation8 + $0x7b0] sm:$0xff]  ;;  %v2999_v31 = vld [vmem:[#allocation8 + $0x7c8] sm:$0xff]  ;;  %v12676_v20 = vpop.permute.xlu1 %1494 }
 0x30b   :  { %14680 = vst [vmem:[#allocation151_spill] sm:$0xff] %v12663_v40  ;;  %v12665_v38 = vadd.f32 %v2685_v63, %v2675_v7  ;;  %v1479_v15 = vmul.f32 %v1467_v59, %v14586_v50  ;;  %v12669_v25 = vpack.c.bf16 %v2989_v8, %v2987_v37  ;;  %v12671_v60 = vpack.c.bf16 %v2988_v0, %v2986_v53  ;;  %v3001_v5 = vld [vmem:[#allocation8 + $0x7d8] sm:$0xff]  ;;  %v14683_v56 = vld [vmem:[#allocation176_spill] sm:$0xff]  ;;  %v14688_v50 = vld [vmem:[#allocation147_spill] sm:$0xff] }
 0x30c   :  { %v1500_v44 = vsel %vm859_vm7, %v14683_v56, %v1493_v27  ;;  %14684 = vst [vmem:[#allocation133_spill] sm:$0xff] %v12676_v20  ;;  %v12678_v43 = vpack.c.bf16 %v2993_v49, %v2991_v13  ;;  %v12680_v7 = vpack.c.bf16 %v2992_v19, %v2990_v6  ;;  %v12682_v33 = vpack.c.bf16 %v2997_v41, %v2995_v23  ;;  %v14689_v37 = vld [vmem:[#allocation148_spill] sm:$0xff]  ;;  %v14692_v18 = vld [vmem:[#allocation149_spill] sm:$0xff]  ;;  %v14693_v41 = vld [vmem:[#allocation150_spill] sm:$0xff] }
 0x30d   :  { %14681 = vst [vmem:[#allocation56_spill] sm:$0xff] %v12669_v25  ;;  %14682 = vst [vmem:[#allocation164_spill] sm:$0xff] %v12671_v60  ;;  %v2084_v8 = vmul.f32 %v14688_v50, %v1478_v17  ;;  %v2702_v53 = vmul.f32 %v14689_v37, %v1478_v17  ;;  %v2085_v0 = vmul.f32 %v14688_v50, %v1479_v15  ;;  %v399_v17 = vpop.permute.xlu0 %398  ;;  %v14714_v21 = vld [vmem:[#allocation183_spill] sm:$0xff] }
 0x30e   :  { %14685 = vst [vmem:[#allocation203_spill] sm:$0xff] %v12678_v43  ;;  %14686 = vst [vmem:[#allocation78_spill] sm:$0xff] %v12680_v7  ;;  %v12688_v35 = vmul.f32 %v14689_v37, %v1479_v15  ;;  %v1510_v4 = vmul.f32 %v12271_v2, %v1500_v44  ;;  %v1499_v13 = vsel %vm859_vm7, %v1493_v27, %v12676_v20  ;;  %v14694_v2 = vld [vmem:[#allocation61_spill] sm:$0xff]  ;;  %v14695_v27 = vld [vmem:[#allocation88_spill] sm:$0xff] }
 0x30f   :  { %14687 = vst [vmem:[#allocation96_spill] sm:$0xff] %v12682_v33  ;;  %v12694_v30 = vpack.c.bf16 %v2996_v10, %v2994_v61  ;;  %v12696_v19 = vpack.c.bf16 %v3001_v5, %v2999_v31  ;;  %v2092_v23 = vadd.f32 %v2084_v8, %v2074_v47  ;;  %v2710_v63 = vadd.f32 %v2702_v53, %v2692_v48  ;;  %v466_v10 = vpop.permute.xlu1 %465  ;;  %v14697_v31 = vld [vmem:[#allocation175_spill] sm:$0xff]  ;;  %v14698_v53 = vld [vmem:[#allocation60_spill] sm:$0xff] }
 0x310   :  { %v1511_v49 = vmul.f32 %v12296_v12, %v1499_v13  ;;  %v12699_v6 = vadd.f32 %v2085_v0, %v2075_v22  ;;  %v2102_v59 = vmul.f32 %v14692_v18, %v1510_v4  ;;  %v2720_v15 = vmul.f32 %v14693_v41, %v1510_v4  ;;  %v14696_v22 = vld [vmem:[#allocation163_spill] sm:$0xff]  ;;  %v14699_v4 = vld [vmem:[#allocation177_spill] sm:$0xff]  ;;  %v14708_v37 = vld [vmem:[#allocation64_spill] sm:$0xff] }
 0x311   :  { %14690 = vst [vmem:[#allocation152_spill] sm:$0xff] %v12694_v30  ;;  %14691 = vst [vmem:[#allocation215_spill] sm:$0xff] %v12696_v19  ;;  %v405_v56 = vsel %vm404_vm1, %v399_v17, %v14694_v2  ;;  %v406_v61 = vsel %vm404_vm1, %v14695_v27, %v399_v17  ;;  %v470_v0 = vsel %vm469_vm0, %v466_v10, %v14698_v53  ;;  %v14700_v17 = vld [vmem:[#allocation76_spill] sm:$0xff]  ;;  %v14701_v27 = vld [vmem:[#allocation77_spill] sm:$0xff] }
 0x312   :  { %v12710_v48 = vmul.f32 %v14692_v18, %v1511_v49  ;;  %v12713_v12 = vmul.f32 %v14693_v41, %v1511_v49  ;;  %v451_v47 = vmul.f32 %v14696_v22, %v406_v61  ;;  %v452_v5 = vmul.f32 %v14697_v31, %v405_v56  ;;  %v14704_v41 = vld [vmem:[#allocation63_spill] sm:$0xff]  ;;  %v14705_v30 = vld [vmem:[#allocation185_spill] sm:$0xff]  ;;  %v14713_v43 = vld [vmem:[#allocation80_spill] sm:$0xff] }
 0x313   :  { %v12717_v44 = vadd.f32 %v2102_v59, %v2092_v23  ;;  %v12719_v8 = vadd.f32 %v2720_v15, %v2710_v63  ;;  %v471_v13 = vsel %vm469_vm0, %v14699_v4, %v466_v10  ;;  %v531_v23 = vpop.permute.xlu0 %530  ;;  %v14702_v59 = vld [vmem:[#allocation189_spill] sm:$0xff]  ;;  %v14703_v15 = vld [vmem:[#allocation167_spill] sm:$0xff]  ;;  %v596_v4 = vpop.permute.xlu1 %595 }
 0x314   :  { %v1522_v2 = vmul.f32 %v14700_v17, %v451_v47  ;;  %v1523_v49 = vmul.f32 %v14700_v17, %v452_v5  ;;  %v2140_v61 = vmul.f32 %v14701_v27, %v451_v47  ;;  %v2141_v56 = vmul.f32 %v14701_v27, %v452_v5  ;;  %v14706_v18 = vld [vmem:[#allocation191_spill] sm:$0xff]  ;;  %v14710_v27 = vld [vmem:[#allocation73_spill] sm:$0xff] }
 0x315   :  { %v516_v63 = vmul.f32 %v14702_v59, %v471_v13  ;;  %v517_v19 = vmul.f32 %v14703_v15, %v470_v0  ;;  %v535_v53 = vsel %vm534_vm2, %v531_v23, %v14704_v41  ;;  %v536_v10 = vsel %vm534_vm2, %v14705_v30, %v531_v23  ;;  %v14707_v33 = vld [vmem:[#allocation55_spill] sm:$0xff]  ;;  %v14709_v13 = vld [vmem:[#allocation201_spill] sm:$0xff] }
 0x316   :  { %v581_v17 = vmul.f32 %v14706_v18, %v536_v10  ;;  %v582_v47 = vmul.f32 %v14707_v33, %v535_v53  ;;  %v600_v5 = vsel %vm599_vm3, %v596_v4, %v14708_v37  ;;  %v601_v0 = vsel %vm599_vm3, %v14709_v13, %v596_v4  ;;  %v14711_v7 = vld [vmem:[#allocation75_spill] sm:$0xff] }
 0x317   :  { %v1540_v50 = vmul.f32 %v14710_v27, %v516_v63  ;;  %v1541_v41 = vmul.f32 %v14710_v27, %v517_v19  ;;  %v2158_v20 = vmul.f32 %v14711_v7, %v516_v63  ;;  %v2159_v30 = vmul.f32 %v14711_v7, %v517_v19  ;;  %v14712_v23 = vld [vmem:[#allocation79_spill] sm:$0xff]  ;;  %v663_v32 = vpop.permute.xlu0 %662  ;;  %v14715_v27 = vld [vmem:[#allocation200_spill] sm:$0xff] }
 0x318   :  { %v1558_v10 = vmul.f32 %v14712_v23, %v581_v17  ;;  %v1559_v53 = vmul.f32 %v14712_v23, %v582_v47  ;;  %v2176_v60 = vmul.f32 %v14713_v43, %v581_v17  ;;  %v2177_v37 = vmul.f32 %v14713_v43, %v582_v47  ;;  %v14716_v63 = vld [vmem:[#allocation51_spill] sm:$0xff]  ;;  %v14717_v19 = vld [vmem:[#allocation72_spill] sm:$0xff]  ;;  %v728_v17 = vpop.permute.xlu1 %727 }
 0x319   :  { %v1548_v25 = vadd.f32 %v1540_v50, %v1522_v2  ;;  %v1549_v40 = vadd.f32 %v1541_v41, %v1523_v49  ;;  %v2166_v4 = vadd.f32 %v2158_v20, %v2140_v61  ;;  %v2167_v13 = vadd.f32 %v2159_v30, %v2141_v56  ;;  %v14718_v2 = vld [vmem:[#allocation85_spill] sm:$0xff]  ;;  %v14719_v61 = vld [vmem:[#allocation86_spill] sm:$0xff] }
 0x31a   :  { %v646_v36 = vmul.f32 %v14714_v21, %v601_v0  ;;  %v647_v42 = vmul.f32 %v14715_v27, %v600_v5  ;;  %v665_v7 = vsel %vm664_vm4, %v14716_v63, %v663_v32  ;;  %v672_v23 = vsel %vm664_vm4, %v663_v32, %v14717_v19  ;;  %v14720_v0 = vld [vmem:[#allocation124_spill] sm:$0xff] }
 0x31b   :  { %v1566_v16 = vadd.f32 %v1558_v10, %v1548_v25  ;;  %v1567_v43 = vadd.f32 %v1559_v53, %v1549_v40  ;;  %v2184_v47 = vadd.f32 %v2176_v60, %v2166_v4  ;;  %v2185_v50 = vadd.f32 %v2177_v37, %v2167_v13  ;;  %v14721_v63 = vld [vmem:[#allocation192_spill] sm:$0xff]  ;;  %v14722_v25 = vld [vmem:[#allocation83_spill] sm:$0xff]  ;;  %v14723_v4 = vld [vmem:[#allocation89_spill] sm:$0xff] }
 0x31c   :  { %v1576_v20 = vmul.f32 %v14718_v2, %v646_v36  ;;  %v1577_v49 = vmul.f32 %v14718_v2, %v647_v42  ;;  %v2194_v56 = vmul.f32 %v14719_v61, %v646_v36  ;;  %v2195_v5 = vmul.f32 %v14719_v61, %v647_v42  ;;  %v14724_v13 = vld [vmem:[#allocation90_spill] sm:$0xff] }
 0x31d   :  { %v711_v41 = vmul.f32 %v14720_v0, %v665_v7  ;;  %v712_v30 = vmul.f32 %v12289_v58, %v672_v23  ;;  %v730_v32 = vsel %vm729_vm5, %v14721_v63, %v728_v17  ;;  %v737_v40 = vsel %vm729_vm5, %v728_v17, %v14722_v25  ;;  %v14725_v23 = vld [vmem:[#allocation194_spill] sm:$0xff] }
 0x31e   :  { %v1584_v60 = vadd.f32 %v1576_v20, %v1566_v16  ;;  %v1585_v10 = vadd.f32 %v1577_v49, %v1567_v43  ;;  %v2202_v53 = vadd.f32 %v2194_v56, %v2184_v47  ;;  %v2203_v37 = vadd.f32 %v2195_v5, %v2185_v50  ;;  %v793_v47 = vpop.permute.xlu0 %792  ;;  %v858_v50 = vpop.permute.xlu1 %857  ;;  %v14728_v20 = vld [vmem:[#allocation211_spill] sm:$0xff] }
 0x31f   :  { %v1650_v36 = vmul.f32 %v14723_v4, %v711_v41  ;;  %v1651_v42 = vmul.f32 %v14723_v4, %v712_v30  ;;  %v2268_v7 = vmul.f32 %v14724_v13, %v711_v41  ;;  %v2269_v19 = vmul.f32 %v14724_v13, %v712_v30  ;;  %v14729_v56 = vld [vmem:[#allocation59_spill] sm:$0xff]  ;;  %v14730_v4 = vld [vmem:[#allocation93_spill] sm:$0xff]  ;;  %v14731_v13 = vld [vmem:[#allocation94_spill] sm:$0xff] }
 0x320   :  { %v1640_v2 = vadd.f32 %v14725_v23, %v1584_v60  ;;  %v14726_v61 = vcombine.high %v14725_v23, %v14725_v23  ;;  %v2258_v17 = vadd.f32 %v12285_v29, %v2202_v53  ;;  %v14727_v16 = vcombine.high %v12285_v29, %v12285_v29  ;;  %v14732_v23 = vld [vmem:[#allocation153_spill] sm:$0xff] }
 0x321   :  { %v776_v49 = vmul.f32 %v14728_v20, %v730_v32  ;;  %v777_v5 = vmul.f32 %v14729_v56, %v737_v40  ;;  %v2111_v41 = vadd.f32 %v12710_v48, %v12699_v6  ;;  %v2711_v30 = vadd.f32 %v12688_v35, %v12665_v38  ;;  %v14733_v35 = vld [vmem:[#allocation157_spill] sm:$0xff] }
 0x322   :  { %v1641_v63 = vadd.f32 %v14726_v61, %v1585_v10  ;;  %v2259_v43 = vadd.f32 %v14727_v16, %v2203_v37  ;;  %v1658_v25 = vadd.f32 %v1650_v36, %v1640_v2  ;;  %v2276_v10 = vadd.f32 %v2268_v7, %v2258_v17  ;;  %v12804_v2 = vld [vmem:[%s14083_s6 + $0x70] ss:$0 sm:$0xff] }
 0x323   :  { %v1668_v29 = vmul.f32 %v14730_v4, %v776_v49  ;;  %v1669_v37 = vmul.f32 %v14730_v4, %v777_v5  ;;  %v2286_v32 = vmul.f32 %v14731_v13, %v776_v49  ;;  %v2287_v40 = vmul.f32 %v14731_v13, %v777_v5  ;;  %v12808_v49 = vld [vmem:[%s14083_s6 + $0x78] ss:$0 sm:$0xff]  ;;  %v1000_v5 = vpop.permute.xlu1 %999 }
 0x324   :  { %v1659_v60 = vadd.f32 %v1651_v42, %v1641_v63  ;;  %v2277_v53 = vadd.f32 %v2269_v19, %v2259_v43  ;;  %v2121_v61 = vadd.f32 %v14732_v23, %v2111_v41  ;;  %v2729_v6 = vadd.f32 %v12713_v12, %v2711_v30  ;;  %v968_v12 = vpop.permute.xlu0 %967  ;;  %v14734_v41 = vld [vmem:[#allocation186_spill] sm:$0xff] }
 0x325   :  { %v2120_v38 = vadd.f32 %v14732_v23, %v12717_v44  ;;  %v2738_v48 = vadd.f32 %v14733_v35, %v12719_v8  ;;  %v1676_v36 = vadd.f32 %v1668_v29, %v1658_v25  ;;  %v2294_v7 = vadd.f32 %v2286_v32, %v2276_v10  ;;  %v14735_v8 = vld [vmem:[#allocation104_spill] sm:$0xff]  ;;  %v14737_v10 = vld [vmem:[#allocation117_spill] sm:$0xff] }
 0x326   :  { %v1677_v42 = vadd.f32 %v1669_v37, %v1659_v60  ;;  %v2295_v19 = vadd.f32 %v2287_v40, %v2277_v53  ;;  %v2129_v63 = vmax.f32 %v2121_v61, 0.0  ;;  %v2739_v17 = vadd.f32 %v14733_v35, %v2729_v6  ;;  %v14736_v25 = vld [vmem:[#allocation52_spill] sm:$0xff]  ;;  %v14739_v61 = vld [vmem:[#allocation134_spill] sm:$0xff] }
 0x327   :  { %v2128_v16 = vmax.f32 %v2120_v38, 0.0  ;;  %v2746_v43 = vmax.f32 %v2738_v48, 0.0  ;;  %v795_v44 = vsel %vm794_vm6, %v14734_v41, %v793_v47  ;;  %v802_v30 = vsel %vm794_vm6, %v793_v47, %v14735_v8  ;;  %v14738_v47 = vld [vmem:[#allocation138_spill] sm:$0xff]  ;;  %v14741_v48 = vld [vmem:[#allocation95_spill] sm:$0xff]  ;;  %v14743_v8 = vld [vmem:[#allocation101_spill] sm:$0xff] }
 0x328   :  { %v860_v60 = vsel %vm859_vm7, %v14736_v25, %v858_v50  ;;  %v867_v53 = vsel %vm859_vm7, %v858_v50, %v14737_v10  ;;  %3212 = vmatprep.mubr.f32.mxu0 %v2129_v63  ;;  %v2747_v4 = vmax.f32 %v2739_v17, 0.0  ;;  %v841_v29 = vmul.f32 %v12359_v3, %v795_v44  ;;  %v14740_v50 = vld [vmem:[#allocation143_spill] sm:$0xff]  ;;  %v14744_v25 = vld [vmem:[#allocation102_spill] sm:$0xff] }
 0x329   :  { %v842_v37 = vmul.f32 %v12370_v46, %v802_v30  ;;  %v906_v13 = vmul.f32 %v12804_v2, %v860_v60  ;;  %3213 = vmatmul.mubr.f32.vlgmr.msra.gmra.mrb[0].mxu0 %v2128_v16  ;;  %v907_v32 = vmul.f32 %v12808_v49, %v867_v53  ;;  %v971_v40 = vsel %vm404_vm1, %v968_v12, %v14738_v47  ;;  %v14742_v16 = vld [vmem:[#allocation97_spill] sm:$0xff] }
 0x32a   :  { %v972_v6 = vsel %vm404_vm1, %v14739_v61, %v968_v12  ;;  %v1003_v38 = vsel %vm469_vm0, %v1000_v5, %v14740_v50  ;;  %3496 = vmatprep.mubr.f32.mxu1 %v2747_v4  ;;  %7743 = vmatpush1.bf16.msra.mxu0 %v12353_v54  ;;  %v1686_v63 = vmul.f32 %v14741_v48, %v841_v29 }
 0x32b   :  { %v1687_v17 = vmul.f32 %v14741_v48, %v842_v37  ;;  %v2304_v41 = vmul.f32 %v14742_v16, %v841_v29  ;;  %3497 = vmatmul.mubr.f32.vlgmr.msra.gmra.mrb[0].mxu1 %v2746_v43  ;;  %v2305_v44 = vmul.f32 %v14742_v16, %v842_v37  ;;  %v1704_v30 = vmul.f32 %v14743_v8, %v906_v13  ;;  %v1032_v37 = vpop.permute.xlu0 %1031 }
 0x32c   :  { %v1705_v12 = vmul.f32 %v14743_v8, %v907_v32  ;;  %v2322_v60 = vmul.f32 %v14744_v25, %v906_v13  ;;  %7999 = vmatpush1.bf16.msra.mxu1 %v12353_v54  ;;  %v1694_v10 = vadd.f32 %v1686_v63, %v1676_v36  ;;  %v2323_v47 = vmul.f32 %v14744_v25, %v907_v32  ;;  %v14746_v63 = vld [vmem:[#allocation154_spill] sm:$0xff]  ;;  %v14748_v8 = vld [vmem:[#allocation107_spill] sm:$0xff] }
 0x32d   :  { %v1695_v53 = vadd.f32 %v1687_v17, %v1677_v42  ;;  %v2312_v4 = vadd.f32 %v2304_v41, %v2294_v7  ;;  %v2313_v61 = vadd.f32 %v2305_v44, %v2295_v19  ;;  %7745 = vmatprep.subr.bf16.mxu0 %v12392_v39  ;;  %8001 = vmatprep.subr.bf16.mxu1 %v12392_v39  ;;  %v14745_v39 = vld [vmem:[#allocation106_spill] sm:$0xff]  ;;  %v14747_v41 = vld [vmem:[#allocation195_spill] sm:$0xff] }
 0x32e   :  { %v985_v43 = vmul.f32 %v972_v6, %v14696_v22  ;;  %v986_v29 = vmul.f32 %v971_v40, %v14697_v31  ;;  %v1712_v50 = vadd.f32 %v1704_v30, %v1694_v10  ;;  %7747 = vmatpush1.bf16.msra.mxu0 %v12405_v62  ;;  %v1004_v54 = vsel %vm469_vm0, %v12340_v55, %v1000_v5  ;;  %v1064_v5 = vpop.permute.xlu1 %1063 }
 0x32f   :  { %v1713_v48 = vadd.f32 %v1705_v12, %v1695_v53  ;;  %v2330_v13 = vadd.f32 %v2322_v60, %v2312_v4  ;;  %v2331_v36 = vadd.f32 %v2323_v47, %v2313_v61  ;;  %7749 = vmatprep.subr.bf16.mxu0 %v12407_v34  ;;  %v1017_v40 = vmul.f32 %v1004_v54, %v14702_v59  ;;  %v14750_v60 = vld [vmem:[#allocation198_spill] sm:$0xff]  ;;  %v1098_v61 = vpop.permute.xlu0 %1097  ;;  %v14753_v54 = vld [vmem:[#allocation109_spill] sm:$0xff] }
 0x330   :  { %v1722_v42 = vmul.f32 %v14423_v51, %v985_v43  ;;  %v1723_v7 = vmul.f32 %v14423_v51, %v986_v29  ;;  %v2340_v19 = vmul.f32 %v14745_v39, %v985_v43  ;;  %8003 = vmatpush1.bf16.msra.mxu1 %v12405_v62  ;;  %v2341_v32 = vmul.f32 %v14745_v39, %v986_v29 }
 0x331   :  { %v1018_v6 = vmul.f32 %v1003_v38, %v14703_v15  ;;  %v1035_v55 = vsel %vm534_vm2, %v1032_v37, %v14746_v63  ;;  %8005 = vmatprep.subr.bf16.mxu1 %v12407_v34  ;;  %v1036_v62 = vsel %vm534_vm2, %v14747_v41, %v1032_v37  ;;  %v1740_v30 = vmul.f32 %v14748_v8, %v1017_v40  ;;  %v14749_v38 = vld [vmem:[#allocation108_spill] sm:$0xff]  ;;  %v14751_v34 = vld [vmem:[#allocation158_spill] sm:$0xff] }
 0x332   :  { %v1730_v17 = vadd.f32 %v1722_v42, %v1712_v50  ;;  %v1731_v16 = vadd.f32 %v1723_v7, %v1713_v48  ;;  %v2348_v51 = vadd.f32 %v2340_v19, %v2330_v13  ;;  %v2349_v44 = vadd.f32 %v2341_v32, %v2331_v36  ;;  %7751 = vmatpush1.bf16.msra.mxu0 %v14750_v60  ;;  %v14752_v50 = vld [vmem:[#allocation196_spill] sm:$0xff]  ;;  %v14754_v7 = vld [vmem:[#allocation110_spill] sm:$0xff] }
 0x333   :  { %v1741_v12 = vmul.f32 %v14748_v8, %v1018_v6  ;;  %v2358_v25 = vmul.f32 %v14749_v38, %v1017_v40  ;;  %v2359_v10 = vmul.f32 %v14749_v38, %v1018_v6  ;;  %v1049_v53 = vmul.f32 %v1036_v62, %v14706_v18  ;;  %7753 = vmatprep.subr.bf16.mxu0 %v12453_v11  ;;  %v14755_v6 = vld [vmem:[#allocation58_spill] sm:$0xff]  ;;  %v14757_v62 = vld [vmem:[#allocation111_spill] sm:$0xff] }
 0x334   :  { %v1050_v4 = vmul.f32 %v1035_v55, %v14707_v33  ;;  %v1067_v47 = vsel %vm599_vm3, %v1064_v5, %v14751_v34  ;;  %v1748_v43 = vadd.f32 %v1740_v30, %v1730_v17  ;;  %8007 = vmatpush1.bf16.msra.mxu1 %v14750_v60  ;;  %v1068_v48 = vsel %vm599_vm3, %v14752_v50, %v1064_v5  ;;  %v1130_v55 = vpop.permute.xlu1 %1129  ;;  %v14758_v30 = vld [vmem:[#allocation112_spill] sm:$0xff] }
 0x335   :  { %v1749_v29 = vadd.f32 %v1741_v12, %v1731_v16  ;;  %v2366_v37 = vadd.f32 %v2358_v25, %v2348_v51  ;;  %v2367_v13 = vadd.f32 %v2359_v10, %v2349_v44  ;;  %v1758_v36 = vmul.f32 %v14753_v54, %v1049_v53  ;;  %8009 = vmatprep.subr.bf16.mxu1 %v12453_v11  ;;  %v14756_v51 = vld [vmem:[#allocation98_spill] sm:$0xff] }
 0x336   :  { %v1759_v42 = vmul.f32 %v14753_v54, %v1050_v4  ;;  %v2376_v39 = vmul.f32 %v14754_v7, %v1049_v53  ;;  %v2377_v19 = vmul.f32 %v14754_v7, %v1050_v4  ;;  %v1081_v32 = vmul.f32 %v1068_v48, %v14714_v21  ;;  %7755 = vmatpush1.bf16.msra.mxu0 %v12455_v14  ;;  %v14761_v48 = vld [vmem:[#allocation114_spill] sm:$0xff] }
 0x337   :  { %v1082_v40 = vmul.f32 %v1067_v47, %v14715_v27  ;;  %v1099_v63 = vsel %vm664_vm4, %v14755_v6, %v1098_v61  ;;  %v1766_v5 = vadd.f32 %v1758_v36, %v1748_v43  ;;  %v1106_v11 = vsel %vm664_vm4, %v1098_v61, %v14756_v51  ;;  %7757 = vmatprep.subr.bf16.mxu0 %v12492_v57  ;;  %v14759_v47 = vld [vmem:[#allocation168_spill] sm:$0xff]  ;;  %v14767_v51 = vld [vmem:[#allocation118_spill] sm:$0xff] }
 0x338   :  { %v1767_v17 = vadd.f32 %v1759_v42, %v1749_v29  ;;  %v2384_v16 = vadd.f32 %v2376_v39, %v2366_v37  ;;  %v2385_v41 = vadd.f32 %v2377_v19, %v2367_v13  ;;  %v1776_v44 = vmul.f32 %v14757_v62, %v1081_v32  ;;  %8011 = vmatpush1.bf16.msra.mxu1 %v12455_v14  ;;  %v1162_v14 = vpop.permute.xlu0 %1161  ;;  %v14760_v29 = vld [vmem:[#allocation113_spill] sm:$0xff] }
 0x339   :  { %v1777_v8 = vmul.f32 %v14757_v62, %v1082_v40  ;;  %v2394_v12 = vmul.f32 %v14758_v30, %v1081_v32  ;;  %v2395_v38 = vmul.f32 %v14758_v30, %v1082_v40  ;;  %v1113_v25 = vmul.f32 %v1099_v63, %v14720_v0  ;;  %8013 = vmatprep.subr.bf16.mxu1 %v12492_v57  ;;  %v14764_v40 = vld [vmem:[#allocation54_spill] sm:$0xff]  ;;  %v14768_v62 = vld [vmem:[#allocation119_spill] sm:$0xff] }
 0x33a   :  { %v1114_v60 = vmul.f32 %v1106_v11, %v12289_v58  ;;  %v1131_v10 = vsel %vm729_vm5, %v12439_v45, %v1130_v55  ;;  %v1784_v53 = vadd.f32 %v1776_v44, %v1766_v5  ;;  %v1138_v61 = vsel %vm729_vm5, %v1130_v55, %v14759_v47  ;;  %7759 = vmatpush1.bf16.msra.mxu0 %v12494_v24 }
 0x33b   :  { %v1785_v4 = vadd.f32 %v1777_v8, %v1767_v17  ;;  %v2402_v34 = vadd.f32 %v2394_v12, %v2384_v16  ;;  %v2403_v43 = vadd.f32 %v2395_v38, %v2385_v41  ;;  %v1850_v37 = vmul.f32 %v14760_v29, %v1113_v25  ;;  %7761 = vmatprep.subr.bf16.mxu0 %v12523_v26  ;;  %v14765_v17 = vld [vmem:[#allocation172_spill] sm:$0xff]  ;;  %v14769_v12 = vld [vmem:[#allocation199_spill] sm:$0xff] }
 0x33c   :  { %v1851_v50 = vmul.f32 %v14760_v29, %v1114_v60  ;;  %v2468_v13 = vmul.f32 %v14761_v48, %v1113_v25  ;;  %v1840_v45 = vadd.f32 %v12473_v1, %v1784_v53  ;;  %v14762_v57 = vcombine.high %v12473_v1, %v12473_v1  ;;  %8015 = vmatpush1.bf16.msra.mxu1 %v12494_v24  ;;  %v1194_v1 = vpop.permute.xlu1 %1193  ;;  %v1271_v25 = vpop.permute.xlu0 %1270  ;;  %v14772_v29 = vld [vmem:[#allocation121_spill] sm:$0xff] }
 0x33d   :  { %v2458_v36 = vadd.f32 %v12490_v28, %v2402_v34  ;;  %v2469_v42 = vmul.f32 %v14761_v48, %v1114_v60  ;;  %v14763_v7 = vcombine.high %v12490_v28, %v12490_v28  ;;  %v1145_v19 = vmul.f32 %v1131_v10, %v14728_v20  ;;  %8017 = vmatprep.subr.bf16.mxu1 %v12523_v26  ;;  %v14766_v28 = vld [vmem:[#allocation202_spill] sm:$0xff] }
 0x33e   :  { %v1841_v54 = vadd.f32 %v14762_v57, %v1785_v4  ;;  %v1146_v32 = vmul.f32 %v1138_v61, %v14729_v56  ;;  %v1163_v6 = vsel %vm794_vm6, %v14764_v40, %v1162_v14  ;;  %v1858_v63 = vadd.f32 %v1850_v37, %v1840_v45  ;;  %7763 = vmatpush1.bf16.msra.mxu0 %v14766_v28  ;;  %v14770_v4 = vld [vmem:[#allocation174_spill] sm:$0xff]  ;;  %v14771_v61 = vld [vmem:[#allocation120_spill] sm:$0xff] }
 0x33f   :  { %v2459_v39 = vadd.f32 %v14763_v7, %v2403_v43  ;;  %v2476_v5 = vadd.f32 %v2468_v13, %v2458_v36  ;;  %v1170_v24 = vsel %vm794_vm6, %v1162_v14, %v14765_v17  ;;  %v1868_v11 = vmul.f32 %v14767_v51, %v1145_v19  ;;  %7765 = vmatprep.subr.bf16.mxu0 %v12540_v52  ;;  %v14774_v57 = vld [vmem:[#allocation100_spill] sm:$0xff]  ;;  %v14775_v36 = vld [vmem:[#allocation69_spill] sm:$0xff] }
 0x340   :  { %v1859_v55 = vadd.f32 %v1851_v50, %v1841_v54  ;;  %v1869_v41 = vmul.f32 %v14767_v51, %v1146_v32  ;;  %v2486_v44 = vmul.f32 %v14768_v62, %v1145_v19  ;;  %v2487_v26 = vmul.f32 %v14768_v62, %v1146_v32  ;;  %8019 = vmatpush1.bf16.msra.mxu1 %v14766_v28  ;;  %v14773_v50 = vld [vmem:[#allocation62_spill] sm:$0xff]  ;;  %v14776_v19 = vld [vmem:[#allocation155_spill] sm:$0xff] }
 0x341   :  { %v2477_v16 = vadd.f32 %v2469_v42, %v2459_v39  ;;  %v1177_v8 = vmul.f32 %v1163_v6, %v12359_v3  ;;  %v1178_v30 = vmul.f32 %v1170_v24, %v12370_v46  ;;  %v1195_v38 = vsel %vm859_vm7, %v14769_v12, %v1194_v1  ;;  %8021 = vmatprep.subr.bf16.mxu1 %v12540_v52  ;;  %v1303_v52 = vpop.permute.xlu1 %1302  ;;  %v14777_v6 = vld [vmem:[#allocation125_spill] sm:$0xff] }
 0x342   :  { %v1876_v60 = vadd.f32 %v1868_v11, %v1858_v63  ;;  %v1877_v10 = vadd.f32 %v1869_v41, %v1859_v55  ;;  %v2494_v53 = vadd.f32 %v2486_v44, %v2476_v5  ;;  %v1202_v34 = vsel %vm859_vm7, %v1194_v1, %v14770_v4  ;;  %7767 = vmatpush1.bf16.msra.mxu0 %v14773_v50  ;;  %v14778_v55 = vld [vmem:[#allocation126_spill] sm:$0xff]  ;;  %v1335_v11 = vpop.permute.xlu0 %1334  ;;  %v14780_v41 = vld [vmem:[#allocation208_spill] sm:$0xff]  ;;  %v14782_v12 = vld [vmem:[#allocation65_spill] sm:$0xff] }
 0x343   :  { %v2495_v47 = vadd.f32 %v2487_v26, %v2477_v16  ;;  %v1886_v14 = vmul.f32 %v14771_v61, %v1177_v8  ;;  %v1887_v43 = vmul.f32 %v14771_v61, %v1178_v30  ;;  %v2504_v37 = vmul.f32 %v14772_v29, %v1177_v8  ;;  %7769 = vmatprep.subr.bf16.mxu0 %v14775_v36  ;;  %v14779_v16 = vld [vmem:[#allocation184_spill] sm:$0xff] }
 0x344   :  { %v2505_v48 = vmul.f32 %v14772_v29, %v1178_v30  ;;  %v1209_v13 = vmul.f32 %v12804_v2, %v1195_v38  ;;  %v1210_v45 = vmul.f32 %v12808_v49, %v1202_v34  ;;  %v1274_v54 = vsel %vm404_vm1, %v1271_v25, %v14774_v57  ;;  %8023 = vmatpush1.bf16.msra.mxu1 %v14773_v50  ;;  %v14781_v8 = vld [vmem:[#allocation204_spill] sm:$0xff]  ;;  %v14786_v50 = vld [vmem:[#allocation206_spill] sm:$0xff] }
 0x345   :  { %v1894_v42 = vadd.f32 %v1886_v14, %v1876_v60  ;;  %v1895_v7 = vadd.f32 %v1887_v43, %v1877_v10  ;;  %v2512_v39 = vadd.f32 %v2504_v37, %v2494_v53  ;;  %v1275_v32 = vsel %vm404_vm1, %v14776_v19, %v1271_v25  ;;  %8025 = vmatprep.subr.bf16.mxu1 %v14775_v36  ;;  %v14784_v60 = vld [vmem:[#allocation129_spill] sm:$0xff]  ;;  %v1367_v14 = vpop.permute.xlu1 %1366  ;;  %v14791_v19 = vld [vmem:[#allocation188_spill] sm:$0xff] }
 0x346   :  { %v2513_v40 = vadd.f32 %v2505_v48, %v2495_v47  ;;  %v1904_v1 = vmul.f32 %v14777_v6, %v1209_v13  ;;  %v1905_v63 = vmul.f32 %v14777_v6, %v1210_v45  ;;  %v2522_v5 = vmul.f32 %v14778_v55, %v1209_v13  ;;  %7771 = vmatpush1.bf16.msra.mxu0 %v14780_v41  ;;  %v14785_v47 = vld [vmem:[#allocation123_spill] sm:$0xff]  ;;  %v14790_v36 = vld [vmem:[#allocation209_spill] sm:$0xff] }
 0x347   :  { %v2523_v17 = vmul.f32 %v14778_v55, %v1210_v45  ;;  %v1288_v24 = vmul.f32 %v1275_v32, %v14696_v22  ;;  %v1289_v28 = vmul.f32 %v1274_v54, %v14697_v31  ;;  %v1306_v51 = vsel %vm469_vm0, %v1303_v52, %v14779_v16  ;;  %7773 = vmatprep.subr.bf16.mxu0 %v14782_v12  ;;  %v14783_v22 = vld [vmem:[#allocation127_spill] sm:$0xff]  ;;  %v14792_v55 = vld [vmem:[#allocation70_spill] sm:$0xff] }
 0x348   :  { %v1912_v62 = vadd.f32 %v1904_v1, %v1894_v42  ;;  %v1913_v44 = vadd.f32 %v1905_v63, %v1895_v7  ;;  %v2530_v26 = vadd.f32 %v2522_v5, %v2512_v39  ;;  %v1307_v30 = vsel %vm469_vm0, %v14781_v8, %v1303_v52  ;;  %8027 = vmatpush1.bf16.msra.mxu1 %v14780_v41  ;;  %v14787_v13 = vld [vmem:[#allocation207_spill] sm:$0xff] }
 0x349   :  { %v2531_v38 = vadd.f32 %v2523_v17, %v2513_v40  ;;  %v1922_v25 = vmul.f32 %v14783_v22, %v1288_v24  ;;  %v1923_v31 = vmul.f32 %v14783_v22, %v1289_v28  ;;  %v2540_v10 = vmul.f32 %v14784_v60, %v1288_v24  ;;  %8029 = vmatprep.subr.bf16.mxu1 %v14782_v12  ;;  %v14789_v54 = vld [vmem:[#allocation131_spill] sm:$0xff]  ;;  %v1401_v40 = vpop.permute.xlu0 %1400  ;;  %v1433_v8 = vpop.permute.xlu1 %1432 }
 0x34a   :  { %v2541_v53 = vmul.f32 %v14784_v60, %v1289_v28  ;;  %v1320_v4 = vmul.f32 %v1307_v30, %v14702_v59  ;;  %v1321_v34 = vmul.f32 %v1306_v51, %v14703_v15  ;;  %v1338_v61 = vsel %vm534_vm2, %v1335_v11, %v14785_v47  ;;  %7775 = vmatpush1.bf16.msra.mxu0 %v14787_v13  ;;  %v14788_v59 = vld [vmem:[#allocation130_spill] sm:$0xff]  ;;  %v14794_v28 = vld [vmem:[#allocation136_spill] sm:$0xff]  ;;  %v14795_v51 = vld [vmem:[#allocation87_spill] sm:$0xff] }
 0x34b   :  { %v1930_v43 = vadd.f32 %v1922_v25, %v1912_v62  ;;  %v1931_v29 = vadd.f32 %v1923_v31, %v1913_v44  ;;  %v2548_v37 = vadd.f32 %v2540_v10, %v2530_v26  ;;  %v1339_v48 = vsel %vm534_vm2, %v14786_v50, %v1335_v11  ;;  %7777 = vmatprep.subr.bf16.mxu0 %v14790_v36  ;;  %v14796_v44 = vld [vmem:[#allocation210_spill] sm:$0xff]  ;;  %v14798_v25 = vld [vmem:[#allocation193_spill] sm:$0xff] }
 0x34c   :  { %v2549_v45 = vadd.f32 %v2541_v53, %v2531_v38  ;;  %v1940_v57 = vmul.f32 %v14788_v59, %v1320_v4  ;;  %v1941_v15 = vmul.f32 %v14788_v59, %v1321_v34  ;;  %v2558_v52 = vmul.f32 %v14789_v54, %v1320_v4  ;;  %8031 = vmatpush1.bf16.msra.mxu1 %v14787_v13  ;;  %v14797_v30 = vld [vmem:[#allocation214_spill] sm:$0xff]  ;;  %v14800_v53 = vld [vmem:[#allocation139_spill] sm:$0xff]  ;;  %v14803_v13 = vld [vmem:[#allocation197_spill] sm:$0xff] }
 0x34d   :  { %v2559_v42 = vmul.f32 %v14789_v54, %v1321_v34  ;;  %v1352_v7 = vmul.f32 %v1339_v48, %v14706_v18  ;;  %v1353_v39 = vmul.f32 %v1338_v61, %v14707_v33  ;;  %v1370_v32 = vsel %vm599_vm3, %v1367_v14, %v14791_v19  ;;  %8033 = vmatprep.subr.bf16.mxu1 %v14790_v36  ;;  %v14793_v18 = vld [vmem:[#allocation135_spill] sm:$0xff]  ;;  %v1465_v59 = vpop.permute.xlu0 %1464 }
 0x34e   :  { %v1948_v6 = vadd.f32 %v1940_v57, %v1930_v43  ;;  %v1949_v1 = vadd.f32 %v1941_v15, %v1931_v29  ;;  %v2566_v63 = vadd.f32 %v2558_v52, %v2548_v37  ;;  %v1371_v5 = vsel %vm599_vm3, %v14792_v55, %v1367_v14  ;;  %7779 = vmatpush1.bf16.msra.mxu0 %v14795_v51  ;;  %v14801_v14 = vld [vmem:[#allocation160_spill] sm:$0xff]  ;;  %v14802_v29 = vld [vmem:[#allocation151_spill] sm:$0xff]  ;;  %v14806_v52 = vld [vmem:[#allocation141_spill] sm:$0xff] }
 0x34f   :  { %v2567_v17 = vadd.f32 %v2559_v42, %v2549_v45  ;;  %v1958_v24 = vmul.f32 %v14793_v18, %v1352_v7  ;;  %v1959_v33 = vmul.f32 %v14793_v18, %v1353_v39  ;;  %v2576_v16 = vmul.f32 %v14794_v28, %v1352_v7  ;;  %7781 = vmatprep.subr.bf16.mxu0 %v14797_v30  ;;  %v14804_v57 = vld [vmem:[#allocation56_spill] sm:$0xff]  ;;  %v14807_v42 = vld [vmem:[#allocation173_spill] sm:$0xff] }
 0x350   :  { %v2577_v11 = vmul.f32 %v14794_v28, %v1353_v39  ;;  %v1384_v41 = vmul.f32 %v1371_v5, %v14714_v21  ;;  %v1385_v62 = vmul.f32 %v1370_v32, %v14715_v27  ;;  %v1402_v26 = vsel %vm664_vm4, %v14796_v44, %v1401_v40  ;;  %8035 = vmatpush1.bf16.msra.mxu1 %v14795_v51  ;;  %v14799_v21 = vld [vmem:[#allocation137_spill] sm:$0xff]  ;;  %v14809_v32 = vld [vmem:[#allocation212_spill] sm:$0xff] }
 0x351   :  { %v1966_v12 = vadd.f32 %v1958_v24, %v1948_v6  ;;  %v1967_v38 = vadd.f32 %v1959_v33, %v1949_v1  ;;  %v2584_v22 = vadd.f32 %v2576_v16, %v2566_v63  ;;  %v1409_v31 = vsel %vm664_vm4, %v1401_v40, %v14798_v25  ;;  %8037 = vmatprep.subr.bf16.mxu1 %v14797_v30  ;;  %v1497_v24 = vpop.permute.xlu1 %1496  ;;  %v14812_v33 = vld [vmem:[#allocation164_spill] sm:$0xff]  ;;  %v14817_v25 = vld [vmem:[#allocation133_spill] sm:$0xff] }
 0x352   :  { %v2585_v60 = vadd.f32 %v2577_v11, %v2567_v17  ;;  %v1976_v10 = vmul.f32 %v14799_v21, %v1384_v41  ;;  %v1977_v27 = vmul.f32 %v14799_v21, %v1385_v62  ;;  %v2594_v4 = vmul.f32 %v14800_v53, %v1384_v41  ;;  %7783 = vmatpush1.bf16.msra.mxu0 %v14802_v29  ;;  %v14811_v17 = vld [vmem:[#allocation105_spill] sm:$0xff] }
 0x353   :  { %v2595_v34 = vmul.f32 %v14800_v53, %v1385_v62  ;;  %v1416_v47 = vmul.f32 %v1402_v26, %v14720_v0  ;;  %v1417_v61 = vmul.f32 %v1409_v31, %v12289_v58  ;;  %v1434_v43 = vsel %vm729_vm5, %v14801_v14, %v1433_v8  ;;  %7785 = vmatprep.subr.bf16.mxu0 %v14804_v57  ;;  %v14805_v0 = vld [vmem:[#allocation140_spill] sm:$0xff]  ;;  %v14813_v11 = vld [vmem:[#allocation205_spill] sm:$0xff]  ;;  %v14814_v62 = vld [vmem:[#allocation203_spill] sm:$0xff] }
 0x354   :  { %v1984_v37 = vadd.f32 %v1976_v10, %v1966_v12  ;;  %v1985_v50 = vadd.f32 %v1977_v27, %v1967_v38  ;;  %v2602_v48 = vadd.f32 %v2594_v4, %v2584_v22  ;;  %v1441_v45 = vsel %vm729_vm5, %v1433_v8, %v14803_v13  ;;  %8039 = vmatpush1.bf16.msra.mxu1 %v14802_v29  ;;  %v14816_v8 = vld [vmem:[#allocation145_spill] sm:$0xff]  ;;  %v14819_v4 = vld [vmem:[#allocation78_spill] sm:$0xff]  ;;  %v3003_v13 = vld [vmem:[#allocation8 + $0x7e8] sm:$0xff] }
 0x355   :  { %v2603_v15 = vadd.f32 %v2595_v34, %v2585_v60  ;;  %v2050_v54 = vmul.f32 %v14805_v0, %v1416_v47  ;;  %v2051_v58 = vmul.f32 %v14805_v0, %v1417_v61  ;;  %v2668_v36 = vmul.f32 %v14806_v52, %v1416_v47  ;;  %8041 = vmatprep.subr.bf16.mxu1 %v14804_v57  ;;  %v14818_v27 = vld [vmem:[#allocation213_spill] sm:$0xff]  ;;  %v14820_v47 = vld [vmem:[#allocation147_spill] sm:$0xff] }
 0x356   :  { %v2040_v7 = vadd.f32 %v14807_v42, %v1984_v37  ;;  %v14808_v39 = vcombine.high %v14807_v42, %v14807_v42  ;;  %v2658_v40 = vadd.f32 %v14809_v32, %v2602_v48  ;;  %v2669_v6 = vmul.f32 %v14806_v52, %v1417_v61  ;;  %7787 = vmatpush1.bf16.msra.mxu0 %v14812_v33  ;;  %v14821_v61 = vld [vmem:[#allocation148_spill] sm:$0xff]  ;;  %v2998_v29 = vld [vmem:[#allocation8 + $0x7c0] sm:$0xff] }
 0x357   :  { %v14810_v1 = vcombine.high %v14809_v32, %v14809_v32  ;;  %v1448_v55 = vmul.f32 %v1434_v43, %v14728_v20  ;;  %v1449_v5 = vmul.f32 %v1441_v45, %v14729_v56  ;;  %v1466_v18 = vsel %vm794_vm6, %v14811_v17, %v1465_v59  ;;  %7789 = vmatprep.subr.bf16.mxu0 %v14814_v62  ;;  %v14815_v20 = vld [vmem:[#allocation144_spill] sm:$0xff]  ;;  %v3005_v45 = vld [vmem:[#allocation8 + $0x7f8] sm:$0xff]  ;;  %v3002_v32 = vld [vmem:[#allocation8 + $0x7e0] sm:$0xff] }
 0x358   :  { %v2041_v19 = vadd.f32 %v14808_v39, %v1985_v50  ;;  %v2058_v28 = vadd.f32 %v2050_v54, %v2040_v7  ;;  %v2676_v51 = vadd.f32 %v2668_v36, %v2658_v40  ;;  %v1473_v41 = vsel %vm794_vm6, %v1465_v59, %v14813_v11  ;;  %8043 = vmatpush1.bf16.msra.mxu1 %v14812_v33  ;;  %v14822_v43 = vld [vmem:[#allocation96_spill] sm:$0xff]  ;;  %v14823_v54 = vld [vmem:[#allocation149_spill] sm:$0xff]  ;;  %v14826_v39 = vld [vmem:[#allocation215_spill] sm:$0xff] }
 0x359   :  { %v2659_v63 = vadd.f32 %v14810_v1, %v2603_v15  ;;  %v2068_v26 = vmul.f32 %v14815_v20, %v1448_v55  ;;  %v2069_v56 = vmul.f32 %v14815_v20, %v1449_v5  ;;  %v2686_v30 = vmul.f32 %v14816_v8, %v1448_v55  ;;  %8045 = vmatprep.subr.bf16.mxu1 %v14814_v62  ;;  %v3000_v37 = vld [vmem:[#allocation8 + $0x7d0] sm:$0xff] }
 0x35a   :  { %v2059_v16 = vadd.f32 %v2051_v58, %v2041_v19  ;;  %v2687_v12 = vmul.f32 %v14816_v8, %v1449_v5  ;;  %v1480_v38 = vmul.f32 %v1466_v18, %v12359_v3  ;;  %v1481_v22 = vmul.f32 %v1473_v41, %v12370_v46  ;;  %7791 = vmatpush1.bf16.msra.mxu0 %v14819_v4  ;;  %v14824_v36 = vld [vmem:[#allocation152_spill] sm:$0xff] }
 0x35b   :  { %v2677_v44 = vadd.f32 %v2669_v6, %v2659_v63  ;;  %v1498_v31 = vsel %vm859_vm7, %v14817_v25, %v1497_v24  ;;  %v2076_v60 = vadd.f32 %v2068_v26, %v2058_v28  ;;  %v2694_v10 = vadd.f32 %v2686_v30, %v2676_v51  ;;  %7793 = vmatprep.subr.bf16.mxu0 %v14822_v43  ;;  %v3004_v40 = vld [vmem:[#allocation8 + $0x7f0] sm:$0xff] }
 0x35c   :  { %v2077_v21 = vadd.f32 %v2069_v56, %v2059_v16  ;;  %v1505_v53 = vsel %vm859_vm7, %v1497_v24, %v14818_v27  ;;  %v2086_v3 = vmul.f32 %v14820_v47, %v1480_v38  ;;  %v2087_v46 = vmul.f32 %v14820_v47, %v1481_v22  ;;  %8047 = vmatpush1.bf16.msra.mxu1 %v14819_v4  ;;  %v3580_v4 = vld [vmem:[#allocation11 + $0x30] sm:$0xff] }
 0x35d   :  { %v2695_v34 = vadd.f32 %v2687_v12, %v2677_v44  ;;  %v2704_v14 = vmul.f32 %v14821_v61, %v1480_v38  ;;  %v2705_v50 = vmul.f32 %v14821_v61, %v1481_v22  ;;  %v1512_v48 = vmul.f32 %v12804_v2, %v1498_v31  ;;  %8049 = vmatprep.subr.bf16.mxu1 %v14822_v43  ;;  %v14825_v2 = vld [vmem:[#allocation150_spill] sm:$0xff]  ;;  %v3575_v12 = vld [vmem:[#allocation11 + $0x8] sm:$0xff] }
 0x35e   :  { %v1513_v9 = vmul.f32 %v12808_v49, %v1505_v53  ;;  %v2094_v59 = vadd.f32 %v2086_v3, %v2076_v60  ;;  %v2095_v57 = vadd.f32 %v2087_v46, %v2077_v21  ;;  %7795 = vmatpush1.bf16.msra.mxu0 %v14824_v36  ;;  %v7798_v42 = vpack.c.bf16 %v3000_v37, %v2998_v29  ;;  %v3579_v38 = vld [vmem:[#allocation11 + $0x28] sm:$0xff]  ;;  %v3577_v22 = vld [vmem:[#allocation11 + $0x18] sm:$0xff]  ;;  %v3574_v60 = vld [vmem:[#allocation11] sm:$0xff] }
 0x35f   :  { %v2712_v15 = vadd.f32 %v2704_v14, %v2694_v10  ;;  %v2713_v0 = vadd.f32 %v2705_v50, %v2695_v34  ;;  %v2104_v58 = vmul.f32 %v14823_v54, %v1512_v48  ;;  %v2722_v7 = vmul.f32 %v14825_v2, %v1512_v48  ;;  %7797 = vmatprep.subr.bf16.mxu0 %v14826_v39  ;;  %v3581_v31 = vld [vmem:[#allocation11 + $0x38] sm:$0xff]  ;;  %v3578_v21 = vld [vmem:[#allocation11 + $0x20] sm:$0xff]  ;;  %v3576_v53 = vld [vmem:[#allocation11 + $0x10] sm:$0xff] }
 0x360   :  { %v2105_v52 = vmul.f32 %v14823_v54, %v1513_v9  ;;  %v2723_v49 = vmul.f32 %v14825_v2, %v1513_v9  ;;  %v7800_v19 = vpack.c.bf16 %v3005_v45, %v3003_v13  ;;  %8051 = vmatpush1.bf16.msra.mxu1 %v14824_v36  ;;  %v7802_v17 = vpack.c.bf16 %v3004_v40, %v3002_v32  ;;  %v3583_v34 = vld [vmem:[#allocation11 + $0x48] sm:$0xff]  ;;  %v3585_v46 = vld [vmem:[#allocation11 + $0x58] sm:$0xff]  ;;  %v3582_v29 = vld [vmem:[#allocation11 + $0x40] sm:$0xff] }
 0x361   :  { %v2112_v6 = vadd.f32 %v2104_v58, %v2094_v59  ;;  %v2730_v63 = vadd.f32 %v2722_v7, %v2712_v15  ;;  %8053 = vmatprep.subr.bf16.mxu1 %v14826_v39  ;;  %v8060_v25 = vpack.c.bf16 %v3579_v38, %v3575_v12  ;;  %v8188_v10 = vpack.c.bf16 %v3581_v31, %v3577_v22  ;;  %v3587_v3 = vld [vmem:[#allocation11 + $0x68] sm:$0xff]  ;;  %v3589_v61 = vld [vmem:[#allocation11 + $0x78] sm:$0xff]  ;;  %v3586_v37 = vld [vmem:[#allocation11 + $0x60] sm:$0xff] }
 0x362   :  { %v2113_v1 = vadd.f32 %v2105_v52, %v2095_v57  ;;  %v2731_v55 = vadd.f32 %v2723_v49, %v2713_v0  ;;  %7799 = vmatpush1.bf16.msra.mxu0 %v7798_v42  ;;  %v8062_v27 = vpack.c.bf16 %v3578_v21, %v3574_v60  ;;  %v8190_v47 = vpack.c.bf16 %v3580_v4, %v3576_v53  ;;  %v3584_v50 = vld [vmem:[#allocation11 + $0x50] sm:$0xff]  ;;  %v3591_v13 = vld [vmem:[#allocation11 + $0x88] sm:$0xff]  ;;  %v3593_v15 = vld [vmem:[#allocation11 + $0x98] sm:$0xff] }
 0x363   :  { %7801 = vmatprep.subr.bf16.mxu0 %v7800_v19  ;;  %v2122_v24 = vadd.f32 %v14732_v23, %v2112_v6  ;;  %v2740_v16 = vadd.f32 %v14733_v35, %v2730_v63  ;;  %v8064_v14 = vpack.c.bf16 %v3587_v3, %v3583_v34  ;;  %v8192_v43 = vpack.c.bf16 %v3589_v61, %v3585_v46  ;;  %v3588_v9 = vld [vmem:[#allocation11 + $0x70] sm:$0xff]  ;;  %v3595_v45 = vld [vmem:[#allocation11 + $0xa8] sm:$0xff]  ;;  %v3597_v0 = vld [vmem:[#allocation11 + $0xb8] sm:$0xff] }
 0x364   :  { %v2123_v5 = vadd.f32 %v14732_v23, %v2113_v1  ;;  %v2741_v18 = vadd.f32 %v14733_v35, %v2731_v55  ;;  %8055 = vmatpush1.bf16.msra.mxu1 %v7798_v42  ;;  %v8066_v48 = vpack.c.bf16 %v3586_v37, %v3582_v29  ;;  %v8194_v59 = vpack.c.bf16 %v3588_v9, %v3584_v50  ;;  %v3590_v58 = vld [vmem:[#allocation11 + $0x80] sm:$0xff]  ;;  %v3592_v36 = vld [vmem:[#allocation11 + $0x90] sm:$0xff]  ;;  %v3599_v7 = vld [vmem:[#allocation11 + $0xc8] sm:$0xff] }
 0x365   :  { %8057 = vmatprep.subr.bf16.mxu1 %v7800_v19  ;;  %v2130_v51 = vmax.f32 %v2122_v24, 0.0  ;;  %v2748_v11 = vmax.f32 %v2740_v16, 0.0  ;;  %v8068_v57 = vpack.c.bf16 %v3595_v45, %v3591_v13  ;;  %v8196_v54 = vpack.c.bf16 %v3597_v0, %v3593_v15  ;;  %v3594_v52 = vld [vmem:[#allocation11 + $0xa0] sm:$0xff]  ;;  %v3596_v2 = vld [vmem:[#allocation11 + $0xb0] sm:$0xff]  ;;  %v3603_v49 = vld [vmem:[#allocation11 + $0xe8] sm:$0xff] }
 0x366   :  { %v2131_v33 = vmax.f32 %v2123_v5, 0.0  ;;  %v2749_v28 = vmax.f32 %v2741_v18, 0.0  ;;  %7803 = vmatpush1.bf16.msra.mxu0 %v7802_v17  ;;  %v8070_v42 = vpack.c.bf16 %v3594_v52, %v3590_v58  ;;  %v8198_v39 = vpack.c.bf16 %v3596_v2, %v3592_v36  ;;  %v3601_v32 = vld [vmem:[#allocation11 + $0xd8] sm:$0xff]  ;;  %v3598_v6 = vld [vmem:[#allocation11 + $0xc0] sm:$0xff]  ;;  %v3600_v55 = vld [vmem:[#allocation11 + $0xd0] sm:$0xff] }
 0x367   :  { %8061 = vmatprep.subr.bf16.mxu0 %v8060_v25  ;;  %v8072_v19 = vpack.c.bf16 %v3603_v49, %v3599_v7  ;;  %v3605_v40 = vld [vmem:[#allocation11 + $0xf8] sm:$0xff]  ;;  %v3602_v63 = vld [vmem:[#allocation11 + $0xe0] sm:$0xff]  ;;  %v3604_v5 = vld [vmem:[#allocation11 + $0xf0] sm:$0xff]  ;;  %vm6363_vm0 = vcmask 654336   ;;  %vm6367_vm1 = vcmask 916480   ;;  %vm6365_vm2 = vcmask 785408  }
 0x368   :  { %3283 = vmatprep.mubr.f32.mxu0 %v2131_v33  ;;  %3567 = vmatprep.mubr.f32.mxu1 %v2749_v28  ;;  %v8200_v1 = vpack.c.bf16 %v3605_v40, %v3601_v32  ;;  %v3607_v18 = vld [vmem:[#allocation11 + $0x108] sm:$0xff]  ;;  %v3609_v33 = vld [vmem:[#allocation11 + $0x118] sm:$0xff]  ;;  %v8202_v28 = vpack.c.bf16 %v3604_v5, %v3600_v55  ;;  %v3614_v60 = vld [vmem:[#allocation11 + $0x140] sm:$0xff]  ;;  %vm7000_vm3 = vcmask 74752  }
 0x369   :  { %8059 = vmatpush1.bf16.msra.mxu1 %v7802_v17  ;;  %3284 = vmatmul.mubr.f32.vlgmr.msra.gmra.mrb[0].mxu0 %v2130_v51  ;;  %v8074_v17 = vpack.c.bf16 %v3602_v63, %v3598_v6  ;;  %v3611_v24 = vld [vmem:[#allocation11 + $0x128] sm:$0xff]  ;;  %v3613_v51 = vld [vmem:[#allocation11 + $0x138] sm:$0xff]  ;;  %v3618_v21 = vld [vmem:[#allocation11 + $0x160] sm:$0xff] }
 0x36a   :  { %8189 = vmatprep.subr.bf16.mxu1 %v8188_v10  ;;  %8063 = vmatpush1.bf16.msra.mxu0 %v8062_v27  ;;  %v8076_v16 = vpack.c.bf16 %v3611_v24, %v3607_v18  ;;  %v3617_v12 = vld [vmem:[#allocation11 + $0x158] sm:$0xff]  ;;  %v3616_v10 = vld [vmem:[#allocation11 + $0x150] sm:$0xff]  ;;  %v3623_v4 = vld [vmem:[#allocation11 + $0x188] sm:$0xff]  ;;  %v8082_v46 = vpack.c.bf16 %v3618_v21, %v3614_v60 }
 0x36b   :  { %8065 = vmatprep.subr.bf16.mxu0 %v8064_v14  ;;  %v3621_v38 = vld [vmem:[#allocation11 + $0x178] sm:$0xff]  ;;  %v3620_v53 = vld [vmem:[#allocation11 + $0x170] sm:$0xff]  ;;  %v3627_v34 = vld [vmem:[#allocation11 + $0x1a8] sm:$0xff] }
 0x36c   :  { %3568 = vmatmul.mubr.f32.vlgmr.msra.gmra.mrb[0].mxu1 %v2748_v11  ;;  %v3606_v11 = vld [vmem:[#allocation11 + $0x100] sm:$0xff]  ;;  %v8208_v27 = vpack.c.bf16 %v3621_v38, %v3617_v12  ;;  %v3629_v3 = vld [vmem:[#allocation11 + $0x1b8] sm:$0xff]  ;;  %v8210_v61 = vpack.c.bf16 %v3620_v53, %v3616_v10  ;;  %v8084_v14 = vpack.c.bf16 %v3627_v34, %v3623_v4  ;;  %v3624_v37 = vld [vmem:[#allocation11 + $0x190] sm:$0xff] }
 0x36d   :  { %8191 = vmatpush1.bf16.msra.mxu1 %v8190_v47  ;;  %v3625_v47 = vld [vmem:[#allocation11 + $0x198] sm:$0xff]  ;;  %v3626_v29 = vld [vmem:[#allocation11 + $0x1a0] sm:$0xff]  ;;  %v3631_v9 = vld [vmem:[#allocation11 + $0x1c8] sm:$0xff] }
 0x36e   :  { %8193 = vmatprep.subr.bf16.mxu1 %v8192_v43  ;;  %8067 = vmatpush1.bf16.msra.mxu0 %v8066_v48  ;;  %v3622_v43 = vld [vmem:[#allocation11 + $0x180] sm:$0xff]  ;;  %v8212_v50 = vpack.c.bf16 %v3629_v3, %v3625_v47  ;;  %v3628_v48 = vld [vmem:[#allocation11 + $0x1b0] sm:$0xff]  ;;  %v3635_v13 = vld [vmem:[#allocation11 + $0x1e8] sm:$0xff] }
 0x36f   :  { %8069 = vmatprep.subr.bf16.mxu0 %v8068_v57  ;;  %v3633_v45 = vld [vmem:[#allocation11 + $0x1d8] sm:$0xff]  ;;  %v8086_v57 = vpack.c.bf16 %v3626_v29, %v3622_v43  ;;  %v8214_v15 = vpack.c.bf16 %v3628_v48, %v3624_v37  ;;  %v8088_v0 = vpack.c.bf16 %v3635_v13, %v3631_v9  ;;  %v3634_v58 = vld [vmem:[#allocation11 + $0x1e0] sm:$0xff]  ;;  %v3632_v52 = vld [vmem:[#allocation11 + $0x1d0] sm:$0xff] }
 0x370   :  { %v3639_v2 = vld [vmem:[#allocation11 + $0x208] sm:$0xff]  ;;  %v3641_v49 = vld [vmem:[#allocation11 + $0x218] sm:$0xff]  ;;  %v3638_v6 = vld [vmem:[#allocation11 + $0x200] sm:$0xff] }
 0x371   :  { %8195 = vmatpush1.bf16.msra.mxu1 %v8194_v59  ;;  %v3637_v59 = vld [vmem:[#allocation11 + $0x1f8] sm:$0xff]  ;;  %v3643_v7 = vld [vmem:[#allocation11 + $0x228] sm:$0xff]  ;;  %v3640_v63 = vld [vmem:[#allocation11 + $0x210] sm:$0xff] }
 0x372   :  { %8197 = vmatprep.subr.bf16.mxu1 %v8196_v54  ;;  %8071 = vmatpush1.bf16.msra.mxu0 %v8070_v42  ;;  %v3630_v54 = vld [vmem:[#allocation11 + $0x1c0] sm:$0xff]  ;;  %v8216_v36 = vpack.c.bf16 %v3637_v59, %v3633_v45  ;;  %v3636_v42 = vld [vmem:[#allocation11 + $0x1f0] sm:$0xff]  ;;  %v8092_v40 = vpack.c.bf16 %v3643_v7, %v3639_v2  ;;  %v3651_v18 = vld [vmem:[#allocation11 + $0x268] sm:$0xff] }
 0x373   :  { %8073 = vmatprep.subr.bf16.mxu0 %v8072_v19  ;;  %v8090_v19 = vpack.c.bf16 %v3634_v58, %v3630_v54  ;;  %v8218_v32 = vpack.c.bf16 %v3636_v42, %v3632_v52  ;;  %v3644_v5 = vld [vmem:[#allocation11 + $0x230] sm:$0xff]  ;;  %v3649_v24 = vld [vmem:[#allocation11 + $0x258] sm:$0xff]  ;;  %v3654_v60 = vld [vmem:[#allocation11 + $0x280] sm:$0xff] }
 0x374   :  { %v3657_v12 = vld [vmem:[#allocation11 + $0x298] sm:$0xff]  ;;  %v3658_v21 = vld [vmem:[#allocation11 + $0x2a0] sm:$0xff]  ;;  %v3656_v10 = vld [vmem:[#allocation11 + $0x290] sm:$0xff] }
 0x375   :  { %8199 = vmatpush1.bf16.msra.mxu1 %v8198_v39  ;;  %v3645_v39 = vld [vmem:[#allocation11 + $0x238] sm:$0xff]  ;;  %v3660_v53 = vld [vmem:[#allocation11 + $0x2b0] sm:$0xff]  ;;  %v3663_v4 = vld [vmem:[#allocation11 + $0x2c8] sm:$0xff] }
 0x376   :  { %8201 = vmatprep.subr.bf16.mxu1 %v8200_v1  ;;  %8075 = vmatpush1.bf16.msra.mxu0 %v8074_v17  ;;  %v3642_v1 = vld [vmem:[#allocation11 + $0x220] sm:$0xff]  ;;  %v8220_v55 = vpack.c.bf16 %v3645_v39, %v3641_v49  ;;  %v3647_v17 = vld [vmem:[#allocation11 + $0x248] sm:$0xff]  ;;  %v3661_v38 = vld [vmem:[#allocation11 + $0x2b8] sm:$0xff] }
 0x377   :  { %8077 = vmatprep.subr.bf16.mxu0 %v8076_v16  ;;  %v8222_v16 = vpack.c.bf16 %v3644_v5, %v3640_v63  ;;  %v3667_v34 = vld [vmem:[#allocation11 + $0x2e8] sm:$0xff]  ;;  %v3665_v47 = vld [vmem:[#allocation11 + $0x2d8] sm:$0xff]  ;;  %v3662_v43 = vld [vmem:[#allocation11 + $0x2c0] sm:$0xff] }
 0x378   :  { %v3669_v3 = vld [vmem:[#allocation11 + $0x2f8] sm:$0xff]  ;;  %v3666_v29 = vld [vmem:[#allocation11 + $0x2e0] sm:$0xff]  ;;  %v3664_v37 = vld [vmem:[#allocation11 + $0x2d0] sm:$0xff] }
 0x379   :  { %8203 = vmatpush1.bf16.msra.mxu1 %v8202_v28  ;;  %v8094_v28 = vpack.c.bf16 %v3642_v1, %v3638_v6  ;;  %v3668_v48 = vld [vmem:[#allocation11 + $0x2f0] sm:$0xff]  ;;  %v3671_v9 = vld [vmem:[#allocation11 + $0x308] sm:$0xff]  ;;  %v3673_v45 = vld [vmem:[#allocation11 + $0x318] sm:$0xff] }
 0x37a   :  { %v3675_v13 = vld [vmem:[#allocation11 + $0x328] sm:$0xff]  ;;  %v3677_v59 = vld [vmem:[#allocation11 + $0x338] sm:$0xff]  ;;  %v3670_v54 = vld [vmem:[#allocation11 + $0x300] sm:$0xff] }
 0x37b   :  { %v3674_v58 = vld [vmem:[#allocation11 + $0x320] sm:$0xff]  ;;  %v3672_v52 = vld [vmem:[#allocation11 + $0x310] sm:$0xff]  ;;  %v3679_v2 = vld [vmem:[#allocation11 + $0x348] sm:$0xff] }
 0x37c   :  { %v3676_v42 = vld [vmem:[#allocation11 + $0x330] sm:$0xff]  ;;  %v3683_v7 = vld [vmem:[#allocation11 + $0x368] sm:$0xff]  ;;  %v3681_v49 = vld [vmem:[#allocation11 + $0x358] sm:$0xff] }
 0x37d   :  { %v3685_v39 = vld [vmem:[#allocation11 + $0x378] sm:$0xff]  ;;  %v3678_v6 = vld [vmem:[#allocation11 + $0x340] sm:$0xff]  ;;  %v3680_v63 = vld [vmem:[#allocation11 + $0x350] sm:$0xff] }
 0x37e   :  { %v3682_v1 = vld [vmem:[#allocation11 + $0x360] sm:$0xff]  ;;  %v3684_v5 = vld [vmem:[#allocation11 + $0x370] sm:$0xff] }
 0x43c   :  { %v13102_v41 = vpop.f32.mrb[0].mxu0 }
 0x43d   :  { %v4089_v23 = vsel %vm4088_vm8, %v13102_v41, 0.0  ;;  %v13106_v62 = vpop.f32.mrb[1].mxu0 }
 0x43e   :  { %v4090_v35 = vsel %vm4088_vm8, %v13106_v62, 0.0 }
 0x43f   :  { %v13108_v44 = vpop.f32.mrb[0].mxu1  ;;  %v4091_v56 = vadd.f32 %v4090_v35, %v4089_v23  ;;  %v3610_v23 = vld [vmem:[#allocation11 + $0x120] sm:$0xff]  ;;  %v8204_v35 = vpack.c.bf16 %v3613_v51, %v3609_v33  ;;  %v3653_v33 = vld [vmem:[#allocation11 + $0x278] sm:$0xff]  ;;  %v8096_v51 = vpack.c.bf16 %v3651_v18, %v3647_v17  ;;  %v3687_v17 = vld [vmem:[#allocation11 + $0x388] sm:$0xff] }
 0x440   :  { %v4105_v20 = vsel %vm4088_vm8, %v13108_v44, 0.0  ;;  %v13114_v26 = vpop.f32.mrb[1].mxu1  ;;  %v8078_v22 = vpack.c.bf16 %v3610_v23, %v3606_v11  ;;  %v3646_v11 = vld [vmem:[#allocation11 + $0x240] sm:$0xff]  ;;  %v3691_v18 = vld [vmem:[#allocation11 + $0x3a8] sm:$0xff] }
 0x441   :  { %v4106_v8 = vsel %vm4088_vm8, %v13114_v26, 0.0  ;;  %4092 = vadd.xlane.f32.xlu0 %v4091_v56  ;;  %v3612_v56 = vld [vmem:[#allocation11 + $0x130] sm:$0xff]  ;;  %8205 = vmatprep.subr.bf16.mxu1 %v8204_v35  ;;  %v3650_v23 = vld [vmem:[#allocation11 + $0x260] sm:$0xff] }
 0x442   :  { %v4107_v30 = vadd.f32 %v4106_v8, %v4105_v20  ;;  %v3608_v20 = vld [vmem:[#allocation11 + $0x110] sm:$0xff]  ;;  %v3615_v8 = vld [vmem:[#allocation11 + $0x148] sm:$0xff]  ;;  %8079 = vmatpush1.bf16.msra.mxu0 %v8078_v22  ;;  %v8098_v22 = vpack.c.bf16 %v3650_v23, %v3646_v11  ;;  %v3686_v11 = vld [vmem:[#allocation11 + $0x380] sm:$0xff] }
 0x443   :  { %v8206_v25 = vpack.c.bf16 %v3612_v56, %v3608_v20  ;;  %v3648_v35 = vld [vmem:[#allocation11 + $0x250] sm:$0xff]  ;;  %v8224_v20 = vpack.c.bf16 %v3653_v33, %v3649_v24  ;;  %v3689_v24 = vld [vmem:[#allocation11 + $0x398] sm:$0xff]  ;;  %v3690_v23 = vld [vmem:[#allocation11 + $0x3a0] sm:$0xff] }
 0x444   :  { %4108 = vadd.xlane.f32.xlu1 %v4107_v30  ;;  %v3619_v30 = vld [vmem:[#allocation11 + $0x168] sm:$0xff]  ;;  %v3652_v56 = vld [vmem:[#allocation11 + $0x270] sm:$0xff]  ;;  %v3693_v33 = vld [vmem:[#allocation11 + $0x3b8] sm:$0xff] }
 0x445   :  { %v8080_v31 = vpack.c.bf16 %v3619_v30, %v3615_v8  ;;  %8207 = vmatpush1.bf16.msra.mxu1 %v8206_v25  ;;  %v3655_v8 = vld [vmem:[#allocation11 + $0x288] sm:$0xff]  ;;  %v8226_v25 = vpack.c.bf16 %v3652_v56, %v3648_v35  ;;  %v8244_v35 = vpack.c.bf16 %v3693_v33, %v3689_v24  ;;  %v3692_v56 = vld [vmem:[#allocation11 + $0x3b0] sm:$0xff] }
 0x446   :  { %8209 = vmatprep.subr.bf16.mxu1 %v8208_v27  ;;  %v3659_v30 = vld [vmem:[#allocation11 + $0x2a8] sm:$0xff]  ;;  %v8228_v27 = vpack.c.bf16 %v3661_v38, %v3657_v12  ;;  %v3712_v24 = vld [vmem:[#allocation11 + $0x450] sm:$0xff] }
 0x447   :  { %8081 = vmatprep.subr.bf16.mxu0 %v8080_v31  ;;  %v8100_v31 = vpack.c.bf16 %v3659_v30, %v3655_v8  ;;  %v8118_v8 = vpack.c.bf16 %v3690_v23, %v3686_v11  ;;  %v3695_v12 = vld [vmem:[#allocation11 + $0x3c8] sm:$0xff]  ;;  %v3716_v33 = vld [vmem:[#allocation11 + $0x470] sm:$0xff]  ;;  %v3721_v23 = vld [vmem:[#allocation11 + $0x498] sm:$0xff] }
 0x448   :  { %8083 = vmatpush1.bf16.msra.mxu0 %v8082_v46  ;;  %v8102_v46 = vpack.c.bf16 %v3658_v21, %v3654_v60  ;;  %v3699_v38 = vld [vmem:[#allocation11 + $0x3e8] sm:$0xff]  ;;  %v3694_v60 = vld [vmem:[#allocation11 + $0x3c0] sm:$0xff] }
 0x449   :  { %8211 = vmatpush1.bf16.msra.mxu1 %v8210_v61  ;;  %8085 = vmatprep.subr.bf16.mxu0 %v8084_v14  ;;  %v8230_v61 = vpack.c.bf16 %v3660_v53, %v3656_v10  ;;  %v8104_v14 = vpack.c.bf16 %v3667_v34, %v3663_v4  ;;  %v3698_v21 = vld [vmem:[#allocation11 + $0x3e0] sm:$0xff]  ;;  %v3696_v53 = vld [vmem:[#allocation11 + $0x3d0] sm:$0xff]  ;;  %v3703_v34 = vld [vmem:[#allocation11 + $0x408] sm:$0xff] }
 0x44a   :  { %8213 = vmatprep.subr.bf16.mxu1 %v8212_v50  ;;  %v8232_v50 = vpack.c.bf16 %v3669_v3, %v3665_v47  ;;  %v3700_v4 = vld [vmem:[#allocation11 + $0x3f0] sm:$0xff]  ;;  %v3707_v3 = vld [vmem:[#allocation11 + $0x428] sm:$0xff] }
 0x44b   :  { %v8250_v47 = vpack.c.bf16 %v3700_v4, %v3696_v53  ;;  %v3723_v11 = vld [vmem:[#allocation11 + $0x4a8] sm:$0xff] }
 0x44c   :  { %8087 = vmatpush1.bf16.msra.mxu0 %v8086_v57  ;;  %v8106_v57 = vpack.c.bf16 %v3666_v29, %v3662_v43 }
 0x44d   :  { %8215 = vmatpush1.bf16.msra.mxu1 %v8214_v15  ;;  %8089 = vmatprep.subr.bf16.mxu0 %v8088_v0  ;;  %v8234_v15 = vpack.c.bf16 %v3668_v48, %v3664_v37  ;;  %v8108_v0 = vpack.c.bf16 %v3675_v13, %v3671_v9 }
 0x44e   :  { %8217 = vmatprep.subr.bf16.mxu1 %v8216_v36  ;;  %v8236_v36 = vpack.c.bf16 %v3677_v59, %v3673_v45 }
 0x450   :  { %8091 = vmatpush1.bf16.msra.mxu0 %v8090_v19  ;;  %v8110_v19 = vpack.c.bf16 %v3674_v58, %v3670_v54 }
 0x451   :  { %8219 = vmatpush1.bf16.msra.mxu1 %v8218_v32  ;;  %8093 = vmatprep.subr.bf16.mxu0 %v8092_v40  ;;  %v8238_v32 = vpack.c.bf16 %v3676_v42, %v3672_v52  ;;  %v8112_v40 = vpack.c.bf16 %v3683_v7, %v3679_v2  ;;  %v3706_v42 = vld [vmem:[#allocation11 + $0x420] sm:$0xff]  ;;  %v3704_v2 = vld [vmem:[#allocation11 + $0x410] sm:$0xff] }
 0x452   :  { %8221 = vmatprep.subr.bf16.mxu1 %v8220_v55  ;;  %v8240_v55 = vpack.c.bf16 %v3685_v39, %v3681_v49  ;;  %v3708_v7 = vld [vmem:[#allocation11 + $0x430] sm:$0xff]  ;;  %v3711_v49 = vld [vmem:[#allocation11 + $0x448] sm:$0xff] }
 0x454   :  { %8095 = vmatpush1.bf16.msra.mxu0 %v8094_v28  ;;  %v8114_v28 = vpack.c.bf16 %v3682_v1, %v3678_v6 }
 0x455   :  { %8223 = vmatpush1.bf16.msra.mxu1 %v8222_v16  ;;  %8097 = vmatprep.subr.bf16.mxu0 %v8096_v51  ;;  %v8242_v16 = vpack.c.bf16 %v3684_v5, %v3680_v63  ;;  %v8116_v51 = vpack.c.bf16 %v3691_v18, %v3687_v17  ;;  %v3710_v5 = vld [vmem:[#allocation11 + $0x440] sm:$0xff] }
 0x456   :  { %8225 = vmatprep.subr.bf16.mxu1 %v8224_v20  ;;  %v3688_v20 = vld [vmem:[#allocation11 + $0x390] sm:$0xff]  ;;  %v3714_v17 = vld [vmem:[#allocation11 + $0x460] sm:$0xff] }
 0x457   :  { %v8246_v30 = vpack.c.bf16 %v3692_v56, %v3688_v20  ;;  %v8130_v56 = vpack.c.bf16 %v3714_v17, %v3710_v5 }
 0x458   :  { %8099 = vmatpush1.bf16.msra.mxu0 %v8098_v22  ;;  %v3697_v22 = vld [vmem:[#allocation11 + $0x3d8] sm:$0xff] }
 0x459   :  { %8227 = vmatpush1.bf16.msra.mxu1 %v8226_v25  ;;  %8101 = vmatprep.subr.bf16.mxu0 %v8100_v31  ;;  %v8120_v25 = vpack.c.bf16 %v3699_v38, %v3695_v12  ;;  %v3701_v31 = vld [vmem:[#allocation11 + $0x3f8] sm:$0xff]  ;;  %v3722_v12 = vld [vmem:[#allocation11 + $0x4a0] sm:$0xff] }
 0x45a   :  { %8229 = vmatprep.subr.bf16.mxu1 %v8228_v27  ;;  %v8248_v10 = vpack.c.bf16 %v3701_v31, %v3697_v22  ;;  %v8122_v27 = vpack.c.bf16 %v3698_v21, %v3694_v60  ;;  %v3724_v31 = vld [vmem:[#allocation11 + $0x4b0] sm:$0xff]  ;;  %v3727_v60 = vld [vmem:[#allocation11 + $0x4c8] sm:$0xff] }
 0x45b   :  { %v3731_v21 = vld [vmem:[#allocation11 + $0x4e8] sm:$0xff] }
 0x45c   :  { %8103 = vmatpush1.bf16.msra.mxu0 %v8102_v46  ;;  %v3705_v46 = vld [vmem:[#allocation11 + $0x418] sm:$0xff] }
 0x45d   :  { %8231 = vmatpush1.bf16.msra.mxu1 %v8230_v61  ;;  %8105 = vmatprep.subr.bf16.mxu0 %v8104_v14  ;;  %v3709_v61 = vld [vmem:[#allocation11 + $0x438] sm:$0xff]  ;;  %v8124_v14 = vpack.c.bf16 %v3707_v3, %v3703_v34  ;;  %v3726_v34 = vld [vmem:[#allocation11 + $0x4c0] sm:$0xff]  ;;  %v8136_v3 = vpack.c.bf16 %v3731_v21, %v3727_v60  ;;  %v3764_v60 = vld [vmem:[#allocation11 + $0x5f0] sm:$0xff] }
 0x45e   :  { %8233 = vmatprep.subr.bf16.mxu1 %v8232_v50  ;;  %v8252_v43 = vpack.c.bf16 %v3709_v61, %v3705_v46  ;;  %v3728_v61 = vld [vmem:[#allocation11 + $0x4d0] sm:$0xff]  ;;  %v3767_v21 = vld [vmem:[#allocation11 + $0x608] sm:$0xff] }
 0x460   :  { %8107 = vmatpush1.bf16.msra.mxu0 %v8106_v57 }
 0x461   :  { %8235 = vmatpush1.bf16.msra.mxu1 %v8234_v15  ;;  %8109 = vmatprep.subr.bf16.mxu0 %v8108_v0 }
 0x462   :  { %8237 = vmatprep.subr.bf16.mxu1 %v8236_v36  ;;  %v3702_v36 = vld [vmem:[#allocation11 + $0x400] sm:$0xff] }
 0x463   :  { %v8126_v63 = vpack.c.bf16 %v3706_v42, %v3702_v36  ;;  %v3749_v36 = vld [vmem:[#allocation11 + $0x578] sm:$0xff] }
 0x464   :  { %8111 = vmatpush1.bf16.msra.mxu0 %v8110_v19  ;;  %v3715_v19 = vld [vmem:[#allocation11 + $0x468] sm:$0xff] }
 0x465   :  { %8239 = vmatpush1.bf16.msra.mxu1 %v8238_v32  ;;  %8113 = vmatprep.subr.bf16.mxu0 %v8112_v40  ;;  %v3713_v32 = vld [vmem:[#allocation11 + $0x458] sm:$0xff] }
 0x466   :  { %8241 = vmatprep.subr.bf16.mxu1 %v8240_v55  ;;  %v3717_v40 = vld [vmem:[#allocation11 + $0x478] sm:$0xff]  ;;  %v8254_v55 = vpack.c.bf16 %v3708_v7, %v3704_v2  ;;  %v3742_v7 = vld [vmem:[#allocation11 + $0x540] sm:$0xff] }
 0x468   :  { %8115 = vmatpush1.bf16.msra.mxu0 %v8114_v28  ;;  %v3719_v28 = vld [vmem:[#allocation11 + $0x488] sm:$0xff] }
 0x469   :  { %8243 = vmatpush1.bf16.msra.mxu1 %v8242_v16  ;;  %8117 = vmatprep.subr.bf16.mxu0 %v8116_v51  ;;  %v8128_v16 = vpack.c.bf16 %v3715_v19, %v3711_v49  ;;  %v8256_v51 = vpack.c.bf16 %v3717_v40, %v3713_v32  ;;  %v8132_v38 = vpack.c.bf16 %v3723_v11, %v3719_v28  ;;  %v3746_v49 = vld [vmem:[#allocation11 + $0x560] sm:$0xff]  ;;  %v3744_v32 = vld [vmem:[#allocation11 + $0x550] sm:$0xff] }
 0x46a   :  { %8245 = vmatprep.subr.bf16.mxu1 %v8244_v35  ;;  %v3725_v35 = vld [vmem:[#allocation11 + $0x4b8] sm:$0xff]  ;;  %v3748_v40 = vld [vmem:[#allocation11 + $0x570] sm:$0xff]  ;;  %v8146_v5 = vpack.c.bf16 %v3746_v49, %v3742_v7  ;;  %v3782_v49 = vld [vmem:[#allocation11 + $0x680] sm:$0xff] }
 0x46b   :  { %v8260_v22 = vpack.c.bf16 %v3725_v35, %v3721_v23  ;;  %v8274_v17 = vpack.c.bf16 %v3748_v40, %v3744_v32  ;;  %v3756_v11 = vld [vmem:[#allocation11 + $0x5b0] sm:$0xff]  ;;  %v3759_v23 = vld [vmem:[#allocation11 + $0x5c8] sm:$0xff] }
 0x46c   :  { %8119 = vmatpush1.bf16.msra.mxu0 %v8118_v8  ;;  %v8258_v8 = vpack.c.bf16 %v3716_v33, %v3712_v24  ;;  %v3750_v24 = vld [vmem:[#allocation11 + $0x580] sm:$0xff]  ;;  %v3763_v35 = vld [vmem:[#allocation11 + $0x5e8] sm:$0xff]  ;;  %v3784_v40 = vld [vmem:[#allocation11 + $0x690] sm:$0xff] }
 0x46d   :  { %8247 = vmatpush1.bf16.msra.mxu1 %v8246_v30  ;;  %8121 = vmatprep.subr.bf16.mxu0 %v8120_v25  ;;  %v3718_v30 = vld [vmem:[#allocation11 + $0x480] sm:$0xff]  ;;  %v3720_v25 = vld [vmem:[#allocation11 + $0x490] sm:$0xff] }
 0x46e   :  { %8249 = vmatprep.subr.bf16.mxu1 %v8248_v10  ;;  %v3729_v10 = vld [vmem:[#allocation11 + $0x4d8] sm:$0xff]  ;;  %v8134_v53 = vpack.c.bf16 %v3722_v12, %v3718_v30  ;;  %v8262_v4 = vpack.c.bf16 %v3724_v31, %v3720_v25  ;;  %v3754_v33 = vld [vmem:[#allocation11 + $0x5a0] sm:$0xff]  ;;  %v3760_v31 = vld [vmem:[#allocation11 + $0x5d0] sm:$0xff] }
 0x46f   :  { %v3758_v12 = vld [vmem:[#allocation11 + $0x5c0] sm:$0xff] }
 0x470   :  { %8123 = vmatpush1.bf16.msra.mxu0 %v8122_v27  ;;  %v3733_v27 = vld [vmem:[#allocation11 + $0x4f8] sm:$0xff] }
 0x471   :  { %8251 = vmatpush1.bf16.msra.mxu1 %v8250_v47  ;;  %8125 = vmatprep.subr.bf16.mxu0 %v8124_v14  ;;  %v3730_v47 = vld [vmem:[#allocation11 + $0x4e0] sm:$0xff]  ;;  %v8264_v46 = vpack.c.bf16 %v3733_v27, %v3729_v10  ;;  %v3732_v14 = vld [vmem:[#allocation11 + $0x4f0] sm:$0xff]  ;;  %v3771_v10 = vld [vmem:[#allocation11 + $0x628] sm:$0xff] }
 0x472   :  { %8253 = vmatprep.subr.bf16.mxu1 %v8252_v43  ;;  %v3735_v43 = vld [vmem:[#allocation11 + $0x508] sm:$0xff]  ;;  %v3769_v27 = vld [vmem:[#allocation11 + $0x618] sm:$0xff] }
 0x4ce   :  { %v4093_v29 = vpop.xlane.xlu0 %4092 }
 0x4cf   :  { %v4094_v37 = vrot.slane %v4093_v29, 4 }
 0x4d1   :  { %v4109_v50 = vpop.xlane.xlu1 %4108  ;;  %v4095_v9 = vadd.f32 %v4094_v37, %v4093_v29  ;;  %v3739_v29 = vld [vmem:[#allocation11 + $0x528] sm:$0xff]  ;;  %v3737_v37 = vld [vmem:[#allocation11 + $0x518] sm:$0xff] }
 0x4d2   :  { %v4110_v48 = vrot.slane %v4109_v50, 4 }
 0x4d3   :  { %v4096_v45 = vrot.slane %v4095_v9, 2 }
 0x4d4   :  { %v4111_v13 = vadd.f32 %v4110_v48, %v4109_v50  ;;  %v3741_v50 = vld [vmem:[#allocation11 + $0x538] sm:$0xff]  ;;  %v8138_v48 = vpack.c.bf16 %v3730_v47, %v3726_v34  ;;  %v8282_v34 = vpack.c.bf16 %v3764_v60, %v3760_v31  ;;  %v3766_v47 = vld [vmem:[#allocation11 + $0x600] sm:$0xff]  ;;  %v3800_v60 = vld [vmem:[#allocation11 + $0x710] sm:$0xff] }
 0x4d5   :  { %v4097_v57 = vadd.f32 %v4096_v45, %v4095_v9  ;;  %v8266_v9 = vpack.c.bf16 %v3732_v14, %v3728_v61  ;;  %v3738_v45 = vld [vmem:[#allocation11 + $0x520] sm:$0xff]  ;;  %v3768_v14 = vld [vmem:[#allocation11 + $0x610] sm:$0xff] }
 0x4d6   :  { %v4112_v59 = vrot.slane %v4111_v13, 2 }
 0x4d7   :  { %v4098_v15 = vrot.slane %v4097_v57, 1 }
 0x4d8   :  { %v4113_v0 = vadd.f32 %v4112_v59, %v4111_v13  ;;  %v3734_v13 = vld [vmem:[#allocation11 + $0x500] sm:$0xff]  ;;  %v8140_v59 = vpack.c.bf16 %v3739_v29, %v3735_v43  ;;  %v3772_v43 = vld [vmem:[#allocation11 + $0x630] sm:$0xff]  ;;  %v3775_v29 = vld [vmem:[#allocation11 + $0x648] sm:$0xff] }
 0x4d9   :  { %v4099_v54 = vadd.f32 %v4098_v15, %v4097_v57  ;;  %v8268_v57 = vpack.c.bf16 %v3741_v50, %v3737_v37  ;;  %v3736_v15 = vld [vmem:[#allocation11 + $0x510] sm:$0xff]  ;;  %v8142_v42 = vpack.c.bf16 %v3738_v45, %v3734_v13  ;;  %v3779_v37 = vld [vmem:[#allocation11 + $0x668] sm:$0xff]  ;;  %v3777_v50 = vld [vmem:[#allocation11 + $0x658] sm:$0xff]  ;;  %v8286_v13 = vpack.c.bf16 %v3772_v43, %v3768_v14 }
 0x4da   :  { %v4114_v58 = vrot.slane %v4113_v0, 1  ;;  %v3774_v45 = vld [vmem:[#allocation11 + $0x640] sm:$0xff]  ;;  %v3808_v43 = vld [vmem:[#allocation11 + $0x750] sm:$0xff] }
 0x4db   :  { %9044 = vpush %v4099_v54  ;;  %v3743_v54 = vld [vmem:[#allocation11 + $0x548] sm:$0xff] }
 0x4dc   :  { %v4115_v52 = vadd.f32 %v4114_v58, %v4113_v0  ;;  %v3740_v0 = vld [vmem:[#allocation11 + $0x530] sm:$0xff]  ;;  %v3747_v58 = vld [vmem:[#allocation11 + $0x568] sm:$0xff] }
 0x4dd   :  { %v8270_v2 = vpack.c.bf16 %v3740_v0, %v3736_v15  ;;  %v3776_v0 = vld [vmem:[#allocation11 + $0x650] sm:$0xff] }
 0x4de   :  { %9046 = vpush %v4115_v52  ;;  %v3745_v52 = vld [vmem:[#allocation11 + $0x558] sm:$0xff] }
 0x4df   :  { %v8272_v19 = vpack.c.bf16 %v3749_v36, %v3745_v52  ;;  %v3787_v52 = vld [vmem:[#allocation11 + $0x6a8] sm:$0xff]  ;;  %v3785_v36 = vld [vmem:[#allocation11 + $0x698] sm:$0xff] }
 0x50c   :  { %s9045_s17 = spop %9044 }
 0x50d   :  { %s4101_s15 = smul.f32 0.001953125, %s9045_s17 }
 0x50f   :  { %s9047_s16 = spop %9046  ;;  %v4102_v39 = vstv %s4101_s15 }
 0x510   :  { %s4117_s19 = smul.f32 0.001953125, %s9047_s16  ;;  %v4103_v6 = vsub.f32 %v13102_v41, %v4102_v39  ;;  %v4104_v1 = vsub.f32 %v13106_v62, %v4102_v39  ;;  %v8144_v39 = vpack.c.bf16 %v3747_v58, %v3743_v54  ;;  %v3780_v54 = vld [vmem:[#allocation11 + $0x670] sm:$0xff]  ;;  %v3783_v58 = vld [vmem:[#allocation11 + $0x688] sm:$0xff] }
 0x511   :  { %v8290_v7 = vpack.c.bf16 %v3780_v54, %v3776_v0  ;;  %v3816_v54 = vld [vmem:[#allocation11 + $0x790] sm:$0xff] }
 0x512   :  { %v13120_v18 = vstv %s4117_s19  ;;  %4206 = vmatprep.mubr.f32.mxu0 %v4104_v1  ;;  %4348 = vmatprep.mubr.f32.mxu1 %v4104_v1  ;;  %v3755_v1 = vld [vmem:[#allocation11 + $0x5a8] sm:$0xff] }
 0x513   :  { %v4120_v20 = vsub.f32 %v13114_v26, %v13120_v18  ;;  %4207 = vmatmul.mubr.f32.vlgmr.msra.gmra.mrb[2].mxu0 %v4103_v6  ;;  %4349 = vmatmul.mubr.f32.vlgmr.msra.gmra.mrb[2].mxu1 %v4103_v6  ;;  %v3751_v6 = vld [vmem:[#allocation11 + $0x588] sm:$0xff] }
 0x514   :  { %8127 = vmatpush1.bf16.msra.mxu0 %v8126_v63  ;;  %8255 = vmatpush1.bf16.msra.mxu1 %v8254_v55  ;;  %v3753_v63 = vld [vmem:[#allocation11 + $0x598] sm:$0xff]  ;;  %v8148_v28 = vpack.c.bf16 %v3755_v1, %v3751_v6  ;;  %v3788_v6 = vld [vmem:[#allocation11 + $0x6b0] sm:$0xff]  ;;  %v3791_v1 = vld [vmem:[#allocation11 + $0x6c8] sm:$0xff] }
 0x515   :  { %4277 = vmatprep.mubr.f32.mxu0 %v4120_v20  ;;  %4419 = vmatprep.mubr.f32.mxu1 %v4120_v20  ;;  %v3757_v55 = vld [vmem:[#allocation11 + $0x5b8] sm:$0xff] }
 0x516   :  { %8129 = vmatprep.subr.bf16.mxu0 %v8128_v16  ;;  %8257 = vmatprep.subr.bf16.mxu1 %v8256_v51  ;;  %v8276_v16 = vpack.c.bf16 %v3757_v55, %v3753_v63  ;;  %v3752_v51 = vld [vmem:[#allocation11 + $0x590] sm:$0xff]  ;;  %v3761_v20 = vld [vmem:[#allocation11 + $0x5d8] sm:$0xff]  ;;  %v3795_v63 = vld [vmem:[#allocation11 + $0x6e8] sm:$0xff] }
 0x517   :  { %v8278_v30 = vpack.c.bf16 %v3756_v11, %v3752_v51  ;;  %v3793_v55 = vld [vmem:[#allocation11 + $0x6d8] sm:$0xff]  ;;  %v3792_v11 = vld [vmem:[#allocation11 + $0x6d0] sm:$0xff] }
 0x518   :  { %8131 = vmatpush1.bf16.msra.mxu0 %v8130_v56  ;;  %8259 = vmatpush1.bf16.msra.mxu1 %v8258_v8  ;;  %v3765_v56 = vld [vmem:[#allocation11 + $0x5f8] sm:$0xff]  ;;  %v8150_v8 = vpack.c.bf16 %v3754_v33, %v3750_v24  ;;  %v8294_v24 = vpack.c.bf16 %v3788_v6, %v3784_v40  ;;  %v3790_v33 = vld [vmem:[#allocation11 + $0x6c0] sm:$0xff]  ;;  %v3824_v6 = vld [vmem:[#allocation11 + $0x7d0] sm:$0xff] }
 0x519   :  { %8133 = vmatprep.subr.bf16.mxu0 %v8132_v38  ;;  %8261 = vmatprep.subr.bf16.mxu1 %v8260_v22  ;;  %v3762_v38 = vld [vmem:[#allocation11 + $0x5e0] sm:$0xff]  ;;  %v8152_v22 = vpack.c.bf16 %v3763_v35, %v3759_v23  ;;  %v8280_v25 = vpack.c.bf16 %v3765_v56, %v3761_v20  ;;  %v3796_v23 = vld [vmem:[#allocation11 + $0x6f0] sm:$0xff]  ;;  %v3799_v35 = vld [vmem:[#allocation11 + $0x708] sm:$0xff] }
 0x51a   :  { %v3803_v20 = vld [vmem:[#allocation11 + $0x728] sm:$0xff]  ;;  %v3801_v56 = vld [vmem:[#allocation11 + $0x718] sm:$0xff]  ;;  %v3826_v40 = vld [vmem:[#allocation11 + $0x7e0] sm:$0xff] }
 0x51c   :  { %8135 = vmatpush1.bf16.msra.mxu0 %v8134_v53  ;;  %8263 = vmatpush1.bf16.msra.mxu1 %v8262_v4  ;;  %v3773_v53 = vld [vmem:[#allocation11 + $0x638] sm:$0xff]  ;;  %v8154_v4 = vpack.c.bf16 %v3762_v38, %v3758_v12  ;;  %v8298_v12 = vpack.c.bf16 %v3796_v23, %v3792_v11  ;;  %v3798_v38 = vld [vmem:[#allocation11 + $0x700] sm:$0xff] }
 0x51d   :  { %8137 = vmatprep.subr.bf16.mxu0 %v8136_v3  ;;  %8265 = vmatprep.subr.bf16.mxu1 %v8264_v46  ;;  %v3770_v3 = vld [vmem:[#allocation11 + $0x620] sm:$0xff]  ;;  %v8156_v46 = vpack.c.bf16 %v3771_v10, %v3767_v21  ;;  %v8284_v61 = vpack.c.bf16 %v3773_v53, %v3769_v27  ;;  %v3804_v21 = vld [vmem:[#allocation11 + $0x730] sm:$0xff]  ;;  %v3807_v10 = vld [vmem:[#allocation11 + $0x748] sm:$0xff] }
 0x51e   :  { %v3811_v27 = vld [vmem:[#allocation11 + $0x768] sm:$0xff]  ;;  %v3809_v53 = vld [vmem:[#allocation11 + $0x758] sm:$0xff] }
 0x51f   :  { %v14831_v23 = vld [vmem:[#allocation74_spill] sm:$0xff] }
 0x520   :  { %8139 = vmatpush1.bf16.msra.mxu0 %v8138_v48  ;;  %8267 = vmatpush1.bf16.msra.mxu1 %v8266_v9  ;;  %v3781_v48 = vld [vmem:[#allocation11 + $0x678] sm:$0xff]  ;;  %v8158_v9 = vpack.c.bf16 %v3770_v3, %v3766_v47  ;;  %v8302_v47 = vpack.c.bf16 %v3804_v21, %v3800_v60  ;;  %v3806_v3 = vld [vmem:[#allocation11 + $0x740] sm:$0xff] }
 0x521   :  { %8141 = vmatprep.subr.bf16.mxu0 %v8140_v59  ;;  %8269 = vmatprep.subr.bf16.mxu1 %v8268_v57  ;;  %v3778_v59 = vld [vmem:[#allocation11 + $0x660] sm:$0xff]  ;;  %v8160_v57 = vpack.c.bf16 %v3779_v37, %v3775_v29  ;;  %v8288_v15 = vpack.c.bf16 %v3781_v48, %v3777_v50  ;;  %v3812_v29 = vld [vmem:[#allocation11 + $0x770] sm:$0xff]  ;;  %v3815_v37 = vld [vmem:[#allocation11 + $0x788] sm:$0xff] }
 0x522   :  { %v3819_v50 = vld [vmem:[#allocation11 + $0x7a8] sm:$0xff]  ;;  %v3817_v48 = vld [vmem:[#allocation11 + $0x798] sm:$0xff] }
 0x524   :  { %8143 = vmatpush1.bf16.msra.mxu0 %v8142_v42  ;;  %8271 = vmatpush1.bf16.msra.mxu1 %v8270_v2  ;;  %v3789_v42 = vld [vmem:[#allocation11 + $0x6b8] sm:$0xff]  ;;  %v8162_v2 = vpack.c.bf16 %v3778_v59, %v3774_v45  ;;  %v8306_v45 = vpack.c.bf16 %v3812_v29, %v3808_v43  ;;  %v3814_v59 = vld [vmem:[#allocation11 + $0x780] sm:$0xff] }
 0x525   :  { %8145 = vmatprep.subr.bf16.mxu0 %v8144_v39  ;;  %8273 = vmatprep.subr.bf16.mxu1 %v8272_v19  ;;  %v3786_v39 = vld [vmem:[#allocation11 + $0x6a0] sm:$0xff]  ;;  %v8164_v19 = vpack.c.bf16 %v3787_v52, %v3783_v58  ;;  %v8292_v32 = vpack.c.bf16 %v3789_v42, %v3785_v36  ;;  %v3820_v58 = vld [vmem:[#allocation11 + $0x7b0] sm:$0xff]  ;;  %v3823_v52 = vld [vmem:[#allocation11 + $0x7c8] sm:$0xff] }
 0x526   :  { %v3827_v36 = vld [vmem:[#allocation11 + $0x7e8] sm:$0xff]  ;;  %v3825_v42 = vld [vmem:[#allocation11 + $0x7d8] sm:$0xff] }
 0x527   :  { %v3838_v43 = vld [vmem:[#allocation12 + $0x38] sm:$0xff] }
 0x528   :  { %8147 = vmatpush1.bf16.msra.mxu0 %v8146_v5  ;;  %8275 = vmatpush1.bf16.msra.mxu1 %v8274_v17  ;;  %v3797_v5 = vld [vmem:[#allocation11 + $0x6f8] sm:$0xff]  ;;  %v8166_v17 = vpack.c.bf16 %v3786_v39, %v3782_v49  ;;  %v8310_v49 = vpack.c.bf16 %v3820_v58, %v3816_v54  ;;  %v3822_v39 = vld [vmem:[#allocation11 + $0x7c0] sm:$0xff] }
 0x529   :  { %8149 = vmatprep.subr.bf16.mxu0 %v8148_v28  ;;  %8277 = vmatprep.subr.bf16.mxu1 %v8276_v16  ;;  %v3794_v28 = vld [vmem:[#allocation11 + $0x6e0] sm:$0xff]  ;;  %v8168_v16 = vpack.c.bf16 %v3795_v63, %v3791_v1  ;;  %v8296_v51 = vpack.c.bf16 %v3797_v5, %v3793_v55  ;;  %v3828_v1 = vld [vmem:[#allocation11 + $0x7f0] sm:$0xff]  ;;  %v8186_v63 = vpack.c.bf16 %v3826_v40, %v3822_v39  ;;  %v3846_v54 = vld [vmem:[#allocation12 + $0x78] sm:$0xff] }
 0x52a   :  { %v8314_v55 = vpack.c.bf16 %v3828_v1, %v3824_v6  ;;  %v4119_v5 = vsub.f32 %v13108_v44, %v13120_v18  ;;  %v3839_v58 = vld [vmem:[#allocation12 + $0x40] sm:$0xff]  ;;  %v3848_v39 = vld [vmem:[#allocation12 + $0x88] sm:$0xff]  ;;  %v3854_v6 = vld [vmem:[#allocation12 + $0xb8] sm:$0xff] }
 0x52b   :  { %v3847_v1 = vld [vmem:[#allocation12 + $0x80] sm:$0xff] }
 0x52c   :  { %8151 = vmatpush1.bf16.msra.mxu0 %v8150_v8  ;;  %8279 = vmatpush1.bf16.msra.mxu1 %v8278_v30  ;;  %v3805_v8 = vld [vmem:[#allocation11 + $0x738] sm:$0xff]  ;;  %v8170_v30 = vpack.c.bf16 %v3794_v28, %v3790_v33  ;;  %v14829_v28 = vld [vmem:[#allocation71_spill] sm:$0xff] }
 0x52d   :  { %8153 = vmatprep.subr.bf16.mxu0 %v8152_v22  ;;  %8281 = vmatprep.subr.bf16.mxu1 %v8280_v25  ;;  %v3802_v22 = vld [vmem:[#allocation11 + $0x720] sm:$0xff]  ;;  %v8172_v25 = vpack.c.bf16 %v3803_v20, %v3799_v35  ;;  %v8300_v31 = vpack.c.bf16 %v3805_v8, %v3801_v56 }
 0x530   :  { %8155 = vmatpush1.bf16.msra.mxu0 %v8154_v4  ;;  %8283 = vmatpush1.bf16.msra.mxu1 %v8282_v34  ;;  %v3813_v4 = vld [vmem:[#allocation11 + $0x778] sm:$0xff]  ;;  %v8174_v34 = vpack.c.bf16 %v3802_v22, %v3798_v38 }
 0x531   :  { %8157 = vmatprep.subr.bf16.mxu0 %v8156_v46  ;;  %8285 = vmatprep.subr.bf16.mxu1 %v8284_v61  ;;  %v3810_v46 = vld [vmem:[#allocation11 + $0x760] sm:$0xff]  ;;  %v8176_v61 = vpack.c.bf16 %v3811_v27, %v3807_v10  ;;  %v8304_v14 = vpack.c.bf16 %v3813_v4, %v3809_v53 }
 0x534   :  { %8159 = vmatpush1.bf16.msra.mxu0 %v8158_v9  ;;  %8287 = vmatpush1.bf16.msra.mxu1 %v8286_v13  ;;  %v3821_v9 = vld [vmem:[#allocation11 + $0x7b8] sm:$0xff]  ;;  %v8178_v13 = vpack.c.bf16 %v3810_v46, %v3806_v3  ;;  %v3832_v3 = vld [vmem:[#allocation12 + $0x8] sm:$0xff] }
 0x535   :  { %8161 = vmatprep.subr.bf16.mxu0 %v8160_v57  ;;  %8289 = vmatprep.subr.bf16.mxu1 %v8288_v15  ;;  %v3818_v57 = vld [vmem:[#allocation11 + $0x7a0] sm:$0xff]  ;;  %v8180_v15 = vpack.c.bf16 %v3819_v50, %v3815_v37  ;;  %v8308_v0 = vpack.c.bf16 %v3821_v9, %v3817_v48  ;;  %v3836_v46 = vld [vmem:[#allocation12 + $0x28] sm:$0xff]  ;;  %v3833_v48 = vld [vmem:[#allocation12 + $0x10] sm:$0xff] }
 0x536   :  { %v3831_v37 = vld [vmem:[#allocation12] sm:$0xff] }
 0x537   :  { %v3835_v50 = vld [vmem:[#allocation12 + $0x20] sm:$0xff] }
 0x538   :  { %8163 = vmatpush1.bf16.msra.mxu0 %v8162_v2  ;;  %8291 = vmatpush1.bf16.msra.mxu1 %v8290_v7  ;;  %v3829_v2 = vld [vmem:[#allocation11 + $0x7f8] sm:$0xff]  ;;  %v8182_v7 = vpack.c.bf16 %v3818_v57, %v3814_v59  ;;  %v8318_v9 = vpack.c.bf16 %v3835_v50, %v3831_v37  ;;  %v3844_v59 = vld [vmem:[#allocation12 + $0x68] sm:$0xff]  ;;  %v3867_v37 = vld [vmem:[#allocation12 + $0x120] sm:$0xff] }
 0x539   :  { %8165 = vmatprep.subr.bf16.mxu0 %v8164_v19  ;;  %8293 = vmatprep.subr.bf16.mxu1 %v8292_v32  ;;  %v8184_v19 = vpack.c.bf16 %v3827_v36, %v3823_v52  ;;  %v8312_v32 = vpack.c.bf16 %v3829_v2, %v3825_v42  ;;  %v3843_v36 = vld [vmem:[#allocation12 + $0x60] sm:$0xff]  ;;  %v3841_v42 = vld [vmem:[#allocation12 + $0x50] sm:$0xff] }
 0x53a   :  { %v3845_v2 = vld [vmem:[#allocation12 + $0x70] sm:$0xff] }
 0x53b   :  { %v3865_v50 = vld [vmem:[#allocation12 + $0x110] sm:$0xff] }
 0x53c   :  { %8167 = vmatpush1.bf16.msra.mxu0 %v8166_v17  ;;  %8295 = vmatpush1.bf16.msra.mxu1 %v8294_v24  ;;  %v3830_v17 = vld [vmem:[%s14827_s0] sm:$0xf]  ;;  %s14836_s0 = sld [smem:[#allocation45_spill]] }
 0x53d   :  { %8169 = vmatprep.subr.bf16.mxu0 %v8168_v16  ;;  %8297 = vmatprep.subr.bf16.mxu1 %v8296_v51  ;;  %v14828_v24 = vld [vmem:[#allocation67_spill] sm:$0xff]  ;;  %v4133_v16 = vrot.slane %v3830_v17, %v14829_v28  ;;  %v14830_v51 = vld [vmem:[#allocation66_spill] sm:$0xff]  ;;  %v4137_v35 = vrot.slane %v3830_v17, %v14831_v23 }
 0x53e   :  { %v4125_v33 = vrot.slane %v3830_v17, %v14828_v24  ;;  %v4129_v11 = vrot.slane %v3830_v17, %v14830_v51  ;;  %v3853_v17 = vld [vmem:[#allocation12 + $0xb0] sm:$0xff] }
 0x540   :  { %8171 = vmatpush1.bf16.msra.mxu0 %v8170_v30  ;;  %8299 = vmatpush1.bf16.msra.mxu1 %v8298_v12 }
 0x541   :  { %8173 = vmatprep.subr.bf16.mxu0 %v8172_v25  ;;  %8301 = vmatprep.subr.bf16.mxu1 %v8300_v31 }
 0x544   :  { %8175 = vmatpush1.bf16.msra.mxu0 %v8174_v34  ;;  %8303 = vmatpush1.bf16.msra.mxu1 %v8302_v47 }
 0x545   :  { %8177 = vmatprep.subr.bf16.mxu0 %v8176_v61  ;;  %8305 = vmatprep.subr.bf16.mxu1 %v8304_v14  ;;  %v3834_v61 = vld [vmem:[#allocation12 + $0x18] sm:$0xff]  ;;  %v8316_v14 = vpack.c.bf16 %v3836_v46, %v3832_v3 }
 0x546   :  { %v8444_v29 = vpack.c.bf16 %v3838_v43, %v3834_v61  ;;  %v3866_v3 = vld [vmem:[#allocation12 + $0x118] sm:$0xff] }
 0x547   :  { %v3870_v46 = vld [vmem:[#allocation12 + $0x138] sm:$0xff] }
 0x548   :  { %8179 = vmatpush1.bf16.msra.mxu0 %v8178_v13  ;;  %8307 = vmatpush1.bf16.msra.mxu1 %v8306_v45  ;;  %v3837_v13 = vld [vmem:[#allocation12 + $0x30] sm:$0xff]  ;;  %v3840_v45 = vld [vmem:[#allocation12 + $0x48] sm:$0xff] }
 0x549   :  { %8181 = vmatprep.subr.bf16.mxu0 %v8180_v15  ;;  %8309 = vmatprep.subr.bf16.mxu1 %v8308_v0  ;;  %v8446_v57 = vpack.c.bf16 %v3837_v13, %v3833_v48  ;;  %v8320_v15 = vpack.c.bf16 %v3844_v59, %v3840_v45  ;;  %v3842_v0 = vld [vmem:[#allocation12 + $0x58] sm:$0xff]  ;;  %v8460_v48 = vpack.c.bf16 %v3870_v46, %v3866_v3  ;;  %v3872_v13 = vld [vmem:[#allocation12 + $0x148] sm:$0xff] }
 0x54a   :  { %v8448_v52 = vpack.c.bf16 %v3846_v54, %v3842_v0  ;;  %v3876_v45 = vld [vmem:[#allocation12 + $0x168] sm:$0xff]  ;;  %v3874_v59 = vld [vmem:[#allocation12 + $0x158] sm:$0xff] }
 0x54b   :  { %v8336_v54 = vpack.c.bf16 %v3876_v45, %v3872_v13  ;;  %v3898_v3 = vld [vmem:[#allocation12 + $0x218] sm:$0xff]  ;;  %v3904_v13 = vld [vmem:[#allocation12 + $0x248] sm:$0xff] }
 0x54c   :  { %8183 = vmatpush1.bf16.msra.mxu0 %v8182_v7  ;;  %8311 = vmatpush1.bf16.msra.mxu1 %v8310_v49  ;;  %v8322_v7 = vpack.c.bf16 %v3843_v36, %v3839_v58  ;;  %v8450_v49 = vpack.c.bf16 %v3845_v2, %v3841_v42  ;;  %v3871_v58 = vld [vmem:[#allocation12 + $0x140] sm:$0xff]  ;;  %v3873_v36 = vld [vmem:[#allocation12 + $0x150] sm:$0xff]  ;;  %v3902_v46 = vld [vmem:[#allocation12 + $0x238] sm:$0xff] }
 0x54d   :  { %8185 = vmatprep.subr.bf16.mxu0 %v8184_v19  ;;  %8313 = vmatprep.subr.bf16.mxu1 %v8312_v32  ;;  %v3852_v19 = vld [vmem:[#allocation12 + $0xa8] sm:$0xff]  ;;  %v3850_v32 = vld [vmem:[#allocation12 + $0x98] sm:$0xff]  ;;  %v3877_v2 = vld [vmem:[#allocation12 + $0x170] sm:$0xff] }
 0x54e   :  { %v8324_v40 = vpack.c.bf16 %v3852_v19, %v3848_v39  ;;  %v3882_v39 = vld [vmem:[#allocation12 + $0x198] sm:$0xff]  ;;  %v3908_v45 = vld [vmem:[#allocation12 + $0x268] sm:$0xff] }
 0x54f   :  { %v3886_v19 = vld [vmem:[#allocation12 + $0x1b8] sm:$0xff] }
 0x550   :  { %8187 = vmatpush1.bf16.msra.mxu0 %v8186_v63  ;;  %8315 = vmatpush1.bf16.msra.mxu1 %v8314_v55  ;;  %v3851_v63 = vld [vmem:[#allocation12 + $0xa0] sm:$0xff]  ;;  %v8452_v55 = vpack.c.bf16 %v3854_v6, %v3850_v32 }
 0x551   :  { %8317 = vmatprep.subr.bf16.mxu0 %v8316_v14  ;;  %8445 = vmatprep.subr.bf16.mxu1 %v8444_v29  ;;  %v3863_v29 = vld [vmem:[#allocation12 + $0x100] sm:$0xff] }
 0x553   :  { %4278 = vmatmul.mubr.f32.vlgmr.msra.gmra.mrb[2].mxu0 %v4119_v5  ;;  %4420 = vmatmul.mubr.f32.vlgmr.msra.gmra.mrb[2].mxu1 %v4119_v5  ;;  %v3849_v5 = vld [vmem:[#allocation12 + $0x90] sm:$0xff] }
 0x554   :  { %8319 = vmatpush1.bf16.msra.mxu0 %v8318_v9  ;;  %8447 = vmatpush1.bf16.msra.mxu1 %v8446_v57  ;;  %v3869_v9 = vld [vmem:[#allocation12 + $0x130] sm:$0xff]  ;;  %v3878_v57 = vld [vmem:[#allocation12 + $0x178] sm:$0xff] }
 0x555   :  { %8321 = vmatprep.subr.bf16.mxu0 %v8320_v15  ;;  %8449 = vmatprep.subr.bf16.mxu1 %v8448_v52  ;;  %v8334_v15 = vpack.c.bf16 %v3867_v37, %v3863_v29  ;;  %v8462_v0 = vpack.c.bf16 %v3869_v9, %v3865_v50  ;;  %v3875_v52 = vld [vmem:[#allocation12 + $0x160] sm:$0xff]  ;;  %v8464_v42 = vpack.c.bf16 %v3878_v57, %v3874_v59  ;;  %v3897_v50 = vld [vmem:[#allocation12 + $0x210] sm:$0xff]  ;;  %v3906_v59 = vld [vmem:[#allocation12 + $0x258] sm:$0xff] }
 0x556   :  { %v8338_v32 = vpack.c.bf16 %v3875_v52, %v3871_v58  ;;  %v3895_v29 = vld [vmem:[#allocation12 + $0x200] sm:$0xff]  ;;  %v3901_v9 = vld [vmem:[#allocation12 + $0x230] sm:$0xff]  ;;  %v3910_v57 = vld [vmem:[#allocation12 + $0x278] sm:$0xff] }
 0x557   :  { %v3899_v37 = vld [vmem:[#allocation12 + $0x220] sm:$0xff] }
 0x558   :  { %8323 = vmatpush1.bf16.msra.mxu0 %v8322_v7  ;;  %8451 = vmatpush1.bf16.msra.mxu1 %v8450_v49  ;;  %v3880_v7 = vld [vmem:[#allocation12 + $0x188] sm:$0xff]  ;;  %v3903_v58 = vld [vmem:[#allocation12 + $0x240] sm:$0xff] }
 0x559   :  { %8325 = vmatprep.subr.bf16.mxu0 %v8324_v40  ;;  %8453 = vmatprep.subr.bf16.mxu1 %v8452_v55  ;;  %v3884_v49 = vld [vmem:[#allocation12 + $0x1a8] sm:$0xff]  ;;  %v8466_v40 = vpack.c.bf16 %v3877_v2, %v3873_v36  ;;  %v3881_v55 = vld [vmem:[#allocation12 + $0x190] sm:$0xff]  ;;  %v3907_v52 = vld [vmem:[#allocation12 + $0x260] sm:$0xff] }
 0x55a   :  { %v8340_v6 = vpack.c.bf16 %v3884_v49, %v3880_v7  ;;  %v3905_v36 = vld [vmem:[#allocation12 + $0x250] sm:$0xff]  ;;  %v3912_v7 = vld [vmem:[#allocation12 + $0x288] sm:$0xff] }
 0x55b   :  { %v3909_v2 = vld [vmem:[#allocation12 + $0x270] sm:$0xff]  ;;  %v3916_v49 = vld [vmem:[#allocation12 + $0x2a8] sm:$0xff] }
 0x626   :  { %v4279_v20 = vpop.f32.mrb[2].mxu0  ;;  %v4421_v56 = vpop.f32.mrb[2].mxu1 }
 0x627   :  { %v13131_v8 = vadd.f32 %v4279_v20, %v4125_v33  ;;  %v13133_v30 = vadd.f32 %v4421_v56, %v4133_v16  ;;  %v4281_v12 = vpop.f32.mrb[3].mxu0  ;;  %v4423_v38 = vpop.f32.mrb[3].mxu1  ;;  %v3856_v33 = vld [vmem:[#allocation12 + $0xc8] sm:$0xff]  ;;  %v8326_v16 = vpack.c.bf16 %v3851_v63, %v3847_v1  ;;  %v3862_v20 = vld [vmem:[#allocation12 + $0xf8] sm:$0xff]  ;;  %v8454_v56 = vpack.c.bf16 %v3853_v17, %v3849_v5  ;;  %v3879_v1 = vld [vmem:[#allocation12 + $0x180] sm:$0xff] }
 0x628   :  { %v13135_v18 = vadd.f32 %v4281_v12, %v4129_v11  ;;  %v13137_v22 = vadd.f32 %v4423_v38, %v4137_v35  ;;  %v3860_v11 = vld [vmem:[#allocation12 + $0xe8] sm:$0xff]  ;;  %v3858_v35 = vld [vmem:[#allocation12 + $0xd8] sm:$0xff]  ;;  %v3855_v38 = vld [vmem:[#allocation12 + $0xc0] sm:$0xff]  ;;  %v8468_v5 = vpack.c.bf16 %v3886_v19, %v3882_v39 }
 0x629   :  { %v4426_v25 = vmax.f32 %v13131_v8, 0.0  ;;  %v4428_v31 = vmax.f32 %v13133_v30, 0.0  ;;  %v8328_v12 = vpack.c.bf16 %v3860_v11, %v3856_v33  ;;  %8327 = vmatpush1.bf16.msra.mxu0 %v8326_v16  ;;  %8455 = vmatpush1.bf16.msra.mxu1 %v8454_v56  ;;  %v3883_v63 = vld [vmem:[#allocation12 + $0x1a0] sm:$0xff]  ;;  %v3885_v17 = vld [vmem:[#allocation12 + $0x1b0] sm:$0xff]  ;;  %v3888_v33 = vld [vmem:[#allocation12 + $0x1c8] sm:$0xff] }
 0x62a   :  { %v4427_v60 = vmax.f32 %v13135_v18, 0.0  ;;  %v4429_v21 = vmax.f32 %v13137_v22, 0.0  ;;  %v3892_v16 = vld [vmem:[#allocation12 + $0x1e8] sm:$0xff]  ;;  %v3890_v11 = vld [vmem:[#allocation12 + $0x1d8] sm:$0xff]  ;;  %v8470_v56 = vpack.c.bf16 %v3885_v17, %v3881_v55  ;;  %v3913_v55 = vld [vmem:[#allocation12 + $0x290] sm:$0xff] }
 0x62b   :  { %v4430_v10 = vsel %vm4088_vm8, %v4426_v25, 0.0  ;;  %v4446_v4 = vsel %vm4088_vm8, %v4428_v31, 0.0  ;;  %8329 = vmatprep.subr.bf16.mxu0 %v8328_v12  ;;  %v8344_v12 = vpack.c.bf16 %v3892_v16, %v3888_v33  ;;  %v3914_v39 = vld [vmem:[#allocation12 + $0x298] sm:$0xff]  ;;  %v3917_v17 = vld [vmem:[#allocation12 + $0x2b0] sm:$0xff]  ;;  %v3920_v33 = vld [vmem:[#allocation12 + $0x2c8] sm:$0xff] }
 0x62c   :  { %v4431_v27 = vsel %vm4088_vm8, %v4427_v60, 0.0  ;;  %v4447_v34 = vsel %vm4088_vm8, %v4429_v21, 0.0  ;;  %v3918_v19 = vld [vmem:[#allocation12 + $0x2b8] sm:$0xff]  ;;  %v3924_v16 = vld [vmem:[#allocation12 + $0x2e8] sm:$0xff] }
 0x62d   :  { %v4432_v53 = vadd.f32 %v4431_v27, %v4430_v10  ;;  %v4448_v47 = vadd.f32 %v4447_v34, %v4446_v4  ;;  %v3859_v10 = vld [vmem:[#allocation12 + $0xe0] sm:$0xff]  ;;  %v3857_v27 = vld [vmem:[#allocation12 + $0xd0] sm:$0xff]  ;;  %v3864_v34 = vld [vmem:[#allocation12 + $0x108] sm:$0xff] }
 0x62e   :  { %v3861_v4 = vld [vmem:[#allocation12 + $0xf0] sm:$0xff]  ;;  %v8330_v61 = vpack.c.bf16 %v3859_v10, %v3855_v38  ;;  %v3887_v38 = vld [vmem:[#allocation12 + $0x1c0] sm:$0xff]  ;;  %v3982_v8 = vld [vmem:[#allocation12 + $0x4b8] sm:$0xff] }
 0x62f   :  { %4433 = vadd.xlane.f32.xlu0 %v4432_v53  ;;  %v8456_v53 = vpack.c.bf16 %v3862_v20, %v3858_v35  ;;  %v8458_v14 = vpack.c.bf16 %v3861_v4, %v3857_v27  ;;  %v3894_v35 = vld [vmem:[#allocation12 + $0x1f8] sm:$0xff]  ;;  %v8342_v20 = vpack.c.bf16 %v3883_v63, %v3879_v1  ;;  %v3891_v10 = vld [vmem:[#allocation12 + $0x1e0] sm:$0xff]  ;;  %v3889_v27 = vld [vmem:[#allocation12 + $0x1d0] sm:$0xff] }
 0x630   :  { %8331 = vmatpush1.bf16.msra.mxu0 %v8330_v61  ;;  %v3893_v4 = vld [vmem:[#allocation12 + $0x1f0] sm:$0xff]  ;;  %v8346_v61 = vpack.c.bf16 %v3891_v10, %v3887_v38  ;;  %v3911_v1 = vld [vmem:[#allocation12 + $0x280] sm:$0xff] }
 0x631   :  { %8457 = vmatprep.subr.bf16.mxu1 %v8456_v53  ;;  %v8472_v53 = vpack.c.bf16 %v3894_v35, %v3890_v11  ;;  %v3915_v63 = vld [vmem:[#allocation12 + $0x2a0] sm:$0xff]  ;;  %v3922_v11 = vld [vmem:[#allocation12 + $0x2d8] sm:$0xff] }
 0x632   :  { %8459 = vmatpush1.bf16.msra.mxu1 %v8458_v14  ;;  %v8474_v14 = vpack.c.bf16 %v3893_v4, %v3889_v27  ;;  %v3926_v35 = vld [vmem:[#allocation12 + $0x2f8] sm:$0xff]  ;;  %v3919_v38 = vld [vmem:[#allocation12 + $0x2c0] sm:$0xff]  ;;  %v3921_v27 = vld [vmem:[#allocation12 + $0x2d0] sm:$0xff] }
 0x633   :  { %4449 = vadd.xlane.f32.xlu0 %v4448_v47  ;;  %v3868_v47 = vld [vmem:[#allocation12 + $0x128] sm:$0xff]  ;;  %8461 = vmatprep.subr.bf16.mxu1 %v8460_v48  ;;  %v8476_v48 = vpack.c.bf16 %v3902_v46, %v3898_v3  ;;  %v3923_v10 = vld [vmem:[#allocation12 + $0x2e0] sm:$0xff]  ;;  %v3925_v4 = vld [vmem:[#allocation12 + $0x2f0] sm:$0xff] }
 0x634   :  { %v8332_v43 = vpack.c.bf16 %v3868_v47, %v3864_v34  ;;  %v3896_v34 = vld [vmem:[#allocation12 + $0x208] sm:$0xff]  ;;  %v3930_v3 = vld [vmem:[#allocation12 + $0x318] sm:$0xff] }
 0x635   :  { %v3900_v47 = vld [vmem:[#allocation12 + $0x228] sm:$0xff]  ;;  %v3934_v46 = vld [vmem:[#allocation12 + $0x338] sm:$0xff] }
 0x636   :  { %8333 = vmatprep.subr.bf16.mxu0 %v8332_v43  ;;  %8463 = vmatpush1.bf16.msra.mxu1 %v8462_v0  ;;  %v8348_v43 = vpack.c.bf16 %v3900_v47, %v3896_v34  ;;  %v8478_v0 = vpack.c.bf16 %v3901_v9, %v3897_v50  ;;  %v3928_v34 = vld [vmem:[#allocation12 + $0x308] sm:$0xff]  ;;  %v3929_v50 = vld [vmem:[#allocation12 + $0x310] sm:$0xff] }
 0x637   :  { %8335 = vmatpush1.bf16.msra.mxu0 %v8334_v15  ;;  %8465 = vmatprep.subr.bf16.mxu1 %v8464_v42  ;;  %v8350_v15 = vpack.c.bf16 %v3899_v37, %v3895_v29  ;;  %v8480_v42 = vpack.c.bf16 %v3910_v57, %v3906_v59  ;;  %v3932_v47 = vld [vmem:[#allocation12 + $0x328] sm:$0xff]  ;;  %v3927_v29 = vld [vmem:[#allocation12 + $0x300] sm:$0xff]  ;;  %v3933_v9 = vld [vmem:[#allocation12 + $0x330] sm:$0xff] }
 0x638   :  { %8337 = vmatprep.subr.bf16.mxu0 %v8336_v54  ;;  %v8352_v54 = vpack.c.bf16 %v3908_v45, %v3904_v13  ;;  %v3931_v37 = vld [vmem:[#allocation12 + $0x320] sm:$0xff]  ;;  %v3936_v13 = vld [vmem:[#allocation12 + $0x348] sm:$0xff]  ;;  %v3938_v59 = vld [vmem:[#allocation12 + $0x358] sm:$0xff] }
 0x639   :  { %v3940_v45 = vld [vmem:[#allocation12 + $0x368] sm:$0xff]  ;;  %v3942_v57 = vld [vmem:[#allocation12 + $0x378] sm:$0xff] }
 0x63a   :  { %8467 = vmatpush1.bf16.msra.mxu1 %v8466_v40  ;;  %v8482_v40 = vpack.c.bf16 %v3909_v2, %v3905_v36  ;;  %v3937_v36 = vld [vmem:[#allocation12 + $0x350] sm:$0xff] }
 0x63b   :  { %8339 = vmatpush1.bf16.msra.mxu0 %v8338_v32  ;;  %8469 = vmatprep.subr.bf16.mxu1 %v8468_v5  ;;  %v8354_v32 = vpack.c.bf16 %v3907_v52, %v3903_v58  ;;  %v8484_v5 = vpack.c.bf16 %v3918_v19, %v3914_v39  ;;  %v3935_v58 = vld [vmem:[#allocation12 + $0x340] sm:$0xff]  ;;  %v3941_v2 = vld [vmem:[#allocation12 + $0x370] sm:$0xff]  ;;  %v3946_v39 = vld [vmem:[#allocation12 + $0x398] sm:$0xff] }
 0x63c   :  { %8341 = vmatprep.subr.bf16.mxu0 %v8340_v6  ;;  %v8356_v6 = vpack.c.bf16 %v3916_v49, %v3912_v7  ;;  %v3939_v52 = vld [vmem:[#allocation12 + $0x360] sm:$0xff]  ;;  %v3944_v7 = vld [vmem:[#allocation12 + $0x388] sm:$0xff]  ;;  %v3950_v19 = vld [vmem:[#allocation12 + $0x3b8] sm:$0xff] }
 0x63d   :  { %v3948_v49 = vld [vmem:[#allocation12 + $0x3a8] sm:$0xff] }
 0x63e   :  { %8471 = vmatpush1.bf16.msra.mxu1 %v8470_v56  ;;  %v8486_v56 = vpack.c.bf16 %v3917_v17, %v3913_v55  ;;  %v8500_v55 = vpack.c.bf16 %v3950_v19, %v3946_v39  ;;  %v3949_v17 = vld [vmem:[#allocation12 + $0x3b0] sm:$0xff]  ;;  %v3968_v39 = vld [vmem:[#allocation12 + $0x448] sm:$0xff] }
 0x63f   :  { %8343 = vmatpush1.bf16.msra.mxu0 %v8342_v20  ;;  %8473 = vmatprep.subr.bf16.mxu1 %v8472_v53  ;;  %v8358_v20 = vpack.c.bf16 %v3915_v63, %v3911_v1  ;;  %v8488_v53 = vpack.c.bf16 %v3926_v35, %v3922_v11  ;;  %v3943_v1 = vld [vmem:[#allocation12 + $0x380] sm:$0xff]  ;;  %v3952_v11 = vld [vmem:[#allocation12 + $0x3c8] sm:$0xff] }
 0x640   :  { %8345 = vmatprep.subr.bf16.mxu0 %v8344_v12  ;;  %v8360_v12 = vpack.c.bf16 %v3924_v16, %v3920_v33  ;;  %v3947_v63 = vld [vmem:[#allocation12 + $0x3a0] sm:$0xff]  ;;  %v3956_v35 = vld [vmem:[#allocation12 + $0x3e8] sm:$0xff] }
 0x641   :  { %v8374_v33 = vpack.c.bf16 %v3947_v63, %v3943_v1  ;;  %v3972_v19 = vld [vmem:[#allocation12 + $0x468] sm:$0xff] }
 0x642   :  { %8475 = vmatpush1.bf16.msra.mxu1 %v8474_v14  ;;  %v8490_v14 = vpack.c.bf16 %v3925_v4, %v3921_v27  ;;  %v3953_v4 = vld [vmem:[#allocation12 + $0x3d0] sm:$0xff] }
 0x643   :  { %8347 = vmatpush1.bf16.msra.mxu0 %v8346_v61  ;;  %8477 = vmatprep.subr.bf16.mxu1 %v8476_v48  ;;  %v8362_v61 = vpack.c.bf16 %v3923_v10, %v3919_v38  ;;  %v8492_v48 = vpack.c.bf16 %v3934_v46, %v3930_v3  ;;  %v3951_v38 = vld [vmem:[#allocation12 + $0x3c0] sm:$0xff]  ;;  %v3960_v3 = vld [vmem:[#allocation12 + $0x408] sm:$0xff] }
 0x644   :  { %8349 = vmatprep.subr.bf16.mxu0 %v8348_v43  ;;  %v8364_v43 = vpack.c.bf16 %v3932_v47, %v3928_v34  ;;  %v3955_v10 = vld [vmem:[#allocation12 + $0x3e0] sm:$0xff]  ;;  %v3957_v34 = vld [vmem:[#allocation12 + $0x3f0] sm:$0xff]  ;;  %v3964_v46 = vld [vmem:[#allocation12 + $0x428] sm:$0xff] }
 0x645   :  { %v8506_v47 = vpack.c.bf16 %v3957_v34, %v3953_v4 }
 0x646   :  { %8479 = vmatpush1.bf16.msra.mxu1 %v8478_v0  ;;  %v8494_v0 = vpack.c.bf16 %v3933_v9, %v3929_v50 }
 0x647   :  { %8351 = vmatpush1.bf16.msra.mxu0 %v8350_v15  ;;  %8481 = vmatprep.subr.bf16.mxu1 %v8480_v42  ;;  %v8366_v15 = vpack.c.bf16 %v3931_v37, %v3927_v29  ;;  %v8496_v42 = vpack.c.bf16 %v3942_v57, %v3938_v59 }
 0x648   :  { %8353 = vmatprep.subr.bf16.mxu0 %v8352_v54  ;;  %v8368_v54 = vpack.c.bf16 %v3940_v45, %v3936_v13 }
 0x64a   :  { %8483 = vmatpush1.bf16.msra.mxu1 %v8482_v40  ;;  %v8498_v40 = vpack.c.bf16 %v3941_v2, %v3937_v36  ;;  %v3963_v2 = vld [vmem:[#allocation12 + $0x420] sm:$0xff] }
 0x64b   :  { %8355 = vmatpush1.bf16.msra.mxu0 %v8354_v32  ;;  %8485 = vmatprep.subr.bf16.mxu1 %v8484_v5  ;;  %v8370_v32 = vpack.c.bf16 %v3939_v52, %v3935_v58  ;;  %v3945_v5 = vld [vmem:[#allocation12 + $0x390] sm:$0xff] }
 0x64c   :  { %8357 = vmatprep.subr.bf16.mxu0 %v8356_v6  ;;  %v8372_v6 = vpack.c.bf16 %v3948_v49, %v3944_v7  ;;  %v8502_v16 = vpack.c.bf16 %v3949_v17, %v3945_v5  ;;  %v3961_v7 = vld [vmem:[#allocation12 + $0x410] sm:$0xff]  ;;  %v3967_v17 = vld [vmem:[#allocation12 + $0x440] sm:$0xff] }
 0x64d   :  { %v3965_v49 = vld [vmem:[#allocation12 + $0x430] sm:$0xff] }
 0x64e   :  { %8487 = vmatpush1.bf16.msra.mxu1 %v8486_v56  ;;  %v8376_v56 = vpack.c.bf16 %v3956_v35, %v3952_v11  ;;  %v8510_v5 = vpack.c.bf16 %v3965_v49, %v3961_v7  ;;  %v3969_v35 = vld [vmem:[#allocation12 + $0x450] sm:$0xff]  ;;  %v4000_v49 = vld [vmem:[#allocation12 + $0x548] sm:$0xff] }
 0x64f   :  { %8359 = vmatpush1.bf16.msra.mxu0 %v8358_v20  ;;  %8489 = vmatprep.subr.bf16.mxu1 %v8488_v53  ;;  %v3954_v20 = vld [vmem:[#allocation12 + $0x3d8] sm:$0xff]  ;;  %v8378_v53 = vpack.c.bf16 %v3955_v10, %v3951_v38  ;;  %v3997_v7 = vld [vmem:[#allocation12 + $0x530] sm:$0xff] }
 0x650   :  { %8361 = vmatprep.subr.bf16.mxu0 %v8360_v12  ;;  %v3958_v12 = vld [vmem:[#allocation12 + $0x3f8] sm:$0xff] }
 0x651   :  { %v8504_v27 = vpack.c.bf16 %v3958_v12, %v3954_v20  ;;  %v3973_v20 = vld [vmem:[#allocation12 + $0x470] sm:$0xff]  ;;  %v3980_v12 = vld [vmem:[#allocation12 + $0x4a8] sm:$0xff]  ;;  %v3978_v38 = vld [vmem:[#allocation12 + $0x498] sm:$0xff] }
 0x652   :  { %8491 = vmatpush1.bf16.msra.mxu1 %v8490_v14  ;;  %v8380_v14 = vpack.c.bf16 %v3964_v46, %v3960_v3  ;;  %v8514_v10 = vpack.c.bf16 %v3973_v20, %v3969_v35  ;;  %v8516_v34 = vpack.c.bf16 %v3982_v8, %v3978_v38  ;;  %v3981_v3 = vld [vmem:[#allocation12 + $0x4b0] sm:$0xff]  ;;  %v3984_v46 = vld [vmem:[#allocation12 + $0x4c8] sm:$0xff]  ;;  %v4010_v35 = vld [vmem:[#allocation12 + $0x598] sm:$0xff] }
 0x653   :  { %8363 = vmatpush1.bf16.msra.mxu0 %v8362_v61  ;;  %8493 = vmatprep.subr.bf16.mxu1 %v8492_v48  ;;  %v3962_v61 = vld [vmem:[#allocation12 + $0x418] sm:$0xff]  ;;  %v4007_v38 = vld [vmem:[#allocation12 + $0x580] sm:$0xff] }
 0x654   :  { %8365 = vmatprep.subr.bf16.mxu0 %v8364_v43  ;;  %v3966_v43 = vld [vmem:[#allocation12 + $0x438] sm:$0xff]  ;;  %v4011_v8 = vld [vmem:[#allocation12 + $0x5a0] sm:$0xff] }
 0x655   :  { %v8508_v29 = vpack.c.bf16 %v3966_v43, %v3962_v61  ;;  %v3988_v61 = vld [vmem:[#allocation12 + $0x4e8] sm:$0xff]  ;;  %v3990_v43 = vld [vmem:[#allocation12 + $0x4f8] sm:$0xff] }
 0x656   :  { %8495 = vmatpush1.bf16.msra.mxu1 %v8494_v0  ;;  %v4014_v20 = vld [vmem:[#allocation12 + $0x5b8] sm:$0xff] }
 0x657   :  { %8367 = vmatpush1.bf16.msra.mxu0 %v8366_v15  ;;  %8497 = vmatprep.subr.bf16.mxu1 %v8496_v42  ;;  %v3959_v42 = vld [vmem:[#allocation12 + $0x400] sm:$0xff] }
 0x658   :  { %8369 = vmatprep.subr.bf16.mxu0 %v8368_v54 }
 0x65a   :  { %8499 = vmatpush1.bf16.msra.mxu1 %v8498_v40  ;;  %v3974_v40 = vld [vmem:[#allocation12 + $0x478] sm:$0xff] }
 0x65b   :  { %8371 = vmatpush1.bf16.msra.mxu0 %v8370_v32  ;;  %8501 = vmatprep.subr.bf16.mxu1 %v8500_v55  ;;  %v3970_v32 = vld [vmem:[#allocation12 + $0x458] sm:$0xff]  ;;  %v8382_v55 = vpack.c.bf16 %v3963_v2, %v3959_v42  ;;  %v3993_v2 = vld [vmem:[#allocation12 + $0x510] sm:$0xff] }
 0x65c   :  { %8373 = vmatprep.subr.bf16.mxu0 %v8372_v6  ;;  %v8512_v11 = vpack.c.bf16 %v3974_v40, %v3970_v32  ;;  %v4006_v32 = vld [vmem:[#allocation12 + $0x578] sm:$0xff] }
 0x65e   :  { %8503 = vmatpush1.bf16.msra.mxu1 %v8502_v16  ;;  %v8384_v16 = vpack.c.bf16 %v3972_v19, %v3968_v39  ;;  %v4004_v39 = vld [vmem:[#allocation12 + $0x568] sm:$0xff]  ;;  %v4002_v19 = vld [vmem:[#allocation12 + $0x558] sm:$0xff] }
 0x65f   :  { %8375 = vmatpush1.bf16.msra.mxu0 %v8374_v33  ;;  %8505 = vmatprep.subr.bf16.mxu1 %v8504_v27  ;;  %v3971_v33 = vld [vmem:[#allocation12 + $0x460] sm:$0xff] }
 0x660   :  { %8377 = vmatprep.subr.bf16.mxu0 %v8376_v56  ;;  %v3976_v56 = vld [vmem:[#allocation12 + $0x488] sm:$0xff]  ;;  %v3975_v27 = vld [vmem:[#allocation12 + $0x480] sm:$0xff] }
 0x661   :  { %v8388_v4 = vpack.c.bf16 %v3980_v12, %v3976_v56 }
 0x662   :  { %8507 = vmatpush1.bf16.msra.mxu1 %v8506_v47  ;;  %v3977_v47 = vld [vmem:[#allocation12 + $0x490] sm:$0xff] }
 0x663   :  { %8379 = vmatpush1.bf16.msra.mxu0 %v8378_v53  ;;  %8509 = vmatprep.subr.bf16.mxu1 %v8508_v29  ;;  %v3979_v53 = vld [vmem:[#allocation12 + $0x4a0] sm:$0xff] }
 0x664   :  { %8381 = vmatprep.subr.bf16.mxu0 %v8380_v14  ;;  %v3986_v14 = vld [vmem:[#allocation12 + $0x4d8] sm:$0xff]  ;;  %v8390_v22 = vpack.c.bf16 %v3979_v53, %v3975_v27  ;;  %v3983_v29 = vld [vmem:[#allocation12 + $0x4c0] sm:$0xff]  ;;  %v4013_v27 = vld [vmem:[#allocation12 + $0x5b0] sm:$0xff] }
 0x665   :  { %v4016_v53 = vld [vmem:[#allocation12 + $0x5c8] sm:$0xff] }
 0x6bc   :  { %v4434_v37 = vpop.xlane.xlu0 %4433 }
 0x6bd   :  { %v4435_v50 = vrot.slane %v4434_v37, 4 }
 0x6bf   :  { %v4436_v48 = vadd.f32 %v4435_v50, %v4434_v37  ;;  %v3987_v37 = vld [vmem:[#allocation12 + $0x4e0] sm:$0xff]  ;;  %v8392_v50 = vpack.c.bf16 %v3988_v61, %v3984_v46 }
 0x6c0   :  { %v4450_v9 = vpop.xlane.xlu0 %4449  ;;  %v4015_v61 = vld [vmem:[#allocation12 + $0x5c0] sm:$0xff] }
 0x6c1   :  { %v4437_v13 = vrot.slane %v4436_v48, 2  ;;  %v4451_v45 = vrot.slane %v4450_v9, 4 }
 0x6c3   :  { %v4452_v59 = vadd.f32 %v4451_v45, %v4450_v9  ;;  %v4438_v57 = vadd.f32 %v4437_v13, %v4436_v48  ;;  %v8520_v48 = vpack.c.bf16 %v3990_v43, %v3986_v14  ;;  %v3985_v9 = vld [vmem:[#allocation12 + $0x4d0] sm:$0xff]  ;;  %v3992_v45 = vld [vmem:[#allocation12 + $0x508] sm:$0xff]  ;;  %v4019_v14 = vld [vmem:[#allocation12 + $0x5e0] sm:$0xff] }
 0x6c4   :  { %v3989_v13 = vld [vmem:[#allocation12 + $0x4f0] sm:$0xff] }
 0x6c5   :  { %v4453_v15 = vrot.slane %v4452_v59, 2  ;;  %v4439_v0 = vrot.slane %v4438_v57, 1 }
 0x6c7   :  { %v4440_v54 = vadd.f32 %v4439_v0, %v4438_v57  ;;  %v4454_v58 = vadd.f32 %v4453_v15, %v4452_v59  ;;  %v3996_v59 = vld [vmem:[#allocation12 + $0x528] sm:$0xff]  ;;  %v3994_v57 = vld [vmem:[#allocation12 + $0x518] sm:$0xff]  ;;  %v8394_v0 = vpack.c.bf16 %v3987_v37, %v3983_v29  ;;  %v4021_v29 = vld [vmem:[#allocation12 + $0x5f0] sm:$0xff] }
 0x6c8   :  { %v3998_v15 = vld [vmem:[#allocation12 + $0x538] sm:$0xff]  ;;  %v4024_v37 = vld [vmem:[#allocation12 + $0x608] sm:$0xff] }
 0x6c9   :  { %9048 = vpush %v4440_v54  ;;  %v4455_v52 = vrot.slane %v4454_v58, 1  ;;  %v8522_v54 = vpack.c.bf16 %v3989_v13, %v3985_v9  ;;  %v8524_v42 = vpack.c.bf16 %v3998_v15, %v3994_v57  ;;  %v4030_v9 = vld [vmem:[#allocation12 + $0x638] sm:$0xff]  ;;  %v8410_v13 = vpack.c.bf16 %v4019_v14, %v4015_v61  ;;  %v4027_v57 = vld [vmem:[#allocation12 + $0x620] sm:$0xff]  ;;  %v4053_v61 = vld [vmem:[#allocation12 + $0x6f0] sm:$0xff] }
 0x6ca   :  { %v4056_v14 = vld [vmem:[#allocation12 + $0x708] sm:$0xff] }
 0x6cb   :  { %v4456_v36 = vadd.f32 %v4455_v52, %v4454_v58  ;;  %v3991_v58 = vld [vmem:[#allocation12 + $0x500] sm:$0xff] }
 0x6cc   :  { %v3995_v52 = vld [vmem:[#allocation12 + $0x520] sm:$0xff] }
 0x6cd   :  { %9050 = vpush %v4456_v36  ;;  %v8396_v36 = vpack.c.bf16 %v3996_v59, %v3992_v45  ;;  %v8398_v40 = vpack.c.bf16 %v3995_v52, %v3991_v58  ;;  %v4023_v59 = vld [vmem:[#allocation12 + $0x600] sm:$0xff]  ;;  %v4029_v58 = vld [vmem:[#allocation12 + $0x630] sm:$0xff]  ;;  %v4032_v52 = vld [vmem:[#allocation12 + $0x648] sm:$0xff] }
 0x6fa   :  { %s9049_s6 = spop %9048 }
 0x6fb   :  { %s4442_s9 = smul.f32 0.001953125, %s9049_s6 }
 0x6fd   :  { %v4443_v6 = vstv %s4442_s9 }
 0x6fe   :  { %v4444_v1 = vsub.f32 %v4426_v25, %v4443_v6  ;;  %v4445_v63 = vsub.f32 %v4427_v60, %v4443_v6  ;;  %s9051_s13 = spop %9050  ;;  %v8386_v60 = vpack.c.bf16 %v3971_v33, %v3967_v17  ;;  %v8526_v6 = vpack.c.bf16 %v3997_v7, %v3993_v2  ;;  %v4001_v17 = vld [vmem:[#allocation12 + $0x550] sm:$0xff]  ;;  %v4038_v2 = vld [vmem:[#allocation12 + $0x678] sm:$0xff] }
 0x6ff   :  { %s4458_s1 = smul.f32 0.001953125, %s9051_s13  ;;  %v4005_v33 = vld [vmem:[#allocation12 + $0x570] sm:$0xff]  ;;  %v8414_v7 = vpack.c.bf16 %v4027_v57, %v4023_v59  ;;  %v4064_v57 = vld [vmem:[#allocation12 + $0x748] sm:$0xff] }
 0x700   :  { %4547 = vmatprep.mubr.f32.mxu0 %v4445_v63  ;;  %4689 = vmatprep.mubr.f32.mxu1 %v4445_v63  ;;  %v4003_v63 = vld [vmem:[#allocation12 + $0x560] sm:$0xff]  ;;  %v8530_v12 = vpack.c.bf16 %v4005_v33, %v4001_v17  ;;  %v4046_v17 = vld [vmem:[#allocation12 + $0x6b8] sm:$0xff]  ;;  %v4061_v59 = vld [vmem:[#allocation12 + $0x730] sm:$0xff] }
 0x701   :  { %v13159_v25 = vstv %s4458_s1  ;;  %4548 = vmatmul.mubr.f32.vlgmr.msra.gmra.mrb[4].mxu0 %v4444_v1  ;;  %4690 = vmatmul.mubr.f32.vlgmr.msra.gmra.mrb[4].mxu1 %v4444_v1  ;;  %v3999_v1 = vld [vmem:[#allocation12 + $0x540] sm:$0xff] }
 0x702   :  { %v4461_v18 = vsub.f32 %v4429_v21, %v13159_v25  ;;  %8383 = vmatpush1.bf16.msra.mxu0 %v8382_v55  ;;  %8511 = vmatpush1.bf16.msra.mxu1 %v8510_v5  ;;  %v8518_v21 = vpack.c.bf16 %v3981_v3, %v3977_v47  ;;  %v8400_v55 = vpack.c.bf16 %v4004_v39, %v4000_v49  ;;  %v4022_v47 = vld [vmem:[#allocation12 + $0x5f8] sm:$0xff]  ;;  %v4031_v39 = vld [vmem:[#allocation12 + $0x640] sm:$0xff] }
 0x703   :  { %8385 = vmatprep.subr.bf16.mxu0 %v8384_v16  ;;  %8513 = vmatprep.subr.bf16.mxu1 %v8512_v11  ;;  %v8528_v5 = vpack.c.bf16 %v4006_v32, %v4002_v19  ;;  %v4008_v16 = vld [vmem:[#allocation12 + $0x588] sm:$0xff]  ;;  %v8402_v56 = vpack.c.bf16 %v4003_v63, %v3999_v1  ;;  %v8406_v3 = vpack.c.bf16 %v4011_v8, %v4007_v38  ;;  %v4035_v19 = vld [vmem:[#allocation12 + $0x660] sm:$0xff]  ;;  %v4037_v1 = vld [vmem:[#allocation12 + $0x670] sm:$0xff] }
 0x704   :  { %4618 = vmatprep.mubr.f32.mxu0 %v4461_v18  ;;  %4760 = vmatprep.mubr.f32.mxu1 %v4461_v18  ;;  %v4012_v11 = vld [vmem:[#allocation12 + $0x5a8] sm:$0xff]  ;;  %v8418_v33 = vpack.c.bf16 %v4035_v19, %v4031_v39  ;;  %v4045_v38 = vld [vmem:[#allocation12 + $0x6b0] sm:$0xff] }
 0x705   :  { %v8404_v18 = vpack.c.bf16 %v4012_v11, %v4008_v16  ;;  %v4040_v63 = vld [vmem:[#allocation12 + $0x688] sm:$0xff]  ;;  %v4039_v11 = vld [vmem:[#allocation12 + $0x680] sm:$0xff]  ;;  %v4069_v39 = vld [vmem:[#allocation12 + $0x770] sm:$0xff] }
 0x706   :  { %8387 = vmatpush1.bf16.msra.mxu0 %v8386_v60  ;;  %8515 = vmatpush1.bf16.msra.mxu1 %v8514_v10  ;;  %v8532_v60 = vpack.c.bf16 %v4014_v20, %v4010_v35  ;;  %v4009_v10 = vld [vmem:[#allocation12 + $0x590] sm:$0xff]  ;;  %v4043_v35 = vld [vmem:[#allocation12 + $0x6a0] sm:$0xff]  ;;  %v4048_v8 = vld [vmem:[#allocation12 + $0x6c8] sm:$0xff] }
 0x707   :  { %8389 = vmatprep.subr.bf16.mxu0 %v8388_v4  ;;  %8517 = vmatprep.subr.bf16.mxu1 %v8516_v34  ;;  %v4020_v4 = vld [vmem:[#allocation12 + $0x5e8] sm:$0xff]  ;;  %v4018_v34 = vld [vmem:[#allocation12 + $0x5d8] sm:$0xff]  ;;  %v8534_v46 = vpack.c.bf16 %v4013_v27, %v4009_v10  ;;  %v8422_v27 = vpack.c.bf16 %v4043_v35, %v4039_v11  ;;  %v4077_v11 = vld [vmem:[#allocation12 + $0x7b0] sm:$0xff] }
 0x708   :  { %v8408_v43 = vpack.c.bf16 %v4020_v4, %v4016_v53  ;;  %v4054_v10 = vld [vmem:[#allocation12 + $0x6f8] sm:$0xff]  ;;  %v4047_v4 = vld [vmem:[#allocation12 + $0x6c0] sm:$0xff]  ;;  %v4072_v19 = vld [vmem:[#allocation12 + $0x788] sm:$0xff] }
 0x709   :  { %v4080_v35 = vld [vmem:[#allocation12 + $0x7c8] sm:$0xff] }
 0x70a   :  { %8391 = vmatpush1.bf16.msra.mxu0 %v8390_v22  ;;  %8519 = vmatpush1.bf16.msra.mxu1 %v8518_v21  ;;  %v8536_v22 = vpack.c.bf16 %v4022_v47, %v4018_v34  ;;  %v4017_v21 = vld [vmem:[#allocation12 + $0x5d0] sm:$0xff]  ;;  %v4051_v34 = vld [vmem:[#allocation12 + $0x6e0] sm:$0xff] }
 0x70b   :  { %8393 = vmatprep.subr.bf16.mxu0 %v8392_v50  ;;  %8521 = vmatprep.subr.bf16.mxu1 %v8520_v48  ;;  %v4028_v50 = vld [vmem:[#allocation12 + $0x628] sm:$0xff]  ;;  %v4026_v48 = vld [vmem:[#allocation12 + $0x618] sm:$0xff]  ;;  %v8538_v45 = vpack.c.bf16 %v4021_v29, %v4017_v21  ;;  %v8426_v29 = vpack.c.bf16 %v4051_v34, %v4047_v4  ;;  %v4085_v4 = vld [vmem:[#allocation12 + $0x7f0] sm:$0xff] }
 0x70c   :  { %v8412_v15 = vpack.c.bf16 %v4028_v50, %v4024_v37  ;;  %v4062_v21 = vld [vmem:[#allocation12 + $0x738] sm:$0xff]  ;;  %v4055_v50 = vld [vmem:[#allocation12 + $0x700] sm:$0xff] }
 0x70d   :  { %v4791_v34 = vld [vmem:[%s14832_s11 + $0x80] sm:$0xff] }
 0x70e   :  { %8395 = vmatpush1.bf16.msra.mxu0 %v8394_v0  ;;  %8523 = vmatpush1.bf16.msra.mxu1 %v8522_v54  ;;  %v8540_v0 = vpack.c.bf16 %v4030_v9, %v4026_v48  ;;  %v4025_v54 = vld [vmem:[#allocation12 + $0x610] sm:$0xff]  ;;  %v4059_v48 = vld [vmem:[#allocation12 + $0x720] sm:$0xff] }
 0x70f   :  { %8397 = vmatprep.subr.bf16.mxu0 %v8396_v36  ;;  %8525 = vmatprep.subr.bf16.mxu1 %v8524_v42  ;;  %v4036_v36 = vld [vmem:[#allocation12 + $0x668] sm:$0xff]  ;;  %v4034_v42 = vld [vmem:[#allocation12 + $0x658] sm:$0xff]  ;;  %v8542_v49 = vpack.c.bf16 %v4029_v58, %v4025_v54  ;;  %v8430_v58 = vpack.c.bf16 %v4059_v48, %v4055_v50  ;;  %v4777_v48 = vld [vmem:[%s14832_s11 + $0x10] sm:$0xff] }
 0x710   :  { %v8416_v32 = vpack.c.bf16 %v4036_v36, %v4032_v52  ;;  %v4070_v54 = vld [vmem:[#allocation12 + $0x778] sm:$0xff]  ;;  %v4063_v36 = vld [vmem:[#allocation12 + $0x740] sm:$0xff] }
 0x712   :  { %8399 = vmatpush1.bf16.msra.mxu0 %v8398_v40  ;;  %8527 = vmatpush1.bf16.msra.mxu1 %v8526_v6  ;;  %v8544_v40 = vpack.c.bf16 %v4038_v2, %v4034_v42  ;;  %v4033_v6 = vld [vmem:[#allocation12 + $0x650] sm:$0xff]  ;;  %v4067_v42 = vld [vmem:[#allocation12 + $0x760] sm:$0xff] }
 0x713   :  { %8401 = vmatprep.subr.bf16.mxu0 %v8400_v55  ;;  %8529 = vmatprep.subr.bf16.mxu1 %v8528_v5  ;;  %v4044_v55 = vld [vmem:[#allocation12 + $0x6a8] sm:$0xff]  ;;  %v4042_v5 = vld [vmem:[#allocation12 + $0x698] sm:$0xff]  ;;  %v8546_v16 = vpack.c.bf16 %v4037_v1, %v4033_v6  ;;  %v8434_v1 = vpack.c.bf16 %v4067_v42, %v4063_v36  ;;  %v4799_v36 = vld [vmem:[%s14832_s11 + $0xc0] sm:$0xff] }
 0x714   :  { %v8420_v20 = vpack.c.bf16 %v4044_v55, %v4040_v63  ;;  %v4078_v6 = vld [vmem:[#allocation12 + $0x7b8] sm:$0xff]  ;;  %v4071_v55 = vld [vmem:[#allocation12 + $0x780] sm:$0xff]  ;;  %v4800_v42 = vld [vmem:[%s14832_s11 + $0xc8] sm:$0xff] }
 0x716   :  { %8403 = vmatpush1.bf16.msra.mxu0 %v8402_v56  ;;  %8531 = vmatpush1.bf16.msra.mxu1 %v8530_v12  ;;  %v8548_v56 = vpack.c.bf16 %v4046_v17, %v4042_v5  ;;  %v4041_v12 = vld [vmem:[#allocation12 + $0x690] sm:$0xff]  ;;  %v4075_v5 = vld [vmem:[#allocation12 + $0x7a0] sm:$0xff] }
 0x717   :  { %8405 = vmatprep.subr.bf16.mxu0 %v8404_v18  ;;  %8533 = vmatprep.subr.bf16.mxu1 %v8532_v60  ;;  %v4052_v18 = vld [vmem:[#allocation12 + $0x6e8] sm:$0xff]  ;;  %v4050_v60 = vld [vmem:[#allocation12 + $0x6d8] sm:$0xff]  ;;  %v8550_v53 = vpack.c.bf16 %v4045_v38, %v4041_v12  ;;  %v8438_v38 = vpack.c.bf16 %v4075_v5, %v4071_v55  ;;  %v4803_v5 = vld [vmem:[%s14832_s11 + $0xe0] sm:$0xff] }
 0x718   :  { %v8424_v47 = vpack.c.bf16 %v4052_v18, %v4048_v8  ;;  %v4086_v12 = vld [vmem:[#allocation12 + $0x7f8] sm:$0xff]  ;;  %v4079_v18 = vld [vmem:[#allocation12 + $0x7c0] sm:$0xff] }
 0x71a   :  { %8407 = vmatpush1.bf16.msra.mxu0 %v8406_v3  ;;  %8535 = vmatpush1.bf16.msra.mxu1 %v8534_v46  ;;  %v8552_v3 = vpack.c.bf16 %v4054_v10, %v4050_v60  ;;  %v4049_v46 = vld [vmem:[#allocation12 + $0x6d0] sm:$0xff] }
 0x71b   :  { %8409 = vmatprep.subr.bf16.mxu0 %v8408_v43  ;;  %8537 = vmatprep.subr.bf16.mxu1 %v8536_v22  ;;  %v4060_v43 = vld [vmem:[#allocation12 + $0x728] sm:$0xff]  ;;  %v4058_v22 = vld [vmem:[#allocation12 + $0x718] sm:$0xff]  ;;  %v8554_v37 = vpack.c.bf16 %v4053_v61, %v4049_v46 }
 0x71c   :  { %v8428_v9 = vpack.c.bf16 %v4060_v43, %v4056_v14  ;;  %v4775_v14 = vld [vmem:[%s14832_s11] sm:$0xff]  ;;  %v4776_v43 = vld [vmem:[%s14832_s11 + $0x8] sm:$0xff] }
 0x71e   :  { %8411 = vmatpush1.bf16.msra.mxu0 %v8410_v13  ;;  %8539 = vmatpush1.bf16.msra.mxu1 %v8538_v45  ;;  %v8556_v13 = vpack.c.bf16 %v4062_v21, %v4058_v22  ;;  %v4057_v45 = vld [vmem:[#allocation12 + $0x710] sm:$0xff]  ;;  %v4794_v21 = vld [vmem:[%s14832_s11 + $0x98] sm:$0xff] }
 0x71f   :  { %8413 = vmatprep.subr.bf16.mxu0 %v8412_v15  ;;  %8541 = vmatprep.subr.bf16.mxu1 %v8540_v0  ;;  %v4068_v15 = vld [vmem:[#allocation12 + $0x768] sm:$0xff]  ;;  %v4066_v0 = vld [vmem:[#allocation12 + $0x758] sm:$0xff]  ;;  %v8558_v52 = vpack.c.bf16 %v4061_v59, %v4057_v45  ;;  %v4793_v22 = vld [vmem:[%s14832_s11 + $0x90] sm:$0xff] }
 0x720   :  { %v8432_v2 = vpack.c.bf16 %v4068_v15, %v4064_v57  ;;  %v8576_v50 = vpack.c.bf16 %v4794_v21, %v4793_v22  ;;  %v4796_v45 = vld [vmem:[%s14832_s11 + $0xa8] sm:$0xff]  ;;  %v4797_v57 = vld [vmem:[%s14832_s11 + $0xb0] sm:$0xff]  ;;  %v4798_v15 = vld [vmem:[%s14832_s11 + $0xb8] sm:$0xff] }
 0x722   :  { %8415 = vmatpush1.bf16.msra.mxu0 %v8414_v7  ;;  %8543 = vmatpush1.bf16.msra.mxu1 %v8542_v49  ;;  %v8560_v7 = vpack.c.bf16 %v4070_v54, %v4066_v0  ;;  %v4065_v49 = vld [vmem:[#allocation12 + $0x750] sm:$0xff]  ;;  %v8584_v54 = vpack.c.bf16 %v4798_v15, %v4797_v57 }
 0x723   :  { %8417 = vmatprep.subr.bf16.mxu0 %v8416_v32  ;;  %8545 = vmatprep.subr.bf16.mxu1 %v8544_v40  ;;  %v4076_v32 = vld [vmem:[#allocation12 + $0x7a8] sm:$0xff]  ;;  %v4074_v40 = vld [vmem:[#allocation12 + $0x798] sm:$0xff]  ;;  %v8562_v63 = vpack.c.bf16 %v4069_v39, %v4065_v49  ;;  %v4783_v49 = vld [vmem:[%s14832_s11 + $0x40] sm:$0xff] }
 0x724   :  { %v8436_v17 = vpack.c.bf16 %v4076_v32, %v4072_v19  ;;  %v4784_v39 = vld [vmem:[%s14832_s11 + $0x48] sm:$0xff]  ;;  %v4801_v19 = vld [vmem:[%s14832_s11 + $0xd0] sm:$0xff]  ;;  %v4802_v32 = vld [vmem:[%s14832_s11 + $0xd8] sm:$0xff] }
 0x726   :  { %8419 = vmatpush1.bf16.msra.mxu0 %v8418_v33  ;;  %8547 = vmatpush1.bf16.msra.mxu1 %v8546_v16  ;;  %v8564_v33 = vpack.c.bf16 %v4078_v6, %v4074_v40  ;;  %v4073_v16 = vld [vmem:[#allocation12 + $0x790] sm:$0xff]  ;;  %v8590_v40 = vpack.c.bf16 %v4784_v39, %v4783_v49  ;;  %v8592_v6 = vpack.c.bf16 %v4802_v32, %v4801_v19  ;;  %v4957_v19 = vld [vmem:[#allocation14 + $0x20] sm:$0xff] }
 0x727   :  { %8421 = vmatprep.subr.bf16.mxu0 %v8420_v20  ;;  %8549 = vmatprep.subr.bf16.mxu1 %v8548_v56  ;;  %v4084_v20 = vld [vmem:[#allocation12 + $0x7e8] sm:$0xff]  ;;  %v4082_v56 = vld [vmem:[#allocation12 + $0x7d8] sm:$0xff]  ;;  %v8566_v8 = vpack.c.bf16 %v4077_v11, %v4073_v16  ;;  %v4959_v32 = vld [vmem:[#allocation14 + $0x30] sm:$0xff] }
 0x728   :  { %v8440_v60 = vpack.c.bf16 %v4084_v20, %v4080_v35  ;;  %v8568_v10 = vpack.c.bf16 %v4086_v12, %v4082_v56  ;;  %v4788_v11 = vld [vmem:[%s14832_s11 + $0x68] sm:$0xff]  ;;  %v4805_v35 = vld [vmem:[%s14832_s11 + $0xf0] sm:$0xff]  ;;  %v4806_v20 = vld [vmem:[%s14832_s11 + $0xf8] sm:$0xff] }
 0x729   :  { %v8600_v12 = vpack.c.bf16 %v4806_v20, %v4805_v35 }
 0x72a   :  { %8423 = vmatpush1.bf16.msra.mxu0 %v8422_v27  ;;  %8551 = vmatpush1.bf16.msra.mxu1 %v8550_v53  ;;  %v4083_v27 = vld [vmem:[#allocation12 + $0x7e0] sm:$0xff]  ;;  %v4081_v53 = vld [vmem:[#allocation12 + $0x7d0] sm:$0xff] }
 0x72b   :  { %8425 = vmatprep.subr.bf16.mxu0 %v8424_v47  ;;  %8553 = vmatprep.subr.bf16.mxu1 %v8552_v3  ;;  %v4792_v47 = vld [vmem:[%s14832_s11 + $0x88] sm:$0xff]  ;;  %v8442_v3 = vpack.c.bf16 %v4083_v27, %v4079_v18  ;;  %v8570_v46 = vpack.c.bf16 %v4085_v4, %v4081_v53 }
 0x72c   :  { %v8572_v61 = vpack.c.bf16 %v4792_v47, %v4791_v34 }
 0x72e   :  { %8427 = vmatpush1.bf16.msra.mxu0 %v8426_v29  ;;  %8555 = vmatpush1.bf16.msra.mxu1 %v8554_v37  ;;  %v8574_v29 = vpack.c.bf16 %v4776_v43, %v4775_v14  ;;  %v4460_v37 = vsub.f32 %v4428_v31, %v13159_v25  ;;  %v4779_v31 = vld [vmem:[%s14832_s11 + $0x20] sm:$0xff]  ;;  %v4780_v25 = vld [vmem:[%s14832_s11 + $0x28] sm:$0xff] }
 0x72f   :  { %8429 = vmatprep.subr.bf16.mxu0 %v8428_v9  ;;  %8557 = vmatprep.subr.bf16.mxu1 %v8556_v13  ;;  %v4778_v9 = vld [vmem:[%s14832_s11 + $0x18] sm:$0xff]  ;;  %v4795_v13 = vld [vmem:[%s14832_s11 + $0xa0] sm:$0xff]  ;;  %v8582_v0 = vpack.c.bf16 %v4780_v25, %v4779_v31 }
 0x730   :  { %v8578_v59 = vpack.c.bf16 %v4778_v9, %v4777_v48  ;;  %v8580_v30 = vpack.c.bf16 %v4796_v45, %v4795_v13 }
 0x732   :  { %8431 = vmatpush1.bf16.msra.mxu0 %v8430_v58  ;;  %8559 = vmatpush1.bf16.msra.mxu1 %v8558_v52  ;;  %v4781_v58 = vld [vmem:[%s14832_s11 + $0x30] sm:$0xff]  ;;  %v4782_v52 = vld [vmem:[%s14832_s11 + $0x38] sm:$0xff] }
 0x733   :  { %8433 = vmatprep.subr.bf16.mxu0 %v8432_v2  ;;  %8561 = vmatprep.subr.bf16.mxu1 %v8560_v7  ;;  %v8586_v2 = vpack.c.bf16 %v4782_v52, %v4781_v58  ;;  %v8588_v7 = vpack.c.bf16 %v4800_v42, %v4799_v36  ;;  %v4953_v58 = vld [vmem:[#allocation14] sm:$0xff]  ;;  %v4955_v42 = vld [vmem:[#allocation14 + $0x10] sm:$0xff] }
 0x734   :  { %v8638_v49 = vpack.c.bf16 %v4955_v42, %v4953_v58 }
 0x736   :  { %8435 = vmatpush1.bf16.msra.mxu0 %v8434_v1  ;;  %8563 = vmatpush1.bf16.msra.mxu1 %v8562_v63  ;;  %v4785_v1 = vld [vmem:[%s14832_s11 + $0x50] sm:$0xff]  ;;  %v4786_v63 = vld [vmem:[%s14832_s11 + $0x58] sm:$0xff] }
 0x737   :  { %8437 = vmatprep.subr.bf16.mxu0 %v8436_v17  ;;  %8565 = vmatprep.subr.bf16.mxu1 %v8564_v33  ;;  %v8594_v55 = vpack.c.bf16 %v4786_v63, %v4785_v1  ;;  %v4804_v17 = vld [vmem:[%s14832_s11 + $0xe8] sm:$0xff]  ;;  %v4787_v33 = vld [vmem:[%s14832_s11 + $0x60] sm:$0xff]  ;;  %v4964_v1 = vld [vmem:[#allocation14 + $0x58] sm:$0xff]  ;;  %v8642_v63 = vpack.c.bf16 %v4959_v32, %v4957_v19 }
 0x738   :  { %v8596_v16 = vpack.c.bf16 %v4804_v17, %v4803_v5  ;;  %v8598_v56 = vpack.c.bf16 %v4788_v11, %v4787_v33  ;;  %v4961_v17 = vld [vmem:[#allocation14 + $0x40] sm:$0xff]  ;;  %v4963_v33 = vld [vmem:[#allocation14 + $0x50] sm:$0xff]  ;;  %v4968_v11 = vld [vmem:[#allocation14 + $0x78] sm:$0xff] }
 0x739   :  { %v8646_v20 = vpack.c.bf16 %v4963_v33, %v4961_v17 }
 0x73a   :  { %8439 = vmatpush1.bf16.msra.mxu0 %v8438_v38  ;;  %8567 = vmatpush1.bf16.msra.mxu1 %v8566_v8  ;;  %v4789_v38 = vld [vmem:[%s14832_s11 + $0x70] sm:$0xff]  ;;  %v4790_v8 = vld [vmem:[%s14832_s11 + $0x78] sm:$0xff] }
 0x73b   :  { %8441 = vmatprep.subr.bf16.mxu0 %v8440_v60  ;;  %8569 = vmatprep.subr.bf16.mxu1 %v8568_v10  ;;  %v8602_v18 = vpack.c.bf16 %v4790_v8, %v4789_v38  ;;  %v4087_v60 = vld [vmem:[%s14833_s22] sm:$0xf]  ;;  %v4967_v8 = vld [vmem:[#allocation14 + $0x70] sm:$0xff] }
 0x73c   :  { %v4466_v10 = vrot.slane %v4087_v60, %v14828_v24  ;;  %v4474_v27 = vrot.slane %v4087_v60, %v14829_v28  ;;  %v4470_v53 = vrot.slane %v4087_v60, %v14830_v51  ;;  %v4478_v4 = vrot.slane %v4087_v60, %v14831_v23  ;;  %v4965_v38 = vld [vmem:[#allocation14 + $0x60] sm:$0xff]  ;;  %v4972_v60 = vld [vmem:[#allocation14 + $0x98] sm:$0xff] }
 0x73e   :  { %8443 = vmatpush1.bf16.msra.mxu0 %v8442_v3  ;;  %8571 = vmatpush1.bf16.msra.mxu1 %v8570_v46 }
 0x73f   :  { %8573 = vmatprep.subr.bf16.mxu0 %v8572_v61  ;;  %8605 = vmatprep.subr.bf16.mxu1 %v8572_v61 }
 0x741   :  { %4619 = vmatmul.mubr.f32.vlgmr.msra.gmra.mrb[4].mxu0 %v4460_v37  ;;  %4761 = vmatmul.mubr.f32.vlgmr.msra.gmra.mrb[4].mxu1 %v4460_v37 }
 0x742   :  { %8575 = vmatpush3.bf16.msra.mxu0 %v8574_v29  ;;  %8607 = vmatpush3.bf16.msra.mxu1 %v8574_v29 }
 0x743   :  { %8577 = vmatprep.subr.bf16.mxu0 %v8576_v50  ;;  %8609 = vmatprep.subr.bf16.mxu1 %v8576_v50 }
 0x746   :  { %8579 = vmatpush3.bf16.msra.mxu0 %v8578_v59  ;;  %8611 = vmatpush3.bf16.msra.mxu1 %v8578_v59 }
 0x747   :  { %8581 = vmatprep.subr.bf16.mxu0 %v8580_v30  ;;  %8613 = vmatprep.subr.bf16.mxu1 %v8580_v30 }
 0x74a   :  { %8583 = vmatpush3.bf16.msra.mxu0 %v8582_v0  ;;  %8615 = vmatpush3.bf16.msra.mxu1 %v8582_v0  ;;  %v4954_v0 = vld [vmem:[#allocation14 + $0x8] sm:$0xff] }
 0x74b   :  { %8585 = vmatprep.subr.bf16.mxu0 %v8584_v54  ;;  %8617 = vmatprep.subr.bf16.mxu1 %v8584_v54  ;;  %v4956_v54 = vld [vmem:[#allocation14 + $0x18] sm:$0xff] }
 0x74c   :  { %v8636_v36 = vpack.c.bf16 %v4956_v54, %v4954_v0 }
 0x74e   :  { %8587 = vmatpush3.bf16.msra.mxu0 %v8586_v2  ;;  %8619 = vmatpush3.bf16.msra.mxu1 %v8586_v2  ;;  %v4958_v2 = vld [vmem:[#allocation14 + $0x28] sm:$0xff] }
 0x74f   :  { %8589 = vmatprep.subr.bf16.mxu0 %v8588_v7  ;;  %8621 = vmatprep.subr.bf16.mxu1 %v8588_v7  ;;  %v4960_v7 = vld [vmem:[#allocation14 + $0x38] sm:$0xff] }
 0x750   :  { %v8640_v39 = vpack.c.bf16 %v4960_v7, %v4958_v2  ;;  %v4985_v7 = vld [vmem:[%s14834_s25] sm:$0x3] }
 0x752   :  { %8591 = vmatpush3.bf16.msra.mxu0 %v8590_v40  ;;  %8623 = vmatpush3.bf16.msra.mxu1 %v8590_v40  ;;  %v4962_v40 = vld [vmem:[#allocation14 + $0x48] sm:$0xff] }
 0x753   :  { %8593 = vmatprep.subr.bf16.mxu0 %v8592_v6  ;;  %8625 = vmatprep.subr.bf16.mxu1 %v8592_v6  ;;  %v8644_v5 = vpack.c.bf16 %v4964_v1, %v4962_v40 }
 0x756   :  { %8595 = vmatpush3.bf16.msra.mxu0 %v8594_v55  ;;  %8627 = vmatpush3.bf16.msra.mxu1 %v8594_v55 }
 0x757   :  { %8597 = vmatprep.subr.bf16.mxu0 %v8596_v16  ;;  %8629 = vmatprep.subr.bf16.mxu1 %v8596_v16  ;;  %v4966_v16 = vld [vmem:[#allocation14 + $0x68] sm:$0xff] }
 0x75a   :  { %8599 = vmatpush3.bf16.msra.mxu0 %v8598_v56  ;;  %8631 = vmatpush3.bf16.msra.mxu1 %v8598_v56 }
 0x75b   :  { %8601 = vmatprep.subr.bf16.mxu0 %v8600_v12  ;;  %8633 = vmatprep.subr.bf16.mxu1 %v8600_v12  ;;  %v8648_v12 = vpack.c.bf16 %v4968_v11, %v4966_v16  ;;  %v4987_v11 = vld [vmem:[#allocation15 + $0x8] sm:$0xff] }
 0x75e   :  { %8603 = vmatpush3.bf16.msra.mxu0 %v8602_v18  ;;  %8635 = vmatpush3.bf16.msra.mxu1 %v8602_v18  ;;  %v4970_v18 = vld [vmem:[#allocation14 + $0x88] sm:$0xff] }
 0x75f   :  { %8637 = vmatprep.subr.bf16.mxu0 %v8636_v36 }
 0x814   :  { %v4620_v34 = vpop.f32.mrb[4].mxu0  ;;  %v4762_v47 = vpop.f32.mrb[4].mxu1 }
 0x815   :  { %v9020_v3 = vadd.f32 %v4620_v34, %v4466_v10  ;;  %v9022_v46 = vadd.f32 %v4762_v47, %v4474_v27  ;;  %v4622_v61 = vpop.f32.mrb[5].mxu0  ;;  %v4764_v14 = vpop.f32.mrb[5].mxu1  ;;  %v8650_v27 = vpack.c.bf16 %v4967_v8, %v4965_v38  ;;  %v4971_v34 = vld [vmem:[#allocation14 + $0x90] sm:$0xff]  ;;  %v4974_v47 = vld [vmem:[#allocation14 + $0xa8] sm:$0xff] }
 0x816   :  { %v9021_v43 = vadd.f32 %v4622_v61, %v4470_v53  ;;  %v9023_v22 = vadd.f32 %v4764_v14, %v4478_v4  ;;  %v8652_v53 = vpack.c.bf16 %v4972_v60, %v4970_v18  ;;  %v4969_v4 = vld [vmem:[#allocation14 + $0x80] sm:$0xff]  ;;  %v4991_v8 = vld [vmem:[#allocation15 + $0x28] sm:$0xff]  ;;  %v4993_v18 = vld [vmem:[#allocation15 + $0x38] sm:$0xff] }
 0x817   :  { %v4767_v21 = vadd.f32 %v9020_v3, %v13102_v41  ;;  %v4769_v29 = vadd.f32 %v9022_v46, %v13108_v44  ;;  %v4976_v3 = vld [vmem:[#allocation14 + $0xb8] sm:$0xff]  ;;  %v8654_v46 = vpack.c.bf16 %v4971_v34, %v4969_v4  ;;  %v4973_v14 = vld [vmem:[#allocation14 + $0xa0] sm:$0xff]  ;;  %v4995_v4 = vld [vmem:[#allocation15 + $0x48] sm:$0xff] }
 0x818   :  { %v4768_v37 = vadd.f32 %v9021_v43, %v13106_v62  ;;  %v4770_v28 = vadd.f32 %v9023_v22, %v13114_v26  ;;  %v8656_v61 = vpack.c.bf16 %v4976_v3, %v4974_v47  ;;  %v4975_v43 = vld [vmem:[#allocation14 + $0xb0] sm:$0xff]  ;;  %v4978_v22 = vld [vmem:[#allocation14 + $0xc8] sm:$0xff]  ;;  %v4990_v60 = vld [vmem:[#allocation15 + $0x20] sm:$0xff] }
 0x819   :  { %v4771_v9 = vmax.f32 %v4767_v21, 0.0  ;;  %v4773_v23 = vmax.f32 %v4769_v29, 0.0  ;;  %v4980_v21 = vld [vmem:[#allocation14 + $0xd8] sm:$0xff]  ;;  %v8658_v29 = vpack.c.bf16 %v4975_v43, %v4973_v14  ;;  %v4994_v47 = vld [vmem:[#allocation15 + $0x40] sm:$0xff] }
 0x81a   :  { %v4772_v50 = vmax.f32 %v4768_v37, 0.0  ;;  %v4774_v48 = vmax.f32 %v4770_v28, 0.0  ;;  %v8660_v37 = vpack.c.bf16 %v4980_v21, %v4978_v22  ;;  %v4977_v28 = vld [vmem:[#allocation14 + $0xc0] sm:$0xff]  ;;  %v4997_v34 = vld [vmem:[#allocation15 + $0x58] sm:$0xff] }
 0x81b   :  { %v8676_v3 = vpack.c.bf16 %v4997_v34, %v4995_v4  ;;  %v5001_v14 = vld [vmem:[#allocation15 + $0x78] sm:$0xff]  ;;  %v4998_v21 = vld [vmem:[#allocation15 + $0x60] sm:$0xff] }
 0x81c   :  { %4871 = vmatprep.mubr.f32.mxu0 %v4772_v50  ;;  %4941 = vmatprep.mubr.f32.mxu1 %v4774_v48  ;;  %v4979_v50 = vld [vmem:[#allocation14 + $0xd0] sm:$0xff]  ;;  %v4982_v48 = vld [vmem:[#allocation14 + $0xe8] sm:$0xff] }
 0x81d   :  { %4872 = vmatmul.mubr.f32.vlgmr.msra.gmra.mrb[6].mxu0 %v4771_v9  ;;  %4942 = vmatmul.mubr.f32.vlgmr.msra.gmra.mrb[6].mxu1 %v4773_v23  ;;  %v8662_v9 = vpack.c.bf16 %v4979_v50, %v4977_v28  ;;  %v4984_v23 = vld [vmem:[#allocation14 + $0xf8] sm:$0xff] }
 0x81e   :  { %8639 = vmatpush1.bf16.msra.mxu0 %v8638_v49  ;;  %v5087_v49 = vrot.slane %v4985_v7, %v14828_v24  ;;  %v5005_v28 = vld [vmem:[#allocation15 + $0x98] sm:$0xff] }
 0x81f   :  { %8641 = vmatprep.subr.bf16.mxu0 %v8640_v39  ;;  %v5091_v39 = vrot.slane %v4985_v7, %v14830_v51  ;;  %v5014_v7 = vld [vmem:[#allocation15 + $0xe0] sm:$0xff] }
 0x822   :  { %8643 = vmatpush1.bf16.msra.mxu0 %v8642_v63 }
 0x823   :  { %8645 = vmatprep.subr.bf16.mxu0 %v8644_v5 }
 0x826   :  { %8647 = vmatpush1.bf16.msra.mxu0 %v8646_v20  ;;  %v4986_v20 = vld [vmem:[#allocation15] sm:$0xff] }
 0x827   :  { %8649 = vmatprep.subr.bf16.mxu0 %v8648_v12  ;;  %v4988_v12 = vld [vmem:[#allocation15 + $0x10] sm:$0xff] }
 0x828   :  { %v8670_v38 = vpack.c.bf16 %v4988_v12, %v4986_v20  ;;  %v5029_v20 = vld [vmem:[#allocation15 + $0x158] sm:$0xff] }
 0x82a   :  { %8651 = vmatpush1.bf16.msra.mxu0 %v8650_v27  ;;  %v4992_v27 = vld [vmem:[#allocation15 + $0x30] sm:$0xff] }
 0x82b   :  { %8653 = vmatprep.subr.bf16.mxu0 %v8652_v53  ;;  %v8674_v53 = vpack.c.bf16 %v4992_v27, %v4990_v60  ;;  %v5031_v60 = vld [vmem:[#allocation15 + $0x168] sm:$0xff] }
 0x82e   :  { %8655 = vmatpush1.bf16.msra.mxu0 %v8654_v46  ;;  %v4996_v46 = vld [vmem:[#allocation15 + $0x50] sm:$0xff] }
 0x82f   :  { %8657 = vmatprep.subr.bf16.mxu0 %v8656_v61  ;;  %v4999_v61 = vld [vmem:[#allocation15 + $0x68] sm:$0xff]  ;;  %v8678_v43 = vpack.c.bf16 %v4996_v46, %v4994_v47  ;;  %v5030_v47 = vld [vmem:[#allocation15 + $0x160] sm:$0xff] }
 0x830   :  { %v8680_v22 = vpack.c.bf16 %v5001_v14, %v4999_v61  ;;  %v5035_v46 = vld [vmem:[#allocation15 + $0x188] sm:$0xff]  ;;  %v5037_v61 = vld [vmem:[#allocation15 + $0x198] sm:$0xff] }
 0x832   :  { %8659 = vmatpush1.bf16.msra.mxu0 %v8658_v29  ;;  %v5000_v29 = vld [vmem:[#allocation15 + $0x70] sm:$0xff] }
 0x833   :  { %8661 = vmatprep.subr.bf16.mxu0 %v8660_v37  ;;  %v5003_v37 = vld [vmem:[#allocation15 + $0x88] sm:$0xff]  ;;  %v8682_v50 = vpack.c.bf16 %v5000_v29, %v4998_v21  ;;  %v8716_v21 = vpack.c.bf16 %v5037_v61, %v5035_v46  ;;  %v5034_v29 = vld [vmem:[#allocation15 + $0x180] sm:$0xff] }
 0x836   :  { %8663 = vmatpush1.bf16.msra.mxu0 %v8662_v9  ;;  %v5002_v9 = vld [vmem:[#allocation15 + $0x80] sm:$0xff] }
 0x8f0   :  { %v7162_v13 = vpop.f32.mrb[6].mxu0  ;;  %v7197_v45 = vpop.f32.mrb[6].mxu1 }
 0x8f1   :  { %v7163_v59 = vpop.f32.mrb[7].mxu0  ;;  %v7198_v30 = vpop.f32.mrb[7].mxu1 }
 0x8f2   :  { %v7164_v31 = vadd.f32 %v7163_v59, %v7162_v13  ;;  %v7199_v41 = vadd.f32 %v7198_v30, %v7197_v45  ;;  %v4981_v13 = vld [vmem:[#allocation14 + $0xe0] sm:$0xff]  ;;  %v4983_v45 = vld [vmem:[#allocation14 + $0xf0] sm:$0xff]  ;;  %v9622_v59 = vmov 0.0   ;;  %v8664_v30 = vpack.c.bf16 %v4984_v23, %v4982_v48 }
 0x8f3   :  { %5158 = vmatprep.mubr.f32.mxu0 %v9622_v59  ;;  %v8684_v48 = vpack.c.bf16 %v5005_v28, %v5003_v37  ;;  %v5004_v23 = vld [vmem:[#allocation15 + $0x90] sm:$0xff] }
 0x8f4   :  { %4948 = vrot.lane.b32.xlu1 %v7199_v41, %s9621_s23  ;;  %8665 = vmatprep.subr.bf16.mxu0 %v8664_v30  ;;  %v8686_v30 = vpack.c.bf16 %v5004_v23, %v5002_v9  ;;  %v5036_v37 = vld [vmem:[#allocation15 + $0x190] sm:$0xff]  ;;  %v5039_v9 = vld [vmem:[#allocation15 + $0x1a8] sm:$0xff]  ;;  %v5041_v23 = vld [vmem:[#allocation15 + $0x1b8] sm:$0xff] }
 0x966   :  { %v4949_v62 = vpop.permute.xlu1 %4948 }
 0x967   :  { %v13210_v44 = vsel %vm4951_vm9, %v7164_v31, %v4949_v62  ;;  %v8666_v31 = vpack.c.bf16 %v4983_v45, %v4981_v13  ;;  %v5007_v13 = vld [vmem:[#allocation15 + $0xa8] sm:$0xff]  ;;  %v5009_v45 = vld [vmem:[#allocation15 + $0xb8] sm:$0xff] }
 0x968   :  { %5066 = vrot.lane.b32.xlu0 %v13210_v44, %s9621_s23  ;;  %v5052_v26 = vsel %vm5051_vm10, %v13210_v44, 0.0 }
 0x969   :  { %5053 = vadd.xlane.f32.xlu1 %v5052_v26  ;;  %8667 = vmatpush1.bf16.msra.mxu0 %v8666_v31  ;;  %v8688_v31 = vpack.c.bf16 %v5009_v45, %v5007_v13  ;;  %v5038_v13 = vld [vmem:[#allocation15 + $0x1a0] sm:$0xff]  ;;  %v8720_v45 = vpack.c.bf16 %v5041_v23, %v5039_v9 }
 0x9da   :  { %v13216_v25 = vpop.permute.xlu0 %5066 }
 0x9db   :  { %v5069_v57 = vsel %vm5051_vm10, %v13216_v25, 0.0 }
 0x9dc   :  { %5070 = vadd.xlane.f32.xlu0 %v5069_v57 }
 0x9f6   :  { %v5054_v15 = vpop.xlane.xlu1 %5053 }
 0x9f7   :  { %v5055_v52 = vrot.slane %v5054_v15, 4 }
 0x9f9   :  { %v5056_v6 = vadd.f32 %v5055_v52, %v5054_v15 }
 0x9fb   :  { %v5057_v55 = vrot.slane %v5056_v6, 2 }
 0x9fd   :  { %v5058_v35 = vadd.f32 %v5057_v55, %v5056_v6 }
 0x9ff   :  { %v5059_v56 = vrot.slane %v5058_v35, 1 }
 0xa01   :  { %v5060_v10 = vadd.f32 %v5059_v56, %v5058_v35  ;;  %v4989_v35 = vld [vmem:[#allocation15 + $0x18] sm:$0xff] }
 0xa02   :  { %v8668_v56 = vpack.c.bf16 %v4989_v35, %v4987_v11  ;;  %v5024_v11 = vld [vmem:[#allocation15 + $0x130] sm:$0xff]  ;;  %v5027_v35 = vld [vmem:[#allocation15 + $0x148] sm:$0xff] }
 0xa03   :  { %9052 = vpush %v5060_v10  ;;  %v8672_v10 = vpack.c.bf16 %v4993_v18, %v4991_v8  ;;  %v8708_v12 = vpack.c.bf16 %v5029_v20, %v5027_v35  ;;  %v5028_v8 = vld [vmem:[#allocation15 + $0x150] sm:$0xff] }
 0xa04   :  { %8669 = vmatprep.subr.bf16.mxu1 %v8668_v56 }
 0xa05   :  { %8671 = vmatpush1.bf16.msra.mxu1 %v8670_v38  ;;  %v5026_v38 = vld [vmem:[#allocation15 + $0x140] sm:$0xff] }
 0xa06   :  { %8673 = vmatprep.subr.bf16.mxu1 %v8672_v10  ;;  %v5033_v10 = vld [vmem:[#allocation15 + $0x178] sm:$0xff] }
 0xa07   :  { %v8712_v34 = vpack.c.bf16 %v5033_v10, %v5031_v60 }
 0xa09   :  { %8675 = vmatpush1.bf16.msra.mxu1 %v8674_v53  ;;  %v8710_v53 = vpack.c.bf16 %v5028_v8, %v5026_v38 }
 0xa0a   :  { %8677 = vmatprep.subr.bf16.mxu1 %v8676_v3  ;;  %v5032_v3 = vld [vmem:[#allocation15 + $0x170] sm:$0xff] }
 0xa0d   :  { %8679 = vmatpush1.bf16.msra.mxu1 %v8678_v43  ;;  %v8714_v43 = vpack.c.bf16 %v5032_v3, %v5030_v47 }
 0xa0e   :  { %8681 = vmatprep.subr.bf16.mxu1 %v8680_v22 }
 0xa11   :  { %8683 = vmatpush1.bf16.msra.mxu1 %v8682_v50  ;;  %v8718_v50 = vpack.c.bf16 %v5036_v37, %v5034_v29 }
 0xa12   :  { %8685 = vmatprep.subr.bf16.mxu1 %v8684_v48 }
 0xa15   :  { %8687 = vmatpush1.bf16.msra.mxu1 %v8686_v30  ;;  %v5040_v30 = vld [vmem:[#allocation15 + $0x1b0] sm:$0xff] }
 0xa16   :  { %8689 = vmatprep.subr.bf16.mxu1 %v8688_v31  ;;  %v8722_v31 = vpack.c.bf16 %v5040_v30, %v5038_v13 }
 0xa34   :  { %s9053_s3 = spop %9052 }
 0xa35   :  { %s5062_s29 = smul.f32 0.0078125, %s9053_s3 }
 0xa37   :  { %v5063_v58 = vstv %s5062_s29 }
 0xa38   :  { %v5064_v36 = vsub.f32 %v13210_v44, %v5063_v58  ;;  %v5012_v58 = vld [vmem:[#allocation15 + $0xd0] sm:$0xff] }
 0xa69   :  { %v5071_v41 = vpop.xlane.xlu0 %5070 }
 0xa6a   :  { %v5072_v62 = vrot.slane %v5071_v41, 4 }
 0xa6c   :  { %v5073_v26 = vadd.f32 %v5072_v62, %v5071_v41  ;;  %v5006_v41 = vld [vmem:[#allocation15 + $0xa0] sm:$0xff]  ;;  %v5008_v62 = vld [vmem:[#allocation15 + $0xb0] sm:$0xff] }
 0xa6e   :  { %v5074_v57 = vrot.slane %v5073_v26, 2 }
 0xa70   :  { %v5075_v15 = vadd.f32 %v5074_v57, %v5073_v26  ;;  %v5011_v26 = vld [vmem:[#allocation15 + $0xc8] sm:$0xff]  ;;  %v5013_v57 = vld [vmem:[#allocation15 + $0xd8] sm:$0xff] }
 0xa72   :  { %v5076_v0 = vrot.slane %v5075_v15, 1 }
 0xa74   :  { %v5077_v54 = vadd.f32 %v5076_v0, %v5075_v15  ;;  %v8690_v15 = vpack.c.bf16 %v5008_v62, %v5006_v41  ;;  %v8692_v0 = vpack.c.bf16 %v5013_v57, %v5011_v26  ;;  %v5043_v41 = vld [vmem:[#allocation15 + $0x1c8] sm:$0xff]  ;;  %v5045_v62 = vld [vmem:[#allocation15 + $0x1d8] sm:$0xff]  ;;  %v5042_v26 = vld [vmem:[#allocation15 + $0x1c0] sm:$0xff] }
 0xa75   :  { %v8724_v57 = vpack.c.bf16 %v5045_v62, %v5043_v41  ;;  %v5318_v62 = vld [vmem:[#allocation17 + $0x8] sm:$0xff] }
 0xa76   :  { %9054 = vpush %v5077_v54  ;;  %v5010_v54 = vld [vmem:[#allocation15 + $0xc0] sm:$0xff]  ;;  %8691 = vmatpush1.bf16.msra.mxu1 %v8690_v15  ;;  %v5044_v15 = vld [vmem:[#allocation15 + $0x1d0] sm:$0xff] }
 0xa77   :  { %8693 = vmatprep.subr.bf16.mxu1 %v8692_v0  ;;  %v5047_v0 = vld [vmem:[#allocation15 + $0x1e8] sm:$0xff] }
 0xaa7   :  { %s9055_s5 = spop %9054 }
 0xaa8   :  { %s5079_s28 = smul.f32 0.0078125, %s9055_s5 }
 0xaaa   :  { %v5080_v52 = vstv %s5079_s28 }
 0xaab   :  { %v5081_v42 = vsub.f32 %v13210_v44, %v5080_v52  ;;  %v5015_v52 = vld [vmem:[#allocation15 + $0xe8] sm:$0xff] }
 0xaad   :  { %v5082_v2 = vsel %vm4951_vm9, %v5064_v36, %v5081_v42  ;;  %v5017_v36 = vld [vmem:[#allocation15 + $0xf8] sm:$0xff]  ;;  %v8694_v42 = vpack.c.bf16 %v5012_v58, %v5010_v54  ;;  %v8726_v58 = vpack.c.bf16 %v5044_v15, %v5042_v26 }
 0xaae   :  { %5159 = vmatmul.mubr.f32.vlgmr.msra.gmra.mrb[8].mxu0 %v5082_v2  ;;  %v8696_v2 = vpack.c.bf16 %v5017_v36, %v5015_v52  ;;  %v5049_v54 = vld [vmem:[#allocation15 + $0x1f8] sm:$0xff]  ;;  %v5046_v36 = vld [vmem:[#allocation15 + $0x1e0] sm:$0xff] }
 0xaaf   :  { %8695 = vmatpush1.bf16.msra.mxu1 %v8694_v42  ;;  %v8728_v52 = vpack.c.bf16 %v5049_v54, %v5047_v0  ;;  %v5048_v42 = vld [vmem:[#allocation15 + $0x1f0] sm:$0xff]  ;;  %v5320_v26 = vld [vmem:[#allocation17 + $0x18] sm:$0xff] }
 0xab0   :  { %8697 = vmatprep.subr.bf16.mxu1 %v8696_v2  ;;  %v8730_v2 = vpack.c.bf16 %v5048_v42, %v5046_v36  ;;  %v8732_v15 = vpack.c.bf16 %v5320_v26, %v5318_v62  ;;  %v5319_v0 = vld [vmem:[#allocation17 + $0x10] sm:$0xff]  ;;  %v5321_v36 = vld [vmem:[#allocation17 + $0x20] sm:$0xff]  ;;  %v5358_v62 = vld [vmem:[#allocation17 + $0x148] sm:$0xff] }
 0xab1   :  { %v5360_v26 = vld [vmem:[#allocation17 + $0x158] sm:$0xff] }
 0xab2   :  { %8733 = vmatprep.subr.bf16.mxu0 %v8732_v15  ;;  %v8772_v15 = vpack.c.bf16 %v5360_v26, %v5358_v62 }
 0xb81   :  { %v5160_v19 = vpop.f32.mrb[8].mxu0 }
 0xb82   :  { %v5161_v32 = vadd.f32 %v5160_v19, %v5087_v49  ;;  %v5162_v40 = vpop.f32.mrb[9].mxu0  ;;  %v5016_v49 = vld [vmem:[#allocation15 + $0xf0] sm:$0xff]  ;;  %v5021_v19 = vld [vmem:[#allocation15 + $0x118] sm:$0xff] }
 0xb83   :  { %v5163_v6 = vadd.f32 %v5162_v40, %v5091_v39  ;;  %v5019_v39 = vld [vmem:[#allocation15 + $0x108] sm:$0xff] }
 0xb84   :  { %v13227_v1 = vmax.f32 %v5161_v32, 0.0  ;;  %v8698_v32 = vpack.c.bf16 %v5016_v49, %v5014_v7  ;;  %v8700_v40 = vpack.c.bf16 %v5021_v19, %v5019_v39 }
 0xb85   :  { %v13229_v63 = vmax.f32 %v5163_v6, 0.0  ;;  %v5018_v6 = vld [vmem:[#allocation15 + $0x100] sm:$0xff] }
 0xb86   :  { %5181 = vrot.lane.b32.xlu1 %v13227_v1, %s9621_s23  ;;  %v5167_v44 = vsel %vm5051_vm10, %v13227_v1, 0.0  ;;  %8699 = vmatpush1.bf16.msra.mxu1 %v8698_v32 }
 0xb87   :  { %5211 = vrot.lane.b32.xlu0 %v13229_v63, %s9621_s23  ;;  %v5197_v55 = vsel %vm5051_vm10, %v13229_v63, 0.0  ;;  %8701 = vmatprep.subr.bf16.mxu1 %v8700_v40 }
 0xbaa   :  { %5168 = vadd.xlane.f32.xlu1 %v5167_v44  ;;  %v5020_v44 = vld [vmem:[#allocation15 + $0x110] sm:$0xff] }
 0xbae   :  { %5198 = vadd.xlane.f32.xlu1 %v5197_v55  ;;  %v5023_v55 = vld [vmem:[#allocation15 + $0x128] sm:$0xff] }
 0xbf8   :  { %v5182_v5 = vpop.permute.xlu1 %5181 }
 0xbf9   :  { %v5184_v17 = vsel %vm5051_vm10, %v5182_v5, 0.0  ;;  %v5212_v33 = vpop.permute.xlu0 %5211  ;;  %v5025_v5 = vld [vmem:[#allocation15 + $0x138] sm:$0xff] }
 0xbfa   :  { %5185 = vadd.xlane.f32.xlu0 %v5184_v17  ;;  %v5214_v16 = vsel %vm5051_vm10, %v5212_v33, 0.0  ;;  %v8702_v17 = vpack.c.bf16 %v5020_v44, %v5018_v6  ;;  %v8704_v33 = vpack.c.bf16 %v5025_v5, %v5023_v55 }
 0xbfc   :  { %8703 = vmatpush1.bf16.msra.mxu1 %v8702_v17 }
 0xbfd   :  { %8705 = vmatprep.subr.bf16.mxu1 %v8704_v33 }
 0xbfe   :  { %5215 = vadd.xlane.f32.xlu0 %v5214_v16  ;;  %v5022_v16 = vld [vmem:[#allocation15 + $0x120] sm:$0xff] }
 0xbff   :  { %v8706_v56 = vpack.c.bf16 %v5024_v11, %v5022_v16 }
 0xc01   :  { %8707 = vmatpush1.bf16.msra.mxu1 %v8706_v56 }
 0xc02   :  { %8709 = vmatprep.subr.bf16.mxu1 %v8708_v12 }
 0xc05   :  { %8711 = vmatpush1.bf16.msra.mxu1 %v8710_v53 }
 0xc06   :  { %8713 = vmatprep.subr.bf16.mxu1 %v8712_v34 }
 0xc09   :  { %8715 = vmatpush1.bf16.msra.mxu1 %v8714_v43 }
 0xc0a   :  { %8717 = vmatprep.subr.bf16.mxu1 %v8716_v21 }
 0xc0d   :  { %8719 = vmatpush1.bf16.msra.mxu1 %v8718_v50 }
 0xc0e   :  { %8721 = vmatprep.subr.bf16.mxu1 %v8720_v45 }
 0xc11   :  { %8723 = vmatpush1.bf16.msra.mxu1 %v8722_v31 }
 0xc12   :  { %8725 = vmatprep.subr.bf16.mxu1 %v8724_v57  ;;  %v5317_v57 = vld [vmem:[#allocation17] sm:$0xff] }
 0xc13   :  { %v8734_v54 = vpack.c.bf16 %v5319_v0, %v5317_v57  ;;  %v5357_v0 = vld [vmem:[#allocation17 + $0x140] sm:$0xff] }
 0xc15   :  { %8727 = vmatpush1.bf16.msra.mxu1 %v8726_v58  ;;  %8735 = vmatpush1.bf16.msra.mxu0 %v8734_v54  ;;  %v5322_v58 = vld [vmem:[#allocation17 + $0x28] sm:$0xff]  ;;  %v5359_v54 = vld [vmem:[#allocation17 + $0x150] sm:$0xff] }
 0xc16   :  { %8729 = vmatprep.subr.bf16.mxu1 %v8728_v52  ;;  %v5324_v52 = vld [vmem:[#allocation17 + $0x38] sm:$0xff] }
 0xc17   :  { %v8736_v42 = vpack.c.bf16 %v5324_v52, %v5322_v58  ;;  %v5362_v52 = vld [vmem:[#allocation17 + $0x168] sm:$0xff] }
 0xc19   :  { %8731 = vmatpush1.bf16.msra.mxu1 %v8730_v2  ;;  %v5323_v2 = vld [vmem:[#allocation17 + $0x30] sm:$0xff]  ;;  %8737 = vmatprep.subr.bf16.mxu0 %v8736_v42 }
 0xc37   :  { %v5169_v18 = vpop.xlane.xlu1 %5168 }
 0xc38   :  { %v5170_v27 = vrot.slane %v5169_v18, 4 }
 0xc3a   :  { %v5171_v4 = vadd.f32 %v5170_v27, %v5169_v18 }
 0xc3b   :  { %v5199_v7 = vpop.xlane.xlu1 %5198 }
 0xc3c   :  { %v5172_v14 = vrot.slane %v5171_v4, 2  ;;  %v5200_v49 = vrot.slane %v5199_v7, 4 }
 0xc3e   :  { %v5173_v22 = vadd.f32 %v5172_v14, %v5171_v4  ;;  %v5201_v39 = vadd.f32 %v5200_v49, %v5199_v7  ;;  %v5050_v14 = vld [vmem:[%s14835_s2] sm:$0x3]  ;;  %v8738_v7 = vpack.c.bf16 %v5323_v2, %v5321_v36  ;;  %v5326_v49 = vld [vmem:[#allocation17 + $0x48] sm:$0xff]  ;;  %v5364_v36 = vld [vmem:[#allocation17 + $0x178] sm:$0xff]  ;;  %v8774_v2 = vpack.c.bf16 %v5359_v54, %v5357_v0 }
 0xc3f   :  { %v5233_v43 = vrot.slane %v5050_v14, %v14828_v24 }
 0xc40   :  { %v5174_v28 = vrot.slane %v5173_v22, 1  ;;  %v5202_v19 = vrot.slane %v5201_v39, 2  ;;  %8739 = vmatpush1.bf16.msra.mxu0 %v8738_v7 }
 0xc42   :  { %v5175_v48 = vadd.f32 %v5174_v28, %v5173_v22  ;;  %v5203_v55 = vadd.f32 %v5202_v19, %v5201_v39  ;;  %v5237_v22 = vrot.slane %v5050_v14, %v14830_v51  ;;  %v5311_v28 = vsel %vm4951_vm9, 0.0, %v13216_v25  ;;  %v5328_v39 = vld [vmem:[#allocation17 + $0x58] sm:$0xff]  ;;  %v5325_v19 = vld [vmem:[#allocation17 + $0x40] sm:$0xff] }
 0xc43   :  { %v5348_v14 = vld [vmem:[#allocation17 + $0xf8] sm:$0xff] }
 0xc44   :  { %9056 = vpush %v5175_v48  ;;  %v5204_v11 = vrot.slane %v5203_v55, 1 }
 0xc46   :  { %v5205_v38 = vadd.f32 %v5204_v11, %v5203_v55  ;;  %v5336_v11 = vld [vmem:[#allocation17 + $0x98] sm:$0xff] }
 0xc75   :  { %s9057_s24 = spop %9056 }
 0xc76   :  { %s5177_s8 = smul.f32 0.0078125, %s9057_s24  ;;  %s14837_s24 = sld [smem:[#allocation46_spill]] }
 0xc78   :  { %v5178_v27 = vstv %s5177_s8  ;;  %s14838_s8 = smov 16  }
 0xc79   :  { %v5179_v3 = vsub.f32 %v13227_v1, %v5178_v27  ;;  %v5339_v27 = vld [vmem:[#allocation17 + $0xb0] sm:$0xff] }
 0xc87   :  { %v5186_v32 = vpop.xlane.xlu0 %5185 }
 0xc88   :  { %v5187_v40 = vrot.slane %v5186_v32, 4 }
 0xc8a   :  { %v5188_v6 = vadd.f32 %v5187_v40, %v5186_v32  ;;  %v8740_v32 = vpack.c.bf16 %v5328_v39, %v5326_v49  ;;  %v5327_v40 = vld [vmem:[#allocation17 + $0x50] sm:$0xff]  ;;  %v8776_v49 = vpack.c.bf16 %v5364_v36, %v5362_v52  ;;  %v5361_v39 = vld [vmem:[#allocation17 + $0x160] sm:$0xff] }
 0xc8b   :  { %v5216_v44 = vpop.xlane.xlu0 %5215  ;;  %v8742_v55 = vpack.c.bf16 %v5327_v40, %v5325_v19  ;;  %v5363_v19 = vld [vmem:[#allocation17 + $0x170] sm:$0xff]  ;;  %v5368_v40 = vld [vmem:[#allocation17 + $0x198] sm:$0xff] }
 0xc8c   :  { %v5189_v5 = vrot.slane %v5188_v6, 2  ;;  %v5217_v17 = vrot.slane %v5216_v44, 4  ;;  %8741 = vmatprep.subr.bf16.mxu0 %v8740_v32  ;;  %v5366_v32 = vld [vmem:[#allocation17 + $0x188] sm:$0xff] }
 0xc8d   :  { %8743 = vmatpush1.bf16.msra.mxu0 %v8742_v55 }
 0xc8e   :  { %v5218_v33 = vadd.f32 %v5217_v17, %v5216_v44  ;;  %v5190_v16 = vadd.f32 %v5189_v5, %v5188_v6  ;;  %v5330_v6 = vld [vmem:[#allocation17 + $0x68] sm:$0xff]  ;;  %v5332_v44 = vld [vmem:[#allocation17 + $0x78] sm:$0xff]  ;;  %v5329_v17 = vld [vmem:[#allocation17 + $0x60] sm:$0xff] }
 0xc8f   :  { %v8744_v5 = vpack.c.bf16 %v5332_v44, %v5330_v6  ;;  %v8778_v44 = vpack.c.bf16 %v5363_v19, %v5361_v39 }
 0xc90   :  { %v5219_v35 = vrot.slane %v5218_v33, 2  ;;  %v5191_v20 = vrot.slane %v5190_v16, 1 }
 0xc91   :  { %8745 = vmatprep.subr.bf16.mxu0 %v8744_v5  ;;  %v8780_v5 = vpack.c.bf16 %v5368_v40, %v5366_v32  ;;  %v5381_v40 = vld [vmem:[%s14836_s0] sm:$0x3] }
 0xc92   :  { %v5192_v56 = vadd.f32 %v5191_v20, %v5190_v16  ;;  %v5220_v12 = vadd.f32 %v5219_v35, %v5218_v33  ;;  %v5331_v33 = vld [vmem:[#allocation17 + $0x70] sm:$0xff]  ;;  %v5334_v16 = vld [vmem:[#allocation17 + $0x88] sm:$0xff] }
 0xc93   :  { %v8746_v35 = vpack.c.bf16 %v5331_v33, %v5329_v17  ;;  %v8748_v20 = vpack.c.bf16 %v5336_v11, %v5334_v16  ;;  %v5365_v17 = vld [vmem:[#allocation17 + $0x180] sm:$0xff]  ;;  %v5367_v33 = vld [vmem:[#allocation17 + $0x190] sm:$0xff] }
 0xc94   :  { %9058 = vpush %v5192_v56  ;;  %v5221_v8 = vrot.slane %v5220_v12, 1  ;;  %v5333_v56 = vld [vmem:[#allocation17 + $0x80] sm:$0xff]  ;;  %v8782_v11 = vpack.c.bf16 %v5367_v33, %v5365_v17 }
 0xc95   :  { %9060 = vpush %v5205_v38  ;;  %v5338_v38 = vld [vmem:[#allocation17 + $0xa8] sm:$0xff]  ;;  %8747 = vmatpush1.bf16.msra.mxu0 %v8746_v35 }
 0xc96   :  { %v5222_v18 = vadd.f32 %v5221_v8, %v5220_v12  ;;  %v5335_v12 = vld [vmem:[#allocation17 + $0x90] sm:$0xff]  ;;  %v5340_v8 = vld [vmem:[#allocation17 + $0xb8] sm:$0xff]  ;;  %8749 = vmatprep.subr.bf16.mxu0 %v8748_v20  ;;  %v5370_v20 = vld [vmem:[#allocation17 + $0x1a8] sm:$0xff] }
 0xc98   :  { %9062 = vpush %v5222_v18  ;;  %v8750_v18 = vpack.c.bf16 %v5335_v12, %v5333_v56  ;;  %v5372_v56 = vld [vmem:[#allocation17 + $0x1b8] sm:$0xff]  ;;  %v5369_v12 = vld [vmem:[#allocation17 + $0x1a0] sm:$0xff] }
 0xc9a   :  { %8751 = vmatpush1.bf16.msra.mxu0 %v8750_v18 }
 0xcc5   :  { %s9059_s26 = spop %9058 }
 0xcc6   :  { %s5194_s20 = smul.f32 0.0078125, %s9059_s26  ;;  %s9061_s30 = spop %9060 }
 0xcc7   :  { %s5207_s18 = smul.f32 0.0078125, %s9061_s30  ;;  %s9625_s26 = smov 48  }
 0xcc8   :  { %v5195_v60 = vstv %s5194_s20  ;;  %s9626_s20 = smov 112   ;;  %s9627_s30 = smov 80  }
 0xcc9   :  { %s9063_s7 = spop %9062  ;;  %v5208_v10 = vstv %s5207_s18  ;;  %v5196_v53 = vsub.f32 %v13227_v1, %v5195_v60  ;;  %v5312_v1 = vsel %vm4951_vm9, %v13216_v25, 0.0  ;;  %v8752_v60 = vpack.c.bf16 %v5340_v8, %v5338_v38  ;;  %v5371_v8 = vld [vmem:[#allocation17 + $0x1b0] sm:$0xff] }
 0xcca   :  { %s5224_s4 = smul.f32 0.0078125, %s9063_s7  ;;  %v5209_v34 = vsub.f32 %v13229_v63, %v5208_v10  ;;  %v5337_v10 = vld [vmem:[#allocation17 + $0xa0] sm:$0xff]  ;;  %v8784_v38 = vpack.c.bf16 %v5372_v56, %v5370_v20  ;;  %v8786_v18 = vpack.c.bf16 %v5371_v8, %v5369_v12 }
 0xccb   :  { %v5227_v61 = vsel %vm4951_vm9, %v5179_v3, %v5196_v53  ;;  %v5342_v53 = vld [vmem:[#allocation17 + $0xc8] sm:$0xff]  ;;  %8753 = vmatprep.subr.bf16.mxu0 %v8752_v60  ;;  %v5341_v3 = vld [vmem:[#allocation17 + $0xc0] sm:$0xff] }
 0xccc   :  { %v5225_v4 = vstv %s5224_s4  ;;  %v5374_v60 = vld [vmem:[#allocation17 + $0x1c8] sm:$0xff] }
 0xccd   :  { %v5226_v47 = vsub.f32 %v13229_v63, %v5225_v4  ;;  %v5344_v4 = vld [vmem:[#allocation17 + $0xd8] sm:$0xff] }
 0xccf   :  { %v5228_v46 = vsel %vm4951_vm9, %v5209_v34, %v5226_v47  ;;  %v8754_v34 = vpack.c.bf16 %v5339_v27, %v5337_v10  ;;  %v8756_v47 = vpack.c.bf16 %v5344_v4, %v5342_v53  ;;  %v5376_v10 = vld [vmem:[#allocation17 + $0x1d8] sm:$0xff]  ;;  %v5373_v27 = vld [vmem:[#allocation17 + $0x1c0] sm:$0xff]  ;;  %v5375_v4 = vld [vmem:[#allocation17 + $0x1d0] sm:$0xff] }
 0xcd0   :  { %5304 = vmatprep.mubr.f32.mxu1 %v5228_v46  ;;  %v5343_v46 = vld [vmem:[#allocation17 + $0xd0] sm:$0xff]  ;;  %v8788_v53 = vpack.c.bf16 %v5376_v10, %v5374_v60  ;;  %v5385_v60 = vld [vmem:[#allocation18 + $0x18] sm:$0xff]  ;;  %v5382_v10 = vld [vmem:[#allocation18] sm:$0xff] }
 0xcd1   :  { %5305 = vmatmul.mubr.f32.vlgmr.msra.gmra.mrb[8].mxu1 %v5227_v61  ;;  %v5346_v61 = vld [vmem:[#allocation17 + $0xe8] sm:$0xff]  ;;  %8755 = vmatpush1.bf16.msra.mxu0 %v8754_v34 }
 0xcd2   :  { %8757 = vmatprep.subr.bf16.mxu0 %v8756_v47  ;;  %v5378_v34 = vld [vmem:[#allocation17 + $0x1e8] sm:$0xff]  ;;  %v5380_v47 = vld [vmem:[#allocation17 + $0x1f8] sm:$0xff] }
 0xda4   :  { %v5306_v21 = vpop.f32.mrb[8].mxu1 }
 0xda5   :  { %v5307_v29 = vadd.f32 %v5306_v21, %v5233_v43  ;;  %v5308_v37 = vpop.f32.mrb[9].mxu1  ;;  %v8758_v43 = vpack.c.bf16 %v5343_v46, %v5341_v3  ;;  %v5345_v21 = vld [vmem:[#allocation17 + $0xe0] sm:$0xff]  ;;  %v8790_v3 = vpack.c.bf16 %v5375_v4, %v5373_v27  ;;  %v8792_v46 = vpack.c.bf16 %v5380_v47, %v5378_v34  ;;  %v5387_v34 = vld [vmem:[#allocation18 + $0x28] sm:$0xff]  ;;  %v5389_v47 = vld [vmem:[#allocation18 + $0x38] sm:$0xff] }
 0xda6   :  { %v5309_v63 = vadd.f32 %v5308_v37, %v5237_v22  ;;  %v8760_v22 = vpack.c.bf16 %v5348_v14, %v5346_v61  ;;  %v5350_v37 = vld [vmem:[#allocation17 + $0x108] sm:$0xff]  ;;  %v5377_v61 = vld [vmem:[#allocation17 + $0x1e0] sm:$0xff]  ;;  %v5379_v14 = vld [vmem:[#allocation17 + $0x1f0] sm:$0xff] }
 0xda7   :  { %v5313_v50 = vadd.f32 %v5311_v28, %v5307_v29  ;;  %v5347_v29 = vld [vmem:[#allocation17 + $0xf0] sm:$0xff]  ;;  %v5352_v28 = vld [vmem:[#allocation17 + $0x118] sm:$0xff]  ;;  %8759 = vmatpush1.bf16.msra.mxu0 %v8758_v43  ;;  %v8794_v43 = vpack.c.bf16 %v5379_v14, %v5377_v61 }
 0xda8   :  { %v5314_v48 = vadd.f32 %v5312_v1, %v5309_v63  ;;  %v8762_v63 = vpack.c.bf16 %v5347_v29, %v5345_v21  ;;  %8761 = vmatprep.subr.bf16.mxu0 %v8760_v22  ;;  %v5349_v1 = vld [vmem:[#allocation17 + $0x100] sm:$0xff]  ;;  %v5388_v61 = vld [vmem:[#allocation18 + $0x30] sm:$0xff] }
 0xda9   :  { %v13254_v9 = vmax.f32 %v5313_v50, 0.0  ;;  %v8764_v50 = vpack.c.bf16 %v5352_v28, %v5350_v37 }
 0xdaa   :  { %v13256_v23 = vmax.f32 %v5314_v48, 0.0  ;;  %v5351_v48 = vld [vmem:[#allocation17 + $0x110] sm:$0xff] }
 0xdab   :  { %5461 = vrot.lane.b32.xlu1 %v13254_v9, %s9621_s23  ;;  %v5447_v13 = vsel %vm5051_vm10, %v13254_v9, 0.0  ;;  %8763 = vmatpush1.bf16.msra.mxu0 %v8762_v63 }
 0xdac   :  { %5491 = vrot.lane.b32.xlu0 %v13256_v23, %s9621_s23  ;;  %v5477_v45 = vsel %vm5051_vm10, %v13256_v23, 0.0  ;;  %8765 = vmatprep.subr.bf16.mxu0 %v8764_v50 }
 0xdcf   :  { %5448 = vadd.xlane.f32.xlu1 %v5447_v13  ;;  %v5354_v13 = vld [vmem:[#allocation17 + $0x128] sm:$0xff] }
 0xdd3   :  { %5478 = vadd.xlane.f32.xlu1 %v5477_v45  ;;  %v5356_v45 = vld [vmem:[#allocation17 + $0x138] sm:$0xff] }
 0xe1d   :  { %v5462_v25 = vpop.permute.xlu1 %5461 }
 0xe1e   :  { %v5464_v30 = vsel %vm5051_vm10, %v5462_v25, 0.0  ;;  %v5492_v31 = vpop.permute.xlu0 %5491  ;;  %v8766_v25 = vpack.c.bf16 %v5351_v48, %v5349_v1 }
 0xe1f   :  { %5465 = vadd.xlane.f32.xlu0 %v5464_v30  ;;  %v5494_v41 = vsel %vm5051_vm10, %v5492_v31, 0.0  ;;  %v8768_v30 = vpack.c.bf16 %v5356_v45, %v5354_v13  ;;  %v5353_v31 = vld [vmem:[#allocation17 + $0x120] sm:$0xff] }
 0xe20   :  { %8767 = vmatpush1.bf16.msra.mxu0 %v8766_v25 }
 0xe21   :  { %8769 = vmatprep.subr.bf16.mxu0 %v8768_v30 }
 0xe23   :  { %5495 = vadd.xlane.f32.xlu0 %v5494_v41  ;;  %v5355_v41 = vld [vmem:[#allocation17 + $0x130] sm:$0xff] }
 0xe24   :  { %v8770_v57 = vpack.c.bf16 %v5355_v41, %v5353_v31 }
 0xe26   :  { %8771 = vmatpush1.bf16.msra.mxu0 %v8770_v57 }
 0xe27   :  { %8773 = vmatprep.subr.bf16.mxu0 %v8772_v15 }
 0xe2a   :  { %8775 = vmatpush1.bf16.msra.mxu0 %v8774_v2 }
 0xe2b   :  { %8777 = vmatprep.subr.bf16.mxu0 %v8776_v49 }
 0xe2e   :  { %8779 = vmatpush1.bf16.msra.mxu0 %v8778_v44  ;;  %v5517_v44 = vrot.slane %v5381_v40, %v14830_v51 }
 0xe2f   :  { %8781 = vmatprep.subr.bf16.mxu0 %v8780_v5 }
 0xe32   :  { %8783 = vmatpush1.bf16.msra.mxu0 %v8782_v11 }
 0xe33   :  { %8785 = vmatprep.subr.bf16.mxu0 %v8784_v38 }
 0xe36   :  { %8787 = vmatpush1.bf16.msra.mxu0 %v8786_v18  ;;  %v5383_v18 = vld [vmem:[#allocation18 + $0x8] sm:$0xff] }
 0xe37   :  { %8789 = vmatprep.subr.bf16.mxu0 %v8788_v53  ;;  %v8796_v27 = vpack.c.bf16 %v5385_v60, %v5383_v18  ;;  %v5384_v53 = vld [vmem:[#allocation18 + $0x10] sm:$0xff]  ;;  %v5418_v18 = vld [vmem:[#allocation18 + $0x120] sm:$0xff] }
 0xe38   :  { %v8798_v4 = vpack.c.bf16 %v5384_v53, %v5382_v10  ;;  %v5420_v60 = vld [vmem:[#allocation18 + $0x130] sm:$0xff]  ;;  %v5423_v10 = vld [vmem:[#allocation18 + $0x148] sm:$0xff] }
 0xe39   :  { %8797 = vmatprep.subr.bf16.mxu1 %v8796_v27  ;;  %v5425_v27 = vld [vmem:[#allocation18 + $0x158] sm:$0xff]  ;;  %v8834_v53 = vpack.c.bf16 %v5420_v60, %v5418_v18 }
 0xe3a   :  { %8791 = vmatpush1.bf16.msra.mxu0 %v8790_v3  ;;  %8799 = vmatpush1.bf16.msra.mxu1 %v8798_v4  ;;  %v5386_v3 = vld [vmem:[#allocation18 + $0x20] sm:$0xff]  ;;  %v8836_v4 = vpack.c.bf16 %v5425_v27, %v5423_v10 }
 0xe3b   :  { %8793 = vmatprep.subr.bf16.mxu0 %v8792_v46  ;;  %v8800_v46 = vpack.c.bf16 %v5389_v47, %v5387_v34  ;;  %v8802_v14 = vpack.c.bf16 %v5388_v61, %v5386_v3  ;;  %v5422_v34 = vld [vmem:[#allocation18 + $0x140] sm:$0xff]  ;;  %v5424_v47 = vld [vmem:[#allocation18 + $0x150] sm:$0xff]  ;;  %v5429_v61 = vld [vmem:[#allocation18 + $0x178] sm:$0xff] }
 0xe3d   :  { %8801 = vmatprep.subr.bf16.mxu1 %v8800_v46  ;;  %v5427_v46 = vld [vmem:[#allocation18 + $0x168] sm:$0xff] }
 0xe3e   :  { %8795 = vmatpush1.bf16.msra.mxu0 %v8794_v43  ;;  %v5391_v43 = vld [vmem:[#allocation18 + $0x48] sm:$0xff]  ;;  %8803 = vmatpush1.bf16.msra.mxu1 %v8802_v14 }
 0xe5c   :  { %v5449_v58 = vpop.xlane.xlu1 %5448 }
 0xe5d   :  { %v5450_v42 = vrot.slane %v5449_v58, 4 }
 0xe5f   :  { %v5451_v7 = vadd.f32 %v5450_v42, %v5449_v58 }
 0xe60   :  { %v5479_v22 = vpop.xlane.xlu1 %5478 }
 0xe61   :  { %v5452_v6 = vrot.slane %v5451_v7, 2  ;;  %v5480_v21 = vrot.slane %v5479_v22, 4 }
 0xe63   :  { %v5453_v55 = vadd.f32 %v5452_v6, %v5451_v7  ;;  %v5481_v29 = vadd.f32 %v5480_v21, %v5479_v22  ;;  %v5513_v6 = vrot.slane %v5381_v40, %v14828_v24  ;;  %v5393_v22 = vld [vmem:[#allocation18 + $0x58] sm:$0xff]  ;;  %v5390_v21 = vld [vmem:[#allocation18 + $0x40] sm:$0xff] }
 0xe65   :  { %v5454_v16 = vrot.slane %v5453_v55, 1  ;;  %v5482_v37 = vrot.slane %v5481_v29, 2 }
 0xe67   :  { %v5455_v35 = vadd.f32 %v5454_v16, %v5453_v55  ;;  %v5483_v48 = vadd.f32 %v5482_v37, %v5481_v29  ;;  %v8804_v29 = vpack.c.bf16 %v5393_v22, %v5391_v43  ;;  %v5392_v37 = vld [vmem:[#allocation18 + $0x50] sm:$0xff]  ;;  %v8838_v43 = vpack.c.bf16 %v5424_v47, %v5422_v34 }
 0xe69   :  { %9064 = vpush %v5455_v35  ;;  %v5484_v31 = vrot.slane %v5483_v48, 1  ;;  %8805 = vmatprep.subr.bf16.mxu1 %v8804_v29  ;;  %v5426_v29 = vld [vmem:[#allocation18 + $0x160] sm:$0xff] }
 0xe6b   :  { %v5485_v15 = vadd.f32 %v5484_v31, %v5483_v48  ;;  %v5394_v48 = vld [vmem:[#allocation18 + $0x60] sm:$0xff] }
 0xe9a   :  { %s9065_s21 = spop %9064 }
 0xe9b   :  { %s5457_s17 = smul.f32 0.0078125, %s9065_s21 }
 0xe9d   :  { %v5458_v36 = vstv %s5457_s17  ;;  %s14839_s17 = sld [smem:[#allocation47_spill]] }
 0xe9e   :  { %v5459_v39 = vsub.f32 %v13254_v9, %v5458_v36  ;;  %v5409_v36 = vld [vmem:[#allocation18 + $0xd8] sm:$0xff] }
 0xeac   :  { %v5466_v28 = vpop.xlane.xlu0 %5465 }
 0xead   :  { %v5467_v63 = vrot.slane %v5466_v28, 4 }
 0xeaf   :  { %v5468_v50 = vadd.f32 %v5467_v63, %v5466_v28  ;;  %v5395_v28 = vld [vmem:[#allocation18 + $0x68] sm:$0xff]  ;;  %v5397_v63 = vld [vmem:[#allocation18 + $0x78] sm:$0xff] }
 0xeb0   :  { %v5496_v1 = vpop.xlane.xlu0 %5495 }
 0xeb1   :  { %v5469_v13 = vrot.slane %v5468_v50, 2  ;;  %v5497_v45 = vrot.slane %v5496_v1, 4 }
 0xeb3   :  { %v5498_v25 = vadd.f32 %v5497_v45, %v5496_v1  ;;  %v5470_v30 = vadd.f32 %v5469_v13, %v5468_v50  ;;  %v8806_v50 = vpack.c.bf16 %v5392_v37, %v5390_v21  ;;  %v8808_v1 = vpack.c.bf16 %v5397_v63, %v5395_v28  ;;  %v5396_v13 = vld [vmem:[#allocation18 + $0x70] sm:$0xff]  ;;  %v5399_v45 = vld [vmem:[#allocation18 + $0x88] sm:$0xff]  ;;  %v5433_v63 = vld [vmem:[#allocation18 + $0x198] sm:$0xff] }
 0xeb4   :  { %v8840_v21 = vpack.c.bf16 %v5429_v61, %v5427_v46  ;;  %v5428_v37 = vld [vmem:[#allocation18 + $0x170] sm:$0xff]  ;;  %v5431_v28 = vld [vmem:[#allocation18 + $0x188] sm:$0xff] }
 0xeb5   :  { %v5499_v41 = vrot.slane %v5498_v25, 2  ;;  %v5471_v62 = vrot.slane %v5470_v30, 1  ;;  %8807 = vmatpush1.bf16.msra.mxu1 %v8806_v50 }
 0xeb6   :  { %8809 = vmatprep.subr.bf16.mxu1 %v8808_v1  ;;  %v8842_v1 = vpack.c.bf16 %v5428_v37, %v5426_v29 }
 0xeb7   :  { %v5472_v26 = vadd.f32 %v5471_v62, %v5470_v30  ;;  %v5500_v57 = vadd.f32 %v5499_v41, %v5498_v25  ;;  %v5401_v25 = vld [vmem:[#allocation18 + $0x98] sm:$0xff]  ;;  %v8810_v30 = vpack.c.bf16 %v5396_v13, %v5394_v48  ;;  %v5398_v41 = vld [vmem:[#allocation18 + $0x80] sm:$0xff]  ;;  %v5400_v62 = vld [vmem:[#allocation18 + $0x90] sm:$0xff]  ;;  %v8844_v13 = vpack.c.bf16 %v5433_v63, %v5431_v28 }
 0xeb8   :  { %v8812_v31 = vpack.c.bf16 %v5401_v25, %v5399_v45  ;;  %v5430_v45 = vld [vmem:[#allocation18 + $0x180] sm:$0xff]  ;;  %v5432_v25 = vld [vmem:[#allocation18 + $0x190] sm:$0xff] }
 0xeb9   :  { %9066 = vpush %v5472_v26  ;;  %v5501_v0 = vrot.slane %v5500_v57, 1  ;;  %v5403_v26 = vld [vmem:[#allocation18 + $0xa8] sm:$0xff]  ;;  %8811 = vmatpush1.bf16.msra.mxu1 %v8810_v30 }
 0xeba   :  { %9068 = vpush %v5485_v15  ;;  %v8814_v15 = vpack.c.bf16 %v5400_v62, %v5398_v41  ;;  %8813 = vmatprep.subr.bf16.mxu1 %v8812_v31  ;;  %v8846_v31 = vpack.c.bf16 %v5432_v25, %v5430_v45  ;;  %v5435_v62 = vld [vmem:[#allocation18 + $0x1a8] sm:$0xff] }
 0xebb   :  { %v5502_v54 = vadd.f32 %v5501_v0, %v5500_v57  ;;  %v5405_v57 = vld [vmem:[#allocation18 + $0xb8] sm:$0xff] }
 0xebc   :  { %v8816_v0 = vpack.c.bf16 %v5405_v57, %v5403_v26  ;;  %v5437_v26 = vld [vmem:[#allocation18 + $0x1b8] sm:$0xff]  ;;  %v5434_v57 = vld [vmem:[#allocation18 + $0x1a0] sm:$0xff] }
 0xebd   :  { %9070 = vpush %v5502_v54  ;;  %v5402_v54 = vld [vmem:[#allocation18 + $0xa0] sm:$0xff]  ;;  %8815 = vmatpush1.bf16.msra.mxu1 %v8814_v15  ;;  %v8848_v15 = vpack.c.bf16 %v5437_v26, %v5435_v62  ;;  %v5746_v62 = vld [vmem:[#allocation9 + $0x28] sm:$0xff]  ;;  %v5747_v26 = vld [vmem:[#allocation9 + $0x30] sm:$0xff] }
 0xebe   :  { %8817 = vmatprep.subr.bf16.mxu1 %v8816_v0  ;;  %v5436_v0 = vld [vmem:[#allocation18 + $0x1b0] sm:$0xff] }
 0xeea   :  { %s9067_s15 = spop %9066 }
 0xeeb   :  { %s5474_s16 = smul.f32 0.0078125, %s9067_s15  ;;  %s9069_s19 = spop %9068 }
 0xeec   :  { %s5487_s6 = smul.f32 0.0078125, %s9069_s19 }
 0xeed   :  { %v5475_v58 = vstv %s5474_s16 }
 0xeee   :  { %s9071_s9 = spop %9070  ;;  %v5488_v52 = vstv %s5487_s6  ;;  %v5476_v42 = vsub.f32 %v13254_v9, %v5475_v58  ;;  %v5404_v58 = vld [vmem:[#allocation18 + $0xb0] sm:$0xff] }
 0xeef   :  { %s5504_s13 = smul.f32 0.0078125, %s9071_s9  ;;  %v5489_v7 = vsub.f32 %v13256_v23, %v5488_v52  ;;  %v5407_v52 = vld [vmem:[#allocation18 + $0xc8] sm:$0xff] }
 0xef0   :  { %v5507_v32 = vsel %vm4951_vm9, %v5459_v39, %v5476_v42  ;;  %v8818_v42 = vpack.c.bf16 %v5404_v58, %v5402_v54  ;;  %v5411_v39 = vld [vmem:[#allocation18 + $0xe8] sm:$0xff]  ;;  %v8850_v54 = vpack.c.bf16 %v5436_v0, %v5434_v57 }
 0xef1   :  { %v5505_v2 = vstv %s5504_s13  ;;  %v5439_v58 = vld [vmem:[#allocation18 + $0x1c8] sm:$0xff] }
 0xef2   :  { %v5506_v49 = vsub.f32 %v13256_v23, %v5505_v2  ;;  %v8820_v2 = vpack.c.bf16 %v5409_v36, %v5407_v52  ;;  %8819 = vmatpush1.bf16.msra.mxu1 %v8818_v42  ;;  %v5441_v52 = vld [vmem:[#allocation18 + $0x1d8] sm:$0xff]  ;;  %v5438_v36 = vld [vmem:[#allocation18 + $0x1c0] sm:$0xff] }
 0xef3   :  { %v8852_v42 = vpack.c.bf16 %v5441_v52, %v5439_v58 }
 0xef4   :  { %v5508_v19 = vsel %vm4951_vm9, %v5489_v7, %v5506_v49  ;;  %v5406_v7 = vld [vmem:[#allocation18 + $0xc0] sm:$0xff]  ;;  %v5408_v49 = vld [vmem:[#allocation18 + $0xd0] sm:$0xff]  ;;  %8821 = vmatprep.subr.bf16.mxu1 %v8820_v2 }
 0xef5   :  { %5584 = vmatprep.mubr.f32.mxu0 %v5508_v19  ;;  %v5413_v19 = vld [vmem:[#allocation18 + $0xf8] sm:$0xff]  ;;  %v5440_v2 = vld [vmem:[#allocation18 + $0x1d0] sm:$0xff] }
 0xef6   :  { %5585 = vmatmul.mubr.f32.vlgmr.msra.gmra.mrb[10].mxu0 %v5507_v32  ;;  %v8822_v32 = vpack.c.bf16 %v5408_v49, %v5406_v7  ;;  %v8824_v40 = vpack.c.bf16 %v5413_v19, %v5411_v39  ;;  %v5443_v7 = vld [vmem:[#allocation18 + $0x1e8] sm:$0xff]  ;;  %v5445_v49 = vld [vmem:[#allocation18 + $0x1f8] sm:$0xff]  ;;  %v8854_v39 = vpack.c.bf16 %v5440_v2, %v5438_v36 }
 0xef7   :  { %v8856_v19 = vpack.c.bf16 %v5445_v49, %v5443_v7  ;;  %7329 = vmatprep.mubr.msk.f32.mxu0 %vm9624_vm11, %v9622_v59 }
 0xef8   :  { %8823 = vmatpush1.bf16.msra.mxu1 %v8822_v32  ;;  %v5442_v32 = vld [vmem:[#allocation18 + $0x1e0] sm:$0xff] }
 0xef9   :  { %8825 = vmatprep.subr.bf16.mxu1 %v8824_v40  ;;  %v5444_v40 = vld [vmem:[#allocation18 + $0x1f0] sm:$0xff] }
 0xfc9   :  { %v5586_v55 = vpop.f32.mrb[10].mxu0 }
 0xfca   :  { %v5587_v5 = vadd.f32 %v5586_v55, %v5513_v6  ;;  %v5588_v17 = vpop.f32.mrb[11].mxu0  ;;  %v5410_v6 = vld [vmem:[#allocation18 + $0xe0] sm:$0xff]  ;;  %v5415_v55 = vld [vmem:[#allocation18 + $0x108] sm:$0xff] }
 0xfcb   :  { %v5589_v33 = vadd.f32 %v5588_v17, %v5517_v44  ;;  %v5412_v44 = vld [vmem:[#allocation18 + $0xf0] sm:$0xff] }
 0xfcc   :  { %v13277_v16 = vmax.f32 %v5587_v5, 0.0  ;;  %v5417_v5 = vld [vmem:[#allocation18 + $0x118] sm:$0xff]  ;;  %v8826_v17 = vpack.c.bf16 %v5412_v44, %v5410_v6  ;;  %v5741_v6 = vld [vmem:[#allocation9] sm:$0xff]  ;;  %v5742_v44 = vld [vmem:[#allocation9 + $0x8] sm:$0xff] }
 0xfcd   :  { %v13279_v11 = vmax.f32 %v5589_v33, 0.0  ;;  %v8828_v33 = vpack.c.bf16 %v5417_v5, %v5415_v55  ;;  %v5743_v55 = vld [vmem:[#allocation9 + $0x10] sm:$0xff]  ;;  %v8858_v5 = vpack.c.bf16 %v5444_v40, %v5442_v32 }
 0xfce   :  { %5607 = vrot.lane.b32.xlu1 %v13277_v16, %s9621_s23  ;;  %v5593_v35 = vsel %vm5051_vm10, %v13277_v16, 0.0  ;;  %8827 = vmatpush1.bf16.msra.mxu1 %v8826_v17  ;;  %v9623_v17 = vmov 0.0|0.0  }
 0xfcf   :  { %5637 = vrot.lane.b32.xlu0 %v13279_v11, %s9621_s23  ;;  %v5623_v20 = vsel %vm5051_vm10, %v13279_v11, 0.0  ;;  %8829 = vmatprep.subr.bf16.mxu1 %v8828_v33  ;;  %v13292_v33 = vpack.c.bf16 %v5742_v44, %v5741_v6 }
 0xfd0   :  { %8860 = vmatprep.subr.bf16.mxu0 %v9623_v17 }
 0xfd1   :  { %8862 = vmatpush3.bf16.msra.mxu0 %v13292_v33 }
 0xfd2   :  { %8863 = vmatprep.subr.bf16.mxu0 %v9623_v17 }
 0xff2   :  { %5594 = vadd.xlane.f32.xlu1 %v5593_v35  ;;  %v5414_v35 = vld [vmem:[#allocation18 + $0x100] sm:$0xff] }
 0xff6   :  { %5624 = vadd.xlane.f32.xlu1 %v5623_v20  ;;  %v5416_v20 = vld [vmem:[#allocation18 + $0x110] sm:$0xff] }
0x1040   :  { %v5608_v56 = vpop.permute.xlu1 %5607 }
0x1041   :  { %v5610_v12 = vsel %vm5051_vm10, %v5608_v56, 0.0  ;;  %v5638_v38 = vpop.permute.xlu0 %5637  ;;  %v5419_v56 = vld [vmem:[#allocation18 + $0x128] sm:$0xff] }
0x1042   :  { %5611 = vadd.xlane.f32.xlu0 %v5610_v12  ;;  %v5640_v8 = vsel %vm5051_vm10, %v5638_v38, 0.0  ;;  %v5421_v12 = vld [vmem:[#allocation18 + $0x138] sm:$0xff]  ;;  %v8830_v38 = vpack.c.bf16 %v5416_v20, %v5414_v35 }
0x1043   :  { %v5744_v35 = vld [vmem:[#allocation9 + $0x18] sm:$0xff] }
0x1044   :  { %8831 = vmatpush1.bf16.msra.mxu1 %v8830_v38  ;;  %v13295_v20 = vpack.c.bf16 %v5744_v35, %v5743_v55 }
0x1046   :  { %5641 = vadd.xlane.f32.xlu0 %v5640_v8  ;;  %v8832_v8 = vpack.c.bf16 %v5421_v12, %v5419_v56  ;;  %8865 = vmatpush3.bf16.msra.mxu0 %v13295_v20 }
0x1047   :  { %8866 = vmatprep.subr.bf16.mxu0 %v9623_v17 }
0x1048   :  { %8833 = vmatprep.subr.bf16.mxu1 %v8832_v8 }
0x1049   :  { %8835 = vmatpush1.bf16.msra.mxu1 %v8834_v53 }
0x104a   :  { %8837 = vmatprep.subr.bf16.mxu1 %v8836_v4 }
0x104d   :  { %8839 = vmatpush1.bf16.msra.mxu1 %v8838_v43 }
0x104e   :  { %8841 = vmatprep.subr.bf16.mxu1 %v8840_v21 }
0x1051   :  { %8843 = vmatpush1.bf16.msra.mxu1 %v8842_v1 }
0x1052   :  { %8845 = vmatprep.subr.bf16.mxu1 %v8844_v13 }
0x1055   :  { %8847 = vmatpush1.bf16.msra.mxu1 %v8846_v31 }
0x1056   :  { %8849 = vmatprep.subr.bf16.mxu1 %v8848_v15  ;;  %v5446_v15 = vld [vmem:[%s14837_s24] sm:$0x3] }
0x1057   :  { %v5659_v0 = vrot.slane %v5446_v15, %v14828_v24 }
0x1059   :  { %8851 = vmatpush1.bf16.msra.mxu1 %v8850_v54  ;;  %v5663_v54 = vrot.slane %v5446_v15, %v14830_v51 }
0x105a   :  { %8853 = vmatprep.subr.bf16.mxu1 %v8852_v42 }
0x105d   :  { %8855 = vmatpush1.bf16.msra.mxu1 %v8854_v39 }
0x105e   :  { %8857 = vmatprep.subr.bf16.mxu1 %v8856_v19 }
0x1061   :  { %8859 = vmatpush1.bf16.msra.mxu1 %v8858_v5 }
0x1062   :  { %8896 = vmatprep.subr.bf16.mxu1 %v9623_v17 }
0x107f   :  { %v5595_v3 = vpop.xlane.xlu1 %5594 }
0x1080   :  { %v5596_v14 = vrot.slane %v5595_v3, 4 }
0x1082   :  { %v5597_v22 = vadd.f32 %v5596_v14, %v5595_v3 }
0x1083   :  { %v5625_v56 = vpop.xlane.xlu1 %5624 }
0x1084   :  { %v5598_v50 = vrot.slane %v5597_v22, 2  ;;  %v5626_v12 = vrot.slane %v5625_v56, 4 }
0x1086   :  { %v5599_v48 = vadd.f32 %v5598_v50, %v5597_v22  ;;  %v5627_v38 = vadd.f32 %v5626_v12, %v5625_v56 }
0x1088   :  { %v5600_v30 = vrot.slane %v5599_v48, 1  ;;  %v5628_v8 = vrot.slane %v5627_v38, 2 }
0x108a   :  { %v5601_v41 = vadd.f32 %v5600_v30, %v5599_v48  ;;  %v5629_v53 = vadd.f32 %v5628_v8, %v5627_v38 }
0x108c   :  { %9072 = vpush %v5601_v41  ;;  %v5630_v46 = vrot.slane %v5629_v53, 1  ;;  %v5745_v41 = vld [vmem:[#allocation9 + $0x20] sm:$0xff] }
0x108e   :  { %v5631_v21 = vadd.f32 %v5630_v46, %v5629_v53 }
0x10bd   :  { %s9073_s1 = spop %9072 }
0x10be   :  { %s5603_s11 = smul.f32 0.0078125, %s9073_s1 }
0x10c0   :  { %v5604_v50 = vstv %s5603_s11 }
0x10c1   :  { %v5605_v25 = vsub.f32 %v13277_v16, %v5604_v50  ;;  %v6066_v50 = vld [vmem:[#allocation20 + $0x28] sm:$0xff] }
0x10cf   :  { %v5612_v18 = vpop.xlane.xlu0 %5611 }
0x10d0   :  { %v5613_v60 = vrot.slane %v5612_v18, 4 }
0x10d2   :  { %v5614_v10 = vadd.f32 %v5613_v60, %v5612_v18 }
0x10d3   :  { %v5642_v27 = vpop.xlane.xlu0 %5641 }
0x10d4   :  { %v5615_v4 = vrot.slane %v5614_v10, 2  ;;  %v5643_v34 = vrot.slane %v5642_v27, 4 }
0x10d6   :  { %v5644_v47 = vadd.f32 %v5643_v34, %v5642_v27  ;;  %v5616_v3 = vadd.f32 %v5615_v4, %v5614_v10  ;;  %v6061_v4 = vld [vmem:[#allocation20] sm:$0xff]  ;;  %v6062_v34 = vld [vmem:[#allocation20 + $0x8] sm:$0xff] }
0x10d8   :  { %v5645_v61 = vrot.slane %v5644_v47, 2  ;;  %v5617_v14 = vrot.slane %v5616_v3, 1 }
0x10da   :  { %v5618_v43 = vadd.f32 %v5617_v14, %v5616_v3  ;;  %v5646_v22 = vadd.f32 %v5645_v61, %v5644_v47  ;;  %v8909_v47 = vpack.c.bf16 %v6062_v34, %v6061_v4 }
0x10dc   :  { %9074 = vpush %v5618_v43  ;;  %v5647_v29 = vrot.slane %v5646_v22, 1 }
0x10dd   :  { %9076 = vpush %v5631_v21 }
0x10de   :  { %v5648_v37 = vadd.f32 %v5647_v29, %v5646_v22  ;;  %v6063_v29 = vld [vmem:[#allocation20 + $0x10] sm:$0xff] }
0x10e0   :  { %9078 = vpush %v5648_v37  ;;  %v6064_v37 = vld [vmem:[#allocation20 + $0x18] sm:$0xff] }
0x110d   :  { %s9075_s22 = spop %9074 }
0x110e   :  { %s5620_s25 = smul.f32 0.0078125, %s9075_s22  ;;  %s9077_s3 = spop %9076 }
0x110f   :  { %s5633_s29 = smul.f32 0.0078125, %s9077_s3 }
0x1110   :  { %v5621_v28 = vstv %s5620_s25 }
0x1111   :  { %s9079_s5 = spop %9078  ;;  %v5634_v63 = vstv %s5633_s29  ;;  %v5622_v1 = vsub.f32 %v13277_v16, %v5621_v28  ;;  %v5748_v16 = vld [vmem:[#allocation9 + $0x38] sm:$0xff]  ;;  %v8912_v28 = vpack.c.bf16 %v6064_v37, %v6063_v29  ;;  %v6070_v29 = vld [vmem:[#allocation21] sm:$0xff]  ;;  %v6071_v37 = vld [vmem:[#allocation21 + $0x8] sm:$0xff] }
0x1112   :  { %s5650_s28 = smul.f32 0.0078125, %s9079_s5  ;;  %v5635_v13 = vsub.f32 %v13279_v11, %v5634_v63  ;;  %v8870_v57 = vpack.c.bf16 %v5748_v16, %v5747_v26  ;;  %v6065_v63 = vld [vmem:[#allocation20 + $0x20] sm:$0xff] }
0x1113   :  { %v5653_v31 = vsel %vm4951_vm9, %v5605_v25, %v5622_v1  ;;  %v8915_v1 = vpack.c.bf16 %v6066_v50, %v6065_v63  ;;  %v8921_v63 = vpack.c.bf16 %v6071_v37, %v6070_v29  ;;  %v6073_v50 = vld [vmem:[#allocation21 + $0x18] sm:$0xff] }
0x1114   :  { %v5651_v48 = vstv %s5650_s28 }
0x1115   :  { %v5652_v45 = vsub.f32 %v13279_v11, %v5651_v48  ;;  %v8867_v11 = vpack.c.bf16 %v5746_v62, %v5745_v41  ;;  %v6067_v48 = vld [vmem:[#allocation20 + $0x30] sm:$0xff] }
0x1117   :  { %v5654_v30 = vsel %vm4951_vm9, %v5635_v13, %v5652_v45  ;;  %8868 = vmatpush3.bf16.msra.mxu0 %v8867_v11  ;;  %v6068_v13 = vld [vmem:[#allocation20 + $0x38] sm:$0xff] }
0x1118   :  { %5730 = vmatprep.mubr.f32.mxu1 %v5654_v30  ;;  %8869 = vmatprep.subr.bf16.mxu0 %v9623_v17  ;;  %v8918_v45 = vpack.c.bf16 %v6068_v13, %v6067_v48  ;;  %v6074_v48 = vld [vmem:[#allocation21 + $0x20] sm:$0xff]  ;;  %v6075_v13 = vld [vmem:[#allocation21 + $0x28] sm:$0xff] }
0x1119   :  { %5731 = vmatmul.mubr.f32.vlgmr.msra.gmra.mrb[10].mxu1 %v5653_v31 }
0x111a   :  { %8898 = vmatpush3.bf16.msra.mxu1 %v13292_v33  ;;  %7386 = vmatprep.mubr.msk.f32.mxu1 %vm9624_vm11, %v9622_v59 }
0x111b   :  { %8899 = vmatprep.subr.bf16.mxu1 %v9623_v17  ;;  %8871 = vmatpush3.bf16.msra.mxu0 %v8870_v57 }
0x111c   :  { %8872 = vmatprep.subr.bf16.mxu0 %v9623_v17 }
0x111e   :  { %8901 = vmatpush3.bf16.msra.mxu1 %v13295_v20 }
0x111f   :  { %8902 = vmatprep.subr.bf16.mxu1 %v9623_v17 }
0x1122   :  { %8904 = vmatpush3.bf16.msra.mxu1 %v8867_v11 }
0x1123   :  { %8905 = vmatprep.subr.bf16.mxu1 %v9623_v17 }
0x1126   :  { %8907 = vmatpush3.bf16.msra.mxu1 %v8870_v57 }
0x1127   :  { %8920 = vmatprep.subr.bf16.mxu1 %v9623_v17 }
0x11ec   :  { %v5732_v58 = vpop.f32.mrb[10].mxu1 }
0x11ed   :  { %v5733_v52 = vadd.f32 %v5732_v58, %v5659_v0  ;;  %v5734_v36 = vpop.f32.mrb[11].mxu1 }
0x11ee   :  { %v5735_v42 = vadd.f32 %v5734_v36, %v5663_v54 }
0x11ef   :  { %v5737_v2 = vadd.f32 %v5733_v52, %v13254_v9 }
0x11f0   :  { %v5738_v7 = vadd.f32 %v5735_v42, %v13256_v23 }
0x11f1   :  { %v5739_v49 = vmax.f32 %v5737_v2, 0.0 }
0x11f2   :  { %v5740_v39 = vmax.f32 %v5738_v7, 0.0 }
0x11f3   :  { %5822 = vrot.lane.b32.xlu1 %v5739_v49, %s9621_s23  ;;  %7330 = vmatmul.mubr.msk.f32.vlgmr.msra.gmra.mrb[12].mxu0 %vm4951_vm9, %v5739_v49 }
0x11f4   :  { %5969 = vrot.lane.b32.xlu0 %v5740_v39, %s9621_s23  ;;  %8874 = vmatpush3.bf16.msra.mxu0 %v13292_v33 }
0x11f5   :  { %8875 = vmatprep.subr.bf16.mxu0 %v9623_v17  ;;  %7348 = vmatprep.mubr.msk.f32.mxu0 %vm9624_vm11, %v9622_v59 }
0x11f8   :  { %8877 = vmatpush3.bf16.msra.mxu0 %v13295_v20 }
0x11f9   :  { %8878 = vmatprep.subr.bf16.mxu0 %v9623_v17 }
0x11fc   :  { %8880 = vmatpush3.bf16.msra.mxu0 %v8867_v11 }
0x11fd   :  { %8881 = vmatprep.subr.bf16.mxu0 %v9623_v17 }
0x1200   :  { %8883 = vmatpush3.bf16.msra.mxu0 %v8870_v57 }
0x1201   :  { %8884 = vmatprep.subr.bf16.mxu0 %v9623_v17 }
0x1265   :  { %v5823_v24 = vpop.permute.xlu1 %5822 }
0x1266   :  { %v5970_v51 = vpop.permute.xlu0 %5969  ;;  %7349 = vmatmul.mubr.msk.f32.vlgmr.msra.gmra.mrb[14].mxu0 %vm4951_vm9, %v5823_v24 }
0x1267   :  { %8886 = vmatpush3.bf16.msra.mxu0 %v13292_v33  ;;  %7387 = vmatmul.mubr.msk.f32.vlgmr.msra.gmra.mrb[12].mxu1 %vm4951_vm9, %v5970_v51 }
0x1268   :  { %8887 = vmatprep.subr.bf16.mxu0 %v9623_v17  ;;  %7367 = vmatprep.mubr.msk.f32.mxu0 %vm9624_vm11, %v9622_v59 }
0x1269   :  { %7440 = vmatprep.mubr.msk.f32.mxu1 %vm9624_vm11, %v9622_v59  ;;  %8922 = vmatpush3.bf16.msra.mxu1 %v8921_v63 }
0x126a   :  { %8923 = vmatprep.subr.bf16.mxu1 %v9623_v17 }
0x126b   :  { %8889 = vmatpush3.bf16.msra.mxu0 %v13295_v20 }
0x126c   :  { %8890 = vmatprep.subr.bf16.mxu0 %v9623_v17 }
0x126f   :  { %8892 = vmatpush3.bf16.msra.mxu0 %v8867_v11 }
0x1270   :  { %8893 = vmatprep.subr.bf16.mxu0 %v9623_v17 }
0x1273   :  { %8895 = vmatpush3.bf16.msra.mxu0 %v8870_v57 }
0x1274   :  { %8908 = vmatprep.subr.bf16.mxu0 %v9623_v17 }
0x1276   :  { %7368 = vmatmul.mubr.msk.f32.vlgmr.msra.gmra.mrb[16].mxu0 %vm4951_vm9, %v5740_v39 }
0x1277   :  { %7405 = vmatprep.mubr.msk.f32.mxu0 %vm9624_vm11, %v9622_v59  ;;  %8910 = vmatpush3.bf16.msra.mxu0 %v8909_v47 }
0x1278   :  { %8911 = vmatprep.subr.bf16.mxu0 %v9623_v17 }
0x127b   :  { %8913 = vmatpush3.bf16.msra.mxu0 %v8912_v28  ;;  %v6072_v28 = vld [vmem:[#allocation21 + $0x10] sm:$0xff] }
0x127c   :  { %8914 = vmatprep.subr.bf16.mxu0 %v9623_v17 }
0x127f   :  { %8916 = vmatpush3.bf16.msra.mxu0 %v8915_v1  ;;  %v8924_v1 = vpack.c.bf16 %v6073_v50, %v6072_v28 }
0x1280   :  { %8917 = vmatprep.subr.bf16.mxu0 %v9623_v17 }
0x1281   :  { %8925 = vmatpush3.bf16.msra.mxu1 %v8924_v1 }
0x1282   :  { %8926 = vmatprep.subr.bf16.mxu1 %v9623_v17 }
0x1283   :  { %8919 = vmatpush3.bf16.msra.mxu0 %v8918_v45  ;;  %v8927_v45 = vpack.c.bf16 %v6075_v13, %v6074_v48 }
0x1284   :  { %8944 = vmatprep.subr.bf16.mxu0 %v9623_v17 }
0x1285   :  { %8928 = vmatpush3.bf16.msra.mxu1 %v8927_v45 }
0x1286   :  { %8929 = vmatprep.subr.bf16.mxu1 %v9623_v17 }
0x12c6   :  { %v5818_v9 = vpop.f32.mrb[12].mxu0 }
0x12c7   :  { %v7331_v23 = vpop.f32.mrb[13].mxu0 }
0x1339   :  { %v5892_v19 = vpop.f32.mrb[14].mxu0 }
0x133a   :  { %v6039_v32 = vpop.f32.mrb[12].mxu1  ;;  %6044 = vrot.lane.b32.xlu1 %v5892_v19, %s14838_s8  ;;  %v7350_v40 = vpop.f32.mrb[15].mxu0 }
0x133b   :  { %6052 = vrot.lane.b32.xlu0 %v6039_v32, %s9625_s26  ;;  %v7388_v6 = vpop.f32.mrb[13].mxu1 }
0x1349   :  { %v5965_v44 = vpop.f32.mrb[16].mxu0 }
0x134a   :  { %6048 = vrot.lane.b32.xlu1 %v5965_v44, %s14186_s10  ;;  %v7369_v55 = vpop.f32.mrb[17].mxu0 }
0x13ac   :  { %v6045_v5 = vpop.permute.xlu1 %6044 }
0x13ad   :  { %v6056_v33 = vsel %vm6055_vm12, %v5818_v9, %v6045_v5  ;;  %v6053_v20 = vpop.permute.xlu0 %6052 }
0x13bc   :  { %v6049_v35 = vpop.permute.xlu1 %6048 }
0x13bd   :  { %v6058_v56 = vsel %vm6057_vm13, %v6056_v33, %v6049_v35  ;;  %v7124_v35 = vld [vmem:[%s14839_s17] ss:$0 sm:$0xff] }
0x13be   :  { %v13356_v12 = vsel %vm6059_vm14, %v6058_v56, %v6053_v20 }
0x13bf   :  { %6118 = vrot.lane.b32.xlu0 %v13356_v12, %s14166_s14  ;;  %6102 = vrot.lane.b32.xlu1 %v13356_v12, %s9626_s20  ;;  %v6088_v38 = vsel %vm6087_vm15, %v13356_v12, 0.0 }
0x13c3   :  { %6134 = vrot.lane.b32.xlu1 %v13356_v12, %s9627_s30 }
0x13de   :  { %6089 = vadd.xlane.f32.xlu0 %v6088_v38 }
0x1431   :  { %v6119_v8 = vpop.permute.xlu0 %6118  ;;  %v6103_v18 = vpop.permute.xlu1 %6102 }
0x1432   :  { %v6121_v60 = vsel %vm6087_vm15, %v6119_v8, 0.0  ;;  %v6105_v10 = vsel %vm6087_vm15, %v6103_v18, 0.0 }
0x1433   :  { %6106 = vadd.xlane.f32.xlu1 %v6105_v10  ;;  %6122 = vadd.xlane.f32.xlu0 %v6121_v60 }
0x1435   :  { %v6135_v27 = vpop.permute.xlu1 %6134 }
0x1436   :  { %v6137_v53 = vsel %vm6087_vm15, %v6135_v27, 0.0 }
0x1437   :  { %6138 = vadd.xlane.f32.xlu0 %v6137_v53 }
0x146b   :  { %v6090_v3 = vpop.xlane.xlu0 %6089 }
0x146c   :  { %v6091_v46 = vrot.slane %v6090_v3, 4 }
0x146e   :  { %v6092_v61 = vadd.f32 %v6091_v46, %v6090_v3 }
0x1470   :  { %v6093_v14 = vrot.slane %v6092_v61, 2 }
0x1472   :  { %v6094_v43 = vadd.f32 %v6093_v14, %v6092_v61 }
0x1474   :  { %v6095_v22 = vrot.slane %v6094_v43, 1 }
0x1476   :  { %v6096_v21 = vadd.f32 %v6095_v22, %v6094_v43 }
0x1478   :  { %9080 = vpush %v6096_v21 }
0x14a9   :  { %s9081_s2 = spop %9080 }
0x14aa   :  { %s6098_s18 = smul.f32 0.03125, %s9081_s2 }
0x14ac   :  { %v6099_v51 = vstv %s6098_s18 }
0x14ad   :  { %v6100_v23 = vsub.f32 %v13356_v12, %v6099_v51 }
0x14c0   :  { %v6107_v25 = vpop.xlane.xlu1 %6106  ;;  %v6123_v30 = vpop.xlane.xlu0 %6122 }
0x14c1   :  { %v6108_v31 = vrot.slane %v6107_v25, 4  ;;  %v6124_v41 = vrot.slane %v6123_v30, 4 }
0x14c3   :  { %v6109_v62 = vadd.f32 %v6108_v31, %v6107_v25  ;;  %v6125_v11 = vadd.f32 %v6124_v41, %v6123_v30 }
0x14c4   :  { %v6139_v26 = vpop.xlane.xlu0 %6138 }
0x14c5   :  { %v6110_v16 = vrot.slane %v6109_v62, 2  ;;  %v6126_v57 = vrot.slane %v6125_v11, 2  ;;  %v6140_v15 = vrot.slane %v6139_v26, 4 }
0x14c7   :  { %v6141_v0 = vadd.f32 %v6140_v15, %v6139_v26  ;;  %v6111_v54 = vadd.f32 %v6110_v16, %v6109_v62  ;;  %v6127_v58 = vadd.f32 %v6126_v57, %v6125_v11  ;;  %v6076_v11 = vld [vmem:[#allocation21 + $0x30] sm:$0xff]  ;;  %v6077_v26 = vld [vmem:[#allocation21 + $0x38] sm:$0xff]  ;;  %v6078_v15 = vld [vmem:[#allocation21 + $0x40] sm:$0xff] }
0x14c8   :  { %v8930_v16 = vpack.c.bf16 %v6077_v26, %v6076_v11 }
0x14c9   :  { %v6142_v52 = vrot.slane %v6141_v0, 2  ;;  %v6112_v36 = vrot.slane %v6111_v54, 1  ;;  %v6128_v42 = vrot.slane %v6127_v58, 1 }
0x14ca   :  { %8931 = vmatpush3.bf16.msra.mxu1 %v8930_v16 }
0x14cb   :  { %v6113_v2 = vadd.f32 %v6112_v36, %v6111_v54  ;;  %v6129_v7 = vadd.f32 %v6128_v42, %v6127_v58  ;;  %v6143_v49 = vadd.f32 %v6142_v52, %v6141_v0  ;;  %8932 = vmatprep.subr.bf16.mxu1 %v9623_v17  ;;  %v6079_v0 = vld [vmem:[#allocation21 + $0x48] sm:$0xff]  ;;  %v6080_v58 = vld [vmem:[#allocation21 + $0x50] sm:$0xff]  ;;  %v6081_v52 = vld [vmem:[#allocation21 + $0x58] sm:$0xff] }
0x14cc   :  { %v8933_v54 = vpack.c.bf16 %v6079_v0, %v6078_v15  ;;  %v8936_v36 = vpack.c.bf16 %v6081_v52, %v6080_v58  ;;  %v6082_v42 = vld [vmem:[#allocation21 + $0x60] sm:$0xff] }
0x14cd   :  { %9082 = vpush %v6113_v2  ;;  %v6144_v39 = vrot.slane %v6143_v49, 1  ;;  %v6083_v2 = vld [vmem:[#allocation21 + $0x68] sm:$0xff] }
0x14ce   :  { %9084 = vpush %v6129_v7  ;;  %8934 = vmatpush3.bf16.msra.mxu1 %v8933_v54  ;;  %v8939_v7 = vpack.c.bf16 %v6083_v2, %v6082_v42 }
0x14cf   :  { %v6145_v24 = vadd.f32 %v6144_v39, %v6143_v49  ;;  %8935 = vmatprep.subr.bf16.mxu1 %v9623_v17  ;;  %v6084_v49 = vld [vmem:[#allocation21 + $0x70] sm:$0xff]  ;;  %v6085_v39 = vld [vmem:[#allocation21 + $0x78] sm:$0xff] }
0x14d1   :  { %9086 = vpush %v6145_v24  ;;  %v8942_v24 = vpack.c.bf16 %v6085_v39, %v6084_v49 }
0x14d2   :  { %8937 = vmatpush3.bf16.msra.mxu1 %v8936_v36 }
0x14d3   :  { %8938 = vmatprep.subr.bf16.mxu1 %v9623_v17 }
0x14d6   :  { %8940 = vmatpush3.bf16.msra.mxu1 %v8939_v7 }
0x14d7   :  { %8941 = vmatprep.subr.bf16.mxu1 %v9623_v17 }
0x14da   :  { %8943 = vmatpush3.bf16.msra.mxu1 %v8942_v24 }
0x14db   :  { %8968 = vmatprep.subr.bf16.mxu1 %v9623_v17 }
0x14fe   :  { %s9083_s7 = spop %9082 }
0x14ff   :  { %s6115_s4 = smul.f32 0.03125, %s9083_s7  ;;  %s9085_s21 = spop %9084 }
0x1500   :  { %s6131_s15 = smul.f32 0.03125, %s9085_s21  ;;  %s14840_s7 = sld [smem:[#allocation48_spill]] }
0x1501   :  { %v6116_v9 = vstv %s6115_s4 }
0x1502   :  { %v6117_v19 = vsub.f32 %v13356_v12, %v6116_v9  ;;  %v6132_v32 = vstv %s6131_s15  ;;  %s9087_s16 = spop %9086 }
0x1503   :  { %v6133_v40 = vsub.f32 %v13356_v12, %v6132_v32  ;;  %s6147_s19 = smul.f32 0.03125, %s9087_s16 }
0x1504   :  { %v6150_v6 = vsel %vm6055_vm12, %v6100_v23, %v6117_v19 }
0x1505   :  { %v6148_v44 = vstv %s6147_s19  ;;  %v6151_v5 = vsel %vm6057_vm13, %v6150_v6, %v6133_v40 }
0x1506   :  { %v6149_v55 = vsub.f32 %v13356_v12, %v6148_v44 }
0x1508   :  { %v6152_v33 = vsel %vm6059_vm14, %v6151_v5, %v6149_v55 }
0x1509   :  { %7406 = vmatmul.mubr.msk.f32.vlgmr.msra.gmra.mrb[18].mxu0 %vm4951_vm9, %v6152_v33 }
0x150a   :  { %7475 = vmatprep.mubr.msk.f32.mxu0 %vm9624_vm11, %v9622_v59 }
0x15dc   :  { %v6228_v20 = vpop.f32.mrb[18].mxu0 }
0x15dd   :  { %v6229_v56 = vadd.f32 %v7124_v35, %v6228_v20  ;;  %v7407_v38 = vpop.f32.mrb[19].mxu0 }
0x15df   :  { %v13384_v8 = vmax.f32 %v6229_v56, 0.0 }
0x15e1   :  { %6263 = vrot.lane.b32.xlu0 %v13384_v8, %s14166_s14  ;;  %6247 = vrot.lane.b32.xlu1 %v13384_v8, %s9626_s20  ;;  %v6233_v18 = vsel %vm6087_vm15, %v13384_v8, 0.0 }
0x15e5   :  { %6311 = vrot.lane.b32.xlu0 %v13384_v8, %s9625_s26  ;;  %6279 = vrot.lane.b32.xlu1 %v13384_v8, %s9627_s30 }
0x15e9   :  { %6343 = vrot.lane.b32.xlu0 %v13384_v8, %s14838_s8  ;;  %6295 = vrot.lane.b32.xlu1 %v13384_v8, %s9621_s23 }
0x15ed   :  { %6327 = vrot.lane.b32.xlu1 %v13384_v8, %s14186_s10 }
0x1611   :  { %6234 = vadd.xlane.f32.xlu1 %v6233_v18 }
0x1653   :  { %v6264_v60 = vpop.permute.xlu0 %6263  ;;  %v6248_v10 = vpop.permute.xlu1 %6247 }
0x1654   :  { %v6250_v27 = vsel %vm6087_vm15, %v6248_v10, 0.0  ;;  %v6266_v34 = vsel %vm6087_vm15, %v6264_v60, 0.0 }
0x1655   :  { %6251 = vadd.xlane.f32.xlu0 %v6250_v27 }
0x1657   :  { %v6312_v53 = vpop.permute.xlu0 %6311  ;;  %v6280_v4 = vpop.permute.xlu1 %6279 }
0x1658   :  { %v6282_v47 = vsel %vm6087_vm15, %v6280_v4, 0.0  ;;  %v6314_v46 = vsel %vm6087_vm15, %v6312_v53, 0.0 }
0x1659   :  { %6267 = vadd.xlane.f32.xlu0 %v6266_v34  ;;  %6283 = vadd.xlane.f32.xlu1 %v6282_v47 }
0x165b   :  { %v6296_v3 = vpop.permute.xlu1 %6295  ;;  %v6344_v14 = vpop.permute.xlu0 %6343 }
0x165c   :  { %v6298_v61 = vsel %vm6087_vm15, %v6296_v3, 0.0  ;;  %v6346_v22 = vsel %vm6087_vm15, %v6344_v14, 0.0 }
0x165d   :  { %6299 = vadd.xlane.f32.xlu0 %v6298_v61  ;;  %6315 = vadd.xlane.f32.xlu1 %v6314_v46 }
0x165f   :  { %v6328_v43 = vpop.permute.xlu1 %6327 }
0x1660   :  { %v6330_v21 = vsel %vm6087_vm15, %v6328_v43, 0.0 }
0x1661   :  { %6331 = vadd.xlane.f32.xlu0 %v6330_v21  ;;  %6347 = vadd.xlane.f32.xlu1 %v6346_v22 }
0x1677   :  { %6445 = vrot.lane.b32.xlu0 %v13356_v12, %s14186_s10 }
0x169e   :  { %v6235_v25 = vpop.xlane.xlu1 %6234 }
0x169f   :  { %v6236_v12 = vrot.slane %v6235_v25, 4 }
0x16a1   :  { %v6237_v30 = vadd.f32 %v6236_v12, %v6235_v25 }
0x16a3   :  { %v6238_v31 = vrot.slane %v6237_v30, 2 }
0x16a5   :  { %v6239_v41 = vadd.f32 %v6238_v31, %v6237_v30 }
0x16a7   :  { %v6240_v62 = vrot.slane %v6239_v41, 1 }
0x16a9   :  { %v6241_v57 = vadd.f32 %v6240_v62, %v6239_v41 }
0x16ab   :  { %9088 = vpush %v6241_v57 }
0x16dc   :  { %s9089_s0 = spop %9088 }
0x16dd   :  { %s6243_s6 = smul.f32 0.03125, %s9089_s0 }
0x16df   :  { %v6244_v0 = vstv %s6243_s6 }
0x16e0   :  { %v6245_v58 = vsub.f32 %v13384_v8, %v6244_v0  ;;  %v6459_v0 = vld [vmem:[#allocation23 + $0x38] sm:$0xff] }
0x16e2   :  { %v6252_v51 = vpop.xlane.xlu0 %6251 }
0x16e3   :  { %v6253_v9 = vrot.slane %v6252_v51, 4 }
0x16e5   :  { %v6254_v23 = vadd.f32 %v6253_v9, %v6252_v51 }
0x16e6   :  { %v6268_v19 = vpop.xlane.xlu0 %6267  ;;  %v6284_v32 = vpop.xlane.xlu1 %6283 }
0x16e7   :  { %v6255_v40 = vrot.slane %v6254_v23, 2  ;;  %v6269_v6 = vrot.slane %v6268_v19, 4  ;;  %v6285_v44 = vrot.slane %v6284_v32, 4 }
0x16e9   :  { %v6270_v55 = vadd.f32 %v6269_v6, %v6268_v19  ;;  %v6286_v5 = vadd.f32 %v6285_v44, %v6284_v32  ;;  %v6256_v33 = vadd.f32 %v6255_v40, %v6254_v23 }
0x16ea   :  { %v6300_v35 = vpop.xlane.xlu0 %6299  ;;  %v6316_v20 = vpop.xlane.xlu1 %6315 }
0x16eb   :  { %v6271_v56 = vrot.slane %v6270_v55, 2  ;;  %v6287_v38 = vrot.slane %v6286_v5, 2  ;;  %v6301_v18 = vrot.slane %v6300_v35, 4  ;;  %v6317_v60 = vrot.slane %v6316_v20, 4 }
0x16ec   :  { %v6257_v10 = vrot.slane %v6256_v33, 1 }
0x16ed   :  { %v6302_v27 = vadd.f32 %v6301_v18, %v6300_v35  ;;  %v6318_v53 = vadd.f32 %v6317_v60, %v6316_v20  ;;  %v6272_v4 = vadd.f32 %v6271_v56, %v6270_v55  ;;  %v6288_v34 = vadd.f32 %v6287_v38, %v6286_v5  ;;  %v7126_v20 = vld [vmem:[%s14840_s7] ss:$0 sm:$0xff] }
0x16ee   :  { %v6332_v47 = vpop.xlane.xlu0 %6331  ;;  %v6348_v3 = vpop.xlane.xlu1 %6347  ;;  %v6258_v46 = vadd.f32 %v6257_v10, %v6256_v33 }
0x16ef   :  { %v6303_v61 = vrot.slane %v6302_v27, 2  ;;  %v6319_v14 = vrot.slane %v6318_v53, 2  ;;  %v6333_v43 = vrot.slane %v6332_v47, 4  ;;  %v6349_v22 = vrot.slane %v6348_v3, 4 }
0x16f0   :  { %9090 = vpush %v6258_v46  ;;  %v6273_v21 = vrot.slane %v6272_v4, 1  ;;  %v6289_v29 = vrot.slane %v6288_v34, 1 }
0x16f1   :  { %v6334_v37 = vadd.f32 %v6333_v43, %v6332_v47  ;;  %v6350_v28 = vadd.f32 %v6349_v22, %v6348_v3  ;;  %v6304_v63 = vadd.f32 %v6303_v61, %v6302_v27  ;;  %v6320_v50 = vadd.f32 %v6319_v14, %v6318_v53 }
0x16f2   :  { %v6274_v1 = vadd.f32 %v6273_v21, %v6272_v4  ;;  %v6290_v48 = vadd.f32 %v6289_v29, %v6288_v34  ;;  %v6446_v35 = vpop.permute.xlu0 %6445 }
0x16f3   :  { %v6335_v13 = vrot.slane %v6334_v37, 2  ;;  %v6351_v45 = vrot.slane %v6350_v28, 2  ;;  %v6305_v25 = vrot.slane %v6304_v63, 1  ;;  %v6321_v12 = vrot.slane %v6320_v50, 1 }
0x16f4   :  { %9092 = vpush %v6274_v1  ;;  %v6448_v56 = vsel %vm6057_vm13, 0.0, %v6446_v35  ;;  %v6453_v1 = vld [vmem:[#allocation23 + $0x8] sm:$0xff] }
0x16f5   :  { %9094 = vpush %v6290_v48  ;;  %v6306_v30 = vadd.f32 %v6305_v25, %v6304_v63  ;;  %v6336_v31 = vadd.f32 %v6335_v13, %v6334_v37  ;;  %v6352_v41 = vadd.f32 %v6351_v45, %v6350_v28  ;;  %v6322_v62 = vadd.f32 %v6321_v12, %v6320_v50  ;;  %v6452_v50 = vld [vmem:[#allocation23] sm:$0xff]  ;;  %v6454_v48 = vld [vmem:[#allocation23 + $0x10] sm:$0xff]  ;;  %v6455_v45 = vld [vmem:[#allocation23 + $0x18] sm:$0xff] }
0x16f6   :  { %v6449_v10 = vsel %vm6365_vm2, %v6448_v56, 0.0  ;;  %v8945_v13 = vpack.c.bf16 %v6453_v1, %v6452_v50  ;;  %v8948_v25 = vpack.c.bf16 %v6455_v45, %v6454_v48  ;;  %v6456_v12 = vld [vmem:[#allocation23 + $0x20] sm:$0xff] }
0x16f7   :  { %9096 = vpush %v6306_v30  ;;  %v6337_v11 = vrot.slane %v6336_v31, 1  ;;  %v6353_v26 = vrot.slane %v6352_v41, 1  ;;  %v6457_v30 = vld [vmem:[#allocation23 + $0x28] sm:$0xff] }
0x16f8   :  { %9098 = vpush %v6322_v62  ;;  %8946 = vmatpush3.bf16.msra.mxu0 %v8945_v13 }
0x16f9   :  { %v6338_v16 = vadd.f32 %v6337_v11, %v6336_v31  ;;  %v6354_v57 = vadd.f32 %v6353_v26, %v6352_v41  ;;  %8947 = vmatprep.subr.bf16.mxu0 %v9623_v17  ;;  %v8951_v31 = vpack.c.bf16 %v6457_v30, %v6456_v12 }
0x16fb   :  { %9100 = vpush %v6338_v16 }
0x16fc   :  { %9102 = vpush %v6354_v57  ;;  %8949 = vmatpush3.bf16.msra.mxu0 %v8948_v25 }
0x16fd   :  { %8950 = vmatprep.subr.bf16.mxu0 %v9623_v17 }
0x1700   :  { %8952 = vmatpush3.bf16.msra.mxu0 %v8951_v31 }
0x1701   :  { %8953 = vmatprep.subr.bf16.mxu0 %v9623_v17 }
0x1721   :  { %s9091_s9 = spop %9090 }
0x1722   :  { %s6260_s13 = smul.f32 0.03125, %s9091_s9 }
0x1724   :  { %v6261_v15 = vstv %s6260_s13 }
0x1725   :  { %s9093_s1 = spop %9092  ;;  %v6262_v54 = vsub.f32 %v13384_v8, %v6261_v15  ;;  %v6458_v15 = vld [vmem:[#allocation23 + $0x30] sm:$0xff] }
0x1726   :  { %s6276_s11 = smul.f32 0.03125, %s9093_s1  ;;  %s9095_s22 = spop %9094 }
0x1727   :  { %s6292_s25 = smul.f32 0.03125, %s9095_s22  ;;  %v6359_v2 = vsel %vm6055_vm12, %v6245_v58, %v6262_v54  ;;  %v8954_v54 = vpack.c.bf16 %v6459_v0, %v6458_v15 }
0x1728   :  { %v6277_v52 = vstv %s6276_s11  ;;  %s9097_s3 = spop %9096 }
0x1729   :  { %v6278_v36 = vsub.f32 %v13384_v8, %v6277_v52  ;;  %v6293_v42 = vstv %s6292_s25  ;;  %s6308_s29 = smul.f32 0.03125, %s9097_s3  ;;  %s9099_s5 = spop %9098  ;;  %8955 = vmatpush3.bf16.msra.mxu0 %v8954_v54  ;;  %v6460_v52 = vld [vmem:[#allocation23 + $0x40] sm:$0xff] }
0x172a   :  { %v6294_v7 = vsub.f32 %v13384_v8, %v6293_v42  ;;  %s6324_s28 = smul.f32 0.03125, %s9099_s5  ;;  %8956 = vmatprep.subr.bf16.mxu0 %v9623_v17  ;;  %s14841_s3 = sld [smem:[#allocation49_spill]] }
0x172b   :  { %v6360_v49 = vsel %vm6057_vm13, %v6359_v2, %v6278_v36  ;;  %v6309_v39 = vstv %s6308_s29  ;;  %v6461_v36 = vld [vmem:[#allocation23 + $0x48] sm:$0xff]  ;;  %v6462_v2 = vld [vmem:[#allocation23 + $0x50] sm:$0xff] }
0x172c   :  { %v6310_v24 = vsub.f32 %v13384_v8, %v6309_v39  ;;  %v6325_v51 = vstv %s6324_s28  ;;  %s9101_s24 = spop %9100  ;;  %v6361_v9 = vsel %vm6059_vm14, %v6360_v49, %v6294_v7  ;;  %v8957_v42 = vpack.c.bf16 %v6461_v36, %v6460_v52  ;;  %v6463_v7 = vld [vmem:[#allocation23 + $0x58] sm:$0xff]  ;;  %v6464_v39 = vld [vmem:[#allocation23 + $0x60] sm:$0xff] }
0x172d   :  { %v6326_v23 = vsub.f32 %v13384_v8, %v6325_v51  ;;  %s6340_s2 = smul.f32 0.03125, %s9101_s24  ;;  %s9103_s18 = spop %9102  ;;  %v8960_v49 = vpack.c.bf16 %v6463_v7, %v6462_v2 }
0x172e   :  { %v6362_v19 = vsel %vm4951_vm9, %v6361_v9, %v6310_v24  ;;  %s6356_s4 = smul.f32 0.03125, %s9103_s18  ;;  %8958 = vmatpush3.bf16.msra.mxu0 %v8957_v42  ;;  %v6465_v24 = vld [vmem:[#allocation23 + $0x68] sm:$0xff]  ;;  %v6466_v9 = vld [vmem:[#allocation23 + $0x70] sm:$0xff] }
0x172f   :  { %v6341_v32 = vstv %s6340_s2  ;;  %v6364_v44 = vsel %vm6363_vm0, %v6362_v19, %v6326_v23  ;;  %8959 = vmatprep.subr.bf16.mxu0 %v9623_v17  ;;  %v8963_v51 = vpack.c.bf16 %v6465_v24, %v6464_v39  ;;  %v6467_v23 = vld [vmem:[#allocation23 + $0x78] sm:$0xff] }
0x1730   :  { %v6342_v40 = vsub.f32 %v13384_v8, %v6341_v32  ;;  %v6357_v6 = vstv %s6356_s4  ;;  %v8966_v19 = vpack.c.bf16 %v6467_v23, %v6466_v9 }
0x1731   :  { %v6358_v55 = vsub.f32 %v13384_v8, %v6357_v6 }
0x1732   :  { %v6366_v5 = vsel %vm6365_vm2, %v6364_v44, %v6342_v40  ;;  %8961 = vmatpush3.bf16.msra.mxu0 %v8960_v49 }
0x1733   :  { %v6368_v33 = vsel %vm6367_vm1, %v6366_v5, %v6358_v55  ;;  %8962 = vmatprep.subr.bf16.mxu0 %v9623_v17 }
0x1734   :  { %7441 = vmatmul.mubr.f32.vlgmr.msra.gmra.mrb[14].mxu1 %v6368_v33 }
0x1735   :  { %7510 = vmatprep.mubr.msk.f32.mxu1 %vm9624_vm11, %v9622_v59 }
0x1736   :  { %8964 = vmatpush3.bf16.msra.mxu0 %v8963_v51 }
0x1737   :  { %8965 = vmatprep.subr.bf16.mxu0 %v9623_v17 }
0x173a   :  { %8967 = vmatpush3.bf16.msra.mxu0 %v8966_v19 }
0x173b   :  { %8992 = vmatprep.subr.bf16.mxu0 %v9623_v17 }
0x1807   :  { %v6441_v38 = vpop.f32.mrb[14].mxu1 }
0x1808   :  { %v6442_v18 = vadd.f32 %v7126_v20, %v6441_v38  ;;  %v7442_v60 = vpop.f32.mrb[15].mxu1 }
0x180a   :  { %v6450_v27 = vadd.f32 %v6449_v10, %v6442_v18 }
0x180c   :  { %v13439_v53 = vmax.f32 %v6450_v27, 0.0 }
0x180e   :  { %6532 = vrot.lane.b32.xlu0 %v13439_v53, %s9627_s30  ;;  %6500 = vrot.lane.b32.xlu1 %v13439_v53, %s9626_s20  ;;  %v6486_v8 = vsel %vm6087_vm15, %v13439_v53, 0.0 }
0x1812   :  { %6564 = vrot.lane.b32.xlu0 %v13439_v53, %s9625_s26  ;;  %6516 = vrot.lane.b32.xlu1 %v13439_v53, %s14166_s14 }
0x1816   :  { %6596 = vrot.lane.b32.xlu0 %v13439_v53, %s14838_s8  ;;  %6548 = vrot.lane.b32.xlu1 %v13439_v53, %s9621_s23 }
0x181a   :  { %6580 = vrot.lane.b32.xlu1 %v13439_v53, %s14186_s10 }
0x183e   :  { %6487 = vadd.xlane.f32.xlu1 %v6486_v8 }
0x1880   :  { %v6533_v4 = vpop.permute.xlu0 %6532  ;;  %v6501_v34 = vpop.permute.xlu1 %6500 }
0x1881   :  { %v6535_v47 = vsel %vm6087_vm15, %v6533_v4, 0.0  ;;  %v6503_v3 = vsel %vm6087_vm15, %v6501_v34, 0.0 }
0x1882   :  { %6504 = vadd.xlane.f32.xlu0 %v6503_v3  ;;  %6536 = vadd.xlane.f32.xlu1 %v6535_v47 }
0x1884   :  { %v6565_v46 = vpop.permute.xlu0 %6564  ;;  %v6517_v61 = vpop.permute.xlu1 %6516 }
0x1885   :  { %v6567_v14 = vsel %vm6087_vm15, %v6565_v46, 0.0  ;;  %v6519_v43 = vsel %vm6087_vm15, %v6517_v61, 0.0 }
0x1886   :  { %6520 = vadd.xlane.f32.xlu0 %v6519_v43  ;;  %6568 = vadd.xlane.f32.xlu1 %v6567_v14 }
0x1888   :  { %v6597_v22 = vpop.permute.xlu0 %6596  ;;  %v6549_v21 = vpop.permute.xlu1 %6548 }
0x1889   :  { %v6599_v29 = vsel %vm6087_vm15, %v6597_v22, 0.0  ;;  %v6551_v37 = vsel %vm6087_vm15, %v6549_v21, 0.0 }
0x188a   :  { %6552 = vadd.xlane.f32.xlu0 %v6551_v37  ;;  %6600 = vadd.xlane.f32.xlu1 %v6599_v29 }
0x188c   :  { %v6581_v28 = vpop.permute.xlu1 %6580 }
0x188d   :  { %v6583_v63 = vsel %vm6087_vm15, %v6581_v28, 0.0 }
0x188e   :  { %6584 = vadd.xlane.f32.xlu0 %v6583_v63 }
0x18cb   :  { %v6488_v41 = vpop.xlane.xlu1 %6487 }
0x18cc   :  { %v6489_v62 = vrot.slane %v6488_v41, 4 }
0x18ce   :  { %v6490_v11 = vadd.f32 %v6489_v62, %v6488_v41 }
0x18d0   :  { %v6491_v26 = vrot.slane %v6490_v11, 2 }
0x18d2   :  { %v6492_v16 = vadd.f32 %v6491_v26, %v6490_v11 }
0x18d4   :  { %v6493_v57 = vrot.slane %v6492_v16, 1 }
0x18d6   :  { %v6494_v58 = vadd.f32 %v6493_v57, %v6492_v16 }
0x18d8   :  { %9104 = vpush %v6494_v58 }
0x1909   :  { %s9105_s21 = spop %9104 }
0x190a   :  { %s6496_s17 = smul.f32 0.03125, %s9105_s21 }
0x190c   :  { %v6497_v52 = vstv %s6496_s17 }
0x190d   :  { %v6498_v2 = vsub.f32 %v13439_v53, %v6497_v52  ;;  %v6477_v52 = vld [vmem:[#allocation24 + $0x40] sm:$0xff] }
0x190f   :  { %v6505_v32 = vpop.xlane.xlu0 %6504  ;;  %v6537_v40 = vpop.xlane.xlu1 %6536 }
0x1910   :  { %v6506_v6 = vrot.slane %v6505_v32, 4  ;;  %v6538_v44 = vrot.slane %v6537_v40, 4 }
0x1912   :  { %v6507_v55 = vadd.f32 %v6506_v6, %v6505_v32  ;;  %v6539_v5 = vadd.f32 %v6538_v44, %v6537_v40 }
0x1913   :  { %v6521_v33 = vpop.xlane.xlu0 %6520  ;;  %v6569_v35 = vpop.xlane.xlu1 %6568 }
0x1914   :  { %v6508_v20 = vrot.slane %v6507_v55, 2  ;;  %v6540_v56 = vrot.slane %v6539_v5, 2  ;;  %v6522_v38 = vrot.slane %v6521_v33, 4  ;;  %v6570_v18 = vrot.slane %v6569_v35, 4 }
0x1916   :  { %v6523_v60 = vadd.f32 %v6522_v38, %v6521_v33  ;;  %v6571_v10 = vadd.f32 %v6570_v18, %v6569_v35  ;;  %v6509_v27 = vadd.f32 %v6508_v20, %v6507_v55  ;;  %v6541_v34 = vadd.f32 %v6540_v56, %v6539_v5  ;;  %v7127_v18 = vld [vmem:[%s14841_s3] ss:$0 sm:$0xff] }
0x1917   :  { %v6553_v8 = vpop.xlane.xlu0 %6552  ;;  %v6601_v4 = vpop.xlane.xlu1 %6600 }
0x1918   :  { %v6524_v47 = vrot.slane %v6523_v60, 2  ;;  %v6572_v3 = vrot.slane %v6571_v10, 2  ;;  %v6554_v46 = vrot.slane %v6553_v8, 4  ;;  %v6602_v61 = vrot.slane %v6601_v4, 4 }
0x1919   :  { %v6510_v14 = vrot.slane %v6509_v27, 1  ;;  %v6542_v28 = vrot.slane %v6541_v34, 1 }
0x191a   :  { %v6555_v43 = vadd.f32 %v6554_v46, %v6553_v8  ;;  %v6603_v22 = vadd.f32 %v6602_v61, %v6601_v4  ;;  %v6525_v21 = vadd.f32 %v6524_v47, %v6523_v60  ;;  %v6573_v63 = vadd.f32 %v6572_v3, %v6571_v10 }
0x191b   :  { %v6585_v29 = vpop.xlane.xlu0 %6584  ;;  %v6511_v37 = vadd.f32 %v6510_v14, %v6509_v27  ;;  %v6543_v30 = vadd.f32 %v6542_v28, %v6541_v34 }
0x191c   :  { %v6556_v50 = vrot.slane %v6555_v43, 2  ;;  %v6604_v1 = vrot.slane %v6603_v22, 2  ;;  %v6586_v48 = vrot.slane %v6585_v29, 4  ;;  %v6526_v13 = vrot.slane %v6525_v21, 1 }
0x191d   :  { %9106 = vpush %v6511_v37  ;;  %v6574_v31 = vrot.slane %v6573_v63, 1 }
0x191e   :  { %v6587_v45 = vadd.f32 %v6586_v48, %v6585_v29  ;;  %v6527_v25 = vadd.f32 %v6526_v13, %v6525_v21  ;;  %v6557_v12 = vadd.f32 %v6556_v50, %v6555_v43  ;;  %v6605_v41 = vadd.f32 %v6604_v1, %v6603_v22  ;;  %v6469_v50 = vld [vmem:[#allocation24] sm:$0xff]  ;;  %v6470_v1 = vld [vmem:[#allocation24 + $0x8] sm:$0xff]  ;;  %v6471_v48 = vld [vmem:[#allocation24 + $0x10] sm:$0xff] }
0x191f   :  { %v6575_v57 = vadd.f32 %v6574_v31, %v6573_v63  ;;  %v8969_v13 = vpack.c.bf16 %v6470_v1, %v6469_v50 }
0x1920   :  { %v6588_v62 = vrot.slane %v6587_v45, 2  ;;  %9108 = vpush %v6527_v25  ;;  %v6558_v11 = vrot.slane %v6557_v12, 1  ;;  %v6606_v15 = vrot.slane %v6605_v41, 1 }
0x1921   :  { %9110 = vpush %v6543_v30  ;;  %8970 = vmatpush3.bf16.msra.mxu1 %v8969_v13 }
0x1922   :  { %v6559_v26 = vadd.f32 %v6558_v11, %v6557_v12  ;;  %v6589_v16 = vadd.f32 %v6588_v62, %v6587_v45  ;;  %v6607_v58 = vadd.f32 %v6606_v15, %v6605_v41  ;;  %v6472_v45 = vld [vmem:[#allocation24 + $0x18] sm:$0xff]  ;;  %8971 = vmatprep.subr.bf16.mxu1 %v9623_v17 }
0x1923   :  { %v8972_v25 = vpack.c.bf16 %v6472_v45, %v6471_v48 }
0x1924   :  { %9112 = vpush %v6559_v26  ;;  %v6590_v0 = vrot.slane %v6589_v16, 1 }
0x1925   :  { %9114 = vpush %v6575_v57  ;;  %8973 = vmatpush3.bf16.msra.mxu1 %v8972_v25  ;;  %v6474_v57 = vld [vmem:[#allocation24 + $0x28] sm:$0xff] }
0x1926   :  { %v6591_v54 = vadd.f32 %v6590_v0, %v6589_v16  ;;  %8974 = vmatprep.subr.bf16.mxu1 %v9623_v17  ;;  %v6473_v16 = vld [vmem:[#allocation24 + $0x20] sm:$0xff]  ;;  %v6475_v0 = vld [vmem:[#allocation24 + $0x30] sm:$0xff] }
0x1927   :  { %v8975_v15 = vpack.c.bf16 %v6474_v57, %v6473_v16 }
0x1928   :  { %9116 = vpush %v6591_v54  ;;  %v6476_v54 = vld [vmem:[#allocation24 + $0x38] sm:$0xff] }
0x1929   :  { %9118 = vpush %v6607_v58  ;;  %8976 = vmatpush3.bf16.msra.mxu1 %v8975_v15  ;;  %v8978_v58 = vpack.c.bf16 %v6476_v54, %v6475_v0 }
0x192a   :  { %8977 = vmatprep.subr.bf16.mxu1 %v9623_v17 }
0x192d   :  { %8979 = vmatpush3.bf16.msra.mxu1 %v8978_v58 }
0x192e   :  { %8980 = vmatprep.subr.bf16.mxu1 %v9623_v17 }
0x194e   :  { %s9107_s15 = spop %9106 }
0x194f   :  { %s6513_s16 = smul.f32 0.03125, %s9107_s15 }
0x1951   :  { %v6514_v36 = vstv %s6513_s16  ;;  %s9109_s19 = spop %9108 }
0x1952   :  { %v6515_v42 = vsub.f32 %v13439_v53, %v6514_v36  ;;  %s6529_s0 = smul.f32 0.03125, %s9109_s19  ;;  %s9111_s6 = spop %9110  ;;  %v6478_v36 = vld [vmem:[#allocation24 + $0x48] sm:$0xff] }
0x1953   :  { %s6545_s9 = smul.f32 0.03125, %s9111_s6  ;;  %s9628_s19 = smov [#allocation27]  }
0x1954   :  { %v6530_v7 = vstv %s6529_s0  ;;  %v6612_v24 = vsel %vm6055_vm12, %v6498_v2, %v6515_v42  ;;  %v8981_v42 = vpack.c.bf16 %v6478_v36, %v6477_v52  ;;  %v6479_v2 = vld [vmem:[#allocation24 + $0x50] sm:$0xff]  ;;  %s7008_s0 = sshll.u32 %s9628_s19, 4  ;;  %s7009_s0 = int_to_ptr.vmem [resolvable:$true] %s7008_s0 }
0x1955   :  { %v6531_v49 = vsub.f32 %v13439_v53, %v6530_v7  ;;  %v6546_v39 = vstv %s6545_s9  ;;  %s9113_s13 = spop %9112  ;;  %v6480_v7 = vld [vmem:[#allocation24 + $0x58] sm:$0xff]  ;;  %s9521_s6 = scalar_lea.vmem %s7009_s0, 32 }
0x1956   :  { %v6547_v51 = vsub.f32 %v13439_v53, %v6546_v39  ;;  %s6561_s1 = smul.f32 0.03125, %s9113_s13  ;;  %s9115_s11 = spop %9114  ;;  %8982 = vmatpush3.bf16.msra.mxu1 %v8981_v42  ;;  %v6481_v39 = vld [vmem:[#allocation24 + $0x60] sm:$0xff] }
0x1957   :  { %v6613_v9 = vsel %vm6057_vm13, %v6612_v24, %v6531_v49  ;;  %s6577_s22 = smul.f32 0.03125, %s9115_s11  ;;  %8983 = vmatprep.subr.bf16.mxu1 %v9623_v17  ;;  %v8984_v49 = vpack.c.bf16 %v6480_v7, %v6479_v2  ;;  %v6482_v24 = vld [vmem:[#allocation24 + $0x68] sm:$0xff]  ;;  %p9522_p2 = scmp.ne.s32.totalorder %s7009_s0, %s9521_s6 }
0x1958   :  { %v6562_v23 = vstv %s6561_s1  ;;  %v6614_v40 = vsel %vm6059_vm14, %v6613_v9, %v6547_v51  ;;  %v8987_v51 = vpack.c.bf16 %v6482_v24, %v6481_v39  ;;  %v6483_v9 = vld [vmem:[#allocation24 + $0x70] sm:$0xff]  ;;  %p9526_p3 = scmp.lt.s32.totalorder %s7009_s0, %s7009_s0  ;;  %p9527_p4 = scmp.lt.s32.totalorder %s9521_s6, %s9521_s6 }
0x1959   :  { %v6563_v19 = vsub.f32 %v13439_v53, %v6562_v23  ;;  %v6578_v32 = vstv %s6577_s22  ;;  %s9117_s25 = spop %9116  ;;  %v6484_v23 = vld [vmem:[#allocation24 + $0x78] sm:$0xff] }
0x195a   :  { %v6579_v6 = vsub.f32 %v13439_v53, %v6578_v32  ;;  %s6593_s29 = smul.f32 0.03125, %s9117_s25  ;;  %s9119_s5 = spop %9118  ;;  %8985 = vmatpush3.bf16.msra.mxu1 %v8984_v49  ;;  %v6908_v32 = vld [vmem:[#allocation26 + $0x8] sm:$0xff] }
0x195b   :  { %v6615_v44 = vsel %vm4951_vm9, %v6614_v40, %v6563_v19  ;;  %s6609_s28 = smul.f32 0.03125, %s9119_s5  ;;  %8986 = vmatprep.subr.bf16.mxu1 %v9623_v17  ;;  %v6907_v19 = vld [vmem:[#allocation26] sm:$0xff]  ;;  %v6909_v40 = vld [vmem:[#allocation26 + $0x10] sm:$0xff]  ;;  %p9528_p5 = por %p9527_p4, %p9526_p3 }
0x195c   :  { %v6594_v55 = vstv %s6593_s29  ;;  %v6616_v35 = vsel %vm6363_vm0, %v6615_v44, %v6579_v6  ;;  %v8993_v6 = vpack.c.bf16 %v6908_v32, %v6907_v19  ;;  %v6910_v44 = vld [vmem:[#allocation26 + $0x18] sm:$0xff] }
0x195d   :  { %v6595_v5 = vsub.f32 %v13439_v53, %v6594_v55  ;;  %v6610_v33 = vstv %s6609_s28  ;;  %v8990_v55 = vpack.c.bf16 %v6484_v23, %v6483_v9  ;;  %p9529_p6 = pnand %p9528_p5, %p9522_p2 }
0x195e   :  { %v6611_v20 = vsub.f32 %v13439_v53, %v6610_v33  ;;  %8988 = vmatpush3.bf16.msra.mxu1 %v8987_v51  ;;  %v6911_v33 = vld [vmem:[#allocation26 + $0x20] sm:$0xff] }
0x195f   :  { %v6617_v56 = vsel %vm6365_vm2, %v6616_v35, %v6595_v5  ;;  %v8996_v5 = vpack.c.bf16 %v6910_v44, %v6909_v40  ;;  %8989 = vmatprep.subr.bf16.mxu1 %v9623_v17  ;;  %v6912_v35 = vld [vmem:[#allocation26 + $0x28] sm:$0xff] }
0x1960   :  { %v6618_v38 = vsel %vm6367_vm1, %v6617_v56, %v6611_v20  ;;  %v8999_v20 = vpack.c.bf16 %v6912_v35, %v6911_v33  ;;  %v6913_v56 = vld [vmem:[#allocation26 + $0x30] sm:$0xff] }
0x1961   :  { %7476 = vmatmul.mubr.f32.vlgmr.msra.gmra.mrb[20].mxu0 %v6618_v38  ;;  %v6914_v38 = vld [vmem:[#allocation26 + $0x38] sm:$0xff] }
0x1962   :  { %7545 = vmatprep.mubr.msk.f32.mxu0 %vm9624_vm11, %v9622_v59  ;;  %8994 = vmatpush3.bf16.msra.mxu0 %v8993_v6 }
0x1963   :  { %8995 = vmatprep.subr.bf16.mxu0 %v9623_v17  ;;  %8991 = vmatpush3.bf16.msra.mxu1 %v8990_v55 }
0x1966   :  { %8997 = vmatpush3.bf16.msra.mxu0 %v8996_v5 }
0x1967   :  { %8998 = vmatprep.subr.bf16.mxu0 %v9623_v17 }
0x196a   :  { %9000 = vmatpush3.bf16.msra.mxu0 %v8999_v20 }
0x196b   :  { %9001 = vmatprep.subr.bf16.mxu0 %v9623_v17 }
0x1a34   :  { %v6691_v60 = vpop.f32.mrb[20].mxu0 }
0x1a35   :  { %v6692_v10 = vadd.f32 %v7127_v18, %v6691_v60  ;;  %v7477_v27 = vpop.f32.mrb[21].mxu0  ;;  %v9002_v18 = vpack.c.bf16 %v6914_v38, %v6913_v56  ;;  %v6915_v60 = vld [vmem:[#allocation26 + $0x40] sm:$0xff] }
0x1a37   :  { %v13490_v8 = vmax.f32 %v6692_v10, 0.0  ;;  %v6916_v10 = vld [vmem:[#allocation26 + $0x48] sm:$0xff]  ;;  %9003 = vmatpush3.bf16.msra.mxu0 %v9002_v18 }
0x1a38   :  { %v9005_v27 = vpack.c.bf16 %v6916_v10, %v6915_v60  ;;  %9004 = vmatprep.subr.bf16.mxu0 %v9623_v17 }
0x1a39   :  { %6726 = vrot.lane.b32.xlu0 %v13490_v8, %s14166_s14  ;;  %6710 = vrot.lane.b32.xlu1 %v13490_v8, %s9626_s20  ;;  %v6696_v59 = vsel %vm6087_vm15, %v13490_v8, 0.0 }
0x1a3b   :  { %9006 = vmatpush3.bf16.msra.mxu0 %v9005_v27 }
0x1a3c   :  { %9007 = vmatprep.subr.bf16.mxu0 %v9623_v17 }
0x1a3d   :  { %6790 = vrot.lane.b32.xlu0 %v13490_v8, %s14186_s10  ;;  %6742 = vrot.lane.b32.xlu1 %v13490_v8, %s9627_s30 }
0x1a41   :  { %6758 = vrot.lane.b32.xlu1 %v13490_v8, %s9621_s23 }
0x1a45   :  { %6774 = vrot.lane.b32.xlu1 %v13490_v8, %s9625_s26 }
0x1a49   :  { %6806 = vrot.lane.b32.xlu1 %v13490_v8, %s14838_s8 }
0x1a5c   :  { %6697 = vadd.xlane.f32.xlu0 %v6696_v59  ;;  %v6917_v59 = vld [vmem:[#allocation26 + $0x50] sm:$0xff] }
0x1aab   :  { %v6727_v4 = vpop.permute.xlu0 %6726  ;;  %v6711_v34 = vpop.permute.xlu1 %6710 }
0x1aac   :  { %v6713_v47 = vsel %vm6087_vm15, %v6711_v34, 0.0  ;;  %v6729_v46 = vsel %vm6087_vm15, %v6727_v4, 0.0  ;;  %v6918_v4 = vld [vmem:[#allocation26 + $0x58] sm:$0xff] }
0x1aad   :  { %6714 = vadd.xlane.f32.xlu0 %v6713_v47  ;;  %v9008_v34 = vpack.c.bf16 %v6918_v4, %v6917_v59 }
0x1aaf   :  { %v6743_v3 = vpop.permute.xlu1 %6742  ;;  %v6791_v14 = vpop.permute.xlu0 %6790  ;;  %9009 = vmatpush3.bf16.msra.mxu0 %v9008_v34 }
0x1ab0   :  { %v6745_v61 = vsel %vm6087_vm15, %v6743_v3, 0.0  ;;  %v6793_v22 = vsel %vm6087_vm15, %v6791_v14, 0.0  ;;  %9010 = vmatprep.subr.bf16.mxu0 %v9623_v17 }
0x1ab1   :  { %6746 = vadd.xlane.f32.xlu1 %v6745_v61  ;;  %6730 = vadd.xlane.f32.xlu0 %v6729_v46 }
0x1ab3   :  { %v6759_v43 = vpop.permute.xlu1 %6758 }
0x1ab4   :  { %v6761_v21 = vsel %vm6087_vm15, %v6759_v43, 0.0 }
0x1ab5   :  { %6794 = vadd.xlane.f32.xlu1 %v6793_v22  ;;  %6762 = vadd.xlane.f32.xlu0 %v6761_v21 }
0x1ab7   :  { %v6775_v29 = vpop.permute.xlu1 %6774 }
0x1ab8   :  { %v6777_v37 = vsel %vm6087_vm15, %v6775_v29, 0.0 }
0x1ab9   :  { %6778 = vadd.xlane.f32.xlu0 %v6777_v37 }
0x1abb   :  { %v6807_v28 = vpop.permute.xlu1 %6806 }
0x1abc   :  { %v6809_v63 = vsel %vm6087_vm15, %v6807_v28, 0.0 }
0x1abd   :  { %6810 = vadd.xlane.f32.xlu0 %v6809_v63 }
0x1ae9   :  { %v6698_v12 = vpop.xlane.xlu0 %6697 }
0x1aea   :  { %v6699_v30 = vrot.slane %v6698_v12, 4 }
0x1aec   :  { %v6700_v31 = vadd.f32 %v6699_v30, %v6698_v12 }
0x1aee   :  { %v6701_v41 = vrot.slane %v6700_v31, 2 }
0x1af0   :  { %v6702_v62 = vadd.f32 %v6701_v41, %v6700_v31 }
0x1af2   :  { %v6703_v11 = vrot.slane %v6702_v62, 1 }
0x1af4   :  { %v6704_v26 = vadd.f32 %v6703_v11, %v6702_v62 }
0x1af6   :  { %9120 = vpush %v6704_v26 }
0x1b27   :  { %s9121_s14 = spop %9120 }
0x1b28   :  { %s6706_s8 = smul.f32 0.03125, %s9121_s14 }
0x1b2a   :  { %v6707_v35 = vstv %s6706_s8 }
0x1b2b   :  { %v6708_v60 = vsub.f32 %v13490_v8, %v6707_v35 }
0x1b3a   :  { %v6715_v47 = vpop.xlane.xlu0 %6714 }
0x1b3b   :  { %v6716_v3 = vrot.slane %v6715_v47, 4 }
0x1b3d   :  { %v6717_v46 = vadd.f32 %v6716_v3, %v6715_v47 }
0x1b3e   :  { %v6747_v61 = vpop.xlane.xlu1 %6746  ;;  %v6731_v14 = vpop.xlane.xlu0 %6730 }
0x1b3f   :  { %v6718_v43 = vrot.slane %v6717_v46, 2  ;;  %v6748_v22 = vrot.slane %v6747_v61, 4  ;;  %v6732_v21 = vrot.slane %v6731_v14, 4 }
0x1b41   :  { %v6749_v29 = vadd.f32 %v6748_v22, %v6747_v61  ;;  %v6733_v37 = vadd.f32 %v6732_v21, %v6731_v14  ;;  %v6719_v28 = vadd.f32 %v6718_v43, %v6717_v46 }
0x1b42   :  { %v6795_v63 = vpop.xlane.xlu1 %6794  ;;  %v6763_v50 = vpop.xlane.xlu0 %6762 }
0x1b43   :  { %v6750_v1 = vrot.slane %v6749_v29, 2  ;;  %v6734_v48 = vrot.slane %v6733_v37, 2  ;;  %v6796_v13 = vrot.slane %v6795_v63, 4  ;;  %v6764_v45 = vrot.slane %v6763_v50, 4 }
0x1b44   :  { %v6720_v25 = vrot.slane %v6719_v28, 1 }
0x1b45   :  { %v6797_v12 = vadd.f32 %v6796_v13, %v6795_v63  ;;  %v6765_v30 = vadd.f32 %v6764_v45, %v6763_v50  ;;  %v6735_v31 = vadd.f32 %v6734_v48, %v6733_v37  ;;  %v6751_v41 = vadd.f32 %v6750_v1, %v6749_v29  ;;  %v6919_v63 = vld [vmem:[#allocation26 + $0x60] sm:$0xff]  ;;  %v6920_v50 = vld [vmem:[#allocation26 + $0x68] sm:$0xff]  ;;  %v6921_v1 = vld [vmem:[#allocation26 + $0x70] sm:$0xff] }
0x1b46   :  { %v6779_v62 = vpop.xlane.xlu0 %6778  ;;  %v6721_v11 = vadd.f32 %v6720_v25, %v6719_v28  ;;  %v9011_v48 = vpack.c.bf16 %v6920_v50, %v6919_v63  ;;  %v6922_v13 = vld [vmem:[#allocation26 + $0x78] sm:$0xff]  ;;  %v7128_v25 = vld [vmem:[%s9767_s12] ss:$0 sm:$0xff] }
0x1b47   :  { %v6798_v26 = vrot.slane %v6797_v12, 2  ;;  %v6766_v16 = vrot.slane %v6765_v30, 2  ;;  %v6780_v57 = vrot.slane %v6779_v62, 4  ;;  %v6736_v15 = vrot.slane %v6735_v31, 1 }
0x1b48   :  { %9122 = vpush %v6721_v11  ;;  %v6752_v0 = vrot.slane %v6751_v41, 1  ;;  %9012 = vmatpush3.bf16.msra.mxu0 %v9011_v48  ;;  %v9014_v45 = vpack.c.bf16 %v6922_v13, %v6921_v1 }
0x1b49   :  { %v6781_v54 = vadd.f32 %v6780_v57, %v6779_v62  ;;  %v6737_v58 = vadd.f32 %v6736_v15, %v6735_v31  ;;  %v6767_v52 = vadd.f32 %v6766_v16, %v6765_v30  ;;  %v6799_v36 = vadd.f32 %v6798_v26, %v6797_v12  ;;  %9013 = vmatprep.subr.bf16.mxu0 %v9623_v17  ;;  %v7129_v62 = vld [vmem:[%s9777_s27] ss:$0 sm:$0xff] }
0x1b4a   :  { %v6811_v42 = vpop.xlane.xlu0 %6810  ;;  %v6753_v2 = vadd.f32 %v6752_v0, %v6751_v41 }
0x1b4b   :  { %v6782_v7 = vrot.slane %v6781_v54, 2  ;;  %v6812_v49 = vrot.slane %v6811_v42, 4  ;;  %9124 = vpush %v6737_v58  ;;  %v6768_v39 = vrot.slane %v6767_v52, 1  ;;  %v6800_v23 = vrot.slane %v6799_v36, 1 }
0x1b4c   :  { %9126 = vpush %v6753_v2  ;;  %9015 = vmatpush3.bf16.msra.mxu0 %v9014_v45 }
0x1b4d   :  { %v6813_v24 = vadd.f32 %v6812_v49, %v6811_v42  ;;  %v6769_v51 = vadd.f32 %v6768_v39, %v6767_v52  ;;  %v6783_v9 = vadd.f32 %v6782_v7, %v6781_v54  ;;  %v6801_v44 = vadd.f32 %v6800_v23, %v6799_v36 }
0x1b4f   :  { %v6814_v19 = vrot.slane %v6813_v24, 2  ;;  %9128 = vpush %v6769_v51  ;;  %v6784_v32 = vrot.slane %v6783_v9, 1 }
0x1b51   :  { %v6815_v40 = vadd.f32 %v6814_v19, %v6813_v24  ;;  %v6785_v6 = vadd.f32 %v6784_v32, %v6783_v9 }
0x1b53   :  { %9130 = vpush %v6785_v6  ;;  %v6816_v55 = vrot.slane %v6815_v40, 1 }
0x1b54   :  { %9132 = vpush %v6801_v44 }
0x1b55   :  { %v6817_v5 = vadd.f32 %v6816_v55, %v6815_v40 }
0x1b57   :  { %9134 = vpush %v6817_v5 }
0x1b79   :  { %s9123_s10 = spop %9122 }
0x1b7a   :  { %s6723_s23 = smul.f32 0.03125, %s9123_s10 }
0x1b7c   :  { %s9125_s26 = spop %9124  ;;  %v6724_v33 = vstv %s6723_s23 }
0x1b7d   :  { %s6739_s20 = smul.f32 0.03125, %s9125_s26  ;;  %s9127_s30 = spop %9126  ;;  %v6725_v56 = vsub.f32 %v13490_v8, %v6724_v33 }
0x1b7e   :  { %s6755_s24 = smul.f32 0.03125, %s9127_s30 }
0x1b7f   :  { %v6740_v20 = vstv %s6739_s20  ;;  %v6822_v27 = vsel %vm6055_vm12, %v6708_v60, %v6725_v56 }
0x1b80   :  { %s9129_s2 = spop %9128  ;;  %v6741_v38 = vsub.f32 %v13490_v8, %v6740_v20  ;;  %v6756_v18 = vstv %s6755_s24 }
0x1b81   :  { %s6771_s18 = smul.f32 0.03125, %s9129_s2  ;;  %v6757_v59 = vsub.f32 %v13490_v8, %v6756_v18 }
0x1b82   :  { %v6823_v4 = vsel %vm6057_vm13, %v6822_v27, %v6741_v38 }
0x1b83   :  { %v6772_v10 = vstv %s6771_s18  ;;  %v6824_v3 = vsel %vm6059_vm14, %v6823_v4, %v6757_v59 }
0x1b84   :  { %s9131_s7 = spop %9130  ;;  %v6773_v34 = vsub.f32 %v13490_v8, %v6772_v10 }
0x1b85   :  { %s6787_s4 = smul.f32 0.03125, %s9131_s7  ;;  %s9133_s21 = spop %9132 }
0x1b86   :  { %s6803_s17 = smul.f32 0.03125, %s9133_s21  ;;  %v6825_v14 = vsel %vm4951_vm9, %v6824_v3, %v6773_v34 }
0x1b87   :  { %v6788_v47 = vstv %s6787_s4 }
0x1b88   :  { %v6789_v46 = vsub.f32 %v13490_v8, %v6788_v47  ;;  %v6804_v61 = vstv %s6803_s17  ;;  %s9135_s15 = spop %9134 }
0x1b89   :  { %v6805_v43 = vsub.f32 %v13490_v8, %v6804_v61  ;;  %s6819_s16 = smul.f32 0.03125, %s9135_s15 }
0x1b8a   :  { %v6826_v22 = vsel %vm6363_vm0, %v6825_v14, %v6789_v46 }
0x1b8b   :  { %v6820_v21 = vstv %s6819_s16  ;;  %v6827_v37 = vsel %vm6365_vm2, %v6826_v22, %v6805_v43 }
0x1b8c   :  { %v6821_v29 = vsub.f32 %v13490_v8, %v6820_v21 }
0x1b8e   :  { %v6828_v28 = vsel %vm6367_vm1, %v6827_v37, %v6821_v29 }
0x1b8f   :  { %7511 = vmatmul.mubr.f32.vlgmr.msra.gmra.mrb[16].mxu1 %v6828_v28 }
0x1c62   :  { %v6901_v12 = vpop.f32.mrb[16].mxu1 }
0x1c63   :  { %v6902_v30 = vadd.f32 %v7128_v25, %v6901_v12  ;;  %v7512_v8 = vpop.f32.mrb[17].mxu1 }
0x1c65   :  { %v6905_v31 = vadd.f32 %v6902_v30, %v13439_v53 }
0x1c67   :  { %v6906_v41 = vmax.f32 %v6905_v31, 0.0 }
0x1c69   :  { %7546 = vmatmul.mubr.f32.vlgmr.msra.gmra.mrb[22].mxu0 %v6906_v41 }
0x1d3c   :  { %v6996_v11 = vpop.f32.mrb[22].mxu0 }
0x1d3d   :  { %v6997_v26 = vadd.f32 %v7129_v62, %v6996_v11  ;;  %v7547_v16 = vpop.f32.mrb[23].mxu0 }
0x1d3f   :  { %7001 = vst.msk [vmem:[#allocation27] sm:$0x3] %vm7000_vm3, %v6997_v26 }
0x1d40   :  { %9532 = shalt.err (!%p9529_p6)
}
0x1d41   :  { %s14842_s12 = sld [smem:[#allocation50_spill]] }
0x1d47   :  { %s9533_s9 = scalar_lea.hbm %s14842_s12, 32 }
0x1d48   :  { %p9534_p7 = scmp.ne.s32.totalorder %s14842_s12, %s9533_s9  ;;  %p9537_p8 = scmp.lt.u32.totalorder %s9533_s9, %s14842_s12 }
0x1d4a   :  { %p9539_p9 = pnand %p9537_p8, %p9534_p7 }
0x1d4c   :  { %9542 = shalt.err (!%p9539_p9)
}
0x1d4d   :  { %7011 = dma.vmem_to_hbm [thread:$0]  %s7009_s0, 32, %s14842_s12, [#allocation4]  }
0x1d4e   :  { %9561 = dma.done.wait [#allocation4], 32  }
0x1d4f   :  { %9562 = vsyncadd [#allocation4], 4294967264 }
0x1d50   :  { %7015 = vsyncpa [#allocation3], 1 }
0x1d51   :  { %7016 = vsyncpa [#allocation10], 1 }
0x1d52   :  { %7017 = vsyncpa [#allocation13], 1 }
0x1d53   :  { %7018 = vsyncpa [#allocation16], 1 }
0x1d54   :  { %7019 = vsyncpa [#allocation19], 1 }
0x1d55   :  { %7020 = vsyncpa [#allocation22], 1 }
0x1d56   :  { %7021 = vsyncpa [#allocation25], 1 }
0x1d57   :  { %7022 = vsyncpa [#allocation4], 1 }
0x1d58   :  { %7023 = vsyncpa [#allocation5], 1 }
0x1d59   :  { %7024 = vsyncpa [#allocation7], 1 }

</bundles_post_ra>
